<compile_context>
chip_gen: v7x
topology: tpu7x:2x2x1
jax: 0.10.0
libtpu: 0.0.40
codegen_flags: <defaults>
</compile_context>

<pallas_src>
import math

import jax
import jax.numpy as jnp
from jax.experimental import pallas as pl
from jax.experimental.pallas import tpu as pltpu

# ----------------------------- configuration --------------------------------
IMG = 32              # small input spatial size
PATCH = 16            # ViT patch16
IN_CH = 3
EMBED_DIM = 128       # scaled-down backbone width
DEPTH = 2             # scaled-down transformer depth
NUM_HEADS = 4
HEAD_DIM = EMBED_DIM // NUM_HEADS
MLP_DIM = 4 * EMBED_DIM
NUM_CLASSES = 2
LOGITS_PAD = 128      # lane-dense logits slab; sliced to NUM_CLASSES outside
GRID_H = IMG // PATCH
NUM_PATCHES = GRID_H * GRID_H
SEQ = NUM_PATCHES + 1          # +1 cls token (= 5)
SEQ_PAD = 8                    # padded to one full sublane tile
PATCH_DIM = IN_CH * PATCH * PATCH   # 768
HEAD_H1 = 512
HEAD_H2 = 256


# ------------------------------ in-kernel helpers ----------------------------
def _gelu_exact(x):
    # exact (erf-based) GELU, matching torch.nn.GELU default
    return 0.5 * x * (1.0 + jax.lax.erf(x * (1.0 / math.sqrt(2.0))))


def _layernorm(x, g, b, eps):
    x = x.astype(jnp.float32)
    mean = jnp.mean(x, axis=-1, keepdims=True)
    xc = x - mean
    var = jnp.mean(xc * xc, axis=-1, keepdims=True)   # biased var, like torch LayerNorm
    return xc * jax.lax.rsqrt(var + eps) * g + b


# ------------------------------ fused kernel ---------------------------------
def _vit_fused_kernel(
    xp_ref, pw_ref, eadd_ref,
    ln1g_ref, ln1b_ref, qkvw_ref, qkvb_ref, projw_ref, projb_ref,
    ln2g_ref, ln2b_ref, fc1w_ref, fc1b_ref, fc2w_ref, fc2b_ref,
    ng_ref, nb_ref,
    hw1_ref, hb1_ref, hg1_ref, hbb1_ref,
    hw2_ref, hb2_ref, hg2_ref, hbb2_ref,
    hw3_ref, hb3_ref,
    o_ref,
):
    B = xp_ref.shape[0]
    R = B * SEQ_PAD                      # flattened row count for all dense matmuls

    # --- fused patch embed: one (R, 768) @ (768, 128) matmul ---
    # cls token, positional embedding and patch bias are pre-folded into eadd
    # (row 0 = cls + pos[0]; rows 1..4 = patch_b + pos[1..4]; rows 5..7 = 0),
    # and xp_ref row 0 / rows 5..7 are zero, so a single add finishes the embed.
    xp = xp_ref[...].reshape(R, PATCH_DIM).astype(jnp.float32)
    x = jnp.dot(xp, pw_ref[...], preferred_element_type=jnp.float32)
    x = (x.reshape(B, SEQ_PAD, EMBED_DIM) + eadd_ref[...][None]).reshape(R, EMBED_DIM)

    # additive mask for the 3 padded key columns (padded rows never reach output)
    key_ids = jax.lax.broadcasted_iota(jnp.int32, (SEQ_PAD, SEQ_PAD), 1)
    kmask = jnp.where(key_ids >= SEQ, -1e30, 0.0).astype(jnp.float32)

    scale = HEAD_DIM ** -0.5
    for d in range(DEPTH):               # static unroll over stacked block params
        # --- attention branch ---
        h = _layernorm(x, ln1g_ref[d], ln1b_ref[d], 1e-6)
        qkv = jnp.dot(h, qkvw_ref[d], preferred_element_type=jnp.float32) + qkvb_ref[d]
        qkv = qkv.reshape(B, SEQ_PAD, 3 * EMBED_DIM)
        projw = projw_ref[d]
        attn = None
        for hh in range(NUM_HEADS):       # static unroll, 4 heads
            c0 = hh * HEAD_DIM
            qh = qkv[:, :, c0:c0 + HEAD_DIM]
            kh = qkv[:, :, EMBED_DIM + c0:EMBED_DIM + c0 + HEAD_DIM]
            vh = qkv[:, :, 2 * EMBED_DIM + c0:2 * EMBED_DIM + c0 + HEAD_DIM]
            s = jnp.einsum('bqd,bkd->bqk', qh, kh,
                           preferred_element_type=jnp.float32) * scale
            s = s + kmask[None]
            m = jnp.max(s, axis=-1, keepdims=True)
            p = jnp.exp(s - m)
            p = p / jnp.sum(p, axis=-1, keepdims=True)   # exact divide (f32 parity)
            oh = jnp.einsum('bqk,bkd->bqd', p, vh,
                            preferred_element_type=jnp.float32)          # (B, 8, 32)
            # fold head output straight into the projection matmul (no lane concat)
            contrib = jnp.dot(oh.reshape(R, HEAD_DIM),
                              projw[c0:c0 + HEAD_DIM, :],
                              preferred_element_type=jnp.float32)         # (R, 128)
            attn = contrib if attn is None else attn + contrib
        x = x + attn + projb_ref[d]                       # residual

        # --- MLP branch ---
        h = _layernorm(x, ln2g_ref[d], ln2b_ref[d], 1e-6)
        h = jnp.dot(h, fc1w_ref[d], preferred_element_type=jnp.float32) + fc1b_ref[d]
        h = _gelu_exact(h)
        h = jnp.dot(h, fc2w_ref[d], preferred_element_type=jnp.float32) + fc2b_ref[d]
        x = x + h                                         # residual

    # --- final backbone LN on cls rows only + custom head ---
    cls = x.reshape(B, SEQ_PAD, EMBED_DIM)[:, 0, :]       # (B, 128)
    cls = _layernorm(cls, ng_ref[...], nb_ref[...], 1e-6)

    # TODO(synk): Dropout layers modeled as identity (eval-mode inference).
    h = jnp.dot(cls, hw1_ref[...], preferred_element_type=jnp.float32) + hb1_ref[...]
    h = _gelu_exact(_layernorm(h, hg1_ref[...], hbb1_ref[...], 1e-5))
    h = jnp.dot(h, hw2_ref[...], preferred_element_type=jnp.float32) + hb2_ref[...]
    h = _gelu_exact(_layernorm(h, hg2_ref[...], hbb2_ref[...], 1e-5))
    logits = jnp.dot(h, hw3_ref[...], preferred_element_type=jnp.float32) + hb3_ref[...]
    o_ref[...] = logits.astype(o_ref.dtype)               # (B, 128) lane-dense store


# ------------------------------ wrapper --------------------------------------
def vit_forward(params, x_nchw):
    B = x_nchw.shape[0]

    # --- patchify (layout glue only): Conv2d(k=16, s=16) as patch extraction ---
    xp = x_nchw.reshape(B, IN_CH, GRID_H, PATCH, GRID_H, PATCH)
    xp = xp.transpose(0, 2, 4, 1, 3, 5).reshape(B, NUM_PATCHES, PATCH_DIM)
    # pad to SEQ_PAD rows; row 0 is the cls slot (zero), rows 5..7 are padding
    xp_pad = jnp.zeros((B, SEQ_PAD, PATCH_DIM), jnp.float32).at[:, 1:SEQ, :].set(xp)

    # fold cls token + positional embedding + patch bias into one additive slab
    eadd = jnp.zeros((SEQ_PAD, EMBED_DIM), jnp.float32)
    eadd = eadd.at[0, :].set(params["cls_token"][0] + params["pos_embed"][0])
    eadd = eadd.at[1:SEQ, :].set(params["patch_b"] + params["pos_embed"][1:SEQ])

    def fs(shape):
        if len(shape) == 2:
            return pl.BlockSpec(shape, lambda i: (0, 0))
        return pl.BlockSpec(shape, lambda i: (0, 0, 0))

    out = pl.pallas_call(
        _vit_fused_kernel,
        out_shape=jax.ShapeDtypeStruct((B, LOGITS_PAD), jnp.float32),
        grid=(1,),
        in_specs=[
            fs((B, SEQ_PAD, PATCH_DIM)),
            fs((PATCH_DIM, EMBED_DIM)),
            fs((SEQ_PAD, EMBED_DIM)),
            fs((DEPTH, 1, EMBED_DIM)), fs((DEPTH, 1, EMBED_DIM)),
            fs((DEPTH, EMBED_DIM, 3 * EMBED_DIM)), fs((DEPTH, 1, 3 * EMBED_DIM)),
            fs((DEPTH, EMBED_DIM, EMBED_DIM)), fs((DEPTH, 1, EMBED_DIM)),
            fs((DEPTH, 1, EMBED_DIM)), fs((DEPTH, 1, EMBED_DIM)),
            fs((DEPTH, EMBED_DIM, MLP_DIM)), fs((DEPTH, 1, MLP_DIM)),
            fs((DEPTH, MLP_DIM, EMBED_DIM)), fs((DEPTH, 1, EMBED_DIM)),
            fs((1, EMBED_DIM)), fs((1, EMBED_DIM)),
            fs((EMBED_DIM, HEAD_H1)), fs((1, HEAD_H1)),
            fs((1, HEAD_H1)), fs((1, HEAD_H1)),
            fs((HEAD_H1, HEAD_H2)), fs((1, HEAD_H2)),
            fs((1, HEAD_H2)), fs((1, HEAD_H2)),
            fs((HEAD_H2, LOGITS_PAD)), fs((1, LOGITS_PAD)),
        ],
        out_specs=fs((B, LOGITS_PAD)),
        compiler_params=pltpu.CompilerParams(
            dimension_semantics=("arbitrary",),
            vmem_limit_bytes=64 * 1024 * 1024,
        ),
    )(
        xp_pad, params["patch_w"], eadd,
        params["blk_ln1_g"], params["blk_ln1_b"],
        params["blk_qkv_w"], params["blk_qkv_b"],
        params["blk_proj_w"], params["blk_proj_b"],
        params["blk_ln2_g"], params["blk_ln2_b"],
        params["blk_fc1_w"], params["blk_fc1_b"],
        params["blk_fc2_w"], params["blk_fc2_b"],
        params["norm_g"], params["norm_b"],
        params["head_w1"], params["head_b1"],
        params["head_ln1_g"], params["head_ln1_b"],
        params["head_w2"], params["head_b2"],
        params["head_ln2_g"], params["head_ln2_b"],
        params["head_w3p"], params["head_b3p"],
    )
    return out[:, :NUM_CLASSES]


# ------------------------------ parameters ----------------------------------
def init_params(key):
    keys = iter(jax.random.split(key, 64))

    def nrm(shape, std=0.02):
        return (std * jax.random.normal(next(keys), shape)).astype(jnp.float32)

    def ones(shape):
        return jnp.ones(shape, jnp.float32)

    def zeros(shape):
        return jnp.zeros(shape, jnp.float32)

    patch_w = nrm((EMBED_DIM, IN_CH, PATCH, PATCH))           # Conv2d weight (D, C, P, P)
    w3 = nrm((HEAD_H2, NUM_CLASSES))

    params = {
        "patch_w": patch_w.reshape(EMBED_DIM, PATCH_DIM).T,   # (C*P*P, D) matmul form
        "patch_b": zeros((1, EMBED_DIM)),
        "cls_token": nrm((1, EMBED_DIM)),
        "pos_embed": nrm((SEQ, EMBED_DIM)),
        "norm_g": ones((1, EMBED_DIM)),
        "norm_b": zeros((1, EMBED_DIM)),
        # custom head (final linear zero-padded to 128 lanes for a dense store)
        "head_w1": nrm((EMBED_DIM, HEAD_H1)), "head_b1": zeros((1, HEAD_H1)),
        "head_ln1_g": ones((1, HEAD_H1)), "head_ln1_b": zeros((1, HEAD_H1)),
        "head_w2": nrm((HEAD_H1, HEAD_H2)), "head_b2": zeros((1, HEAD_H2)),
        "head_ln2_g": ones((1, HEAD_H2)), "head_ln2_b": zeros((1, HEAD_H2)),
        "head_w3p": jnp.zeros((HEAD_H2, LOGITS_PAD), jnp.float32).at[:, :NUM_CLASSES].set(w3),
        "head_b3p": zeros((1, LOGITS_PAD)),
        # transformer block params stacked along a leading DEPTH axis
        "blk_ln1_g": ones((DEPTH, 1, EMBED_DIM)), "blk_ln1_b": zeros((DEPTH, 1, EMBED_DIM)),
        "blk_qkv_w": nrm((DEPTH, EMBED_DIM, 3 * EMBED_DIM)),
        "blk_qkv_b": zeros((DEPTH, 1, 3 * EMBED_DIM)),
        "blk_proj_w": nrm((DEPTH, EMBED_DIM, EMBED_DIM)),
        "blk_proj_b": zeros((DEPTH, 1, EMBED_DIM)),
        "blk_ln2_g": ones((DEPTH, 1, EMBED_DIM)), "blk_ln2_b": zeros((DEPTH, 1, EMBED_DIM)),
        "blk_fc1_w": nrm((DEPTH, EMBED_DIM, MLP_DIM)), "blk_fc1_b": zeros((DEPTH, 1, MLP_DIM)),
        "blk_fc2_w": nrm((DEPTH, MLP_DIM, EMBED_DIM)), "blk_fc2_b": zeros((DEPTH, 1, EMBED_DIM)),
    }
    return params


# ---------------------------------- main -------------------------------------
if __name__ == "__main__":
    key = jax.random.PRNGKey(0)
    pkey, xkey = jax.random.split(key)
    params = init_params(pkey)
    x = jax.random.normal(xkey, (2, IN_CH, IMG, IMG), dtype=jnp.float32)  # NCHW
    logits = jax.jit(vit_forward)(params, x)
    jax.block_until_ready(logits)
    assert logits.shape == (2, NUM_CLASSES) and logits.dtype == jnp.float32
    print("KERNEL_OK")
</pallas_src>

<mosaic_0001>
module attributes {stable_mosaic.version = 11 : i64} {
  func.func @_vit_fused_kernel(%arg0: i32, %arg1: memref<2x8x768xf32, #tpu.memory_space<vmem>>, %arg2: memref<768x128xf32, #tpu.memory_space<vmem>>, %arg3: memref<8x128xf32, #tpu.memory_space<vmem>>, %arg4: memref<2x1x128xf32, #tpu.memory_space<vmem>>, %arg5: memref<2x1x128xf32, #tpu.memory_space<vmem>>, %arg6: memref<2x128x384xf32, #tpu.memory_space<vmem>>, %arg7: memref<2x1x384xf32, #tpu.memory_space<vmem>>, %arg8: memref<2x128x128xf32, #tpu.memory_space<vmem>>, %arg9: memref<2x1x128xf32, #tpu.memory_space<vmem>>, %arg10: memref<2x1x128xf32, #tpu.memory_space<vmem>>, %arg11: memref<2x1x128xf32, #tpu.memory_space<vmem>>, %arg12: memref<2x128x512xf32, #tpu.memory_space<vmem>>, %arg13: memref<2x1x512xf32, #tpu.memory_space<vmem>>, %arg14: memref<2x512x128xf32, #tpu.memory_space<vmem>>, %arg15: memref<2x1x128xf32, #tpu.memory_space<vmem>>, %arg16: memref<1x128xf32, #tpu.memory_space<vmem>>, %arg17: memref<1x128xf32, #tpu.memory_space<vmem>>, %arg18: memref<128x512xf32, #tpu.memory_space<vmem>>, %arg19: memref<1x512xf32, #tpu.memory_space<vmem>>, %arg20: memref<1x512xf32, #tpu.memory_space<vmem>>, %arg21: memref<1x512xf32, #tpu.memory_space<vmem>>, %arg22: memref<512x256xf32, #tpu.memory_space<vmem>>, %arg23: memref<1x256xf32, #tpu.memory_space<vmem>>, %arg24: memref<1x256xf32, #tpu.memory_space<vmem>>, %arg25: memref<1x256xf32, #tpu.memory_space<vmem>>, %arg26: memref<256x128xf32, #tpu.memory_space<vmem>>, %arg27: memref<1x128xf32, #tpu.memory_space<vmem>>, %arg28: memref<2x128xf32, #tpu.memory_space<vmem>>) attributes {dimension_semantics = [#tpu.dimension_semantics<arbitrary>], iteration_bounds = array<i64: 1>, scalar_prefetch = 0 : i64, scratch_operands = 0 : i64, tpu.core_type = #tpu.core_type<tc>, window_params = [{pipeline_mode = #tpu.pipeline_mode<synchronous>, transform_indices = @transform_0, window_bounds = array<i64: 2, 8, 768>}, {pipeline_mode = #tpu.pipeline_mode<synchronous>, transform_indices = @transform_1, window_bounds = array<i64: 768, 128>}, {pipeline_mode = #tpu.pipeline_mode<synchronous>, transform_indices = @transform_2, window_bounds = array<i64: 8, 128>}, {pipeline_mode = #tpu.pipeline_mode<synchronous>, transform_indices = @transform_3, window_bounds = array<i64: 2, 1, 128>}, {pipeline_mode = #tpu.pipeline_mode<synchronous>, transform_indices = @transform_4, window_bounds = array<i64: 2, 1, 128>}, {pipeline_mode = #tpu.pipeline_mode<synchronous>, transform_indices = @transform_5, window_bounds = array<i64: 2, 128, 384>}, {pipeline_mode = #tpu.pipeline_mode<synchronous>, transform_indices = @transform_6, window_bounds = array<i64: 2, 1, 384>}, {pipeline_mode = #tpu.pipeline_mode<synchronous>, transform_indices = @transform_7, window_bounds = array<i64: 2, 128, 128>}, {pipeline_mode = #tpu.pipeline_mode<synchronous>, transform_indices = @transform_8, window_bounds = array<i64: 2, 1, 128>}, {pipeline_mode = #tpu.pipeline_mode<synchronous>, transform_indices = @transform_9, window_bounds = array<i64: 2, 1, 128>}, {pipeline_mode = #tpu.pipeline_mode<synchronous>, transform_indices = @transform_10, window_bounds = array<i64: 2, 1, 128>}, {pipeline_mode = #tpu.pipeline_mode<synchronous>, transform_indices = @transform_11, window_bounds = array<i64: 2, 128, 512>}, {pipeline_mode = #tpu.pipeline_mode<synchronous>, transform_indices = @transform_12, window_bounds = array<i64: 2, 1, 512>}, {pipeline_mode = #tpu.pipeline_mode<synchronous>, transform_indices = @transform_13, window_bounds = array<i64: 2, 512, 128>}, {pipeline_mode = #tpu.pipeline_mode<synchronous>, transform_indices = @transform_14, window_bounds = array<i64: 2, 1, 128>}, {pipeline_mode = #tpu.pipeline_mode<synchronous>, transform_indices = @transform_15, window_bounds = array<i64: 1, 128>}, {pipeline_mode = #tpu.pipeline_mode<synchronous>, transform_indices = @transform_16, window_bounds = array<i64: 1, 128>}, {pipeline_mode = #tpu.pipeline_mode<synchronous>, transform_indices = @transform_17, window_bounds = array<i64: 128, 512>}, {pipeline_mode = #tpu.pipeline_mode<synchronous>, transform_indices = @transform_18, window_bounds = array<i64: 1, 512>}, {pipeline_mode = #tpu.pipeline_mode<synchronous>, transform_indices = @transform_19, window_bounds = array<i64: 1, 512>}, {pipeline_mode = #tpu.pipeline_mode<synchronous>, transform_indices = @transform_20, window_bounds = array<i64: 1, 512>}, {pipeline_mode = #tpu.pipeline_mode<synchronous>, transform_indices = @transform_21, window_bounds = array<i64: 512, 256>}, {pipeline_mode = #tpu.pipeline_mode<synchronous>, transform_indices = @transform_22, window_bounds = array<i64: 1, 256>}, {pipeline_mode = #tpu.pipeline_mode<synchronous>, transform_indices = @transform_23, window_bounds = array<i64: 1, 256>}, {pipeline_mode = #tpu.pipeline_mode<synchronous>, transform_indices = @transform_24, window_bounds = array<i64: 1, 256>}, {pipeline_mode = #tpu.pipeline_mode<synchronous>, transform_indices = @transform_25, window_bounds = array<i64: 256, 128>}, {pipeline_mode = #tpu.pipeline_mode<synchronous>, transform_indices = @transform_26, window_bounds = array<i64: 1, 128>}, {pipeline_mode = #tpu.pipeline_mode<synchronous>, transform_indices = @transform_27, window_bounds = array<i64: 2, 128>}]} {
    %c0 = arith.constant 0 : index
    %c0_0 = arith.constant 0 : index
    %c0_1 = arith.constant 0 : index
    %0 = vector.load %arg1[%c0, %c0_0, %c0_1] : memref<2x8x768xf32, #tpu.memory_space<vmem>>, vector<2x8x768xf32>
    %1 = vector.shape_cast %0 : vector<2x8x768xf32> to vector<16x768xf32>
    %c0_2 = arith.constant 0 : index
    %c0_3 = arith.constant 0 : index
    %2 = vector.load %arg2[%c0_2, %c0_3] : memref<768x128xf32, #tpu.memory_space<vmem>>, vector<768x128xf32>
    %cst = arith.constant dense<0.000000e+00> : vector<16x128xf32>
    %3 = tpu.matmul %1, %2, %cst {dimension_numbers = #tpu.dot_dimension_numbers<[1], [0], [0], [1], [0, 0, 1, 1], [], []>} : vector<16x768xf32>, vector<768x128xf32>, vector<16x128xf32> -> vector<16x128xf32>
    %4 = vector.shape_cast %3 : vector<16x128xf32> to vector<2x8x128xf32>
    %c0_4 = arith.constant 0 : index
    %c0_5 = arith.constant 0 : index
    %5 = vector.load %arg3[%c0_4, %c0_5] : memref<8x128xf32, #tpu.memory_space<vmem>>, vector<8x128xf32>
    %6 = vector.shape_cast %5 : vector<8x128xf32> to vector<1x8x128xf32>
    %7 = vector.broadcast %6 : vector<1x8x128xf32> to vector<2x8x128xf32>
    %8 = arith.addf %4, %7 : vector<2x8x128xf32>
    %9 = vector.shape_cast %8 : vector<2x8x128xf32> to vector<16x128xf32>
    %10 = tpu.iota {dimensions = array<i32: 1>} : vector<8x8xi32>
    %c5_i32 = arith.constant 5 : i32
    %11 = vector.broadcast %c5_i32 : i32 to vector<8x8xi32>
    %12 = arith.cmpi sge, %10, %11 : vector<8x8xi32>
    %cst_6 = arith.constant -1.000000e+30 : f32
    %cst_7 = arith.constant 0.000000e+00 : f32
    %13 = vector.broadcast %cst_6 : f32 to vector<8x8xf32>
    %14 = vector.broadcast %cst_7 : f32 to vector<8x8xf32>
    %15 = arith.select %12, %13, %14 : vector<8x8xi1>, vector<8x8xf32>
    %c0_8 = arith.constant 0 : index
    %c0_9 = arith.constant 0 : index
    %c0_10 = arith.constant 0 : index
    %16 = vector.load %arg4[%c0_8, %c0_9, %c0_10] : memref<2x1x128xf32, #tpu.memory_space<vmem>>, vector<1x1x128xf32>
    %17 = vector.shape_cast %16 : vector<1x1x128xf32> to vector<1x128xf32>
    %c0_11 = arith.constant 0 : index
    %c0_12 = arith.constant 0 : index
    %c0_13 = arith.constant 0 : index
    %18 = vector.load %arg5[%c0_11, %c0_12, %c0_13] : memref<2x1x128xf32, #tpu.memory_space<vmem>>, vector<1x1x128xf32>
    %19 = vector.shape_cast %18 : vector<1x1x128xf32> to vector<1x128xf32>
    %cst_14 = arith.constant dense<0.000000e+00> : vector<16xf32>
    %20 = vector.multi_reduction <add>, %9, %cst_14 [1] : vector<16x128xf32> to vector<16xf32>
    %21 = vector.shape_cast %20 : vector<16xf32> to vector<16x1xf32>
    %cst_15 = arith.constant 1.280000e+02 : f32
    %22 = vector.broadcast %cst_15 : f32 to vector<16x1xf32>
    %23 = arith.divf %21, %22 : vector<16x1xf32>
    %24 = vector.broadcast %23 : vector<16x1xf32> to vector<16x128xf32>
    %25 = arith.subf %9, %24 : vector<16x128xf32>
    %26 = arith.mulf %25, %25 : vector<16x128xf32>
    %cst_16 = arith.constant dense<0.000000e+00> : vector<16xf32>
    %27 = vector.multi_reduction <add>, %26, %cst_16 [1] : vector<16x128xf32> to vector<16xf32>
    %28 = vector.shape_cast %27 : vector<16xf32> to vector<16x1xf32>
    %cst_17 = arith.constant 1.280000e+02 : f32
    %29 = vector.broadcast %cst_17 : f32 to vector<16x1xf32>
    %30 = arith.divf %28, %29 : vector<16x1xf32>
    %cst_18 = arith.constant 9.99999997E-7 : f32
    %31 = vector.broadcast %cst_18 : f32 to vector<16x1xf32>
    %32 = arith.addf %30, %31 : vector<16x1xf32>
    %33 = math.rsqrt %32 : vector<16x1xf32>
    %34 = vector.broadcast %33 : vector<16x1xf32> to vector<16x128xf32>
    %35 = arith.mulf %25, %34 : vector<16x128xf32>
    %36 = vector.broadcast %17 : vector<1x128xf32> to vector<16x128xf32>
    %37 = arith.mulf %35, %36 : vector<16x128xf32>
    %38 = vector.broadcast %19 : vector<1x128xf32> to vector<16x128xf32>
    %39 = arith.addf %37, %38 : vector<16x128xf32>
    %c0_19 = arith.constant 0 : index
    %c0_20 = arith.constant 0 : index
    %c0_21 = arith.constant 0 : index
    %40 = vector.load %arg6[%c0_19, %c0_20, %c0_21] : memref<2x128x384xf32, #tpu.memory_space<vmem>>, vector<1x128x384xf32>
    %41 = vector.shape_cast %40 : vector<1x128x384xf32> to vector<128x384xf32>
    %cst_22 = arith.constant dense<0.000000e+00> : vector<16x384xf32>
    %42 = tpu.matmul %39, %41, %cst_22 {dimension_numbers = #tpu.dot_dimension_numbers<[1], [0], [0], [1], [0, 0, 1, 1], [], []>} : vector<16x128xf32>, vector<128x384xf32>, vector<16x384xf32> -> vector<16x384xf32>
    %c0_23 = arith.constant 0 : index
    %c0_24 = arith.constant 0 : index
    %c0_25 = arith.constant 0 : index
    %43 = vector.load %arg7[%c0_23, %c0_24, %c0_25] : memref<2x1x384xf32, #tpu.memory_space<vmem>>, vector<1x1x384xf32>
    %44 = vector.shape_cast %43 : vector<1x1x384xf32> to vector<1x384xf32>
    %45 = vector.broadcast %44 : vector<1x384xf32> to vector<16x384xf32>
    %46 = arith.addf %42, %45 : vector<16x384xf32>
    %47 = vector.shape_cast %46 : vector<16x384xf32> to vector<2x8x384xf32>
    %c0_26 = arith.constant 0 : index
    %c0_27 = arith.constant 0 : index
    %c0_28 = arith.constant 0 : index
    %48 = vector.load %arg8[%c0_26, %c0_27, %c0_28] : memref<2x128x128xf32, #tpu.memory_space<vmem>>, vector<1x128x128xf32>
    %49 = vector.shape_cast %48 : vector<1x128x128xf32> to vector<128x128xf32>
    %50 = vector.extract_strided_slice %47 {offsets = [0, 0, 0], sizes = [2, 8, 32], strides = [1, 1, 1]} : vector<2x8x384xf32> to vector<2x8x32xf32>
    %51 = vector.extract_strided_slice %47 {offsets = [0, 0, 128], sizes = [2, 8, 32], strides = [1, 1, 1]} : vector<2x8x384xf32> to vector<2x8x32xf32>
    %52 = vector.extract_strided_slice %47 {offsets = [0, 0, 256], sizes = [2, 8, 32], strides = [1, 1, 1]} : vector<2x8x384xf32> to vector<2x8x32xf32>
    "tpu.trace_start"() <{level = 10 : i32, message = "bqd,bkd->bqk"}> : () -> ()
    %cst_29 = arith.constant dense<0.000000e+00> : vector<2x8x8xf32>
    %53 = tpu.matmul %50, %51, %cst_29 {dimension_numbers = #tpu.dot_dimension_numbers<[2], [2], [1], [1], [0, 0, 0, 1, 1, 1], [0], [0]>} : vector<2x8x32xf32>, vector<2x8x32xf32>, vector<2x8x8xf32> -> vector<2x8x8xf32>
    "tpu.trace_stop"() : () -> ()
    %cst_30 = arith.constant 0.176776692 : f32
    %54 = vector.broadcast %cst_30 : f32 to vector<2x8x8xf32>
    %55 = arith.mulf %53, %54 : vector<2x8x8xf32>
    %56 = vector.shape_cast %15 : vector<8x8xf32> to vector<1x8x8xf32>
    %57 = vector.broadcast %56 : vector<1x8x8xf32> to vector<2x8x8xf32>
    %58 = arith.addf %55, %57 : vector<2x8x8xf32>
    %cst_31 = arith.constant dense<0xFF800000> : vector<2x8xf32>
    %59 = vector.multi_reduction <maximumf>, %58, %cst_31 [2] : vector<2x8x8xf32> to vector<2x8xf32>
    %60 = vector.shape_cast %59 : vector<2x8xf32> to vector<2x8x1xf32>
    %61 = vector.broadcast %60 : vector<2x8x1xf32> to vector<2x8x8xf32>
    %62 = arith.subf %58, %61 : vector<2x8x8xf32>
    %63 = math.exp %62 : vector<2x8x8xf32>
    %cst_32 = arith.constant dense<0.000000e+00> : vector<2x8xf32>
    %64 = vector.multi_reduction <add>, %63, %cst_32 [2] : vector<2x8x8xf32> to vector<2x8xf32>
    %65 = vector.shape_cast %64 : vector<2x8xf32> to vector<2x8x1xf32>
    %66 = vector.broadcast %65 : vector<2x8x1xf32> to vector<2x8x8xf32>
    %67 = arith.divf %63, %66 : vector<2x8x8xf32>
    "tpu.trace_start"() <{level = 10 : i32, message = "bqk,bkd->bqd"}> : () -> ()
    %cst_33 = arith.constant dense<0.000000e+00> : vector<2x8x32xf32>
    %68 = tpu.matmul %67, %52, %cst_33 {dimension_numbers = #tpu.dot_dimension_numbers<[2], [1], [1], [2], [0, 0, 0, 1, 1, 2], [0], [0]>} : vector<2x8x8xf32>, vector<2x8x32xf32>, vector<2x8x32xf32> -> vector<2x8x32xf32>
    "tpu.trace_stop"() : () -> ()
    %69 = vector.shape_cast %68 : vector<2x8x32xf32> to vector<16x32xf32>
    %70 = vector.extract_strided_slice %49 {offsets = [0, 0], sizes = [32, 128], strides = [1, 1]} : vector<128x128xf32> to vector<32x128xf32>
    %cst_34 = arith.constant dense<0.000000e+00> : vector<16x128xf32>
    %71 = tpu.matmul %69, %70, %cst_34 {dimension_numbers = #tpu.dot_dimension_numbers<[1], [0], [0], [1], [0, 0, 1, 1], [], []>} : vector<16x32xf32>, vector<32x128xf32>, vector<16x128xf32> -> vector<16x128xf32>
    %72 = vector.extract_strided_slice %47 {offsets = [0, 0, 32], sizes = [2, 8, 32], strides = [1, 1, 1]} : vector<2x8x384xf32> to vector<2x8x32xf32>
    %73 = vector.extract_strided_slice %47 {offsets = [0, 0, 160], sizes = [2, 8, 32], strides = [1, 1, 1]} : vector<2x8x384xf32> to vector<2x8x32xf32>
    %74 = vector.extract_strided_slice %47 {offsets = [0, 0, 288], sizes = [2, 8, 32], strides = [1, 1, 1]} : vector<2x8x384xf32> to vector<2x8x32xf32>
    "tpu.trace_start"() <{level = 10 : i32, message = "bqd,bkd->bqk"}> : () -> ()
    %cst_35 = arith.constant dense<0.000000e+00> : vector<2x8x8xf32>
    %75 = tpu.matmul %72, %73, %cst_35 {dimension_numbers = #tpu.dot_dimension_numbers<[2], [2], [1], [1], [0, 0, 0, 1, 1, 1], [0], [0]>} : vector<2x8x32xf32>, vector<2x8x32xf32>, vector<2x8x8xf32> -> vector<2x8x8xf32>
    "tpu.trace_stop"() : () -> ()
    %cst_36 = arith.constant 0.176776692 : f32
    %76 = vector.broadcast %cst_36 : f32 to vector<2x8x8xf32>
    %77 = arith.mulf %75, %76 : vector<2x8x8xf32>
    %78 = vector.shape_cast %15 : vector<8x8xf32> to vector<1x8x8xf32>
    %79 = vector.broadcast %78 : vector<1x8x8xf32> to vector<2x8x8xf32>
    %80 = arith.addf %77, %79 : vector<2x8x8xf32>
    %cst_37 = arith.constant dense<0xFF800000> : vector<2x8xf32>
    %81 = vector.multi_reduction <maximumf>, %80, %cst_37 [2] : vector<2x8x8xf32> to vector<2x8xf32>
    %82 = vector.shape_cast %81 : vector<2x8xf32> to vector<2x8x1xf32>
    %83 = vector.broadcast %82 : vector<2x8x1xf32> to vector<2x8x8xf32>
    %84 = arith.subf %80, %83 : vector<2x8x8xf32>
    %85 = math.exp %84 : vector<2x8x8xf32>
    %cst_38 = arith.constant dense<0.000000e+00> : vector<2x8xf32>
    %86 = vector.multi_reduction <add>, %85, %cst_38 [2] : vector<2x8x8xf32> to vector<2x8xf32>
    %87 = vector.shape_cast %86 : vector<2x8xf32> to vector<2x8x1xf32>
    %88 = vector.broadcast %87 : vector<2x8x1xf32> to vector<2x8x8xf32>
    %89 = arith.divf %85, %88 : vector<2x8x8xf32>
    "tpu.trace_start"() <{level = 10 : i32, message = "bqk,bkd->bqd"}> : () -> ()
    %cst_39 = arith.constant dense<0.000000e+00> : vector<2x8x32xf32>
    %90 = tpu.matmul %89, %74, %cst_39 {dimension_numbers = #tpu.dot_dimension_numbers<[2], [1], [1], [2], [0, 0, 0, 1, 1, 2], [0], [0]>} : vector<2x8x8xf32>, vector<2x8x32xf32>, vector<2x8x32xf32> -> vector<2x8x32xf32>
    "tpu.trace_stop"() : () -> ()
    %91 = vector.shape_cast %90 : vector<2x8x32xf32> to vector<16x32xf32>
    %92 = vector.extract_strided_slice %49 {offsets = [32, 0], sizes = [32, 128], strides = [1, 1]} : vector<128x128xf32> to vector<32x128xf32>
    %cst_40 = arith.constant dense<0.000000e+00> : vector<16x128xf32>
    %93 = tpu.matmul %91, %92, %cst_40 {dimension_numbers = #tpu.dot_dimension_numbers<[1], [0], [0], [1], [0, 0, 1, 1], [], []>} : vector<16x32xf32>, vector<32x128xf32>, vector<16x128xf32> -> vector<16x128xf32>
    %94 = arith.addf %71, %93 : vector<16x128xf32>
    %95 = vector.extract_strided_slice %47 {offsets = [0, 0, 64], sizes = [2, 8, 32], strides = [1, 1, 1]} : vector<2x8x384xf32> to vector<2x8x32xf32>
    %96 = vector.extract_strided_slice %47 {offsets = [0, 0, 192], sizes = [2, 8, 32], strides = [1, 1, 1]} : vector<2x8x384xf32> to vector<2x8x32xf32>
    %97 = vector.extract_strided_slice %47 {offsets = [0, 0, 320], sizes = [2, 8, 32], strides = [1, 1, 1]} : vector<2x8x384xf32> to vector<2x8x32xf32>
    "tpu.trace_start"() <{level = 10 : i32, message = "bqd,bkd->bqk"}> : () -> ()
    %cst_41 = arith.constant dense<0.000000e+00> : vector<2x8x8xf32>
    %98 = tpu.matmul %95, %96, %cst_41 {dimension_numbers = #tpu.dot_dimension_numbers<[2], [2], [1], [1], [0, 0, 0, 1, 1, 1], [0], [0]>} : vector<2x8x32xf32>, vector<2x8x32xf32>, vector<2x8x8xf32> -> vector<2x8x8xf32>
    "tpu.trace_stop"() : () -> ()
    %cst_42 = arith.constant 0.176776692 : f32
    %99 = vector.broadcast %cst_42 : f32 to vector<2x8x8xf32>
    %100 = arith.mulf %98, %99 : vector<2x8x8xf32>
    %101 = vector.shape_cast %15 : vector<8x8xf32> to vector<1x8x8xf32>
    %102 = vector.broadcast %101 : vector<1x8x8xf32> to vector<2x8x8xf32>
    %103 = arith.addf %100, %102 : vector<2x8x8xf32>
    %cst_43 = arith.constant dense<0xFF800000> : vector<2x8xf32>
    %104 = vector.multi_reduction <maximumf>, %103, %cst_43 [2] : vector<2x8x8xf32> to vector<2x8xf32>
    %105 = vector.shape_cast %104 : vector<2x8xf32> to vector<2x8x1xf32>
    %106 = vector.broadcast %105 : vector<2x8x1xf32> to vector<2x8x8xf32>
    %107 = arith.subf %103, %106 : vector<2x8x8xf32>
    %108 = math.exp %107 : vector<2x8x8xf32>
    %cst_44 = arith.constant dense<0.000000e+00> : vector<2x8xf32>
    %109 = vector.multi_reduction <add>, %108, %cst_44 [2] : vector<2x8x8xf32> to vector<2x8xf32>
    %110 = vector.shape_cast %109 : vector<2x8xf32> to vector<2x8x1xf32>
    %111 = vector.broadcast %110 : vector<2x8x1xf32> to vector<2x8x8xf32>
    %112 = arith.divf %108, %111 : vector<2x8x8xf32>
    "tpu.trace_start"() <{level = 10 : i32, message = "bqk,bkd->bqd"}> : () -> ()
    %cst_45 = arith.constant dense<0.000000e+00> : vector<2x8x32xf32>
    %113 = tpu.matmul %112, %97, %cst_45 {dimension_numbers = #tpu.dot_dimension_numbers<[2], [1], [1], [2], [0, 0, 0, 1, 1, 2], [0], [0]>} : vector<2x8x8xf32>, vector<2x8x32xf32>, vector<2x8x32xf32> -> vector<2x8x32xf32>
    "tpu.trace_stop"() : () -> ()
    %114 = vector.shape_cast %113 : vector<2x8x32xf32> to vector<16x32xf32>
    %115 = vector.extract_strided_slice %49 {offsets = [64, 0], sizes = [32, 128], strides = [1, 1]} : vector<128x128xf32> to vector<32x128xf32>
    %cst_46 = arith.constant dense<0.000000e+00> : vector<16x128xf32>
    %116 = tpu.matmul %114, %115, %cst_46 {dimension_numbers = #tpu.dot_dimension_numbers<[1], [0], [0], [1], [0, 0, 1, 1], [], []>} : vector<16x32xf32>, vector<32x128xf32>, vector<16x128xf32> -> vector<16x128xf32>
    %117 = arith.addf %94, %116 : vector<16x128xf32>
    %118 = vector.extract_strided_slice %47 {offsets = [0, 0, 96], sizes = [2, 8, 32], strides = [1, 1, 1]} : vector<2x8x384xf32> to vector<2x8x32xf32>
    %119 = vector.extract_strided_slice %47 {offsets = [0, 0, 224], sizes = [2, 8, 32], strides = [1, 1, 1]} : vector<2x8x384xf32> to vector<2x8x32xf32>
    %120 = vector.extract_strided_slice %47 {offsets = [0, 0, 352], sizes = [2, 8, 32], strides = [1, 1, 1]} : vector<2x8x384xf32> to vector<2x8x32xf32>
    "tpu.trace_start"() <{level = 10 : i32, message = "bqd,bkd->bqk"}> : () -> ()
    %cst_47 = arith.constant dense<0.000000e+00> : vector<2x8x8xf32>
    %121 = tpu.matmul %118, %119, %cst_47 {dimension_numbers = #tpu.dot_dimension_numbers<[2], [2], [1], [1], [0, 0, 0, 1, 1, 1], [0], [0]>} : vector<2x8x32xf32>, vector<2x8x32xf32>, vector<2x8x8xf32> -> vector<2x8x8xf32>
    "tpu.trace_stop"() : () -> ()
    %cst_48 = arith.constant 0.176776692 : f32
    %122 = vector.broadcast %cst_48 : f32 to vector<2x8x8xf32>
    %123 = arith.mulf %121, %122 : vector<2x8x8xf32>
    %124 = vector.shape_cast %15 : vector<8x8xf32> to vector<1x8x8xf32>
    %125 = vector.broadcast %124 : vector<1x8x8xf32> to vector<2x8x8xf32>
    %126 = arith.addf %123, %125 : vector<2x8x8xf32>
    %cst_49 = arith.constant dense<0xFF800000> : vector<2x8xf32>
    %127 = vector.multi_reduction <maximumf>, %126, %cst_49 [2] : vector<2x8x8xf32> to vector<2x8xf32>
    %128 = vector.shape_cast %127 : vector<2x8xf32> to vector<2x8x1xf32>
    %129 = vector.broadcast %128 : vector<2x8x1xf32> to vector<2x8x8xf32>
    %130 = arith.subf %126, %129 : vector<2x8x8xf32>
    %131 = math.exp %130 : vector<2x8x8xf32>
    %cst_50 = arith.constant dense<0.000000e+00> : vector<2x8xf32>
    %132 = vector.multi_reduction <add>, %131, %cst_50 [2] : vector<2x8x8xf32> to vector<2x8xf32>
    %133 = vector.shape_cast %132 : vector<2x8xf32> to vector<2x8x1xf32>
    %134 = vector.broadcast %133 : vector<2x8x1xf32> to vector<2x8x8xf32>
    %135 = arith.divf %131, %134 : vector<2x8x8xf32>
    "tpu.trace_start"() <{level = 10 : i32, message = "bqk,bkd->bqd"}> : () -> ()
    %cst_51 = arith.constant dense<0.000000e+00> : vector<2x8x32xf32>
    %136 = tpu.matmul %135, %120, %cst_51 {dimension_numbers = #tpu.dot_dimension_numbers<[2], [1], [1], [2], [0, 0, 0, 1, 1, 2], [0], [0]>} : vector<2x8x8xf32>, vector<2x8x32xf32>, vector<2x8x32xf32> -> vector<2x8x32xf32>
    "tpu.trace_stop"() : () -> ()
    %137 = vector.shape_cast %136 : vector<2x8x32xf32> to vector<16x32xf32>
    %138 = vector.extract_strided_slice %49 {offsets = [96, 0], sizes = [32, 128], strides = [1, 1]} : vector<128x128xf32> to vector<32x128xf32>
    %cst_52 = arith.constant dense<0.000000e+00> : vector<16x128xf32>
    %139 = tpu.matmul %137, %138, %cst_52 {dimension_numbers = #tpu.dot_dimension_numbers<[1], [0], [0], [1], [0, 0, 1, 1], [], []>} : vector<16x32xf32>, vector<32x128xf32>, vector<16x128xf32> -> vector<16x128xf32>
    %140 = arith.addf %117, %139 : vector<16x128xf32>
    %141 = arith.addf %9, %140 : vector<16x128xf32>
    %c0_53 = arith.constant 0 : index
    %c0_54 = arith.constant 0 : index
    %c0_55 = arith.constant 0 : index
    %142 = vector.load %arg9[%c0_53, %c0_54, %c0_55] : memref<2x1x128xf32, #tpu.memory_space<vmem>>, vector<1x1x128xf32>
    %143 = vector.shape_cast %142 : vector<1x1x128xf32> to vector<1x128xf32>
    %144 = vector.broadcast %143 : vector<1x128xf32> to vector<16x128xf32>
    %145 = arith.addf %141, %144 : vector<16x128xf32>
    %c0_56 = arith.constant 0 : index
    %c0_57 = arith.constant 0 : index
    %c0_58 = arith.constant 0 : index
    %146 = vector.load %arg10[%c0_56, %c0_57, %c0_58] : memref<2x1x128xf32, #tpu.memory_space<vmem>>, vector<1x1x128xf32>
    %147 = vector.shape_cast %146 : vector<1x1x128xf32> to vector<1x128xf32>
    %c0_59 = arith.constant 0 : index
    %c0_60 = arith.constant 0 : index
    %c0_61 = arith.constant 0 : index
    %148 = vector.load %arg11[%c0_59, %c0_60, %c0_61] : memref<2x1x128xf32, #tpu.memory_space<vmem>>, vector<1x1x128xf32>
    %149 = vector.shape_cast %148 : vector<1x1x128xf32> to vector<1x128xf32>
    %cst_62 = arith.constant dense<0.000000e+00> : vector<16xf32>
    %150 = vector.multi_reduction <add>, %145, %cst_62 [1] : vector<16x128xf32> to vector<16xf32>
    %151 = vector.shape_cast %150 : vector<16xf32> to vector<16x1xf32>
    %cst_63 = arith.constant 1.280000e+02 : f32
    %152 = vector.broadcast %cst_63 : f32 to vector<16x1xf32>
    %153 = arith.divf %151, %152 : vector<16x1xf32>
    %154 = vector.broadcast %153 : vector<16x1xf32> to vector<16x128xf32>
    %155 = arith.subf %145, %154 : vector<16x128xf32>
    %156 = arith.mulf %155, %155 : vector<16x128xf32>
    %cst_64 = arith.constant dense<0.000000e+00> : vector<16xf32>
    %157 = vector.multi_reduction <add>, %156, %cst_64 [1] : vector<16x128xf32> to vector<16xf32>
    %158 = vector.shape_cast %157 : vector<16xf32> to vector<16x1xf32>
    %cst_65 = arith.constant 1.280000e+02 : f32
    %159 = vector.broadcast %cst_65 : f32 to vector<16x1xf32>
    %160 = arith.divf %158, %159 : vector<16x1xf32>
    %cst_66 = arith.constant 9.99999997E-7 : f32
    %161 = vector.broadcast %cst_66 : f32 to vector<16x1xf32>
    %162 = arith.addf %160, %161 : vector<16x1xf32>
    %163 = math.rsqrt %162 : vector<16x1xf32>
    %164 = vector.broadcast %163 : vector<16x1xf32> to vector<16x128xf32>
    %165 = arith.mulf %155, %164 : vector<16x128xf32>
    %166 = vector.broadcast %147 : vector<1x128xf32> to vector<16x128xf32>
    %167 = arith.mulf %165, %166 : vector<16x128xf32>
    %168 = vector.broadcast %149 : vector<1x128xf32> to vector<16x128xf32>
    %169 = arith.addf %167, %168 : vector<16x128xf32>
    %c0_67 = arith.constant 0 : index
    %c0_68 = arith.constant 0 : index
    %c0_69 = arith.constant 0 : index
    %170 = vector.load %arg12[%c0_67, %c0_68, %c0_69] : memref<2x128x512xf32, #tpu.memory_space<vmem>>, vector<1x128x512xf32>
    %171 = vector.shape_cast %170 : vector<1x128x512xf32> to vector<128x512xf32>
    %cst_70 = arith.constant dense<0.000000e+00> : vector<16x512xf32>
    %172 = tpu.matmul %169, %171, %cst_70 {dimension_numbers = #tpu.dot_dimension_numbers<[1], [0], [0], [1], [0, 0, 1, 1], [], []>} : vector<16x128xf32>, vector<128x512xf32>, vector<16x512xf32> -> vector<16x512xf32>
    %c0_71 = arith.constant 0 : index
    %c0_72 = arith.constant 0 : index
    %c0_73 = arith.constant 0 : index
    %173 = vector.load %arg13[%c0_71, %c0_72, %c0_73] : memref<2x1x512xf32, #tpu.memory_space<vmem>>, vector<1x1x512xf32>
    %174 = vector.shape_cast %173 : vector<1x1x512xf32> to vector<1x512xf32>
    %175 = vector.broadcast %174 : vector<1x512xf32> to vector<16x512xf32>
    %176 = arith.addf %172, %175 : vector<16x512xf32>
    %cst_74 = arith.constant 5.000000e-01 : f32
    %177 = vector.broadcast %cst_74 : f32 to vector<16x512xf32>
    %178 = arith.mulf %177, %176 : vector<16x512xf32>
    %cst_75 = arith.constant 0.707106769 : f32
    %179 = vector.broadcast %cst_75 : f32 to vector<16x512xf32>
    %180 = arith.mulf %176, %179 : vector<16x512xf32>
    %181 = math.erf %180 : vector<16x512xf32>
    %cst_76 = arith.constant 1.000000e+00 : f32
    %182 = vector.broadcast %cst_76 : f32 to vector<16x512xf32>
    %183 = arith.addf %182, %181 : vector<16x512xf32>
    %184 = arith.mulf %178, %183 : vector<16x512xf32>
    %c0_77 = arith.constant 0 : index
    %c0_78 = arith.constant 0 : index
    %c0_79 = arith.constant 0 : index
    %185 = vector.load %arg14[%c0_77, %c0_78, %c0_79] : memref<2x512x128xf32, #tpu.memory_space<vmem>>, vector<1x512x128xf32>
    %186 = vector.shape_cast %185 : vector<1x512x128xf32> to vector<512x128xf32>
    %cst_80 = arith.constant dense<0.000000e+00> : vector<16x128xf32>
    %187 = tpu.matmul %184, %186, %cst_80 {dimension_numbers = #tpu.dot_dimension_numbers<[1], [0], [0], [1], [0, 0, 1, 1], [], []>} : vector<16x512xf32>, vector<512x128xf32>, vector<16x128xf32> -> vector<16x128xf32>
    %c0_81 = arith.constant 0 : index
    %c0_82 = arith.constant 0 : index
    %c0_83 = arith.constant 0 : index
    %188 = vector.load %arg15[%c0_81, %c0_82, %c0_83] : memref<2x1x128xf32, #tpu.memory_space<vmem>>, vector<1x1x128xf32>
    %189 = vector.shape_cast %188 : vector<1x1x128xf32> to vector<1x128xf32>
    %190 = vector.broadcast %189 : vector<1x128xf32> to vector<16x128xf32>
    %191 = arith.addf %187, %190 : vector<16x128xf32>
    %192 = arith.addf %145, %191 : vector<16x128xf32>
    %c1 = arith.constant 1 : index
    %c0_84 = arith.constant 0 : index
    %c0_85 = arith.constant 0 : index
    %193 = vector.load %arg4[%c1, %c0_84, %c0_85] : memref<2x1x128xf32, #tpu.memory_space<vmem>>, vector<1x1x128xf32>
    %194 = vector.shape_cast %193 : vector<1x1x128xf32> to vector<1x128xf32>
    %c1_86 = arith.constant 1 : index
    %c0_87 = arith.constant 0 : index
    %c0_88 = arith.constant 0 : index
    %195 = vector.load %arg5[%c1_86, %c0_87, %c0_88] : memref<2x1x128xf32, #tpu.memory_space<vmem>>, vector<1x1x128xf32>
    %196 = vector.shape_cast %195 : vector<1x1x128xf32> to vector<1x128xf32>
    %cst_89 = arith.constant dense<0.000000e+00> : vector<16xf32>
    %197 = vector.multi_reduction <add>, %192, %cst_89 [1] : vector<16x128xf32> to vector<16xf32>
    %198 = vector.shape_cast %197 : vector<16xf32> to vector<16x1xf32>
    %cst_90 = arith.constant 1.280000e+02 : f32
    %199 = vector.broadcast %cst_90 : f32 to vector<16x1xf32>
    %200 = arith.divf %198, %199 : vector<16x1xf32>
    %201 = vector.broadcast %200 : vector<16x1xf32> to vector<16x128xf32>
    %202 = arith.subf %192, %201 : vector<16x128xf32>
    %203 = arith.mulf %202, %202 : vector<16x128xf32>
    %cst_91 = arith.constant dense<0.000000e+00> : vector<16xf32>
    %204 = vector.multi_reduction <add>, %203, %cst_91 [1] : vector<16x128xf32> to vector<16xf32>
    %205 = vector.shape_cast %204 : vector<16xf32> to vector<16x1xf32>
    %cst_92 = arith.constant 1.280000e+02 : f32
    %206 = vector.broadcast %cst_92 : f32 to vector<16x1xf32>
    %207 = arith.divf %205, %206 : vector<16x1xf32>
    %cst_93 = arith.constant 9.99999997E-7 : f32
    %208 = vector.broadcast %cst_93 : f32 to vector<16x1xf32>
    %209 = arith.addf %207, %208 : vector<16x1xf32>
    %210 = math.rsqrt %209 : vector<16x1xf32>
    %211 = vector.broadcast %210 : vector<16x1xf32> to vector<16x128xf32>
    %212 = arith.mulf %202, %211 : vector<16x128xf32>
    %213 = vector.broadcast %194 : vector<1x128xf32> to vector<16x128xf32>
    %214 = arith.mulf %212, %213 : vector<16x128xf32>
    %215 = vector.broadcast %196 : vector<1x128xf32> to vector<16x128xf32>
    %216 = arith.addf %214, %215 : vector<16x128xf32>
    %c1_94 = arith.constant 1 : index
    %c0_95 = arith.constant 0 : index
    %c0_96 = arith.constant 0 : index
    %217 = vector.load %arg6[%c1_94, %c0_95, %c0_96] : memref<2x128x384xf32, #tpu.memory_space<vmem>>, vector<1x128x384xf32>
    %218 = vector.shape_cast %217 : vector<1x128x384xf32> to vector<128x384xf32>
    %cst_97 = arith.constant dense<0.000000e+00> : vector<16x384xf32>
    %219 = tpu.matmul %216, %218, %cst_97 {dimension_numbers = #tpu.dot_dimension_numbers<[1], [0], [0], [1], [0, 0, 1, 1], [], []>} : vector<16x128xf32>, vector<128x384xf32>, vector<16x384xf32> -> vector<16x384xf32>
    %c1_98 = arith.constant 1 : index
    %c0_99 = arith.constant 0 : index
    %c0_100 = arith.constant 0 : index
    %220 = vector.load %arg7[%c1_98, %c0_99, %c0_100] : memref<2x1x384xf32, #tpu.memory_space<vmem>>, vector<1x1x384xf32>
    %221 = vector.shape_cast %220 : vector<1x1x384xf32> to vector<1x384xf32>
    %222 = vector.broadcast %221 : vector<1x384xf32> to vector<16x384xf32>
    %223 = arith.addf %219, %222 : vector<16x384xf32>
    %224 = vector.shape_cast %223 : vector<16x384xf32> to vector<2x8x384xf32>
    %c1_101 = arith.constant 1 : index
    %c0_102 = arith.constant 0 : index
    %c0_103 = arith.constant 0 : index
    %225 = vector.load %arg8[%c1_101, %c0_102, %c0_103] : memref<2x128x128xf32, #tpu.memory_space<vmem>>, vector<1x128x128xf32>
    %226 = vector.shape_cast %225 : vector<1x128x128xf32> to vector<128x128xf32>
    %227 = vector.extract_strided_slice %224 {offsets = [0, 0, 0], sizes = [2, 8, 32], strides = [1, 1, 1]} : vector<2x8x384xf32> to vector<2x8x32xf32>
    %228 = vector.extract_strided_slice %224 {offsets = [0, 0, 128], sizes = [2, 8, 32], strides = [1, 1, 1]} : vector<2x8x384xf32> to vector<2x8x32xf32>
    %229 = vector.extract_strided_slice %224 {offsets = [0, 0, 256], sizes = [2, 8, 32], strides = [1, 1, 1]} : vector<2x8x384xf32> to vector<2x8x32xf32>
    "tpu.trace_start"() <{level = 10 : i32, message = "bqd,bkd->bqk"}> : () -> ()
    %cst_104 = arith.constant dense<0.000000e+00> : vector<2x8x8xf32>
    %230 = tpu.matmul %227, %228, %cst_104 {dimension_numbers = #tpu.dot_dimension_numbers<[2], [2], [1], [1], [0, 0, 0, 1, 1, 1], [0], [0]>} : vector<2x8x32xf32>, vector<2x8x32xf32>, vector<2x8x8xf32> -> vector<2x8x8xf32>
    "tpu.trace_stop"() : () -> ()
    %cst_105 = arith.constant 0.176776692 : f32
    %231 = vector.broadcast %cst_105 : f32 to vector<2x8x8xf32>
    %232 = arith.mulf %230, %231 : vector<2x8x8xf32>
    %233 = vector.shape_cast %15 : vector<8x8xf32> to vector<1x8x8xf32>
    %234 = vector.broadcast %233 : vector<1x8x8xf32> to vector<2x8x8xf32>
    %235 = arith.addf %232, %234 : vector<2x8x8xf32>
    %cst_106 = arith.constant dense<0xFF800000> : vector<2x8xf32>
    %236 = vector.multi_reduction <maximumf>, %235, %cst_106 [2] : vector<2x8x8xf32> to vector<2x8xf32>
    %237 = vector.shape_cast %236 : vector<2x8xf32> to vector<2x8x1xf32>
    %238 = vector.broadcast %237 : vector<2x8x1xf32> to vector<2x8x8xf32>
    %239 = arith.subf %235, %238 : vector<2x8x8xf32>
    %240 = math.exp %239 : vector<2x8x8xf32>
    %cst_107 = arith.constant dense<0.000000e+00> : vector<2x8xf32>
    %241 = vector.multi_reduction <add>, %240, %cst_107 [2] : vector<2x8x8xf32> to vector<2x8xf32>
    %242 = vector.shape_cast %241 : vector<2x8xf32> to vector<2x8x1xf32>
    %243 = vector.broadcast %242 : vector<2x8x1xf32> to vector<2x8x8xf32>
    %244 = arith.divf %240, %243 : vector<2x8x8xf32>
    "tpu.trace_start"() <{level = 10 : i32, message = "bqk,bkd->bqd"}> : () -> ()
    %cst_108 = arith.constant dense<0.000000e+00> : vector<2x8x32xf32>
    %245 = tpu.matmul %244, %229, %cst_108 {dimension_numbers = #tpu.dot_dimension_numbers<[2], [1], [1], [2], [0, 0, 0, 1, 1, 2], [0], [0]>} : vector<2x8x8xf32>, vector<2x8x32xf32>, vector<2x8x32xf32> -> vector<2x8x32xf32>
    "tpu.trace_stop"() : () -> ()
    %246 = vector.shape_cast %245 : vector<2x8x32xf32> to vector<16x32xf32>
    %247 = vector.extract_strided_slice %226 {offsets = [0, 0], sizes = [32, 128], strides = [1, 1]} : vector<128x128xf32> to vector<32x128xf32>
    %cst_109 = arith.constant dense<0.000000e+00> : vector<16x128xf32>
    %248 = tpu.matmul %246, %247, %cst_109 {dimension_numbers = #tpu.dot_dimension_numbers<[1], [0], [0], [1], [0, 0, 1, 1], [], []>} : vector<16x32xf32>, vector<32x128xf32>, vector<16x128xf32> -> vector<16x128xf32>
    %249 = vector.extract_strided_slice %224 {offsets = [0, 0, 32], sizes = [2, 8, 32], strides = [1, 1, 1]} : vector<2x8x384xf32> to vector<2x8x32xf32>
    %250 = vector.extract_strided_slice %224 {offsets = [0, 0, 160], sizes = [2, 8, 32], strides = [1, 1, 1]} : vector<2x8x384xf32> to vector<2x8x32xf32>
    %251 = vector.extract_strided_slice %224 {offsets = [0, 0, 288], sizes = [2, 8, 32], strides = [1, 1, 1]} : vector<2x8x384xf32> to vector<2x8x32xf32>
    "tpu.trace_start"() <{level = 10 : i32, message = "bqd,bkd->bqk"}> : () -> ()
    %cst_110 = arith.constant dense<0.000000e+00> : vector<2x8x8xf32>
    %252 = tpu.matmul %249, %250, %cst_110 {dimension_numbers = #tpu.dot_dimension_numbers<[2], [2], [1], [1], [0, 0, 0, 1, 1, 1], [0], [0]>} : vector<2x8x32xf32>, vector<2x8x32xf32>, vector<2x8x8xf32> -> vector<2x8x8xf32>
    "tpu.trace_stop"() : () -> ()
    %cst_111 = arith.constant 0.176776692 : f32
    %253 = vector.broadcast %cst_111 : f32 to vector<2x8x8xf32>
    %254 = arith.mulf %252, %253 : vector<2x8x8xf32>
    %255 = vector.shape_cast %15 : vector<8x8xf32> to vector<1x8x8xf32>
    %256 = vector.broadcast %255 : vector<1x8x8xf32> to vector<2x8x8xf32>
    %257 = arith.addf %254, %256 : vector<2x8x8xf32>
    %cst_112 = arith.constant dense<0xFF800000> : vector<2x8xf32>
    %258 = vector.multi_reduction <maximumf>, %257, %cst_112 [2] : vector<2x8x8xf32> to vector<2x8xf32>
    %259 = vector.shape_cast %258 : vector<2x8xf32> to vector<2x8x1xf32>
    %260 = vector.broadcast %259 : vector<2x8x1xf32> to vector<2x8x8xf32>
    %261 = arith.subf %257, %260 : vector<2x8x8xf32>
    %262 = math.exp %261 : vector<2x8x8xf32>
    %cst_113 = arith.constant dense<0.000000e+00> : vector<2x8xf32>
    %263 = vector.multi_reduction <add>, %262, %cst_113 [2] : vector<2x8x8xf32> to vector<2x8xf32>
    %264 = vector.shape_cast %263 : vector<2x8xf32> to vector<2x8x1xf32>
    %265 = vector.broadcast %264 : vector<2x8x1xf32> to vector<2x8x8xf32>
    %266 = arith.divf %262, %265 : vector<2x8x8xf32>
    "tpu.trace_start"() <{level = 10 : i32, message = "bqk,bkd->bqd"}> : () -> ()
    %cst_114 = arith.constant dense<0.000000e+00> : vector<2x8x32xf32>
    %267 = tpu.matmul %266, %251, %cst_114 {dimension_numbers = #tpu.dot_dimension_numbers<[2], [1], [1], [2], [0, 0, 0, 1, 1, 2], [0], [0]>} : vector<2x8x8xf32>, vector<2x8x32xf32>, vector<2x8x32xf32> -> vector<2x8x32xf32>
    "tpu.trace_stop"() : () -> ()
    %268 = vector.shape_cast %267 : vector<2x8x32xf32> to vector<16x32xf32>
    %269 = vector.extract_strided_slice %226 {offsets = [32, 0], sizes = [32, 128], strides = [1, 1]} : vector<128x128xf32> to vector<32x128xf32>
    %cst_115 = arith.constant dense<0.000000e+00> : vector<16x128xf32>
    %270 = tpu.matmul %268, %269, %cst_115 {dimension_numbers = #tpu.dot_dimension_numbers<[1], [0], [0], [1], [0, 0, 1, 1], [], []>} : vector<16x32xf32>, vector<32x128xf32>, vector<16x128xf32> -> vector<16x128xf32>
    %271 = arith.addf %248, %270 : vector<16x128xf32>
    %272 = vector.extract_strided_slice %224 {offsets = [0, 0, 64], sizes = [2, 8, 32], strides = [1, 1, 1]} : vector<2x8x384xf32> to vector<2x8x32xf32>
    %273 = vector.extract_strided_slice %224 {offsets = [0, 0, 192], sizes = [2, 8, 32], strides = [1, 1, 1]} : vector<2x8x384xf32> to vector<2x8x32xf32>
    %274 = vector.extract_strided_slice %224 {offsets = [0, 0, 320], sizes = [2, 8, 32], strides = [1, 1, 1]} : vector<2x8x384xf32> to vector<2x8x32xf32>
    "tpu.trace_start"() <{level = 10 : i32, message = "bqd,bkd->bqk"}> : () -> ()
    %cst_116 = arith.constant dense<0.000000e+00> : vector<2x8x8xf32>
    %275 = tpu.matmul %272, %273, %cst_116 {dimension_numbers = #tpu.dot_dimension_numbers<[2], [2], [1], [1], [0, 0, 0, 1, 1, 1], [0], [0]>} : vector<2x8x32xf32>, vector<2x8x32xf32>, vector<2x8x8xf32> -> vector<2x8x8xf32>
    "tpu.trace_stop"() : () -> ()
    %cst_117 = arith.constant 0.176776692 : f32
    %276 = vector.broadcast %cst_117 : f32 to vector<2x8x8xf32>
    %277 = arith.mulf %275, %276 : vector<2x8x8xf32>
    %278 = vector.shape_cast %15 : vector<8x8xf32> to vector<1x8x8xf32>
    %279 = vector.broadcast %278 : vector<1x8x8xf32> to vector<2x8x8xf32>
    %280 = arith.addf %277, %279 : vector<2x8x8xf32>
    %cst_118 = arith.constant dense<0xFF800000> : vector<2x8xf32>
    %281 = vector.multi_reduction <maximumf>, %280, %cst_118 [2] : vector<2x8x8xf32> to vector<2x8xf32>
    %282 = vector.shape_cast %281 : vector<2x8xf32> to vector<2x8x1xf32>
    %283 = vector.broadcast %282 : vector<2x8x1xf32> to vector<2x8x8xf32>
    %284 = arith.subf %280, %283 : vector<2x8x8xf32>
    %285 = math.exp %284 : vector<2x8x8xf32>
    %cst_119 = arith.constant dense<0.000000e+00> : vector<2x8xf32>
    %286 = vector.multi_reduction <add>, %285, %cst_119 [2] : vector<2x8x8xf32> to vector<2x8xf32>
    %287 = vector.shape_cast %286 : vector<2x8xf32> to vector<2x8x1xf32>
    %288 = vector.broadcast %287 : vector<2x8x1xf32> to vector<2x8x8xf32>
    %289 = arith.divf %285, %288 : vector<2x8x8xf32>
    "tpu.trace_start"() <{level = 10 : i32, message = "bqk,bkd->bqd"}> : () -> ()
    %cst_120 = arith.constant dense<0.000000e+00> : vector<2x8x32xf32>
    %290 = tpu.matmul %289, %274, %cst_120 {dimension_numbers = #tpu.dot_dimension_numbers<[2], [1], [1], [2], [0, 0, 0, 1, 1, 2], [0], [0]>} : vector<2x8x8xf32>, vector<2x8x32xf32>, vector<2x8x32xf32> -> vector<2x8x32xf32>
    "tpu.trace_stop"() : () -> ()
    %291 = vector.shape_cast %290 : vector<2x8x32xf32> to vector<16x32xf32>
    %292 = vector.extract_strided_slice %226 {offsets = [64, 0], sizes = [32, 128], strides = [1, 1]} : vector<128x128xf32> to vector<32x128xf32>
    %cst_121 = arith.constant dense<0.000000e+00> : vector<16x128xf32>
    %293 = tpu.matmul %291, %292, %cst_121 {dimension_numbers = #tpu.dot_dimension_numbers<[1], [0], [0], [1], [0, 0, 1, 1], [], []>} : vector<16x32xf32>, vector<32x128xf32>, vector<16x128xf32> -> vector<16x128xf32>
    %294 = arith.addf %271, %293 : vector<16x128xf32>
    %295 = vector.extract_strided_slice %224 {offsets = [0, 0, 96], sizes = [2, 8, 32], strides = [1, 1, 1]} : vector<2x8x384xf32> to vector<2x8x32xf32>
    %296 = vector.extract_strided_slice %224 {offsets = [0, 0, 224], sizes = [2, 8, 32], strides = [1, 1, 1]} : vector<2x8x384xf32> to vector<2x8x32xf32>
    %297 = vector.extract_strided_slice %224 {offsets = [0, 0, 352], sizes = [2, 8, 32], strides = [1, 1, 1]} : vector<2x8x384xf32> to vector<2x8x32xf32>
    "tpu.trace_start"() <{level = 10 : i32, message = "bqd,bkd->bqk"}> : () -> ()
    %cst_122 = arith.constant dense<0.000000e+00> : vector<2x8x8xf32>
    %298 = tpu.matmul %295, %296, %cst_122 {dimension_numbers = #tpu.dot_dimension_numbers<[2], [2], [1], [1], [0, 0, 0, 1, 1, 1], [0], [0]>} : vector<2x8x32xf32>, vector<2x8x32xf32>, vector<2x8x8xf32> -> vector<2x8x8xf32>
    "tpu.trace_stop"() : () -> ()
    %cst_123 = arith.constant 0.176776692 : f32
    %299 = vector.broadcast %cst_123 : f32 to vector<2x8x8xf32>
    %300 = arith.mulf %298, %299 : vector<2x8x8xf32>
    %301 = vector.shape_cast %15 : vector<8x8xf32> to vector<1x8x8xf32>
    %302 = vector.broadcast %301 : vector<1x8x8xf32> to vector<2x8x8xf32>
    %303 = arith.addf %300, %302 : vector<2x8x8xf32>
    %cst_124 = arith.constant dense<0xFF800000> : vector<2x8xf32>
    %304 = vector.multi_reduction <maximumf>, %303, %cst_124 [2] : vector<2x8x8xf32> to vector<2x8xf32>
    %305 = vector.shape_cast %304 : vector<2x8xf32> to vector<2x8x1xf32>
    %306 = vector.broadcast %305 : vector<2x8x1xf32> to vector<2x8x8xf32>
    %307 = arith.subf %303, %306 : vector<2x8x8xf32>
    %308 = math.exp %307 : vector<2x8x8xf32>
    %cst_125 = arith.constant dense<0.000000e+00> : vector<2x8xf32>
    %309 = vector.multi_reduction <add>, %308, %cst_125 [2] : vector<2x8x8xf32> to vector<2x8xf32>
    %310 = vector.shape_cast %309 : vector<2x8xf32> to vector<2x8x1xf32>
    %311 = vector.broadcast %310 : vector<2x8x1xf32> to vector<2x8x8xf32>
    %312 = arith.divf %308, %311 : vector<2x8x8xf32>
    "tpu.trace_start"() <{level = 10 : i32, message = "bqk,bkd->bqd"}> : () -> ()
    %cst_126 = arith.constant dense<0.000000e+00> : vector<2x8x32xf32>
    %313 = tpu.matmul %312, %297, %cst_126 {dimension_numbers = #tpu.dot_dimension_numbers<[2], [1], [1], [2], [0, 0, 0, 1, 1, 2], [0], [0]>} : vector<2x8x8xf32>, vector<2x8x32xf32>, vector<2x8x32xf32> -> vector<2x8x32xf32>
    "tpu.trace_stop"() : () -> ()
    %314 = vector.shape_cast %313 : vector<2x8x32xf32> to vector<16x32xf32>
    %315 = vector.extract_strided_slice %226 {offsets = [96, 0], sizes = [32, 128], strides = [1, 1]} : vector<128x128xf32> to vector<32x128xf32>
    %cst_127 = arith.constant dense<0.000000e+00> : vector<16x128xf32>
    %316 = tpu.matmul %314, %315, %cst_127 {dimension_numbers = #tpu.dot_dimension_numbers<[1], [0], [0], [1], [0, 0, 1, 1], [], []>} : vector<16x32xf32>, vector<32x128xf32>, vector<16x128xf32> -> vector<16x128xf32>
    %317 = arith.addf %294, %316 : vector<16x128xf32>
    %318 = arith.addf %192, %317 : vector<16x128xf32>
    %c1_128 = arith.constant 1 : index
    %c0_129 = arith.constant 0 : index
    %c0_130 = arith.constant 0 : index
    %319 = vector.load %arg9[%c1_128, %c0_129, %c0_130] : memref<2x1x128xf32, #tpu.memory_space<vmem>>, vector<1x1x128xf32>
    %320 = vector.shape_cast %319 : vector<1x1x128xf32> to vector<1x128xf32>
    %321 = vector.broadcast %320 : vector<1x128xf32> to vector<16x128xf32>
    %322 = arith.addf %318, %321 : vector<16x128xf32>
    %c1_131 = arith.constant 1 : index
    %c0_132 = arith.constant 0 : index
    %c0_133 = arith.constant 0 : index
    %323 = vector.load %arg10[%c1_131, %c0_132, %c0_133] : memref<2x1x128xf32, #tpu.memory_space<vmem>>, vector<1x1x128xf32>
    %324 = vector.shape_cast %323 : vector<1x1x128xf32> to vector<1x128xf32>
    %c1_134 = arith.constant 1 : index
    %c0_135 = arith.constant 0 : index
    %c0_136 = arith.constant 0 : index
    %325 = vector.load %arg11[%c1_134, %c0_135, %c0_136] : memref<2x1x128xf32, #tpu.memory_space<vmem>>, vector<1x1x128xf32>
    %326 = vector.shape_cast %325 : vector<1x1x128xf32> to vector<1x128xf32>
    %cst_137 = arith.constant dense<0.000000e+00> : vector<16xf32>
    %327 = vector.multi_reduction <add>, %322, %cst_137 [1] : vector<16x128xf32> to vector<16xf32>
    %328 = vector.shape_cast %327 : vector<16xf32> to vector<16x1xf32>
    %cst_138 = arith.constant 1.280000e+02 : f32
    %329 = vector.broadcast %cst_138 : f32 to vector<16x1xf32>
    %330 = arith.divf %328, %329 : vector<16x1xf32>
    %331 = vector.broadcast %330 : vector<16x1xf32> to vector<16x128xf32>
    %332 = arith.subf %322, %331 : vector<16x128xf32>
    %333 = arith.mulf %332, %332 : vector<16x128xf32>
    %cst_139 = arith.constant dense<0.000000e+00> : vector<16xf32>
    %334 = vector.multi_reduction <add>, %333, %cst_139 [1] : vector<16x128xf32> to vector<16xf32>
    %335 = vector.shape_cast %334 : vector<16xf32> to vector<16x1xf32>
    %cst_140 = arith.constant 1.280000e+02 : f32
    %336 = vector.broadcast %cst_140 : f32 to vector<16x1xf32>
    %337 = arith.divf %335, %336 : vector<16x1xf32>
    %cst_141 = arith.constant 9.99999997E-7 : f32
    %338 = vector.broadcast %cst_141 : f32 to vector<16x1xf32>
    %339 = arith.addf %337, %338 : vector<16x1xf32>
    %340 = math.rsqrt %339 : vector<16x1xf32>
    %341 = vector.broadcast %340 : vector<16x1xf32> to vector<16x128xf32>
    %342 = arith.mulf %332, %341 : vector<16x128xf32>
    %343 = vector.broadcast %324 : vector<1x128xf32> to vector<16x128xf32>
    %344 = arith.mulf %342, %343 : vector<16x128xf32>
    %345 = vector.broadcast %326 : vector<1x128xf32> to vector<16x128xf32>
    %346 = arith.addf %344, %345 : vector<16x128xf32>
    %c1_142 = arith.constant 1 : index
    %c0_143 = arith.constant 0 : index
    %c0_144 = arith.constant 0 : index
    %347 = vector.load %arg12[%c1_142, %c0_143, %c0_144] : memref<2x128x512xf32, #tpu.memory_space<vmem>>, vector<1x128x512xf32>
    %348 = vector.shape_cast %347 : vector<1x128x512xf32> to vector<128x512xf32>
    %cst_145 = arith.constant dense<0.000000e+00> : vector<16x512xf32>
    %349 = tpu.matmul %346, %348, %cst_145 {dimension_numbers = #tpu.dot_dimension_numbers<[1], [0], [0], [1], [0, 0, 1, 1], [], []>} : vector<16x128xf32>, vector<128x512xf32>, vector<16x512xf32> -> vector<16x512xf32>
    %c1_146 = arith.constant 1 : index
    %c0_147 = arith.constant 0 : index
    %c0_148 = arith.constant 0 : index
    %350 = vector.load %arg13[%c1_146, %c0_147, %c0_148] : memref<2x1x512xf32, #tpu.memory_space<vmem>>, vector<1x1x512xf32>
    %351 = vector.shape_cast %350 : vector<1x1x512xf32> to vector<1x512xf32>
    %352 = vector.broadcast %351 : vector<1x512xf32> to vector<16x512xf32>
    %353 = arith.addf %349, %352 : vector<16x512xf32>
    %cst_149 = arith.constant 5.000000e-01 : f32
    %354 = vector.broadcast %cst_149 : f32 to vector<16x512xf32>
    %355 = arith.mulf %354, %353 : vector<16x512xf32>
    %cst_150 = arith.constant 0.707106769 : f32
    %356 = vector.broadcast %cst_150 : f32 to vector<16x512xf32>
    %357 = arith.mulf %353, %356 : vector<16x512xf32>
    %358 = math.erf %357 : vector<16x512xf32>
    %cst_151 = arith.constant 1.000000e+00 : f32
    %359 = vector.broadcast %cst_151 : f32 to vector<16x512xf32>
    %360 = arith.addf %359, %358 : vector<16x512xf32>
    %361 = arith.mulf %355, %360 : vector<16x512xf32>
    %c1_152 = arith.constant 1 : index
    %c0_153 = arith.constant 0 : index
    %c0_154 = arith.constant 0 : index
    %362 = vector.load %arg14[%c1_152, %c0_153, %c0_154] : memref<2x512x128xf32, #tpu.memory_space<vmem>>, vector<1x512x128xf32>
    %363 = vector.shape_cast %362 : vector<1x512x128xf32> to vector<512x128xf32>
    %cst_155 = arith.constant dense<0.000000e+00> : vector<16x128xf32>
    %364 = tpu.matmul %361, %363, %cst_155 {dimension_numbers = #tpu.dot_dimension_numbers<[1], [0], [0], [1], [0, 0, 1, 1], [], []>} : vector<16x512xf32>, vector<512x128xf32>, vector<16x128xf32> -> vector<16x128xf32>
    %c1_156 = arith.constant 1 : index
    %c0_157 = arith.constant 0 : index
    %c0_158 = arith.constant 0 : index
    %365 = vector.load %arg15[%c1_156, %c0_157, %c0_158] : memref<2x1x128xf32, #tpu.memory_space<vmem>>, vector<1x1x128xf32>
    %366 = vector.shape_cast %365 : vector<1x1x128xf32> to vector<1x128xf32>
    %367 = vector.broadcast %366 : vector<1x128xf32> to vector<16x128xf32>
    %368 = arith.addf %364, %367 : vector<16x128xf32>
    %369 = arith.addf %322, %368 : vector<16x128xf32>
    %370 = vector.shape_cast %369 : vector<16x128xf32> to vector<2x8x128xf32>
    %371 = vector.extract_strided_slice %370 {offsets = [0, 0, 0], sizes = [2, 1, 128], strides = [1, 1, 1]} : vector<2x8x128xf32> to vector<2x1x128xf32>
    %372 = vector.shape_cast %371 : vector<2x1x128xf32> to vector<2x128xf32>
    %c0_159 = arith.constant 0 : index
    %c0_160 = arith.constant 0 : index
    %373 = vector.load %arg16[%c0_159, %c0_160] : memref<1x128xf32, #tpu.memory_space<vmem>>, vector<1x128xf32>
    %c0_161 = arith.constant 0 : index
    %c0_162 = arith.constant 0 : index
    %374 = vector.load %arg17[%c0_161, %c0_162] : memref<1x128xf32, #tpu.memory_space<vmem>>, vector<1x128xf32>
    %cst_163 = arith.constant dense<0.000000e+00> : vector<2xf32>
    %375 = vector.multi_reduction <add>, %372, %cst_163 [1] : vector<2x128xf32> to vector<2xf32>
    %376 = vector.shape_cast %375 : vector<2xf32> to vector<2x1xf32>
    %cst_164 = arith.constant 1.280000e+02 : f32
    %377 = vector.broadcast %cst_164 : f32 to vector<2x1xf32>
    %378 = arith.divf %376, %377 : vector<2x1xf32>
    %379 = vector.broadcast %378 : vector<2x1xf32> to vector<2x128xf32>
    %380 = arith.subf %372, %379 : vector<2x128xf32>
    %381 = arith.mulf %380, %380 : vector<2x128xf32>
    %cst_165 = arith.constant dense<0.000000e+00> : vector<2xf32>
    %382 = vector.multi_reduction <add>, %381, %cst_165 [1] : vector<2x128xf32> to vector<2xf32>
    %383 = vector.shape_cast %382 : vector<2xf32> to vector<2x1xf32>
    %cst_166 = arith.constant 1.280000e+02 : f32
    %384 = vector.broadcast %cst_166 : f32 to vector<2x1xf32>
    %385 = arith.divf %383, %384 : vector<2x1xf32>
    %cst_167 = arith.constant 9.99999997E-7 : f32
    %386 = vector.broadcast %cst_167 : f32 to vector<2x1xf32>
    %387 = arith.addf %385, %386 : vector<2x1xf32>
    %388 = math.rsqrt %387 : vector<2x1xf32>
    %389 = vector.broadcast %388 : vector<2x1xf32> to vector<2x128xf32>
    %390 = arith.mulf %380, %389 : vector<2x128xf32>
    %391 = vector.broadcast %373 : vector<1x128xf32> to vector<2x128xf32>
    %392 = arith.mulf %390, %391 : vector<2x128xf32>
    %393 = vector.broadcast %374 : vector<1x128xf32> to vector<2x128xf32>
    %394 = arith.addf %392, %393 : vector<2x128xf32>
    %c0_168 = arith.constant 0 : index
    %c0_169 = arith.constant 0 : index
    %395 = vector.load %arg18[%c0_168, %c0_169] : memref<128x512xf32, #tpu.memory_space<vmem>>, vector<128x512xf32>
    %cst_170 = arith.constant dense<0.000000e+00> : vector<2x512xf32>
    %396 = tpu.matmul %394, %395, %cst_170 {dimension_numbers = #tpu.dot_dimension_numbers<[1], [0], [0], [1], [0, 0, 1, 1], [], []>} : vector<2x128xf32>, vector<128x512xf32>, vector<2x512xf32> -> vector<2x512xf32>
    %c0_171 = arith.constant 0 : index
    %c0_172 = arith.constant 0 : index
    %397 = vector.load %arg19[%c0_171, %c0_172] : memref<1x512xf32, #tpu.memory_space<vmem>>, vector<1x512xf32>
    %398 = vector.broadcast %397 : vector<1x512xf32> to vector<2x512xf32>
    %399 = arith.addf %396, %398 : vector<2x512xf32>
    %c0_173 = arith.constant 0 : index
    %c0_174 = arith.constant 0 : index
    %400 = vector.load %arg20[%c0_173, %c0_174] : memref<1x512xf32, #tpu.memory_space<vmem>>, vector<1x512xf32>
    %c0_175 = arith.constant 0 : index
    %c0_176 = arith.constant 0 : index
    %401 = vector.load %arg21[%c0_175, %c0_176] : memref<1x512xf32, #tpu.memory_space<vmem>>, vector<1x512xf32>
    %cst_177 = arith.constant dense<0.000000e+00> : vector<2xf32>
    %402 = vector.multi_reduction <add>, %399, %cst_177 [1] : vector<2x512xf32> to vector<2xf32>
    %403 = vector.shape_cast %402 : vector<2xf32> to vector<2x1xf32>
    %cst_178 = arith.constant 5.120000e+02 : f32
    %404 = vector.broadcast %cst_178 : f32 to vector<2x1xf32>
    %405 = arith.divf %403, %404 : vector<2x1xf32>
    %406 = vector.broadcast %405 : vector<2x1xf32> to vector<2x512xf32>
    %407 = arith.subf %399, %406 : vector<2x512xf32>
    %408 = arith.mulf %407, %407 : vector<2x512xf32>
    %cst_179 = arith.constant dense<0.000000e+00> : vector<2xf32>
    %409 = vector.multi_reduction <add>, %408, %cst_179 [1] : vector<2x512xf32> to vector<2xf32>
    %410 = vector.shape_cast %409 : vector<2xf32> to vector<2x1xf32>
    %cst_180 = arith.constant 5.120000e+02 : f32
    %411 = vector.broadcast %cst_180 : f32 to vector<2x1xf32>
    %412 = arith.divf %410, %411 : vector<2x1xf32>
    %cst_181 = arith.constant 9.99999974E-6 : f32
    %413 = vector.broadcast %cst_181 : f32 to vector<2x1xf32>
    %414 = arith.addf %412, %413 : vector<2x1xf32>
    %415 = math.rsqrt %414 : vector<2x1xf32>
    %416 = vector.broadcast %415 : vector<2x1xf32> to vector<2x512xf32>
    %417 = arith.mulf %407, %416 : vector<2x512xf32>
    %418 = vector.broadcast %400 : vector<1x512xf32> to vector<2x512xf32>
    %419 = arith.mulf %417, %418 : vector<2x512xf32>
    %420 = vector.broadcast %401 : vector<1x512xf32> to vector<2x512xf32>
    %421 = arith.addf %419, %420 : vector<2x512xf32>
    %cst_182 = arith.constant 5.000000e-01 : f32
    %422 = vector.broadcast %cst_182 : f32 to vector<2x512xf32>
    %423 = arith.mulf %422, %421 : vector<2x512xf32>
    %cst_183 = arith.constant 0.707106769 : f32
    %424 = vector.broadcast %cst_183 : f32 to vector<2x512xf32>
    %425 = arith.mulf %421, %424 : vector<2x512xf32>
    %426 = math.erf %425 : vector<2x512xf32>
    %cst_184 = arith.constant 1.000000e+00 : f32
    %427 = vector.broadcast %cst_184 : f32 to vector<2x512xf32>
    %428 = arith.addf %427, %426 : vector<2x512xf32>
    %429 = arith.mulf %423, %428 : vector<2x512xf32>
    %c0_185 = arith.constant 0 : index
    %c0_186 = arith.constant 0 : index
    %430 = vector.load %arg22[%c0_185, %c0_186] : memref<512x256xf32, #tpu.memory_space<vmem>>, vector<512x256xf32>
    %cst_187 = arith.constant dense<0.000000e+00> : vector<2x256xf32>
    %431 = tpu.matmul %429, %430, %cst_187 {dimension_numbers = #tpu.dot_dimension_numbers<[1], [0], [0], [1], [0, 0, 1, 1], [], []>} : vector<2x512xf32>, vector<512x256xf32>, vector<2x256xf32> -> vector<2x256xf32>
    %c0_188 = arith.constant 0 : index
    %c0_189 = arith.constant 0 : index
    %432 = vector.load %arg23[%c0_188, %c0_189] : memref<1x256xf32, #tpu.memory_space<vmem>>, vector<1x256xf32>
    %433 = vector.broadcast %432 : vector<1x256xf32> to vector<2x256xf32>
    %434 = arith.addf %431, %433 : vector<2x256xf32>
    %c0_190 = arith.constant 0 : index
    %c0_191 = arith.constant 0 : index
    %435 = vector.load %arg24[%c0_190, %c0_191] : memref<1x256xf32, #tpu.memory_space<vmem>>, vector<1x256xf32>
    %c0_192 = arith.constant 0 : index
    %c0_193 = arith.constant 0 : index
    %436 = vector.load %arg25[%c0_192, %c0_193] : memref<1x256xf32, #tpu.memory_space<vmem>>, vector<1x256xf32>
    %cst_194 = arith.constant dense<0.000000e+00> : vector<2xf32>
    %437 = vector.multi_reduction <add>, %434, %cst_194 [1] : vector<2x256xf32> to vector<2xf32>
    %438 = vector.shape_cast %437 : vector<2xf32> to vector<2x1xf32>
    %cst_195 = arith.constant 2.560000e+02 : f32
    %439 = vector.broadcast %cst_195 : f32 to vector<2x1xf32>
    %440 = arith.divf %438, %439 : vector<2x1xf32>
    %441 = vector.broadcast %440 : vector<2x1xf32> to vector<2x256xf32>
    %442 = arith.subf %434, %441 : vector<2x256xf32>
    %443 = arith.mulf %442, %442 : vector<2x256xf32>
    %cst_196 = arith.constant dense<0.000000e+00> : vector<2xf32>
    %444 = vector.multi_reduction <add>, %443, %cst_196 [1] : vector<2x256xf32> to vector<2xf32>
    %445 = vector.shape_cast %444 : vector<2xf32> to vector<2x1xf32>
    %cst_197 = arith.constant 2.560000e+02 : f32
    %446 = vector.broadcast %cst_197 : f32 to vector<2x1xf32>
    %447 = arith.divf %445, %446 : vector<2x1xf32>
    %cst_198 = arith.constant 9.99999974E-6 : f32
    %448 = vector.broadcast %cst_198 : f32 to vector<2x1xf32>
    %449 = arith.addf %447, %448 : vector<2x1xf32>
    %450 = math.rsqrt %449 : vector<2x1xf32>
    %451 = vector.broadcast %450 : vector<2x1xf32> to vector<2x256xf32>
    %452 = arith.mulf %442, %451 : vector<2x256xf32>
    %453 = vector.broadcast %435 : vector<1x256xf32> to vector<2x256xf32>
    %454 = arith.mulf %452, %453 : vector<2x256xf32>
    %455 = vector.broadcast %436 : vector<1x256xf32> to vector<2x256xf32>
    %456 = arith.addf %454, %455 : vector<2x256xf32>
    %cst_199 = arith.constant 5.000000e-01 : f32
    %457 = vector.broadcast %cst_199 : f32 to vector<2x256xf32>
    %458 = arith.mulf %457, %456 : vector<2x256xf32>
    %cst_200 = arith.constant 0.707106769 : f32
    %459 = vector.broadcast %cst_200 : f32 to vector<2x256xf32>
    %460 = arith.mulf %456, %459 : vector<2x256xf32>
    %461 = math.erf %460 : vector<2x256xf32>
    %cst_201 = arith.constant 1.000000e+00 : f32
    %462 = vector.broadcast %cst_201 : f32 to vector<2x256xf32>
    %463 = arith.addf %462, %461 : vector<2x256xf32>
    %464 = arith.mulf %458, %463 : vector<2x256xf32>
    %c0_202 = arith.constant 0 : index
    %c0_203 = arith.constant 0 : index
    %465 = vector.load %arg26[%c0_202, %c0_203] : memref<256x128xf32, #tpu.memory_space<vmem>>, vector<256x128xf32>
    %cst_204 = arith.constant dense<0.000000e+00> : vector<2x128xf32>
    %466 = tpu.matmul %464, %465, %cst_204 {dimension_numbers = #tpu.dot_dimension_numbers<[1], [0], [0], [1], [0, 0, 1, 1], [], []>} : vector<2x256xf32>, vector<256x128xf32>, vector<2x128xf32> -> vector<2x128xf32>
    %c0_205 = arith.constant 0 : index
    %c0_206 = arith.constant 0 : index
    %467 = vector.load %arg27[%c0_205, %c0_206] : memref<1x128xf32, #tpu.memory_space<vmem>>, vector<1x128xf32>
    %468 = vector.broadcast %467 : vector<1x128xf32> to vector<2x128xf32>
    %469 = arith.addf %466, %468 : vector<2x128xf32>
    %c0_207 = arith.constant 0 : index
    %c0_208 = arith.constant 0 : index
    %470 = vector.load %arg28[%c0_207, %c0_208] : memref<2x128xf32, #tpu.memory_space<vmem>>, vector<2x128xf32>
    tpu.vector_store %arg28[%c0_207, %c0_208], %469 {strides = array<i32>} : memref<2x128xf32, #tpu.memory_space<vmem>>, vector<2x128xf32>,
    return
  }
  func.func @transform_0(%arg0: i32) -> (i32, i32, i32) {
    %c0_i32 = arith.constant 0 : i32
    %c0_i32_0 = arith.constant 0 : i32
    %c0_i32_1 = arith.constant 0 : i32
    %c0_i32_2 = arith.constant 0 : i32
    return %c0_i32, %c0_i32_0, %c0_i32_1 : i32, i32, i32
  }
  func.func @transform_1(%arg0: i32) -> (i32, i32) {
    %c0_i32 = arith.constant 0 : i32
    %c0_i32_0 = arith.constant 0 : i32
    %c0_i32_1 = arith.constant 0 : i32
    return %c0_i32, %c0_i32_0 : i32, i32
  }
  func.func @transform_2(%arg0: i32) -> (i32, i32) {
    %c0_i32 = arith.constant 0 : i32
    %c0_i32_0 = arith.constant 0 : i32
    %c0_i32_1 = arith.constant 0 : i32
    return %c0_i32, %c0_i32_0 : i32, i32
  }
  func.func @transform_3(%arg0: i32) -> (i32, i32, i32) {
    %c0_i32 = arith.constant 0 : i32
    %c0_i32_0 = arith.constant 0 : i32
    %c0_i32_1 = arith.constant 0 : i32
    %c0_i32_2 = arith.constant 0 : i32
    return %c0_i32, %c0_i32_0, %c0_i32_1 : i32, i32, i32
  }
  func.func @transform_4(%arg0: i32) -> (i32, i32, i32) {
    %c0_i32 = arith.constant 0 : i32
    %c0_i32_0 = arith.constant 0 : i32
    %c0_i32_1 = arith.constant 0 : i32
    %c0_i32_2 = arith.constant 0 : i32
    return %c0_i32, %c0_i32_0, %c0_i32_1 : i32, i32, i32
  }
  func.func @transform_5(%arg0: i32) -> (i32, i32, i32) {
    %c0_i32 = arith.constant 0 : i32
    %c0_i32_0 = arith.constant 0 : i32
    %c0_i32_1 = arith.constant 0 : i32
    %c0_i32_2 = arith.constant 0 : i32
    return %c0_i32, %c0_i32_0, %c0_i32_1 : i32, i32, i32
  }
  func.func @transform_6(%arg0: i32) -> (i32, i32, i32) {
    %c0_i32 = arith.constant 0 : i32
    %c0_i32_0 = arith.constant 0 : i32
    %c0_i32_1 = arith.constant 0 : i32
    %c0_i32_2 = arith.constant 0 : i32
    return %c0_i32, %c0_i32_0, %c0_i32_1 : i32, i32, i32
  }
  func.func @transform_7(%arg0: i32) -> (i32, i32, i32) {
    %c0_i32 = arith.constant 0 : i32
    %c0_i32_0 = arith.constant 0 : i32
    %c0_i32_1 = arith.constant 0 : i32
    %c0_i32_2 = arith.constant 0 : i32
    return %c0_i32, %c0_i32_0, %c0_i32_1 : i32, i32, i32
  }
  func.func @transform_8(%arg0: i32) -> (i32, i32, i32) {
    %c0_i32 = arith.constant 0 : i32
    %c0_i32_0 = arith.constant 0 : i32
    %c0_i32_1 = arith.constant 0 : i32
    %c0_i32_2 = arith.constant 0 : i32
    return %c0_i32, %c0_i32_0, %c0_i32_1 : i32, i32, i32
  }
  func.func @transform_9(%arg0: i32) -> (i32, i32, i32) {
    %c0_i32 = arith.constant 0 : i32
    %c0_i32_0 = arith.constant 0 : i32
    %c0_i32_1 = arith.constant 0 : i32
    %c0_i32_2 = arith.constant 0 : i32
    return %c0_i32, %c0_i32_0, %c0_i32_1 : i32, i32, i32
  }
  func.func @transform_10(%arg0: i32) -> (i32, i32, i32) {
    %c0_i32 = arith.constant 0 : i32
    %c0_i32_0 = arith.constant 0 : i32
    %c0_i32_1 = arith.constant 0 : i32
    %c0_i32_2 = arith.constant 0 : i32
    return %c0_i32, %c0_i32_0, %c0_i32_1 : i32, i32, i32
  }
  func.func @transform_11(%arg0: i32) -> (i32, i32, i32) {
    %c0_i32 = arith.constant 0 : i32
    %c0_i32_0 = arith.constant 0 : i32
    %c0_i32_1 = arith.constant 0 : i32
    %c0_i32_2 = arith.constant 0 : i32
    return %c0_i32, %c0_i32_0, %c0_i32_1 : i32, i32, i32
  }
  func.func @transform_12(%arg0: i32) -> (i32, i32, i32) {
    %c0_i32 = arith.constant 0 : i32
    %c0_i32_0 = arith.constant 0 : i32
    %c0_i32_1 = arith.constant 0 : i32
    %c0_i32_2 = arith.constant 0 : i32
    return %c0_i32, %c0_i32_0, %c0_i32_1 : i32, i32, i32
  }
  func.func @transform_13(%arg0: i32) -> (i32, i32, i32) {
    %c0_i32 = arith.constant 0 : i32
    %c0_i32_0 = arith.constant 0 : i32
    %c0_i32_1 = arith.constant 0 : i32
    %c0_i32_2 = arith.constant 0 : i32
    return %c0_i32, %c0_i32_0, %c0_i32_1 : i32, i32, i32
  }
  func.func @transform_14(%arg0: i32) -> (i32, i32, i32) {
    %c0_i32 = arith.constant 0 : i32
    %c0_i32_0 = arith.constant 0 : i32
    %c0_i32_1 = arith.constant 0 : i32
    %c0_i32_2 = arith.constant 0 : i32
    return %c0_i32, %c0_i32_0, %c0_i32_1 : i32, i32, i32
  }
  func.func @transform_15(%arg0: i32) -> (i32, i32) {
    %c0_i32 = arith.constant 0 : i32
    %c0_i32_0 = arith.constant 0 : i32
    %c0_i32_1 = arith.constant 0 : i32
    return %c0_i32, %c0_i32_0 : i32, i32
  }
  func.func @transform_16(%arg0: i32) -> (i32, i32) {
    %c0_i32 = arith.constant 0 : i32
    %c0_i32_0 = arith.constant 0 : i32
    %c0_i32_1 = arith.constant 0 : i32
    return %c0_i32, %c0_i32_0 : i32, i32
  }
  func.func @transform_17(%arg0: i32) -> (i32, i32) {
    %c0_i32 = arith.constant 0 : i32
    %c0_i32_0 = arith.constant 0 : i32
    %c0_i32_1 = arith.constant 0 : i32
    return %c0_i32, %c0_i32_0 : i32, i32
  }
  func.func @transform_18(%arg0: i32) -> (i32, i32) {
    %c0_i32 = arith.constant 0 : i32
    %c0_i32_0 = arith.constant 0 : i32
    %c0_i32_1 = arith.constant 0 : i32
    return %c0_i32, %c0_i32_0 : i32, i32
  }
  func.func @transform_19(%arg0: i32) -> (i32, i32) {
    %c0_i32 = arith.constant 0 : i32
    %c0_i32_0 = arith.constant 0 : i32
    %c0_i32_1 = arith.constant 0 : i32
    return %c0_i32, %c0_i32_0 : i32, i32
  }
  func.func @transform_20(%arg0: i32) -> (i32, i32) {
    %c0_i32 = arith.constant 0 : i32
    %c0_i32_0 = arith.constant 0 : i32
    %c0_i32_1 = arith.constant 0 : i32
    return %c0_i32, %c0_i32_0 : i32, i32
  }
  func.func @transform_21(%arg0: i32) -> (i32, i32) {
    %c0_i32 = arith.constant 0 : i32
    %c0_i32_0 = arith.constant 0 : i32
    %c0_i32_1 = arith.constant 0 : i32
    return %c0_i32, %c0_i32_0 : i32, i32
  }
  func.func @transform_22(%arg0: i32) -> (i32, i32) {
    %c0_i32 = arith.constant 0 : i32
    %c0_i32_0 = arith.constant 0 : i32
    %c0_i32_1 = arith.constant 0 : i32
    return %c0_i32, %c0_i32_0 : i32, i32
  }
  func.func @transform_23(%arg0: i32) -> (i32, i32) {
    %c0_i32 = arith.constant 0 : i32
    %c0_i32_0 = arith.constant 0 : i32
    %c0_i32_1 = arith.constant 0 : i32
    return %c0_i32, %c0_i32_0 : i32, i32
  }
  func.func @transform_24(%arg0: i32) -> (i32, i32) {
    %c0_i32 = arith.constant 0 : i32
    %c0_i32_0 = arith.constant 0 : i32
    %c0_i32_1 = arith.constant 0 : i32
    return %c0_i32, %c0_i32_0 : i32, i32
  }
  func.func @transform_25(%arg0: i32) -> (i32, i32) {
    %c0_i32 = arith.constant 0 : i32
    %c0_i32_0 = arith.constant 0 : i32
    %c0_i32_1 = arith.constant 0 : i32
    return %c0_i32, %c0_i32_0 : i32, i32
  }
  func.func @transform_26(%arg0: i32) -> (i32, i32) {
    %c0_i32 = arith.constant 0 : i32
    %c0_i32_0 = arith.constant 0 : i32
    %c0_i32_1 = arith.constant 0 : i32
    return %c0_i32, %c0_i32_0 : i32, i32
  }
  func.func @transform_27(%arg0: i32) -> (i32, i32) {
    %c0_i32 = arith.constant 0 : i32
    %c0_i32_0 = arith.constant 0 : i32
    %c0_i32_1 = arith.constant 0 : i32
    return %c0_i32, %c0_i32_0 : i32, i32
  }
}

</mosaic_0001>

<bundles_post_ra>
// kernel: vit_forward.1
= control target key start
LH: loop header
LB: loop body
LE: loop exit
PB: predicated region body
PF: predicated region fallthrough
CT: control target
= control target key end

     0   :  { %s10194_s0 = inlined_call_operand.hbm [shape: f32[2,8,768], index: 0, kind: input, shape index: {}]   ;;  %s10195_s1 = inlined_call_operand.hbm [shape: f32[768,128], index: 1, kind: input, shape index: {}]   ;;  %s10196_s2 = inlined_call_operand.hbm [shape: f32[8,128], index: 2, kind: input, shape index: {}]   ;;  %s10197_s3 = inlined_call_operand.hbm [shape: f32[2,1,128], index: 3, kind: input, shape index: {}]   ;;  %s10198_s4 = inlined_call_operand.hbm [shape: f32[2,1,128], index: 4, kind: input, shape index: {}]   ;;  %s10199_s5 = inlined_call_operand.hbm [shape: f32[2,128,384], index: 5, kind: input, shape index: {}]   ;;  %s10200_s6 = inlined_call_operand.hbm [shape: f32[2,1,384], index: 6, kind: input, shape index: {}]   ;;  %s10201_s7 = inlined_call_operand.hbm [shape: f32[2,128,128], index: 7, kind: input, shape index: {}]   ;;  %s10202_s8 = inlined_call_operand.hbm [shape: f32[2,1,128], index: 8, kind: input, shape index: {}]   ;;  %s10203_s9 = inlined_call_operand.hbm [shape: f32[2,1,128], index: 9, kind: input, shape index: {}]   ;;  %s10204_s10 = inlined_call_operand.hbm [shape: f32[2,1,128], index: 10, kind: input, shape index: {}]   ;;  %s10205_s11 = inlined_call_operand.hbm [shape: f32[2,128,512], index: 11, kind: input, shape index: {}]   ;;  %s10206_s12 = inlined_call_operand.hbm [shape: f32[2,1,512], index: 12, kind: input, shape index: {}]   ;;  %s10207_s13 = inlined_call_operand.hbm [shape: f32[2,512,128], index: 13, kind: input, shape index: {}]   ;;  %s10208_s14 = inlined_call_operand.hbm [shape: f32[2,1,128], index: 14, kind: input, shape index: {}]   ;;  %s10209_s15 = inlined_call_operand.hbm [shape: f32[1,128], index: 15, kind: input, shape index: {}]   ;;  %s10210_s16 = inlined_call_operand.hbm [shape: f32[1,128], index: 16, kind: input, shape index: {}]   ;;  %s10211_s17 = inlined_call_operand.hbm [shape: f32[128,512], index: 17, kind: input, shape index: {}]   ;;  %s10212_s18 = inlined_call_operand.hbm [shape: f32[1,512], index: 18, kind: input, shape index: {}]   ;;  %s10213_s19 = inlined_call_operand.hbm [shape: f32[1,512], index: 19, kind: input, shape index: {}]   ;;  %s10214_s20 = inlined_call_operand.hbm [shape: f32[1,512], index: 20, kind: input, shape index: {}]   ;;  %s10215_s21 = inlined_call_operand.hbm [shape: f32[512,256], index: 21, kind: input, shape index: {}]   ;;  %s10216_s22 = inlined_call_operand.hbm [shape: f32[1,256], index: 22, kind: input, shape index: {}]   ;;  %s10217_s23 = inlined_call_operand.hbm [shape: f32[1,256], index: 23, kind: input, shape index: {}]   ;;  %s10218_s24 = inlined_call_operand.hbm [shape: f32[1,256], index: 24, kind: input, shape index: {}]   ;;  %s10219_s25 = inlined_call_operand.hbm [shape: f32[256,128], index: 25, kind: input, shape index: {}]   ;;  %s10220_s26 = inlined_call_operand.hbm [shape: f32[1,128], index: 26, kind: input, shape index: {}]   ;;  %s10221_s27 = inlined_call_operand.hbm [shape: f32[2,128], index: 27, kind: output, shape index: {}]  }
   0x1   :  { %10248 = sst [smem:[#allocation60_spill]] %s10194_s0 }
   0x2   :  { %10249 = sst [smem:[#allocation61_spill]] %s10195_s1 }
   0x3   :  { %10250 = sst [smem:[#allocation62_spill]] %s10196_s2 }
   0x4   :  { %10251 = sst [smem:[#allocation63_spill]] %s10197_s3 }
   0x5   :  { %10252 = sst [smem:[#allocation64_spill]] %s10198_s4 }
   0x6   :  { %10253 = sst [smem:[#allocation65_spill]] %s10199_s5 }
   0x7   :  { %10254 = sst [smem:[#allocation66_spill]] %s10200_s6 }
   0x8   :  { %10255 = sst [smem:[#allocation67_spill]] %s10201_s7 }
   0x9   :  { %10256 = sst [smem:[#allocation68_spill]] %s10202_s8 }
   0xa   :  { %10257 = sst [smem:[#allocation69_spill]] %s10203_s9 }
   0xb   :  { %10258 = sst [smem:[#allocation70_spill]] %s10204_s10 }
   0xc   :  { %10259 = sst [smem:[#allocation71_spill]] %s10205_s11 }
   0xd   :  { %10260 = sst [smem:[#allocation72_spill]] %s10212_s18 }
   0xe   :  { %10261 = sst [smem:[#allocation73_spill]] %s10214_s20 }
   0xf   :  { %10262 = sst [smem:[#allocation74_spill]] %s10216_s22 }
  0x10   :  { %10263 = sst [smem:[#allocation75_spill]] %s10218_s24 }
  0x11   :  { %10264 = sst [smem:[#allocation76_spill]] %s10220_s26 }
  0x12   :  { %10265 = sst [smem:[#allocation77_spill]] %s10221_s27 }
  0x13   :  { %32 = vsyncpa [#allocation3], 0 }
  0x14   :  { %33 = vsyncpa [#allocation6], 0 }
  0x15   :  { %34 = vsyncpa [#allocation9], 0 }
  0x16   :  { %35 = vsyncpa [#allocation12], 0 }
  0x17   :  { %36 = vsyncpa [#allocation15], 0 }
  0x18   :  { %37 = vsyncpa [#allocation18], 0 }
  0x19   :  { %38 = vsyncpa [#allocation21], 0 }
  0x1a   :  { %39 = vsyncpa [#allocation24], 0 }
  0x1b   :  { %40 = vsyncpa [#allocation27], 0 }
  0x1c   :  { %41 = vsyncpa [#allocation30], 0 }
  0x1d   :  { %42 = vsyncpa [#allocation33], 0 }
  0x1e   :  { %43 = vsyncpa [#allocation36], 0 }
  0x1f   :  { %44 = vsyncpa [#allocation39], 0 }
  0x20   :  { %45 = vsyncpa [#allocation42], 0 }
  0x21   :  { %46 = vsyncpa [#allocation4], 0  ;;  %s9077_s7 = smov [#allocation5]   ;;  %s10266_s9 = sld [smem:[#allocation61_spill]] }
  0x22   :  { %s64_s4 = sshll.u32 %s9077_s7, 4  ;;  %s65_s4 = int_to_ptr.vmem [resolvable:$true] %s64_s4 }
  0x27   :  { %s8431_s5 = scalar_lea.hbm %s10266_s9, 12288 }
  0x28   :  { %p8432_p0 = scmp.ne.s32.totalorder %s10266_s9, %s8431_s5  ;;  %p8435_p1 = scmp.lt.u32.totalorder %s8431_s5, %s10266_s9 }
  0x2a   :  { %p8437_p2 = pnand %p8435_p1, %p8432_p0 }
  0x2c   :  { %8440 = shalt.err (!%p8437_p2)
}
  0x2d   :  { %s8441_s1 = scalar_lea.vmem %s65_s4, 12288  ;;  %p8446_p4 = scmp.lt.s32.totalorder %s65_s4, %s65_s4 }
  0x2e   :  { %p8442_p3 = scmp.ne.s32.totalorder %s65_s4, %s8441_s1  ;;  %p8447_p5 = scmp.lt.s32.totalorder %s8441_s1, %s8441_s1 }
  0x30   :  { %p8448_p6 = por %p8447_p5, %p8446_p4 }
  0x32   :  { %p8449_p7 = pnand %p8448_p6, %p8442_p3 }
  0x34   :  { %8452 = shalt.err (!%p8449_p7)
}
  0x35   :  { %s10236_s6 = smov 128   ;;  %s10238_s11 = smov 8  }
  0x36   :  { %70 = dma.hbm_to_vmem [thread:$0]  %s10266_s9, 12288, %s65_s4, [#allocation6], %s10236_s6, %s10236_s6, %s10238_s11  }
  0x37   :  { %s9080_s7 = smov [#allocation8]   ;;  %s10267_s28 = sld [smem:[#allocation63_spill]] }
  0x38   :  { %s86_s8 = sshll.u32 %s9080_s7, 4  ;;  %s87_s8 = int_to_ptr.vmem [resolvable:$true] %s86_s8 }
  0x3d   :  { %s8453_s0 = scalar_lea.hbm %s10267_s28, 32 }
  0x3e   :  { %p8454_p8 = scmp.ne.s32.totalorder %s10267_s28, %s8453_s0  ;;  %p8457_p9 = scmp.lt.u32.totalorder %s8453_s0, %s10267_s28 }
  0x40   :  { %p8459_p10 = pnand %p8457_p9, %p8454_p8 }
  0x42   :  { %8462 = shalt.err (!%p8459_p10)
}
  0x43   :  { %s8463_s26 = scalar_lea.vmem %s87_s8, 32  ;;  %p8468_p12 = scmp.lt.s32.totalorder %s87_s8, %s87_s8 }
  0x44   :  { %p8464_p11 = scmp.ne.s32.totalorder %s87_s8, %s8463_s26  ;;  %p8469_p13 = scmp.lt.s32.totalorder %s8463_s26, %s8463_s26 }
  0x46   :  { %p8470_p0 = por %p8469_p13, %p8468_p12 }
  0x48   :  { %p8471_p1 = pnand %p8470_p0, %p8464_p11 }
  0x4a   :  { %8474 = shalt.err (!%p8471_p1)
}
  0x4b   :  { %s10240_s4 = smov 16   ;;  %s10242_s9 = smov 1  }
  0x4c   :  { %92 = dma.hbm_to_vmem [thread:$0]  %s10267_s28, 32, %s87_s8, [#allocation9], %s10240_s4, %s10240_s4, %s10242_s9  }
  0x4d   :  { %s9083_s27 = smov [#allocation11]   ;;  %s10268_s0 = sld [smem:[#allocation65_spill]] }
  0x4e   :  { %s110_s7 = sshll.u32 %s9083_s27, 4  ;;  %s111_s7 = int_to_ptr.vmem [resolvable:$true] %s110_s7 }
  0x53   :  { %s8475_s10 = scalar_lea.hbm %s10268_s0, 12288 }
  0x54   :  { %p8476_p2 = scmp.ne.s32.totalorder %s10268_s0, %s8475_s10  ;;  %p8479_p3 = scmp.lt.u32.totalorder %s8475_s10, %s10268_s0 }
  0x56   :  { %p8481_p4 = pnand %p8479_p3, %p8476_p2 }
  0x58   :  { %8484 = shalt.err (!%p8481_p4)
}
  0x59   :  { %s8485_s11 = scalar_lea.vmem %s111_s7, 12288  ;;  %p8490_p6 = scmp.lt.s32.totalorder %s111_s7, %s111_s7 }
  0x5a   :  { %p8486_p5 = scmp.ne.s32.totalorder %s111_s7, %s8485_s11  ;;  %p8491_p7 = scmp.lt.s32.totalorder %s8485_s11, %s8485_s11 }
  0x5c   :  { %p8492_p8 = por %p8491_p7, %p8490_p6 }
  0x5e   :  { %p8493_p9 = pnand %p8492_p8, %p8486_p5 }
  0x60   :  { %8496 = shalt.err (!%p8493_p9)
}
  0x61   :  { %s9084_s8 = smov 384   ;;  %s9085_s28 = smov 24  }
  0x62   :  { %116 = dma.hbm_to_vmem [thread:$0]  %s10268_s0, 12288, %s111_s7, [#allocation12], %s9084_s8, %s9084_s8, %s9085_s28  }
  0x63   :  { %s9086_s27 = smov [#allocation14]   ;;  %s9087_s6 = smov [#allocation17]  }
  0x64   :  { %s134_s30 = sshll.u32 %s9086_s27, 4  ;;  %s158_s5 = sshll.u32 %s9087_s6, 4  ;;  %s135_s30 = int_to_ptr.vmem [resolvable:$true] %s134_s30  ;;  %s159_s5 = int_to_ptr.vmem [resolvable:$true] %s158_s5 }
  0x65   :  { %s10269_s29 = sld [smem:[#allocation67_spill]] }
  0x6b   :  { %s8497_s1 = scalar_lea.hbm %s10269_s29, 4096 }
  0x6c   :  { %p8498_p10 = scmp.ne.s32.totalorder %s10269_s29, %s8497_s1  ;;  %p8501_p11 = scmp.lt.u32.totalorder %s8497_s1, %s10269_s29 }
  0x6e   :  { %p8503_p12 = pnand %p8501_p11, %p8498_p10 }
  0x70   :  { %8506 = shalt.err (!%p8503_p12)
}
  0x71   :  { %s8507_s7 = scalar_lea.vmem %s135_s30, 4096  ;;  %p8512_p0 = scmp.lt.s32.totalorder %s135_s30, %s135_s30 }
  0x72   :  { %p8508_p13 = scmp.ne.s32.totalorder %s135_s30, %s8507_s7  ;;  %p8513_p1 = scmp.lt.s32.totalorder %s8507_s7, %s8507_s7 }
  0x74   :  { %p8514_p2 = por %p8513_p1, %p8512_p0 }
  0x76   :  { %p8515_p3 = pnand %p8514_p2, %p8508_p13 }
  0x78   :  { %8518 = shalt.err (!%p8515_p3)
}
  0x79   :  { %s10270_s0 = smov 8   ;;  %s10271_s8 = smov 128  }
  0x7a   :  { %140 = dma.hbm_to_vmem [thread:$0]  %s10269_s29, 4096, %s135_s30, [#allocation15], %s10271_s8, %s10271_s8, %s10270_s0  }
  0x7b   :  { %s10272_s9 = sld [smem:[#allocation69_spill]] }
  0x81   :  { %s8519_s3 = scalar_lea.hbm %s10272_s9, 32 }
  0x82   :  { %p8520_p4 = scmp.ne.s32.totalorder %s10272_s9, %s8519_s3  ;;  %p8523_p5 = scmp.lt.u32.totalorder %s8519_s3, %s10272_s9 }
  0x84   :  { %p8525_p6 = pnand %p8523_p5, %p8520_p4 }
  0x86   :  { %8528 = shalt.err (!%p8525_p6)
}
  0x87   :  { %s8529_s1 = scalar_lea.vmem %s159_s5, 32  ;;  %p8534_p8 = scmp.lt.s32.totalorder %s159_s5, %s159_s5 }
  0x88   :  { %p8530_p7 = scmp.ne.s32.totalorder %s159_s5, %s8529_s1  ;;  %p8535_p9 = scmp.lt.s32.totalorder %s8529_s1, %s8529_s1 }
  0x8a   :  { %p8536_p10 = por %p8535_p9, %p8534_p8 }
  0x8c   :  { %p8537_p11 = pnand %p8536_p10, %p8530_p7 }
  0x8e   :  { %8540 = shalt.err (!%p8537_p11)
}
  0x8f   :  { %s10273_s30 = smov 1   ;;  %s10274_s29 = smov 16  }
  0x90   :  { %164 = dma.hbm_to_vmem [thread:$0]  %s10272_s9, 32, %s159_s5, [#allocation18], %s10274_s29, %s10274_s29, %s10273_s30  }
  0x91   :  { %s9088_s28 = smov [#allocation20]   ;;  %s10275_s3 = sld [smem:[#allocation71_spill]] }
  0x92   :  { %s182_s2 = sshll.u32 %s9088_s28, 4  ;;  %s183_s2 = int_to_ptr.vmem [resolvable:$true] %s182_s2 }
  0x97   :  { %s8541_s27 = scalar_lea.hbm %s10275_s3, 16384 }
  0x98   :  { %p8542_p12 = scmp.ne.s32.totalorder %s10275_s3, %s8541_s27  ;;  %p8545_p13 = scmp.lt.u32.totalorder %s8541_s27, %s10275_s3 }
  0x9a   :  { %p8547_p0 = pnand %p8545_p13, %p8542_p12 }
  0x9c   :  { %8550 = shalt.err (!%p8547_p0)
}
  0x9d   :  { %s8551_s22 = scalar_lea.vmem %s183_s2, 16384  ;;  %p8556_p2 = scmp.lt.s32.totalorder %s183_s2, %s183_s2 }
  0x9e   :  { %p8552_p1 = scmp.ne.s32.totalorder %s183_s2, %s8551_s22  ;;  %p8557_p3 = scmp.lt.s32.totalorder %s8551_s22, %s8551_s22 }
  0xa0   :  { %p8558_p4 = por %p8557_p3, %p8556_p2 }
  0xa2   :  { %p8559_p5 = pnand %p8558_p4, %p8552_p1 }
  0xa4   :  { %8562 = shalt.err (!%p8559_p5)
}
  0xa5   :  { %s9089_s5 = smov 512   ;;  %s9090_s9 = smov 32  }
  0xa6   :  { %188 = dma.hbm_to_vmem [thread:$0]  %s10275_s3, 16384, %s183_s2, [#allocation21], %s9089_s5, %s9089_s5, %s9090_s9  }
  0xa7   :  { %s9091_s28 = smov [#allocation23]   ;;  %s9092_s24 = smov [#allocation26]  }
  0xa8   :  { %s206_s4 = sshll.u32 %s9091_s28, 4  ;;  %s231_s27 = sshll.u32 %s9092_s24, 4  ;;  %s207_s4 = int_to_ptr.vmem [resolvable:$true] %s206_s4  ;;  %s232_s27 = int_to_ptr.vmem [resolvable:$true] %s231_s27 }
  0xa9   :  { %s8563_s10 = scalar_lea.hbm %s10207_s13, 16384 }
  0xaa   :  { %p8564_p6 = scmp.ne.s32.totalorder %s10207_s13, %s8563_s10  ;;  %p8567_p7 = scmp.lt.u32.totalorder %s8563_s10, %s10207_s13 }
  0xac   :  { %p8569_p8 = pnand %p8567_p7, %p8564_p6 }
  0xae   :  { %8572 = shalt.err (!%p8569_p8)
}
  0xaf   :  { %s8573_s2 = scalar_lea.vmem %s207_s4, 16384  ;;  %p8578_p10 = scmp.lt.s32.totalorder %s207_s4, %s207_s4 }
  0xb0   :  { %p8574_p9 = scmp.ne.s32.totalorder %s207_s4, %s8573_s2  ;;  %p8579_p11 = scmp.lt.s32.totalorder %s8573_s2, %s8573_s2 }
  0xb2   :  { %p8580_p12 = por %p8579_p11, %p8578_p10 }
  0xb4   :  { %p8581_p13 = pnand %p8580_p12, %p8574_p9 }
  0xb6   :  { %8584 = shalt.err (!%p8581_p13)
}
  0xb7   :  { %212 = dma.hbm_to_vmem [thread:$0]  %s10207_s13, 16384, %s207_s4, [#allocation24], %s10271_s8, %s10271_s8, %s10270_s0  }
  0xb8   :  { %s8585_s18 = scalar_lea.hbm %s10209_s15, 16 }
  0xb9   :  { %p8586_p0 = scmp.ne.s32.totalorder %s10209_s15, %s8585_s18  ;;  %p8589_p1 = scmp.lt.u32.totalorder %s8585_s18, %s10209_s15 }
  0xbb   :  { %p8591_p2 = pnand %p8589_p1, %p8586_p0 }
  0xbd   :  { %8594 = shalt.err (!%p8591_p2)
}
  0xbe   :  { %s8595_s10 = scalar_lea.vmem %s232_s27, 16  ;;  %s8599_s26 = scalar_lea.vmem %s232_s27, 32 }
  0xbf   :  { %p8596_p3 = scmp.ne.s32.totalorder %s232_s27, %s8595_s10  ;;  %p8600_p4 = scmp.lt.s32.totalorder %s232_s27, %s232_s27 }
  0xc0   :  { %p8601_p5 = scmp.lt.s32.totalorder %s8599_s26, %s8595_s10 }
  0xc2   :  { %p8602_p6 = por %p8601_p5, %p8600_p4 }
  0xc4   :  { %p8603_p7 = pnand %p8602_p6, %p8596_p3 }
  0xc6   :  { %8606 = shalt.err (!%p8603_p7)
}
  0xc7   :  { %234 = dma.hbm_to_vmem [thread:$0]  %s10209_s15, 16, %s232_s27, [#allocation27]  }
  0xc8   :  { %s9093_s1 = smov [#allocation29]   ;;  %s9094_s3 = smov [#allocation32]  }
  0xc9   :  { %s250_s2 = sshll.u32 %s9093_s1, 4  ;;  %s273_s11 = sshll.u32 %s9094_s3, 4  ;;  %s251_s2 = int_to_ptr.vmem [resolvable:$true] %s250_s2  ;;  %s274_s11 = int_to_ptr.vmem [resolvable:$true] %s273_s11 }
  0xca   :  { %s8607_s18 = scalar_lea.hbm %s10211_s17, 8192 }
  0xcb   :  { %p8608_p8 = scmp.ne.s32.totalorder %s10211_s17, %s8607_s18  ;;  %p8611_p9 = scmp.lt.u32.totalorder %s8607_s18, %s10211_s17 }
  0xcd   :  { %p8613_p10 = pnand %p8611_p9, %p8608_p8 }
  0xcf   :  { %8616 = shalt.err (!%p8613_p10)
}
  0xd0   :  { %s8617_s15 = scalar_lea.vmem %s251_s2, 8192  ;;  %p8622_p12 = scmp.lt.s32.totalorder %s251_s2, %s251_s2 }
  0xd1   :  { %p8618_p11 = scmp.ne.s32.totalorder %s251_s2, %s8617_s15  ;;  %p8623_p13 = scmp.lt.s32.totalorder %s8617_s15, %s8617_s15 }
  0xd3   :  { %p8624_p0 = por %p8623_p13, %p8622_p12 }
  0xd5   :  { %p8625_p1 = pnand %p8624_p0, %p8618_p11 }
  0xd7   :  { %8628 = shalt.err (!%p8625_p1)
}
  0xd8   :  { %256 = dma.hbm_to_vmem [thread:$0]  %s10211_s17, 8192, %s251_s2, [#allocation30], %s9089_s5, %s9089_s5, %s9090_s9  }
  0xd9   :  { %s8629_s4 = scalar_lea.hbm %s10213_s19, 64 }
  0xda   :  { %p8630_p2 = scmp.ne.s32.totalorder %s10213_s19, %s8629_s4  ;;  %p8633_p3 = scmp.lt.u32.totalorder %s8629_s4, %s10213_s19 }
  0xdc   :  { %p8635_p4 = pnand %p8633_p3, %p8630_p2 }
  0xde   :  { %8638 = shalt.err (!%p8635_p4)
}
  0xdf   :  { %s8639_s18 = scalar_lea.vmem %s274_s11, 64  ;;  %p8644_p6 = scmp.lt.s32.totalorder %s274_s11, %s274_s11 }
  0xe0   :  { %p8640_p5 = scmp.ne.s32.totalorder %s274_s11, %s8639_s18  ;;  %p8645_p7 = scmp.lt.s32.totalorder %s8639_s18, %s8639_s18 }
  0xe2   :  { %p8646_p8 = por %p8645_p7, %p8644_p6 }
  0xe4   :  { %p8647_p9 = pnand %p8646_p8, %p8640_p5 }
  0xe6   :  { %8650 = shalt.err (!%p8647_p9)
}
  0xe7   :  { %276 = dma.hbm_to_vmem [thread:$0]  %s10213_s19, 64, %s274_s11, [#allocation33]  }
  0xe8   :  { %s9095_s2 = smov [#allocation35]   ;;  %s9096_s24 = smov [#allocation38]  }
  0xe9   :  { %s292_s20 = sshll.u32 %s9095_s2, 4  ;;  %s315_s6 = sshll.u32 %s9096_s24, 4  ;;  %s293_s20 = int_to_ptr.vmem [resolvable:$true] %s292_s20  ;;  %s316_s6 = int_to_ptr.vmem [resolvable:$true] %s315_s6 }
  0xea   :  { %s8651_s27 = scalar_lea.hbm %s10215_s21, 16384 }
  0xeb   :  { %p8652_p10 = scmp.ne.s32.totalorder %s10215_s21, %s8651_s27  ;;  %p8655_p11 = scmp.lt.u32.totalorder %s8651_s27, %s10215_s21 }
  0xed   :  { %p8657_p12 = pnand %p8655_p11, %p8652_p10 }
  0xef   :  { %8660 = shalt.err (!%p8657_p12)
}
  0xf0   :  { %s8661_s19 = scalar_lea.vmem %s293_s20, 16384  ;;  %p8666_p0 = scmp.lt.s32.totalorder %s293_s20, %s293_s20 }
  0xf1   :  { %p8662_p13 = scmp.ne.s32.totalorder %s293_s20, %s8661_s19  ;;  %p8667_p1 = scmp.lt.s32.totalorder %s8661_s19, %s8661_s19 }
  0xf3   :  { %p8668_p2 = por %p8667_p1, %p8666_p0 }
  0xf5   :  { %p8669_p3 = pnand %p8668_p2, %p8662_p13 }
  0xf7   :  { %8672 = shalt.err (!%p8669_p3)
}
  0xf8   :  { %s9097_s11 = smov 256   ;;  %s8673_s18 = scalar_lea.hbm %s10217_s23, 32 }
  0xf9   :  { %298 = dma.hbm_to_vmem [thread:$0]  %s10215_s21, 16384, %s293_s20, [#allocation36], %s9097_s11, %s9097_s11, %s10274_s29  }
  0xfa   :  { %p8674_p4 = scmp.ne.s32.totalorder %s10217_s23, %s8673_s18  ;;  %p8677_p5 = scmp.lt.u32.totalorder %s8673_s18, %s10217_s23 }
  0xfc   :  { %p8679_p6 = pnand %p8677_p5, %p8674_p4 }
  0xfe   :  { %8682 = shalt.err (!%p8679_p6)
}
  0xff   :  { %s8683_s22 = scalar_lea.vmem %s316_s6, 32  ;;  %p8688_p8 = scmp.lt.s32.totalorder %s316_s6, %s316_s6 }
 0x100   :  { %p8684_p7 = scmp.ne.s32.totalorder %s316_s6, %s8683_s22  ;;  %p8689_p9 = scmp.lt.s32.totalorder %s8683_s22, %s8683_s22 }
 0x102   :  { %p8690_p10 = por %p8689_p9, %p8688_p8 }
 0x104   :  { %p8691_p11 = pnand %p8690_p10, %p8684_p7 }
 0x106   :  { %8694 = shalt.err (!%p8691_p11)
}
 0x107   :  { %318 = dma.hbm_to_vmem [thread:$0]  %s10217_s23, 32, %s316_s6, [#allocation39]  }
 0x108   :  { %s9098_s15 = smov [#allocation41]   ;;  %s9099_s10 = smov [#allocation2]  }
 0x109   :  { %s334_s27 = sshll.u32 %s9098_s15, 4  ;;  %s52_s26 = sshll.u32 %s9099_s10, 4  ;;  %s335_s27 = int_to_ptr.vmem [resolvable:$true] %s334_s27  ;;  %s53_s26 = int_to_ptr.vmem [resolvable:$true] %s52_s26 }
 0x10a   :  { %s8695_s19 = scalar_lea.hbm %s10219_s25, 4096 }
 0x10b   :  { %p8696_p12 = scmp.ne.s32.totalorder %s10219_s25, %s8695_s19  ;;  %p8699_p13 = scmp.lt.u32.totalorder %s8695_s19, %s10219_s25 }
 0x10d   :  { %p8701_p0 = pnand %p8699_p13, %p8696_p12 }
 0x10f   :  { %8704 = shalt.err (!%p8701_p0)
}
 0x110   :  { %s8705_s23 = scalar_lea.vmem %s335_s27, 4096  ;;  %p8710_p2 = scmp.lt.s32.totalorder %s335_s27, %s335_s27 }
 0x111   :  { %p8706_p1 = scmp.ne.s32.totalorder %s335_s27, %s8705_s23  ;;  %p8711_p3 = scmp.lt.s32.totalorder %s8705_s23, %s8705_s23 }
 0x113   :  { %p8712_p4 = por %p8711_p3, %p8710_p2 }
 0x115   :  { %p8713_p5 = pnand %p8712_p4, %p8706_p1 }
 0x117   :  { %8716 = shalt.err (!%p8713_p5)
}
 0x118   :  { %340 = dma.hbm_to_vmem [thread:$0]  %s10219_s25, 4096, %s335_s27, [#allocation42], %s10271_s8, %s10271_s8, %s10270_s0  }
 0x119   :  { %s10276_s5 = sld [smem:[#allocation60_spill]] }
 0x11f   :  { %s8717_s2 = scalar_lea.hbm %s10276_s5, 1536 }
 0x120   :  { %p8718_p6 = scmp.ne.s32.totalorder %s10276_s5, %s8717_s2  ;;  %p8721_p7 = scmp.lt.u32.totalorder %s8717_s2, %s10276_s5 }
 0x122   :  { %p8723_p8 = pnand %p8721_p7, %p8718_p6 }
 0x124   :  { %8726 = shalt.err (!%p8723_p8)
}
 0x125   :  { %s8727_s15 = scalar_lea.vmem %s53_s26, 1536  ;;  %p8732_p10 = scmp.lt.s32.totalorder %s53_s26, %s53_s26 }
 0x126   :  { %p8728_p9 = scmp.ne.s32.totalorder %s53_s26, %s8727_s15  ;;  %p8733_p11 = scmp.lt.s32.totalorder %s8727_s15, %s8727_s15 }
 0x128   :  { %p8734_p12 = por %p8733_p11, %p8732_p10 }
 0x12a   :  { %p8735_p13 = pnand %p8734_p12, %p8728_p9 }
 0x12c   :  { %8738 = shalt.err (!%p8735_p13)
}
 0x12d   :  { %s9100_s25 = smov 768   ;;  %s9101_s0 = smov 48  }
 0x12e   :  { %58 = dma.hbm_to_vmem [thread:$0]  %s10276_s5, 1536, %s53_s26, [#allocation3], %s9100_s25, %s9100_s25, %s9101_s0  }
 0x12f   :  { %s9102_s10 = smov [#allocation7]   ;;  %s9103_s4 = smov [#allocation10]  }
 0x130   :  { %s77_s13 = sshll.u32 %s9102_s10, 4  ;;  %s98_s19 = sshll.u32 %s9103_s4, 4  ;;  %s78_s13 = int_to_ptr.vmem [resolvable:$true] %s77_s13  ;;  %s99_s19 = int_to_ptr.vmem [resolvable:$true] %s98_s19 }
 0x131   :  { %s10277_s3 = sld [smem:[#allocation62_spill]] }
 0x137   :  { %s8739_s7 = scalar_lea.hbm %s10277_s3, 128 }
 0x138   :  { %p8740_p0 = scmp.ne.s32.totalorder %s10277_s3, %s8739_s7  ;;  %p8743_p1 = scmp.lt.u32.totalorder %s8739_s7, %s10277_s3 }
 0x13a   :  { %p8745_p2 = pnand %p8743_p1, %p8740_p0 }
 0x13c   :  { %8748 = shalt.err (!%p8745_p2)
}
 0x13d   :  { %s8749_s26 = scalar_lea.vmem %s78_s13, 128  ;;  %p8754_p4 = scmp.lt.s32.totalorder %s78_s13, %s78_s13 }
 0x13e   :  { %p8750_p3 = scmp.ne.s32.totalorder %s78_s13, %s8749_s26  ;;  %p8755_p5 = scmp.lt.s32.totalorder %s8749_s26, %s8749_s26 }
 0x140   :  { %p8756_p6 = por %p8755_p5, %p8754_p4 }
 0x142   :  { %p8757_p7 = pnand %p8756_p6, %p8750_p3 }
 0x144   :  { %8760 = shalt.err (!%p8757_p7)
}
 0x145   :  { %80 = dma.hbm_to_vmem [thread:$0]  %s10277_s3, 128, %s78_s13, [#allocation6]  }
 0x146   :  { %s10278_s22 = sld [smem:[#allocation64_spill]] }
 0x14c   :  { %s8761_s21 = scalar_lea.hbm %s10278_s22, 32 }
 0x14d   :  { %p8762_p8 = scmp.ne.s32.totalorder %s10278_s22, %s8761_s21  ;;  %p8765_p9 = scmp.lt.u32.totalorder %s8761_s21, %s10278_s22 }
 0x14f   :  { %p8767_p10 = pnand %p8765_p9, %p8762_p8 }
 0x151   :  { %8770 = shalt.err (!%p8767_p10)
}
 0x152   :  { %s8771_s27 = scalar_lea.vmem %s99_s19, 32  ;;  %p8776_p12 = scmp.lt.s32.totalorder %s99_s19, %s99_s19 }
 0x153   :  { %p8772_p11 = scmp.ne.s32.totalorder %s99_s19, %s8771_s27  ;;  %p8777_p13 = scmp.lt.s32.totalorder %s8771_s27, %s8771_s27 }
 0x155   :  { %p8778_p0 = por %p8777_p13, %p8776_p12 }
 0x157   :  { %p8779_p1 = pnand %p8778_p0, %p8772_p11 }
 0x159   :  { %8782 = shalt.err (!%p8779_p1)
}
 0x15a   :  { %104 = dma.hbm_to_vmem [thread:$0]  %s10278_s22, 32, %s99_s19, [#allocation9], %s10274_s29, %s10274_s29, %s10273_s30  }
 0x15b   :  { %s9104_s4 = smov [#allocation13]   ;;  %s10279_s7 = sld [smem:[#allocation66_spill]] }
 0x15c   :  { %s122_s11 = sshll.u32 %s9104_s4, 4  ;;  %s123_s11 = int_to_ptr.vmem [resolvable:$true] %s122_s11 }
 0x161   :  { %s8783_s23 = scalar_lea.hbm %s10279_s7, 96 }
 0x162   :  { %p8784_p2 = scmp.ne.s32.totalorder %s10279_s7, %s8783_s23  ;;  %p8787_p3 = scmp.lt.u32.totalorder %s8783_s23, %s10279_s7 }
 0x164   :  { %p8789_p4 = pnand %p8787_p3, %p8784_p2 }
 0x166   :  { %8792 = shalt.err (!%p8789_p4)
}
 0x167   :  { %s8793_s17 = scalar_lea.vmem %s123_s11, 96  ;;  %p8798_p6 = scmp.lt.s32.totalorder %s123_s11, %s123_s11 }
 0x168   :  { %p8794_p5 = scmp.ne.s32.totalorder %s123_s11, %s8793_s17  ;;  %p8799_p7 = scmp.lt.s32.totalorder %s8793_s17, %s8793_s17 }
 0x16a   :  { %p8800_p8 = por %p8799_p7, %p8798_p6 }
 0x16c   :  { %p8801_p9 = pnand %p8800_p8, %p8794_p5 }
 0x16e   :  { %8804 = shalt.err (!%p8801_p9)
}
 0x16f   :  { %s9105_s19 = smov 3   ;;  %s9106_s24 = smov [#allocation16]  }
 0x170   :  { %128 = dma.hbm_to_vmem [thread:$0]  %s10279_s7, 96, %s123_s11, [#allocation12], %s9101_s0, %s9101_s0, %s9105_s19  }
 0x171   :  { %s146_s22 = sshll.u32 %s9106_s24, 4  ;;  %s9107_s21 = smov [#allocation19]   ;;  %s147_s22 = int_to_ptr.vmem [resolvable:$true] %s146_s22 }
 0x172   :  { %s170_s20 = sshll.u32 %s9107_s21, 4  ;;  %s10280_s8 = sld [smem:[#allocation68_spill]]  ;;  %s171_s20 = int_to_ptr.vmem [resolvable:$true] %s170_s20 }
 0x178   :  { %s8805_s27 = scalar_lea.hbm %s10280_s8, 32 }
 0x179   :  { %p8806_p10 = scmp.ne.s32.totalorder %s10280_s8, %s8805_s27  ;;  %p8809_p11 = scmp.lt.u32.totalorder %s8805_s27, %s10280_s8 }
 0x17b   :  { %p8811_p12 = pnand %p8809_p11, %p8806_p10 }
 0x17d   :  { %8814 = shalt.err (!%p8811_p12)
}
 0x17e   :  { %s8815_s0 = scalar_lea.vmem %s147_s22, 32  ;;  %p8820_p0 = scmp.lt.s32.totalorder %s147_s22, %s147_s22 }
 0x17f   :  { %p8816_p13 = scmp.ne.s32.totalorder %s147_s22, %s8815_s0  ;;  %p8821_p1 = scmp.lt.s32.totalorder %s8815_s0, %s8815_s0 }
 0x181   :  { %p8822_p2 = por %p8821_p1, %p8820_p0 }
 0x183   :  { %p8823_p3 = pnand %p8822_p2, %p8816_p13 }
 0x185   :  { %8826 = shalt.err (!%p8823_p3)
}
 0x186   :  { %152 = dma.hbm_to_vmem [thread:$0]  %s10280_s8, 32, %s147_s22, [#allocation15], %s10274_s29, %s10274_s29, %s10273_s30  }
 0x187   :  { %s10281_s6 = sld [smem:[#allocation70_spill]] }
 0x18d   :  { %s8827_s28 = scalar_lea.hbm %s10281_s6, 32 }
 0x18e   :  { %p8828_p4 = scmp.ne.s32.totalorder %s10281_s6, %s8827_s28  ;;  %p8831_p5 = scmp.lt.u32.totalorder %s8827_s28, %s10281_s6 }
 0x190   :  { %p8833_p6 = pnand %p8831_p5, %p8828_p4 }
 0x192   :  { %8836 = shalt.err (!%p8833_p6)
}
 0x193   :  { %s8837_s5 = scalar_lea.vmem %s171_s20, 32  ;;  %p8842_p8 = scmp.lt.s32.totalorder %s171_s20, %s171_s20 }
 0x194   :  { %p8838_p7 = scmp.ne.s32.totalorder %s171_s20, %s8837_s5  ;;  %p8843_p9 = scmp.lt.s32.totalorder %s8837_s5, %s8837_s5 }
 0x196   :  { %p8844_p10 = por %p8843_p9, %p8842_p8 }
 0x198   :  { %p8845_p11 = pnand %p8844_p10, %p8838_p7 }
 0x19a   :  { %8848 = shalt.err (!%p8845_p11)
}
 0x19b   :  { %176 = dma.hbm_to_vmem [thread:$0]  %s10281_s6, 32, %s171_s20, [#allocation18], %s10274_s29, %s10274_s29, %s10273_s30  }
 0x19c   :  { %s9108_s22 = smov [#allocation22]   ;;  %s8849_s8 = scalar_lea.hbm %s10206_s12, 128 }
 0x19d   :  { %s194_s21 = sshll.u32 %s9108_s22, 4  ;;  %p8850_p12 = scmp.ne.s32.totalorder %s10206_s12, %s8849_s8  ;;  %s195_s21 = int_to_ptr.vmem [resolvable:$true] %s194_s21 }
 0x19e   :  { %p8853_p13 = scmp.lt.u32.totalorder %s8849_s8, %s10206_s12 }
 0x1a0   :  { %p8855_p0 = pnand %p8853_p13, %p8850_p12 }
 0x1a2   :  { %8858 = shalt.err (!%p8855_p0)
}
 0x1a3   :  { %s8859_s1 = scalar_lea.vmem %s195_s21, 128  ;;  %p8864_p2 = scmp.lt.s32.totalorder %s195_s21, %s195_s21 }
 0x1a4   :  { %p8860_p1 = scmp.ne.s32.totalorder %s195_s21, %s8859_s1  ;;  %p8865_p3 = scmp.lt.s32.totalorder %s8859_s1, %s8859_s1 }
 0x1a6   :  { %p8866_p4 = por %p8865_p3, %p8864_p2 }
 0x1a8   :  { %p8867_p5 = pnand %p8866_p4, %p8860_p1 }
 0x1aa   :  { %8870 = shalt.err (!%p8867_p5)
}
 0x1ab   :  { %s9109_s20 = smov 64   ;;  %s9110_s0 = smov 4  }
 0x1ac   :  { %200 = dma.hbm_to_vmem [thread:$0]  %s10206_s12, 128, %s195_s21, [#allocation21], %s9109_s20, %s9109_s20, %s9110_s0  }
 0x1ad   :  { %s9111_s7 = smov [#allocation25]   ;;  %s9112_s6 = smov [#allocation28]  }
 0x1ae   :  { %s218_s23 = sshll.u32 %s9111_s7, 4  ;;  %s241_s28 = sshll.u32 %s9112_s6, 4  ;;  %s219_s23 = int_to_ptr.vmem [resolvable:$true] %s218_s23  ;;  %s242_s28 = int_to_ptr.vmem [resolvable:$true] %s241_s28 }
 0x1af   :  { %s8871_s17 = scalar_lea.hbm %s10208_s14, 32 }
 0x1b0   :  { %p8872_p6 = scmp.ne.s32.totalorder %s10208_s14, %s8871_s17  ;;  %p8875_p7 = scmp.lt.u32.totalorder %s8871_s17, %s10208_s14 }
 0x1b2   :  { %p8877_p8 = pnand %p8875_p7, %p8872_p6 }
 0x1b4   :  { %8880 = shalt.err (!%p8877_p8)
}
 0x1b5   :  { %s8881_s12 = scalar_lea.vmem %s219_s23, 32  ;;  %p8886_p10 = scmp.lt.s32.totalorder %s219_s23, %s219_s23 }
 0x1b6   :  { %p8882_p9 = scmp.ne.s32.totalorder %s219_s23, %s8881_s12  ;;  %p8887_p11 = scmp.lt.s32.totalorder %s8881_s12, %s8881_s12 }
 0x1b8   :  { %p8888_p12 = por %p8887_p11, %p8886_p10 }
 0x1ba   :  { %p8889_p13 = pnand %p8888_p12, %p8882_p9 }
 0x1bc   :  { %8892 = shalt.err (!%p8889_p13)
}
 0x1bd   :  { %224 = dma.hbm_to_vmem [thread:$0]  %s10208_s14, 32, %s219_s23, [#allocation24], %s10274_s29, %s10274_s29, %s10273_s30  }
 0x1be   :  { %s8893_s8 = scalar_lea.hbm %s10210_s16, 16 }
 0x1bf   :  { %p8894_p0 = scmp.ne.s32.totalorder %s10210_s16, %s8893_s8  ;;  %p8897_p1 = scmp.lt.u32.totalorder %s8893_s8, %s10210_s16 }
 0x1c1   :  { %p8899_p2 = pnand %p8897_p1, %p8894_p0 }
 0x1c3   :  { %8902 = shalt.err (!%p8899_p2)
}
 0x1c4   :  { %s8903_s1 = scalar_lea.vmem %s242_s28, 16  ;;  %s8907_s0 = scalar_lea.vmem %s242_s28, 32 }
 0x1c5   :  { %p8904_p3 = scmp.ne.s32.totalorder %s242_s28, %s8903_s1  ;;  %p8908_p4 = scmp.lt.s32.totalorder %s242_s28, %s242_s28 }
 0x1c6   :  { %p8909_p5 = scmp.lt.s32.totalorder %s8907_s0, %s8903_s1 }
 0x1c8   :  { %p8910_p6 = por %p8909_p5, %p8908_p4 }
 0x1ca   :  { %p8911_p7 = pnand %p8910_p6, %p8904_p3 }
 0x1cc   :  { %8914 = shalt.err (!%p8911_p7)
}
 0x1cd   :  { %244 = dma.hbm_to_vmem [thread:$0]  %s10210_s16, 16, %s242_s28, [#allocation27]  }
 0x1ce   :  { %s9113_s29 = smov [#allocation31]   ;;  %s9114_s3 = smov [#allocation34]  }
 0x1cf   :  { %s263_s11 = sshll.u32 %s9113_s29, 4  ;;  %s283_s7 = sshll.u32 %s9114_s3, 4  ;;  %s264_s11 = int_to_ptr.vmem [resolvable:$true] %s263_s11  ;;  %s284_s7 = int_to_ptr.vmem [resolvable:$true] %s283_s7 }
 0x1d0   :  { %s10282_s18 = sld [smem:[#allocation72_spill]] }
 0x1d6   :  { %s8915_s26 = scalar_lea.hbm %s10282_s18, 64 }
 0x1d7   :  { %p8916_p8 = scmp.ne.s32.totalorder %s10282_s18, %s8915_s26  ;;  %p8919_p9 = scmp.lt.u32.totalorder %s8915_s26, %s10282_s18 }
 0x1d9   :  { %p8921_p10 = pnand %p8919_p9, %p8916_p8 }
 0x1db   :  { %8924 = shalt.err (!%p8921_p10)
}
 0x1dc   :  { %s8925_s16 = scalar_lea.vmem %s264_s11, 64  ;;  %p8930_p12 = scmp.lt.s32.totalorder %s264_s11, %s264_s11 }
 0x1dd   :  { %p8926_p11 = scmp.ne.s32.totalorder %s264_s11, %s8925_s16  ;;  %p8931_p13 = scmp.lt.s32.totalorder %s8925_s16, %s8925_s16 }
 0x1df   :  { %p8932_p0 = por %p8931_p13, %p8930_p12 }
 0x1e1   :  { %p8933_p1 = pnand %p8932_p0, %p8926_p11 }
 0x1e3   :  { %8936 = shalt.err (!%p8933_p1)
}
 0x1e4   :  { %266 = dma.hbm_to_vmem [thread:$0]  %s10282_s18, 64, %s264_s11, [#allocation30]  }
 0x1e5   :  { %s10283_s21 = sld [smem:[#allocation73_spill]] }
 0x1eb   :  { %s8937_s15 = scalar_lea.hbm %s10283_s21, 64 }
 0x1ec   :  { %p8938_p2 = scmp.ne.s32.totalorder %s10283_s21, %s8937_s15  ;;  %p8941_p3 = scmp.lt.u32.totalorder %s8937_s15, %s10283_s21 }
 0x1ee   :  { %p8943_p4 = pnand %p8941_p3, %p8938_p2 }
 0x1f0   :  { %8946 = shalt.err (!%p8943_p4)
}
 0x1f1   :  { %s8947_s13 = scalar_lea.vmem %s284_s7, 64  ;;  %p8952_p6 = scmp.lt.s32.totalorder %s284_s7, %s284_s7 }
 0x1f2   :  { %p8948_p5 = scmp.ne.s32.totalorder %s284_s7, %s8947_s13  ;;  %p8953_p7 = scmp.lt.s32.totalorder %s8947_s13, %s8947_s13 }
 0x1f4   :  { %p8954_p8 = por %p8953_p7, %p8952_p6 }
 0x1f6   :  { %p8955_p9 = pnand %p8954_p8, %p8948_p5 }
 0x1f8   :  { %8958 = shalt.err (!%p8955_p9)
}
 0x1f9   :  { %286 = dma.hbm_to_vmem [thread:$0]  %s10283_s21, 64, %s284_s7, [#allocation33]  }
 0x1fa   :  { %s9115_s0 = smov [#allocation37]   ;;  %s9116_s30 = smov [#allocation40]  }
 0x1fb   :  { %s305_s14 = sshll.u32 %s9115_s0, 4  ;;  %s325_s29 = sshll.u32 %s9116_s30, 4  ;;  %s306_s14 = int_to_ptr.vmem [resolvable:$true] %s305_s14  ;;  %s326_s29 = int_to_ptr.vmem [resolvable:$true] %s325_s29 }
 0x1fc   :  { %s10284_s23 = sld [smem:[#allocation74_spill]] }
 0x202   :  { %s8959_s6 = scalar_lea.hbm %s10284_s23, 32 }
 0x203   :  { %p8960_p10 = scmp.ne.s32.totalorder %s10284_s23, %s8959_s6  ;;  %p8963_p11 = scmp.lt.u32.totalorder %s8959_s6, %s10284_s23 }
 0x205   :  { %p8965_p12 = pnand %p8963_p11, %p8960_p10 }
 0x207   :  { %8968 = shalt.err (!%p8965_p12)
}
 0x208   :  { %s8969_s7 = scalar_lea.vmem %s306_s14, 32  ;;  %p8974_p0 = scmp.lt.s32.totalorder %s306_s14, %s306_s14 }
 0x209   :  { %p8970_p13 = scmp.ne.s32.totalorder %s306_s14, %s8969_s7  ;;  %p8975_p1 = scmp.lt.s32.totalorder %s8969_s7, %s8969_s7 }
 0x20b   :  { %p8976_p2 = por %p8975_p1, %p8974_p0 }
 0x20d   :  { %p8977_p3 = pnand %p8976_p2, %p8970_p13 }
 0x20f   :  { %8980 = shalt.err (!%p8977_p3)
}
 0x210   :  { %308 = dma.hbm_to_vmem [thread:$0]  %s10284_s23, 32, %s306_s14, [#allocation36]  }
 0x211   :  { %s10285_s24 = sld [smem:[#allocation75_spill]] }
 0x217   :  { %s8981_s12 = scalar_lea.hbm %s10285_s24, 32 }
 0x218   :  { %p8982_p4 = scmp.ne.s32.totalorder %s10285_s24, %s8981_s12  ;;  %p8985_p5 = scmp.lt.u32.totalorder %s8981_s12, %s10285_s24 }
 0x21a   :  { %p8987_p6 = pnand %p8985_p5, %p8982_p4 }
 0x21c   :  { %8990 = shalt.err (!%p8987_p6)
}
 0x21d   :  { %s8991_s8 = scalar_lea.vmem %s326_s29, 32  ;;  %p8996_p8 = scmp.lt.s32.totalorder %s326_s29, %s326_s29 }
 0x21e   :  { %p8992_p7 = scmp.ne.s32.totalorder %s326_s29, %s8991_s8  ;;  %p8997_p9 = scmp.lt.s32.totalorder %s8991_s8, %s8991_s8 }
 0x220   :  { %p8998_p10 = por %p8997_p9, %p8996_p8 }
 0x222   :  { %p8999_p11 = pnand %p8998_p10, %p8992_p7 }
 0x224   :  { %9002 = shalt.err (!%p8999_p11)
}
 0x225   :  { %328 = dma.hbm_to_vmem [thread:$0]  %s10285_s24, 32, %s326_s29, [#allocation39]  }
 0x226   :  { %s9117_s13 = smov [#allocation43]   ;;  %s10286_s14 = sld [smem:[#allocation76_spill]] }
 0x227   :  { %s347_s4 = sshll.u32 %s9117_s13, 4  ;;  %s348_s4 = int_to_ptr.vmem [resolvable:$true] %s347_s4 }
 0x22c   :  { %s9003_s30 = scalar_lea.hbm %s10286_s14, 16 }
 0x22d   :  { %p9004_p12 = scmp.ne.s32.totalorder %s10286_s14, %s9003_s30  ;;  %p9007_p13 = scmp.lt.u32.totalorder %s9003_s30, %s10286_s14 }
 0x22f   :  { %p9009_p0 = pnand %p9007_p13, %p9004_p12 }
 0x231   :  { %9012 = shalt.err (!%p9009_p0)
}
 0x232   :  { %s9013_s18 = scalar_lea.vmem %s348_s4, 16  ;;  %s9017_s29 = scalar_lea.vmem %s348_s4, 32 }
 0x233   :  { %p9014_p1 = scmp.ne.s32.totalorder %s348_s4, %s9013_s18  ;;  %p9018_p2 = scmp.lt.s32.totalorder %s348_s4, %s348_s4 }
 0x234   :  { %p9019_p3 = scmp.lt.s32.totalorder %s9017_s29, %s9013_s18 }
 0x236   :  { %p9020_p4 = por %p9019_p3, %p9018_p2 }
 0x238   :  { %p9021_p5 = pnand %p9020_p4, %p9014_p1 }
 0x23a   :  { %9024 = shalt.err (!%p9021_p5)
}
 0x23b   :  { %350 = dma.hbm_to_vmem [thread:$0]  %s10286_s14, 16, %s348_s4, [#allocation42]  }
 0x23c   :  { %9047 = dma.done.wait [#allocation3], 1536  }
 0x23d   :  { %9048 = vsyncadd [#allocation3], 4294965760 }
 0x23e   :  { %9049 = dma.done.wait [#allocation6], 12416  }
 0x23f   :  { %9050 = vsyncadd [#allocation6], 4294954880 }
 0x240   :  { %9051 = dma.done.wait [#allocation9], 64  }
 0x241   :  { %9052 = vsyncadd [#allocation9], 4294967232 }
 0x242   :  { %9053 = dma.done.wait [#allocation12], 12384  }
 0x243   :  { %9054 = vsyncadd [#allocation12], 4294954912 }
 0x244   :  { %9055 = dma.done.wait [#allocation15], 4128  }
 0x245   :  { %9056 = vsyncadd [#allocation15], 4294963168 }
 0x246   :  { %9057 = dma.done.wait [#allocation18], 64  }
 0x247   :  { %9058 = vsyncadd [#allocation18], 4294967232 }
 0x248   :  { %9059 = dma.done.wait [#allocation21], 16512  }
 0x249   :  { %9060 = vsyncadd [#allocation21], 4294950784 }
 0x24a   :  { %9061 = dma.done.wait [#allocation24], 16416  }
 0x24b   :  { %9062 = vsyncadd [#allocation24], 4294950880 }
 0x24c   :  { %9063 = dma.done.wait [#allocation27], 32  }
 0x24d   :  { %9064 = vsyncadd [#allocation27], 4294967264 }
 0x24e   :  { %9065 = dma.done.wait [#allocation30], 8256  }
 0x24f   :  { %9066 = vsyncadd [#allocation30], 4294959040 }
 0x250   :  { %9067 = dma.done.wait [#allocation33], 128  }
 0x251   :  { %9068 = vsyncadd [#allocation33], 4294967168 }
 0x252   :  { %9069 = dma.done.wait [#allocation36], 16416  }
 0x253   :  { %9070 = vsyncadd [#allocation36], 4294950880 }
 0x254   :  { %9071 = dma.done.wait [#allocation39], 64  }
 0x255   :  { %9072 = vsyncadd [#allocation39], 4294967232 }
 0x256   :  { %9073 = dma.done.wait [#allocation42], 4112  }
 0x257   :  { %9074 = vsyncadd [#allocation42], 4294963184  ;;  %v460_v0 = vld [vmem:[#allocation5 + $0x80] sm:$0xff]  ;;  %v461_v1 = vld [vmem:[#allocation5 + $0x88] sm:$0xff]  ;;  %vm9119_vm0 = vmmov 0   ;;  %vm1046_vm1 = vcmask 261120  }
 0x258   :  { %v444_v2 = vld [vmem:[#allocation5] sm:$0xff]  ;;  %v7472_v3 = vpack.c.bf16 %v461_v1, %v460_v0  ;;  %v445_v4 = vld [vmem:[#allocation5 + $0x8] sm:$0xff]  ;;  %v462_v5 = vld [vmem:[#allocation5 + $0x90] sm:$0xff]  ;;  %vm1203_vm3 = vcmask 64512   ;;  %s9120_s19 = smov 96   ;;  %vm5758_vm4 = vcmask 1041409  }
 0x259   :  { %v463_v6 = vld [vmem:[#allocation5 + $0x98] sm:$0xff]  ;;  %v7474_v7 = vpack.c.bf16 %v445_v4, %v444_v2  ;;  %v446_v9 = vld [vmem:[#allocation5 + $0x10] sm:$0xff]  ;;  %v464_v11 = vld [vmem:[#allocation5 + $0xa0] sm:$0xff]  ;;  %vm5761_vm5 = vcmask 1041408  }
 0x25a   :  { %v7476_v8 = vpack.c.bf16 %v463_v6, %v462_v5  ;;  %v447_v10 = vld [vmem:[#allocation5 + $0x18] sm:$0xff]  ;;  %7473 = vmatprep.subr.bf16.mxu0 %v7472_v3  ;;  %v465_v12 = vld [vmem:[#allocation5 + $0xa8] sm:$0xff]  ;;  %v448_v15 = vld [vmem:[#allocation5 + $0x20] sm:$0xff] }
 0x25b   :  { %7475 = vmatpush3.bf16.msra.mxu0 %v7474_v7  ;;  %v7478_v13 = vpack.c.bf16 %v447_v10, %v446_v9  ;;  %v7480_v14 = vpack.c.bf16 %v465_v12, %v464_v11  ;;  %v449_v16 = vld [vmem:[#allocation5 + $0x28] sm:$0xff]  ;;  %v466_v17 = vld [vmem:[#allocation5 + $0xb0] sm:$0xff]  ;;  %v467_v18 = vld [vmem:[#allocation5 + $0xb8] sm:$0xff] }
 0x25c   :  { %7477 = vmatprep.subr.bf16.mxu0 %v7476_v8  ;;  %v7482_v19 = vpack.c.bf16 %v449_v16, %v448_v15  ;;  %v7484_v20 = vpack.c.bf16 %v467_v18, %v466_v17  ;;  %v450_v21 = vld [vmem:[#allocation5 + $0x30] sm:$0xff]  ;;  %v451_v22 = vld [vmem:[#allocation5 + $0x38] sm:$0xff]  ;;  %v468_v23 = vld [vmem:[#allocation5 + $0xc0] sm:$0xff] }
 0x25d   :  { %v469_v24 = vld [vmem:[#allocation5 + $0xc8] sm:$0xff]  ;;  %v7486_v26 = vpack.c.bf16 %v451_v22, %v450_v21  ;;  %v452_v28 = vld [vmem:[#allocation5 + $0x40] sm:$0xff]  ;;  %v470_v30 = vld [vmem:[#allocation5 + $0xd0] sm:$0xff] }
 0x25e   :  { %v433_v25 = vld [vmem:[#allocation2 + $0x8] sm:$0xff]  ;;  %v7488_v27 = vpack.c.bf16 %v469_v24, %v468_v23  ;;  %v471_v31 = vld [vmem:[#allocation5 + $0xd8] sm:$0xff]  ;;  %v454_v34 = vld [vmem:[#allocation5 + $0x50] sm:$0xff] }
 0x25f   :  { %7479 = vmatpush3.bf16.msra.mxu0 %v7478_v13  ;;  %604 = vmatprep.mubr.f32.mxu0 %v433_v25  ;;  %v453_v29 = vld [vmem:[#allocation5 + $0x48] sm:$0xff]  ;;  %v7492_v33 = vpack.c.bf16 %v471_v31, %v470_v30  ;;  %v455_v35 = vld [vmem:[#allocation5 + $0x58] sm:$0xff]  ;;  %v472_v36 = vld [vmem:[#allocation5 + $0xe0] sm:$0xff] }
 0x260   :  { %7481 = vmatprep.subr.bf16.mxu0 %v7480_v14  ;;  %v7490_v32 = vpack.c.bf16 %v453_v29, %v452_v28  ;;  %v473_v37 = vld [vmem:[#allocation5 + $0xe8] sm:$0xff]  ;;  %v7494_v38 = vpack.c.bf16 %v455_v35, %v454_v34  ;;  %v456_v40 = vld [vmem:[#allocation5 + $0x60] sm:$0xff]  ;;  %v474_v42 = vld [vmem:[#allocation5 + $0xf0] sm:$0xff] }
 0x261   :  { %v7496_v39 = vpack.c.bf16 %v473_v37, %v472_v36  ;;  %v457_v41 = vld [vmem:[#allocation5 + $0x68] sm:$0xff]  ;;  %v475_v43 = vld [vmem:[#allocation5 + $0xf8] sm:$0xff]  ;;  %v458_v46 = vld [vmem:[#allocation5 + $0x70] sm:$0xff] }
 0x262   :  { %v7498_v44 = vpack.c.bf16 %v457_v41, %v456_v40  ;;  %v7500_v45 = vpack.c.bf16 %v475_v43, %v474_v42  ;;  %v459_v47 = vld [vmem:[#allocation5 + $0x78] sm:$0xff]  ;;  %v492_v48 = vld [vmem:[#allocation5 + $0x180] sm:$0xff]  ;;  %v493_v49 = vld [vmem:[#allocation5 + $0x188] sm:$0xff] }
 0x263   :  { %7483 = vmatpush3.bf16.msra.mxu0 %v7482_v19  ;;  %v7502_v50 = vpack.c.bf16 %v459_v47, %v458_v46  ;;  %v7504_v51 = vpack.c.bf16 %v493_v49, %v492_v48  ;;  %v476_v52 = vld [vmem:[#allocation5 + $0x100] sm:$0xff]  ;;  %v477_v53 = vld [vmem:[#allocation5 + $0x108] sm:$0xff]  ;;  %v494_v54 = vld [vmem:[#allocation5 + $0x190] sm:$0xff] }
 0x264   :  { %7485 = vmatprep.subr.bf16.mxu0 %v7484_v20  ;;  %v495_v55 = vld [vmem:[#allocation5 + $0x198] sm:$0xff]  ;;  %v432_v56 = vld [vmem:[#allocation2] sm:$0xff]  ;;  %v7506_v57 = vpack.c.bf16 %v477_v53, %v476_v52  ;;  %v478_v59 = vld [vmem:[#allocation5 + $0x110] sm:$0xff] }
 0x265   :  { %v7508_v58 = vpack.c.bf16 %v495_v55, %v494_v54  ;;  %v479_v60 = vld [vmem:[#allocation5 + $0x118] sm:$0xff]  ;;  %v496_v62 = vld [vmem:[#allocation5 + $0x1a0] sm:$0xff]  ;;  %v497_v63 = vld [vmem:[#allocation5 + $0x1a8] sm:$0xff] }
 0x266   :  { %v439_v61 = vld [vmem:[#allocation2 + $0x38] sm:$0xff]  ;;  %v7510_v0 = vpack.c.bf16 %v479_v60, %v478_v59  ;;  %v438_v1 = vld [vmem:[#allocation2 + $0x30] sm:$0xff]  ;;  %v7512_v2 = vpack.c.bf16 %v497_v63, %v496_v62  ;;  %v480_v3 = vld [vmem:[#allocation5 + $0x120] sm:$0xff] }
 0x267   :  { %7487 = vmatpush3.bf16.msra.mxu0 %v7486_v26  ;;  %v481_v4 = vld [vmem:[#allocation5 + $0x128] sm:$0xff]  ;;  %v435_v5 = vld [vmem:[#allocation2 + $0x18] sm:$0xff]  ;;  %v498_v6 = vld [vmem:[#allocation5 + $0x1b0] sm:$0xff] }
 0x268   :  { %7489 = vmatprep.subr.bf16.mxu0 %v7488_v27  ;;  %v499_v7 = vld [vmem:[#allocation5 + $0x1b8] sm:$0xff]  ;;  %v7514_v8 = vpack.c.bf16 %v481_v4, %v480_v3  ;;  %v482_v10 = vld [vmem:[#allocation5 + $0x130] sm:$0xff]  ;;  %v500_v12 = vld [vmem:[#allocation5 + $0x1c0] sm:$0xff] }
 0x269   :  { %v7516_v9 = vpack.c.bf16 %v499_v7, %v498_v6  ;;  %v483_v11 = vld [vmem:[#allocation5 + $0x138] sm:$0xff]  ;;  %v501_v13 = vld [vmem:[#allocation5 + $0x1c8] sm:$0xff]  ;;  %v484_v16 = vld [vmem:[#allocation5 + $0x140] sm:$0xff] }
 0x26a   :  { %v7518_v14 = vpack.c.bf16 %v483_v11, %v482_v10  ;;  %v7520_v15 = vpack.c.bf16 %v501_v13, %v500_v12  ;;  %v485_v17 = vld [vmem:[#allocation5 + $0x148] sm:$0xff]  ;;  %v502_v18 = vld [vmem:[#allocation5 + $0x1d0] sm:$0xff]  ;;  %v503_v19 = vld [vmem:[#allocation5 + $0x1d8] sm:$0xff] }
 0x26b   :  { %7491 = vmatpush3.bf16.msra.mxu0 %v7490_v32  ;;  %v7522_v20 = vpack.c.bf16 %v485_v17, %v484_v16  ;;  %v7524_v21 = vpack.c.bf16 %v503_v19, %v502_v18  ;;  %v486_v22 = vld [vmem:[#allocation5 + $0x150] sm:$0xff]  ;;  %v487_v23 = vld [vmem:[#allocation5 + $0x158] sm:$0xff]  ;;  %v504_v24 = vld [vmem:[#allocation5 + $0x1e0] sm:$0xff] }
 0x26c   :  { %7493 = vmatprep.subr.bf16.mxu0 %v7492_v33  ;;  %v505_v25 = vld [vmem:[#allocation5 + $0x1e8] sm:$0xff]  ;;  %v7526_v26 = vpack.c.bf16 %v487_v23, %v486_v22  ;;  %v488_v28 = vld [vmem:[#allocation5 + $0x160] sm:$0xff]  ;;  %v506_v30 = vld [vmem:[#allocation5 + $0x1f0] sm:$0xff] }
 0x26d   :  { %v7528_v27 = vpack.c.bf16 %v505_v25, %v504_v24  ;;  %v489_v29 = vld [vmem:[#allocation5 + $0x168] sm:$0xff]  ;;  %v507_v31 = vld [vmem:[#allocation5 + $0x1f8] sm:$0xff]  ;;  %v490_v34 = vld [vmem:[#allocation5 + $0x170] sm:$0xff] }
 0x26e   :  { %v7530_v32 = vpack.c.bf16 %v489_v29, %v488_v28  ;;  %v7532_v33 = vpack.c.bf16 %v507_v31, %v506_v30  ;;  %v491_v35 = vld [vmem:[#allocation5 + $0x178] sm:$0xff]  ;;  %v524_v36 = vld [vmem:[#allocation5 + $0x280] sm:$0xff]  ;;  %v525_v37 = vld [vmem:[#allocation5 + $0x288] sm:$0xff] }
 0x26f   :  { %7495 = vmatpush3.bf16.msra.mxu0 %v7494_v38  ;;  %v7534_v38 = vpack.c.bf16 %v491_v35, %v490_v34  ;;  %v508_v40 = vld [vmem:[#allocation5 + $0x200] sm:$0xff]  ;;  %v509_v41 = vld [vmem:[#allocation5 + $0x208] sm:$0xff]  ;;  %v526_v42 = vld [vmem:[#allocation5 + $0x290] sm:$0xff] }
 0x270   :  { %7497 = vmatprep.subr.bf16.mxu0 %v7496_v39  ;;  %v7536_v39 = vpack.c.bf16 %v525_v37, %v524_v36  ;;  %v527_v43 = vld [vmem:[#allocation5 + $0x298] sm:$0xff]  ;;  %v441_v46 = vld [vmem:[#allocation2 + $0x48] sm:$0xff]  ;;  %v510_v48 = vld [vmem:[#allocation5 + $0x210] sm:$0xff] }
 0x271   :  { %v7540_v47 = vpack.c.bf16 %v527_v43, %v526_v42  ;;  %v511_v49 = vld [vmem:[#allocation5 + $0x218] sm:$0xff]  ;;  %v440_v52 = vld [vmem:[#allocation2 + $0x40] sm:$0xff]  ;;  %v514_v62 = vld [vmem:[#allocation5 + $0x230] sm:$0xff] }
 0x272   :  { %v7542_v53 = vpack.c.bf16 %v511_v49, %v510_v48  ;;  %v512_v55 = vld [vmem:[#allocation5 + $0x220] sm:$0xff]  ;;  %v531_v59 = vld [vmem:[#allocation5 + $0x2b8] sm:$0xff]  ;;  %v534_v6 = vld [vmem:[#allocation5 + $0x2d0] sm:$0xff] }
 0x273   :  { %7499 = vmatpush3.bf16.msra.mxu0 %v7498_v44  ;;  %v434_v44 = vld [vmem:[#allocation2 + $0x10] sm:$0xff]  ;;  %v515_v63 = vld [vmem:[#allocation5 + $0x238] sm:$0xff]  ;;  %v516_v4 = vld [vmem:[#allocation5 + $0x240] sm:$0xff] }
 0x274   :  { %7501 = vmatprep.subr.bf16.mxu0 %v7500_v45  ;;  %v7538_v45 = vpack.c.bf16 %v509_v41, %v508_v40  ;;  %v535_v7 = vld [vmem:[#allocation5 + $0x2d8] sm:$0xff]  ;;  %v518_v10 = vld [vmem:[#allocation5 + $0x250] sm:$0xff]  ;;  %v536_v12 = vld [vmem:[#allocation5 + $0x2e0] sm:$0xff] }
 0x275   :  { %v519_v11 = vld [vmem:[#allocation5 + $0x258] sm:$0xff]  ;;  %v537_v13 = vld [vmem:[#allocation5 + $0x2e8] sm:$0xff]  ;;  %v520_v16 = vld [vmem:[#allocation5 + $0x260] sm:$0xff] }
 0x276   :  { %v521_v17 = vld [vmem:[#allocation5 + $0x268] sm:$0xff]  ;;  %v538_v18 = vld [vmem:[#allocation5 + $0x2f0] sm:$0xff]  ;;  %v539_v19 = vld [vmem:[#allocation5 + $0x2f8] sm:$0xff] }
 0x277   :  { %7503 = vmatpush3.bf16.msra.mxu0 %v7502_v50  ;;  %v528_v50 = vld [vmem:[#allocation5 + $0x2a0] sm:$0xff]  ;;  %v522_v22 = vld [vmem:[#allocation5 + $0x270] sm:$0xff]  ;;  %v523_v23 = vld [vmem:[#allocation5 + $0x278] sm:$0xff] }
 0x278   :  { %7505 = vmatprep.subr.bf16.mxu0 %v7504_v51  ;;  %v529_v51 = vld [vmem:[#allocation5 + $0x2a8] sm:$0xff]  ;;  %v7566_v24 = vpack.c.bf16 %v523_v23, %v522_v22  ;;  %v436_v25 = vld [vmem:[#allocation2 + $0x20] sm:$0xff] }
 0x279   :  { %v7544_v54 = vpack.c.bf16 %v529_v51, %v528_v50  ;;  %v835_v22 = vld [vmem:[#allocation11 + $0xb0] sm:$0xff] }
 0x27a   :  { %605 = vmatmul.mubr.f32.vlgmr.msra.gmra.mrb[0].mxu0 %v432_v56  ;;  %v513_v56 = vld [vmem:[#allocation5 + $0x228] sm:$0xff]  ;;  %v827_v23 = vld [vmem:[#allocation11 + $0x70] sm:$0xff] }
 0x27b   :  { %7507 = vmatpush3.bf16.msra.mxu0 %v7506_v57  ;;  %609 = vmatprep.mubr.f32.mxu0 %v439_v61  ;;  %v437_v57 = vld [vmem:[#allocation2 + $0x28] sm:$0xff]  ;;  %v7546_v60 = vpack.c.bf16 %v513_v56, %v512_v55 }
 0x27c   :  { %7509 = vmatprep.subr.bf16.mxu0 %v7508_v58  ;;  %v530_v58 = vld [vmem:[#allocation5 + $0x2b0] sm:$0xff] }
 0x27d   :  { %v7548_v61 = vpack.c.bf16 %v531_v59, %v530_v58  ;;  %v813_v55 = vld [vmem:[#allocation11] sm:$0xff]  ;;  %v820_v58 = vld [vmem:[#allocation11 + $0x38] sm:$0xff]  ;;  %v823_v59 = vld [vmem:[#allocation11 + $0x50] sm:$0xff] }
 0x27e   :  { %610 = vmatmul.mubr.f32.gmra.mrb[2].mxu0 %v438_v1  ;;  %v533_v1 = vld [vmem:[#allocation5 + $0x2c8] sm:$0xff] }
 0x27f   :  { %7511 = vmatpush3.bf16.msra.mxu0 %v7510_v0  ;;  %679 = vmatprep.mubr.f32.mxu0 %v435_v5  ;;  %v532_v0 = vld [vmem:[#allocation5 + $0x2c0] sm:$0xff]  ;;  %v517_v5 = vld [vmem:[#allocation5 + $0x248] sm:$0xff] }
 0x280   :  { %7513 = vmatprep.subr.bf16.mxu0 %v7512_v2  ;;  %v7550_v2 = vpack.c.bf16 %v515_v63, %v514_v62  ;;  %v7552_v3 = vpack.c.bf16 %v533_v1, %v532_v0  ;;  %v815_v62 = vld [vmem:[#allocation11 + $0x10] sm:$0xff]  ;;  %v818_v63 = vld [vmem:[#allocation11 + $0x28] sm:$0xff] }
 0x281   :  { %v819_v0 = vld [vmem:[#allocation11 + $0x30] sm:$0xff]  ;;  %v7600_v1 = vpack.c.bf16 %v818_v63, %v815_v62 }
 0x282   :  { %v851_v62 = vld [vmem:[#allocation11 + $0x130] sm:$0xff] }
 0x283   :  { %7515 = vmatpush3.bf16.msra.mxu0 %v7514_v8  ;;  %v7554_v8 = vpack.c.bf16 %v517_v5, %v516_v4  ;;  %v829_v4 = vld [vmem:[#allocation11 + $0x80] sm:$0xff] }
 0x284   :  { %7517 = vmatprep.subr.bf16.mxu0 %v7516_v9  ;;  %v7556_v9 = vpack.c.bf16 %v535_v7, %v534_v6  ;;  %v821_v6 = vld [vmem:[#allocation11 + $0x40] sm:$0xff]  ;;  %v824_v7 = vld [vmem:[#allocation11 + $0x58] sm:$0xff] }
 0x287   :  { %7519 = vmatpush3.bf16.msra.mxu0 %v7518_v14  ;;  %v7558_v14 = vpack.c.bf16 %v519_v11, %v518_v10  ;;  %v825_v10 = vld [vmem:[#allocation11 + $0x60] sm:$0xff]  ;;  %v828_v11 = vld [vmem:[#allocation11 + $0x78] sm:$0xff] }
 0x288   :  { %7521 = vmatprep.subr.bf16.mxu0 %v7520_v15  ;;  %v7560_v15 = vpack.c.bf16 %v537_v13, %v536_v12  ;;  %v7578_v12 = vpack.c.bf16 %v828_v11, %v825_v10 }
 0x28b   :  { %7523 = vmatpush3.bf16.msra.mxu0 %v7522_v20  ;;  %v7562_v20 = vpack.c.bf16 %v521_v17, %v520_v16 }
 0x28c   :  { %7525 = vmatprep.subr.bf16.mxu0 %v7524_v21  ;;  %v7564_v21 = vpack.c.bf16 %v539_v19, %v538_v18 }
 0x28f   :  { %7527 = vmatpush3.bf16.msra.mxu0 %v7526_v26  ;;  %v443_v26 = vld [vmem:[#allocation2 + $0x58] sm:$0xff] }
 0x290   :  { %7529 = vmatprep.subr.bf16.mxu0 %v7528_v27  ;;  %v442_v27 = vld [vmem:[#allocation2 + $0x50] sm:$0xff] }
 0x293   :  { %7531 = vmatpush3.bf16.msra.mxu0 %v7530_v32 }
 0x294   :  { %7533 = vmatprep.subr.bf16.mxu0 %v7532_v33 }
 0x297   :  { %7535 = vmatpush3.bf16.msra.mxu0 %v7534_v38 }
 0x298   :  { %7537 = vmatprep.subr.bf16.mxu0 %v7536_v39 }
 0x29a   :  { %680 = vmatmul.mubr.f32.vlgmr.msra.gmra.mrb[4].mxu0 %v434_v44 }
 0x29b   :  { %7539 = vmatpush3.bf16.msra.mxu0 %v7538_v45  ;;  %684 = vmatprep.mubr.f32.mxu0 %v441_v46  ;;  %v765_v45 = vld [vmem:[#allocation7] sm:$0xff] }
 0x29c   :  { %7541 = vmatprep.subr.bf16.mxu0 %v7540_v47 }
 0x29e   :  { %685 = vmatmul.mubr.f32.gmra.mrb[6].mxu0 %v440_v52 }
 0x29f   :  { %7543 = vmatpush3.bf16.msra.mxu0 %v7542_v53  ;;  %754 = vmatprep.mubr.f32.mxu0 %v437_v57  ;;  %v814_v53 = vld [vmem:[#allocation11 + $0x8] sm:$0xff]  ;;  %v816_v57 = vld [vmem:[#allocation11 + $0x18] sm:$0xff] }
 0x2a0   :  { %7545 = vmatprep.subr.bf16.mxu0 %v7544_v54  ;;  %v817_v54 = vld [vmem:[#allocation11 + $0x20] sm:$0xff] }
 0x2a1   :  { %v7568_v56 = vpack.c.bf16 %v817_v54, %v814_v53  ;;  %v848_v54 = vld [vmem:[#allocation11 + $0x118] sm:$0xff] }
 0x2a3   :  { %7547 = vmatpush3.bf16.msra.mxu0 %v7546_v60  ;;  %v7570_v60 = vpack.c.bf16 %v816_v57, %v813_v55  ;;  %7569 = vmatprep.subr.bf16.mxu1 %v7568_v56  ;;  %v849_v55 = vld [vmem:[#allocation11 + $0x120] sm:$0xff]  ;;  %v852_v56 = vld [vmem:[#allocation11 + $0x138] sm:$0xff]  ;;  %v9118_v57 = vmov 0.0  }
 0x2a4   :  { %7549 = vmatprep.subr.bf16.mxu0 %v7548_v61  ;;  %v7572_v61 = vpack.c.bf16 %v823_v59, %v820_v58  ;;  %942 = vmatprep.mubr.f32.mxu1 %v9118_v57  ;;  %v7594_v59 = vpack.c.bf16 %v852_v56, %v849_v55 }
 0x2a5   :  { %7571 = vmatpush1.bf16.msra.mxu1 %v7570_v60  ;;  %v856_v60 = vld [vmem:[#allocation11 + $0x158] sm:$0xff] }
 0x2a6   :  { %7573 = vmatprep.subr.bf16.mxu1 %v7572_v61  ;;  %v859_v61 = vld [vmem:[#allocation11 + $0x170] sm:$0xff] }
 0x2a7   :  { %7551 = vmatpush3.bf16.msra.mxu0 %v7550_v2  ;;  %v822_v2 = vld [vmem:[#allocation11 + $0x48] sm:$0xff]  ;;  %v7596_v63 = vpack.c.bf16 %v859_v61, %v856_v60 }
 0x2a8   :  { %7553 = vmatprep.subr.bf16.mxu0 %v7552_v3  ;;  %v826_v3 = vld [vmem:[#allocation11 + $0x68] sm:$0xff]  ;;  %v7574_v5 = vpack.c.bf16 %v822_v2, %v819_v0 }
 0x2a9   :  { %v854_v0 = vld [vmem:[#allocation11 + $0x148] sm:$0xff] }
 0x2aa   :  { %7575 = vmatpush1.bf16.msra.mxu1 %v7574_v5  ;;  %v858_v2 = vld [vmem:[#allocation11 + $0x168] sm:$0xff]  ;;  %v857_v5 = vld [vmem:[#allocation11 + $0x160] sm:$0xff] }
 0x2ab   :  { %7555 = vmatpush3.bf16.msra.mxu0 %v7554_v8  ;;  %v7576_v8 = vpack.c.bf16 %v829_v4, %v826_v3  ;;  %v7624_v3 = vpack.c.bf16 %v854_v0, %v851_v62 }
 0x2ac   :  { %7557 = vmatprep.subr.bf16.mxu0 %v7556_v9  ;;  %v7604_v9 = vpack.c.bf16 %v824_v7, %v821_v6  ;;  %v860_v6 = vld [vmem:[#allocation11 + $0x178] sm:$0xff] }
 0x2ad   :  { %7577 = vmatprep.subr.bf16.mxu1 %v7576_v8  ;;  %v7628_v7 = vpack.c.bf16 %v860_v6, %v857_v5 }
 0x2ae   :  { %7579 = vmatpush1.bf16.msra.mxu1 %v7578_v12 }
 0x2af   :  { %7559 = vmatpush3.bf16.msra.mxu0 %v7558_v14 }
 0x2b0   :  { %7561 = vmatprep.subr.bf16.mxu0 %v7560_v15 }
 0x2b3   :  { %7563 = vmatpush3.bf16.msra.mxu0 %v7562_v20 }
 0x2b4   :  { %7565 = vmatprep.subr.bf16.mxu0 %v7564_v21  ;;  %v832_v21 = vld [vmem:[#allocation11 + $0x98] sm:$0xff] }
 0x2b7   :  { %7567 = vmatpush3.bf16.msra.mxu0 %v7566_v24  ;;  %v7580_v24 = vpack.c.bf16 %v835_v22, %v832_v21 }
 0x2b8   :  { %7601 = vmatprep.subr.bf16.mxu0 %v7600_v1 }
 0x2b9   :  { %7581 = vmatprep.subr.bf16.mxu1 %v7580_v24 }
 0x2ba   :  { %755 = vmatmul.mubr.f32.vlgmr.msra.gmra.mrb[8].mxu0 %v436_v25  ;;  %v830_v25 = vld [vmem:[#allocation11 + $0x88] sm:$0xff] }
 0x2bb   :  { %759 = vmatprep.mubr.f32.mxu0 %v443_v26  ;;  %7603 = vmatpush3.bf16.msra.mxu0 %v7600_v1  ;;  %v831_v26 = vld [vmem:[#allocation11 + $0x90] sm:$0xff] }
 0x2bc   :  { %7605 = vmatprep.subr.bf16.mxu0 %v7604_v9  ;;  %v855_v1 = vld [vmem:[#allocation11 + $0x150] sm:$0xff] }
 0x2bd   :  { %v7598_v4 = vpack.c.bf16 %v858_v2, %v855_v1 }
 0x2be   :  { %760 = vmatmul.mubr.f32.gmra.mrb[10].mxu0 %v442_v27  ;;  %v834_v27 = vld [vmem:[#allocation11 + $0xa8] sm:$0xff] }
 0x2bf   :  { %7607 = vmatpush3.bf16.msra.mxu0 %v7604_v9 }
 0x34d   :  { %v6737_v28 = vpop.f32.mrb[0].mxu0 }
 0x34e   :  { %v6738_v29 = vpop.f32.mrb[1].mxu0 }
 0x34f   :  { %v6739_v30 = vadd.f32 %v6738_v29, %v6737_v28  ;;  %v7608_v28 = vpack.c.bf16 %v830_v25, %v827_v23  ;;  %v7582_v29 = vpack.c.bf16 %v834_v27, %v831_v26  ;;  %v861_v27 = vld [vmem:[#allocation13] sm:$0x7] }
 0x351   :  { %v6740_v31 = vpop.f32.mrb[2].mxu0  ;;  %7609 = vmatprep.subr.bf16.mxu0 %v7608_v28  ;;  %7583 = vmatpush1.bf16.msra.mxu1 %v7582_v29 }
 0x352   :  { %v6741_v32 = vpop.f32.mrb[3].mxu0  ;;  %7611 = vmatpush3.bf16.msra.mxu0 %v7608_v28 }
 0x353   :  { %v6742_v33 = vadd.f32 %v6741_v32, %v6740_v31  ;;  %v841_v31 = vld [vmem:[#allocation11 + $0xe0] sm:$0xff] }
 0x354   :  { %v833_v32 = vld [vmem:[#allocation11 + $0xa0] sm:$0xff] }
 0x36d   :  { %v6775_v34 = vpop.f32.mrb[4].mxu0 }
 0x36e   :  { %v6776_v35 = vpop.f32.mrb[5].mxu0 }
 0x36f   :  { %v6777_v36 = vadd.f32 %v6776_v35, %v6775_v34  ;;  %v836_v34 = vld [vmem:[#allocation11 + $0xb8] sm:$0xff]  ;;  %v837_v35 = vld [vmem:[#allocation11 + $0xc0] sm:$0xff] }
 0x371   :  { %v682_v37 = vadd.f32 %v6777_v36, %v6739_v30  ;;  %v6778_v38 = vpop.f32.mrb[6].mxu0  ;;  %v838_v30 = vld [vmem:[#allocation11 + $0xc8] sm:$0xff]  ;;  %v840_v36 = vld [vmem:[#allocation11 + $0xd8] sm:$0xff] }
 0x372   :  { %v6779_v39 = vpop.f32.mrb[7].mxu0 }
 0x373   :  { %v6780_v40 = vadd.f32 %v6779_v39, %v6778_v38  ;;  %v7586_v38 = vpack.c.bf16 %v840_v36, %v837_v35  ;;  %v844_v39 = vld [vmem:[#allocation11 + $0xf8] sm:$0xff] }
 0x375   :  { %v687_v41 = vadd.f32 %v6780_v40, %v6742_v33  ;;  %v7584_v33 = vpack.c.bf16 %v841_v31, %v838_v30  ;;  %v847_v40 = vld [vmem:[#allocation11 + $0x110] sm:$0xff] }
 0x377   :  { %7585 = vmatprep.subr.bf16.mxu1 %v7584_v33 }
 0x378   :  { %7587 = vmatpush1.bf16.msra.mxu1 %v7586_v38 }
 0x38d   :  { %v6813_v42 = vpop.f32.mrb[8].mxu0 }
 0x38e   :  { %v6814_v43 = vpop.f32.mrb[9].mxu0 }
 0x38f   :  { %v6815_v44 = vadd.f32 %v6814_v43, %v6813_v42  ;;  %v7588_v42 = vpack.c.bf16 %v847_v40, %v844_v39  ;;  %v842_v43 = vld [vmem:[#allocation11 + $0xe8] sm:$0xff] }
 0x391   :  { %v757_v46 = vadd.f32 %v6815_v44, %v682_v37  ;;  %v6816_v47 = vpop.f32.mrb[10].mxu0  ;;  %v7612_v37 = vpack.c.bf16 %v836_v34, %v833_v32  ;;  %v843_v44 = vld [vmem:[#allocation11 + $0xf0] sm:$0xff]  ;;  %7589 = vmatprep.subr.bf16.mxu1 %v7588_v42 }
 0x392   :  { %v6817_v48 = vpop.f32.mrb[11].mxu0 }
 0x393   :  { %v6818_v49 = vadd.f32 %v6817_v48, %v6816_v47  ;;  %v9628_v50 = vadd.f32 %v765_v45, %v757_v46  ;;  %7613 = vmatprep.subr.bf16.mxu0 %v7612_v37  ;;  %v850_v48 = vld [vmem:[#allocation11 + $0x128] sm:$0xff] }
 0x394   :  { %7615 = vmatpush3.bf16.msra.mxu0 %v7612_v37 }
 0x395   :  { %v762_v51 = vadd.f32 %v6818_v49, %v687_v41  ;;  %774 = vadd.xlane.f32.xlu0 %v9628_v50  ;;  %v839_v41 = vld [vmem:[#allocation11 + $0xd0] sm:$0xff]  ;;  %v853_v49 = vld [vmem:[#allocation11 + $0x140] sm:$0xff] }
 0x396   :  { %v7616_v46 = vpack.c.bf16 %v842_v43, %v839_v41  ;;  %v7592_v53 = vpack.c.bf16 %v853_v49, %v850_v48 }
 0x397   :  { %v9631_v52 = vadd.f32 %v765_v45, %v762_v51  ;;  %v846_v45 = vld [vmem:[#allocation11 + $0x108] sm:$0xff]  ;;  %v845_v51 = vld [vmem:[#allocation11 + $0x100] sm:$0xff] }
 0x398   :  { %v7590_v47 = vpack.c.bf16 %v846_v45, %v843_v44  ;;  %7617 = vmatprep.subr.bf16.mxu0 %v7616_v46  ;;  %v7620_v58 = vpack.c.bf16 %v848_v54, %v845_v51 }
 0x399   :  { %776 = vadd.xlane.f32.xlu0 %v9631_v52  ;;  %7619 = vmatpush3.bf16.msra.mxu0 %v7616_v46 }
 0x39a   :  { %7591 = vmatpush1.bf16.msra.mxu1 %v7590_v47  ;;  %7621 = vmatprep.subr.bf16.mxu0 %v7620_v58 }
 0x39b   :  { %7593 = vmatprep.subr.bf16.mxu1 %v7592_v53 }
 0x39d   :  { %7623 = vmatpush3.bf16.msra.mxu0 %v7620_v58 }
 0x39e   :  { %7595 = vmatpush1.bf16.msra.mxu1 %v7594_v59  ;;  %7625 = vmatprep.subr.bf16.mxu0 %v7624_v3 }
 0x39f   :  { %7597 = vmatprep.subr.bf16.mxu1 %v7596_v63 }
 0x3a1   :  { %7627 = vmatpush3.bf16.msra.mxu0 %v7624_v3 }
 0x3a2   :  { %7599 = vmatpush1.bf16.msra.mxu1 %v7598_v4  ;;  %7629 = vmatprep.subr.bf16.mxu0 %v7628_v7 }
 0x3a3   :  { %7194 = vmatprep.subr.mxu1 %v9118_v57 }
 0x3a5   :  { %7631 = vmatpush3.bf16.msra.mxu0 %v7628_v7 }
 0x3a6   :  { %7189 = vmatprep.subr.mxu0 %v9118_v57 }
 0x422   :  { %v775_v13 = vpop.xlane.xlu0 %774 }
 0x423   :  { %v779_v14 = vmul.f32 0.0078125, %v775_v13 }
 0x425   :  { %v9635_v15 = vsub.f32 %v9628_v50, %v779_v14 }
 0x426   :  { %v777_v16 = vpop.xlane.xlu0 %776 }
 0x427   :  { %v780_v17 = vmul.f32 0.0078125, %v777_v16  ;;  %v783_v18 = vmul.f32 %v9635_v15, %v9635_v15  ;;  %v6626_v16 = vld [vmem:[#allocation8] ss:$0 sm:$0xff] }
 0x429   :  { %v9640_v19 = vsub.f32 %v9631_v52, %v780_v17  ;;  %785 = vadd.xlane.f32.xlu1 %v783_v18  ;;  %v6627_v18 = vld [vmem:[#allocation10] ss:$0 sm:$0xff] }
 0x42b   :  { %v784_v20 = vmul.f32 %v9640_v19, %v9640_v19 }
 0x42d   :  { %787 = vadd.xlane.f32.xlu1 %v784_v20 }
 0x4b6   :  { %v786_v8 = vpop.xlane.xlu1 %785 }
 0x4b7   :  { %v789_v9 = vmul.f32 0.0078125, %v786_v8 }
 0x4b9   :  { %v791_v10 = vadd.f32 1e-06, %v789_v9 }
 0x4ba   :  { %v788_v11 = vpop.xlane.xlu1 %787 }
 0x4bb   :  { %8301 = vrsqrt.f32 %v791_v10  ;;  %v790_v12 = vmul.f32 0.0078125, %v788_v11 }
 0x4bd   :  { %v792_v13 = vadd.f32 1e-06, %v790_v12 }
 0x4bf   :  { %8303 = vrsqrt.f32 %v792_v13 }
 0x4c5   :  { %v8302_v14 = vpop.eup %8301 }
 0x4c6   :  { %v795_v17 = vmul.f32 %v8302_v14, %v9635_v15  ;;  %v768_v15 = vlaneseq }
 0x4c8   :  { %v803_v20 = vmul.f32 %v6626_v16, %v795_v17  ;;  %v9654_v26 = vshrl.u32 %v768_v15, 7  ;;  %v769_v45 = vand.u32 127, %v768_v15 }
 0x4c9   :  { %v8304_v21 = vpop.eup %8303 }
 0x4ca   :  { %v811_v22 = vadd.f32 %v6627_v18, %v803_v20  ;;  %v796_v23 = vmul.f32 %v8304_v21, %v9640_v19  ;;  %v9657_v19 = vsub.s32 1, %v9654_v26  ;;  %v9660_v28 = vsub.s32 0, %v9654_v26 }
 0x4cb   :  { %v9663_v29 = vsub.s32 2, %v9654_v26  ;;  %vm770_vm2 = vcmp.ge.s32.totalorder %v769_v45, 5 }
 0x4cc   :  { %943 = vmatmul.mubr.f32.vlgmr.msra.gmra.mrb[0].mxu1 %v811_v22  ;;  %7186 = vmatprep.mubr.f32.mxu0 %v811_v22  ;;  %v804_v24 = vmul.f32 %v6626_v16, %v796_v23  ;;  %v870_v30 = vrot.slane %v861_v27, %v9657_v19  ;;  %v866_v32 = vrot.slane %v861_v27, %v9660_v28  ;;  %v9697_v46 = vsel %vm770_vm2, -1e+30, %v9118_v57 }
 0x4cd   :  { %948 = vmatprep.mubr.f32.mxu1 %v9118_v57  ;;  %v874_v34 = vrot.slane %v861_v27, %v9663_v29 }
 0x4ce   :  { %v812_v25 = vadd.f32 %v6627_v18, %v804_v24 }
 0x4d0   :  { %949 = vmatmul.mubr.f32.gmra.mrb[2].mxu1 %v812_v25  ;;  %7187 = vmatmul.mubr.f32.vlgmr.msra.gmra.mrb[12].mxu0 %v812_v25 }
 0x4d1   :  { %7191 = vmatprep.mubr.msk.f32.mxu0 %vm9119_vm0, %v9118_v57  ;;  %7196 = vmatprep.mubr.msk.f32.mxu1 %vm9119_vm0, %v9118_v57 }
 0x59f   :  { %v944_v31 = vpop.f32.mrb[0].mxu1 }
 0x5a0   :  { %v946_v33 = vpop.f32.mrb[1].mxu1  ;;  %v9672_v38 = vadd.f32 %v944_v31, %v866_v32 }
 0x5a1   :  { %v9668_v35 = vadd.f32 %v946_v33, %v870_v30 }
 0x5a3   :  { %v950_v36 = vpop.f32.mrb[2].mxu1  ;;  %v7188_v37 = vpop.f32.mrb[12].mxu0  ;;  %7190 = vmatpush3.xpose.msk.msra.mxu0 %vm1046_vm1, %v9668_v35 }
 0x5a4   :  { %v9674_v39 = vadd.f32 %v7188_v37, %v874_v34  ;;  %v952_v40 = vpop.f32.mrb[3].mxu1  ;;  %v1021_v41 = vpop.f32.mrb[13].mxu0  ;;  %7224 = vmatprep.subr.mxu0 %v9118_v57  ;;  %v9685_v43 = vadd.f32 %v950_v36, %v866_v32 }
 0x5a5   :  { %v9677_v42 = vadd.f32 %v952_v40, %v870_v30  ;;  %v9688_v44 = vadd.f32 %v1021_v41, %v874_v34 }
 0x5a6   :  { %7192 = vmatmul.mubr.msk.f32.vlgmr.msra.gmra.mrb[14].mxu0 %vm1046_vm1, %v9672_v38 }
 0x5a7   :  { %7195 = vmatpush3.xpose.msk.msra.mxu1 %vm1046_vm1, %v9677_v42  ;;  %7226 = vmatprep.mubr.msk.f32.mxu0 %vm9119_vm0, %v9118_v57 }
 0x5a8   :  { %7199 = vmatprep.subr.mxu1 %v9118_v57 }
 0x5aa   :  { %7197 = vmatmul.mubr.msk.f32.vlgmr.msra.gmra.mrb[4].mxu1 %vm1046_vm1, %v9685_v43 }
 0x5ab   :  { %7200 = vmatpush3.msra.mxu1 %v9688_v44  ;;  %7201 = vmatprep.mubr.msk.f32.mxu1 %vm9119_vm0, %v9118_v57 }
 0x5ac   :  { %7204 = vmatprep.subr.mxu1 %v9118_v57 }
 0x679   :  { %v1119_v47 = vpop.f32.mrb[14].mxu0 }
 0x67a   :  { %v1199_v48 = vmul.f32 0.17677669, %v1119_v47  ;;  %v7193_v49 = vpop.f32.mrb[15].mxu0 }
 0x67c   :  { %v1201_v51 = vadd.f32 %v1199_v48, %v9697_v46 }
 0x67d   :  { %v1195_v53 = vpop.f32.mrb[4].mxu1 }
 0x67e   :  { %v1200_v54 = vmul.f32 0.17677669, %v1195_v53  ;;  %v7198_v55 = vpop.f32.mrb[5].mxu1  ;;  %v1204_v56 = vsel %vm1203_vm3, %v1201_v51, -inf }
 0x67f   :  { %1205 = vmax.xlane.f32.xlu0 %v1204_v56  ;;  %v1035_v55 = vld [vmem:[#allocation14 + $0x28] sm:$0xff] }
 0x680   :  { %v1202_v58 = vadd.f32 %v1200_v54, %v9697_v46  ;;  %v1034_v54 = vld [vmem:[#allocation14 + $0x20] sm:$0xff] }
 0x681   :  { %v7632_v56 = vpack.c.bf16 %v1035_v55, %v1034_v54 }
 0x682   :  { %v1207_v59 = vsel %vm1203_vm3, %v1202_v58, -inf }
 0x683   :  { %1208 = vmax.xlane.f32.xlu1 %v1207_v59  ;;  %v1030_v59 = vld [vmem:[#allocation14] sm:$0xff] }
 0x694   :  { %1372 = vrot.lane.b32.xlu1 %v9672_v38, %s9120_s19 }
 0x698   :  { %1452 = vrot.lane.b32.xlu1 %v9677_v42, %s9120_s19 }
 0x70c   :  { %v1206_v60 = vpop.xlane.xlu0 %1205 }
 0x70d   :  { %v1210_v61 = vsub.f32 %v1201_v51, %v1206_v60  ;;  %v1031_v60 = vld [vmem:[#allocation14 + $0x8] sm:$0xff] }
 0x70f   :  { %v1212_v62 = vmul.f32 1.442695, %v1210_v61 }
 0x710   :  { %v1209_v63 = vpop.xlane.xlu1 %1208 }
 0x711   :  { %8305 = vpow2.f32 %v1212_v62  ;;  %v1211_v0 = vsub.f32 %v1202_v58, %v1209_v63  ;;  %v7640_v62 = vpack.c.bf16 %v1031_v60, %v1030_v59 }
 0x713   :  { %v1214_v1 = vmul.f32 1.442695, %v1211_v0  ;;  %v1032_v0 = vld [vmem:[#allocation14 + $0x10] sm:$0xff] }
 0x714   :  { %v1373_v6 = vpop.permute.xlu1 %1372 }
 0x715   :  { %8307 = vpow2.f32 %v1214_v1  ;;  %v1033_v1 = vld [vmem:[#allocation14 + $0x18] sm:$0xff] }
 0x718   :  { %v1453_v7 = vpop.permute.xlu1 %1452 }
 0x71b   :  { %v8306_v2 = vpop.eup %8305 }
 0x71c   :  { %v1216_v3 = vsel %vm1203_vm3, %v8306_v2, 0.0 }
 0x71d   :  { %1217 = vadd.xlane.f32.xlu0 %v1216_v3 }
 0x71f   :  { %v8308_v4 = vpop.eup %8307 }
 0x720   :  { %v1219_v5 = vsel %vm1203_vm3, %v8308_v4, 0.0 }
 0x721   :  { %1220 = vadd.xlane.f32.xlu1 %v1219_v5  ;;  %v1036_v5 = vld [vmem:[#allocation14 + $0x30] sm:$0xff] }
 0x732   :  { %1450 = vrot.lane.b32.xlu1 %v9685_v43, %s9120_s19 }
 0x733   :  { %1374 = vrot.lane.b32.xlu0 %v9668_v35, %s9120_s19 }
 0x7aa   :  { %v1218_v8 = vpop.xlane.xlu0 %1217 }
 0x7ab   :  { %8309 = vrcp.f32 %v1218_v8 }
 0x7ae   :  { %v1221_v9 = vpop.xlane.xlu1 %1220  ;;  %v1375_v14 = vpop.permute.xlu0 %1374 }
 0x7af   :  { %8311 = vrcp.f32 %v1221_v9 }
 0x7b2   :  { %v1451_v16 = vpop.permute.xlu1 %1450 }
 0x7b5   :  { %v8310_v10 = vpop.eup %8309 }
 0x7b6   :  { %v1223_v11 = vmul.f32 %v8310_v10, %v8306_v2 }
 0x7b8   :  { %7202 = vmatmul.mubr.msk.f32.vlgmr.msra.gmra.mrb[6].mxu1 %vm1203_vm3, %v1223_v11 }
 0x7b9   :  { %v8312_v12 = vpop.eup %8311  ;;  %7205 = vmatpush3.msra.mxu1 %v9674_v39  ;;  %7206 = vmatprep.mubr.msk.f32.mxu1 %vm9119_vm0, %v9118_v57 }
 0x7ba   :  { %v1225_v13 = vmul.f32 %v8312_v12, %v8308_v4  ;;  %7209 = vmatprep.subr.mxu1 %v9118_v57  ;;  %v7644_v4 = vpack.c.bf16 %v1033_v1, %v1032_v0  ;;  %v1040_v1 = vld [vmem:[#allocation14 + $0x50] sm:$0xff] }
 0x7bc   :  { %7207 = vmatmul.mubr.msk.f32.vlgmr.msra.gmra.mrb[8].mxu1 %vm1203_vm3, %v1225_v13 }
 0x7bd   :  { %7211 = vmatprep.mubr.msk.f32.mxu1 %vm9119_vm0, %v9118_v57 }
 0x7c0   :  { %7210 = vmatpush3.xpose.msk.msra.mxu1 %vm1046_vm1, %v1375_v14 }
 0x7c1   :  { %7214 = vmatprep.subr.mxu1 %v9118_v57 }
 0x7c3   :  { %7212 = vmatmul.mubr.msk.f32.vlgmr.msra.gmra.mrb[10].mxu1 %vm1046_vm1, %v1373_v6  ;;  %v1037_v6 = vld [vmem:[#allocation14 + $0x38] sm:$0xff] }
 0x7c4   :  { %7215 = vmatpush3.xpose.msk.msra.mxu1 %vm1046_vm1, %v1453_v7  ;;  %7216 = vmatprep.mubr.msk.f32.mxu1 %vm9119_vm0, %v9118_v57  ;;  %v7636_v9 = vpack.c.bf16 %v1037_v6, %v1036_v5 }
 0x7c5   :  { %7219 = vmatprep.subr.mxu1 %v9118_v57 }
 0x7c7   :  { %7217 = vmatmul.mubr.msk.f32.vlgmr.msra.gmra.mrb[12].mxu1 %vm1046_vm1, %v1451_v16 }
 0x7c8   :  { %7221 = vmatprep.mubr.msk.f32.mxu1 %vm9119_vm0, %v9118_v57 }
 0x88b   :  { %v1295_v17 = vpop.f32.mrb[6].mxu1 }
 0x88c   :  { %v7203_v18 = vpop.f32.mrb[7].mxu1 }
 0x88f   :  { %v9731_v20 = vpop.f32.mrb[8].mxu1 }
 0x890   :  { %v7208_v21 = vpop.f32.mrb[9].mxu1 }
 0x896   :  { %v1446_v22 = vpop.f32.mrb[10].mxu1 }
 0x897   :  { %v1528_v23 = vmul.f32 0.17677669, %v1446_v22  ;;  %v7213_v24 = vpop.f32.mrb[11].mxu1 }
 0x899   :  { %v1530_v25 = vadd.f32 %v1528_v23, %v9697_v46 }
 0x89a   :  { %v1524_v15 = vpop.f32.mrb[12].mxu1 }
 0x89b   :  { %v1529_v27 = vmul.f32 0.17677669, %v1524_v15  ;;  %v7218_v30 = vpop.f32.mrb[13].mxu1  ;;  %v1532_v31 = vsel %vm1203_vm3, %v1530_v25, -inf }
 0x89c   :  { %1533 = vmax.xlane.f32.xlu0 %v1532_v31 }
 0x89d   :  { %v1531_v32 = vadd.f32 %v1529_v27, %v9697_v46 }
 0x89f   :  { %v1535_v33 = vsel %vm1203_vm3, %v1531_v32, -inf }
 0x8a0   :  { %1536 = vmax.xlane.f32.xlu1 %v1535_v33 }
 0x8b1   :  { %1632 = vrot.lane.b32.xlu1 %v9674_v39, %s9120_s19 }
 0x8b5   :  { %1872 = vrot.lane.b32.xlu1 %v9668_v35, %s9109_s20 }
 0x8b9   :  { %1870 = vrot.lane.b32.xlu1 %v9672_v38, %s9109_s20 }
 0x8bd   :  { %1948 = vrot.lane.b32.xlu1 %v9685_v43, %s9109_s20 }
 0x929   :  { %v1534_v34 = vpop.xlane.xlu0 %1533 }
 0x92a   :  { %v1538_v36 = vsub.f32 %v1530_v25, %v1534_v34 }
 0x92c   :  { %v1540_v37 = vmul.f32 1.442695, %v1538_v36 }
 0x92d   :  { %v1537_v40 = vpop.xlane.xlu1 %1536 }
 0x92e   :  { %8313 = vpow2.f32 %v1540_v37  ;;  %v1539_v41 = vsub.f32 %v1531_v32, %v1537_v40 }
 0x930   :  { %v1542_v45 = vmul.f32 1.442695, %v1539_v41 }
 0x931   :  { %v1633_v47 = vpop.permute.xlu1 %1632 }
 0x932   :  { %8315 = vpow2.f32 %v1542_v45  ;;  %7225 = vmatpush3.msra.mxu0 %v1633_v47 }
 0x933   :  { %7633 = vmatprep.subr.bf16.mxu0 %v7632_v56 }
 0x935   :  { %v1873_v10 = vpop.permute.xlu1 %1872 }
 0x938   :  { %v8314_v48 = vpop.eup %8313 }
 0x939   :  { %v1544_v49 = vsel %vm1203_vm3, %v8314_v48, 0.0  ;;  %v1871_v16 = vpop.permute.xlu1 %1870 }
 0x93a   :  { %1545 = vadd.xlane.f32.xlu0 %v1544_v49 }
 0x93c   :  { %v8316_v51 = vpop.eup %8315 }
 0x93d   :  { %v1547_v53 = vsel %vm1203_vm3, %v8316_v51, 0.0  ;;  %v1949_v18 = vpop.permute.xlu1 %1948 }
 0x93e   :  { %1548 = vadd.xlane.f32.xlu0 %v1547_v53 }
 0x954   :  { %1555 = vrot.lane.b32.xlu0 %v9688_v44, %s9120_s19 }
 0x958   :  { %1950 = vrot.lane.b32.xlu0 %v9677_v42, %s9109_s20 }
 0x9c7   :  { %v1546_v58 = vpop.xlane.xlu0 %1545 }
 0x9c8   :  { %8317 = vrcp.f32 %v1546_v58 }
 0x9cb   :  { %v1549_v61 = vpop.xlane.xlu0 %1548 }
 0x9cc   :  { %8319 = vrcp.f32 %v1549_v61 }
 0x9cf   :  { %v1556_v63 = vpop.permute.xlu0 %1555 }
 0x9d0   :  { %7220 = vmatpush3.msra.mxu1 %v1556_v63 }
 0x9d1   :  { %7641 = vmatprep.subr.bf16.mxu1 %v7640_v62 }
 0x9d2   :  { %v8318_v2 = vpop.eup %8317 }
 0x9d3   :  { %v1551_v3 = vmul.f32 %v8318_v2, %v8314_v48  ;;  %v1041_v2 = vld [vmem:[#allocation14 + $0x58] sm:$0xff] }
 0x9d5   :  { %7222 = vmatmul.mubr.msk.f32.vlgmr.msra.gmra.mrb[14].mxu1 %vm1203_vm3, %v1551_v3  ;;  %v7652_v3 = vpack.c.bf16 %v1041_v2, %v1040_v1  ;;  %v2756_v1 = vld [vmem:[#allocation20 + $0x8] sm:$0xff] }
 0x9d6   :  { %v8320_v7 = vpop.eup %8319  ;;  %7643 = vmatpush3.bf16.msra.mxu1 %v7640_v62  ;;  %7248 = vmatprep.mubr.msk.f32.mxu1 %vm1046_vm1, %v1295_v17  ;;  %v1951_v17 = vpop.permute.xlu0 %1950  ;;  %v2760_v2 = vld [vmem:[#allocation20 + $0x28] sm:$0xff] }
 0x9d7   :  { %v1553_v8 = vmul.f32 %v8320_v7, %v8316_v51  ;;  %7645 = vmatprep.subr.bf16.mxu1 %v7644_v4 }
 0x9d9   :  { %7227 = vmatmul.mubr.msk.f32.vlgmr.msra.gmra.mrb[16].mxu0 %vm1203_vm3, %v1553_v8 }
 0x9da   :  { %7647 = vmatpush3.bf16.msra.mxu1 %v7644_v4  ;;  %7635 = vmatpush3.bf16.msra.mxu0 %v7632_v56 }
 0x9db   :  { %7637 = vmatprep.subr.bf16.mxu0 %v7636_v9 }
 0x9dd   :  { %7249 = vmatmul.mubr.msk.f32.vlgmr.msra.gmra.mrb[16].mxu1 %vm1046_vm1, %v9731_v20 }
 0x9de   :  { %7639 = vmatpush3.bf16.msra.mxu0 %v7636_v9 }
 0x9df   :  { %7251 = vmatprep.subr.mxu0 %v9118_v57 }
 0xaa8   :  { %v1627_v11 = vpop.f32.mrb[14].mxu1 }
 0xaa9   :  { %v7223_v12 = vpop.f32.mrb[15].mxu1  ;;  %7237 = vmatprep.mubr.msk.f32.mxu0 %vm1046_vm1, %v1627_v11 }
 0xaac   :  { %v1704_v13 = vpop.f32.mrb[16].mxu0 }
 0xaad   :  { %v7228_v14 = vpop.f32.mrb[17].mxu0  ;;  %7238 = vmatmul.mubr.msk.f32.vlgmr.msra.gmra.mrb[18].mxu0 %vm1046_vm1, %v1704_v13 }
 0xaae   :  { %7252 = vmatpush3.xpose.msk.msra.mxu0 %vm1046_vm1, %v1873_v10  ;;  %7253 = vmatprep.mubr.msk.f32.mxu0 %vm9119_vm0, %v9118_v57 }
 0xaaf   :  { %7256 = vmatprep.subr.mxu0 %v9118_v57 }
 0xab1   :  { %7254 = vmatmul.mubr.msk.f32.vlgmr.msra.gmra.mrb[20].mxu0 %vm1046_vm1, %v1871_v16 }
 0xab2   :  { %7257 = vmatpush3.xpose.msk.msra.mxu0 %vm1046_vm1, %v1951_v17  ;;  %7258 = vmatprep.mubr.msk.f32.mxu0 %vm9119_vm0, %v9118_v57 }
 0xab3   :  { %7261 = vmatprep.subr.mxu0 %v9118_v57 }
 0xab5   :  { %7259 = vmatmul.mubr.msk.f32.vlgmr.msra.gmra.mrb[22].mxu0 %vm1046_vm1, %v1949_v18 }
 0xab6   :  { %7263 = vmatprep.mubr.msk.f32.mxu0 %vm9119_vm0, %v9118_v57 }
 0xb80   :  { %v9771_v20 = vpop.f32.mrb[18].mxu0 }
 0xb81   :  { %v9773_v21 = vpop.f32.mrb[19].mxu0 }
 0xb84   :  { %v1944_v22 = vpop.f32.mrb[20].mxu0 }
 0xb85   :  { %v2026_v23 = vmul.f32 0.17677669, %v1944_v22  ;;  %v7255_v24 = vpop.f32.mrb[21].mxu0 }
 0xb87   :  { %v2028_v25 = vadd.f32 %v2026_v23, %v9697_v46 }
 0xb88   :  { %v2022_v15 = vpop.f32.mrb[22].mxu0 }
 0xb89   :  { %v2027_v27 = vmul.f32 0.17677669, %v2022_v15  ;;  %v7260_v30 = vpop.f32.mrb[23].mxu0  ;;  %v2030_v31 = vsel %vm1203_vm3, %v2028_v25, -inf }
 0xb8a   :  { %2031 = vmax.xlane.f32.xlu0 %v2030_v31 }
 0xb8b   :  { %v2029_v32 = vadd.f32 %v2027_v27, %v9697_v46 }
 0xb8d   :  { %v2033_v33 = vsel %vm1203_vm3, %v2029_v32, -inf }
 0xb8e   :  { %2034 = vmax.xlane.f32.xlu1 %v2033_v33 }
 0xb9f   :  { %2128 = vrot.lane.b32.xlu1 %v9674_v39, %s9109_s20 }
 0xba3   :  { %2289 = vrot.lane.b32.xlu1 %v9668_v35, %s9090_s9 }
 0xba7   :  { %2287 = vrot.lane.b32.xlu1 %v9672_v38, %s9090_s9  ;;  %v1038_v38 = vld [vmem:[#allocation14 + $0x40] sm:$0xff] }
 0xbab   :  { %2365 = vrot.lane.b32.xlu1 %v9685_v43, %s9090_s9  ;;  %v1039_v43 = vld [vmem:[#allocation14 + $0x48] sm:$0xff] }
 0xbac   :  { %v7648_v51 = vpack.c.bf16 %v1039_v43, %v1038_v38  ;;  %v1045_v38 = vld [vmem:[#allocation14 + $0x78] sm:$0xff] }
 0xbae   :  { %7649 = vmatprep.subr.bf16.mxu1 %v7648_v51 }
 0xbaf   :  { %7651 = vmatpush3.bf16.msra.mxu1 %v7648_v51 }
 0xbb0   :  { %7653 = vmatprep.subr.bf16.mxu1 %v7652_v3 }
 0xbb3   :  { %7655 = vmatpush3.bf16.msra.mxu1 %v7652_v3  ;;  %v2758_v3 = vld [vmem:[#allocation20 + $0x18] sm:$0xff] }
 0xbb4   :  { %7292 = vmatprep.subr.mxu1 %v9118_v57 }
 0xc17   :  { %v2032_v34 = vpop.xlane.xlu0 %2031 }
 0xc18   :  { %v2036_v36 = vsub.f32 %v2028_v25, %v2032_v34 }
 0xc1a   :  { %v2038_v37 = vmul.f32 1.442695, %v2036_v36  ;;  %v1042_v36 = vld [vmem:[#allocation14 + $0x60] sm:$0xff] }
 0xc1b   :  { %v2035_v40 = vpop.xlane.xlu1 %2034 }
 0xc1c   :  { %8321 = vpow2.f32 %v2038_v37  ;;  %v2037_v41 = vsub.f32 %v2029_v32, %v2035_v40  ;;  %v1043_v37 = vld [vmem:[#allocation14 + $0x68] sm:$0xff] }
 0xc1e   :  { %v2040_v45 = vmul.f32 1.442695, %v2037_v41  ;;  %v7656_v41 = vpack.c.bf16 %v1043_v37, %v1042_v36  ;;  %v2777_v36 = vld [vmem:[#allocation20 + $0xb0] sm:$0xff] }
 0xc1f   :  { %v2129_v56 = vpop.permute.xlu1 %2128 }
 0xc20   :  { %8323 = vpow2.f32 %v2040_v45 }
 0xc26   :  { %v8322_v47 = vpop.eup %8321 }
 0xc27   :  { %v2042_v48 = vsel %vm1203_vm3, %v8322_v47, 0.0 }
 0xc28   :  { %2043 = vadd.xlane.f32.xlu0 %v2042_v48 }
 0xc2a   :  { %v8324_v49 = vpop.eup %8323 }
 0xc2b   :  { %v2045_v35 = vsel %vm1203_vm3, %v8324_v49, 0.0 }
 0xc2c   :  { %2046 = vadd.xlane.f32.xlu0 %v2045_v35 }
 0xc42   :  { %2052 = vrot.lane.b32.xlu0 %v9688_v44, %s9109_s20 }
 0xc46   :  { %2367 = vrot.lane.b32.xlu0 %v9677_v42, %s9090_s9  ;;  %v2290_v42 = vpop.permute.xlu1 %2289 }
 0xc4a   :  { %v2288_v62 = vpop.permute.xlu1 %2287 }
 0xc4e   :  { %v2366_v0 = vpop.permute.xlu1 %2365 }
 0xcb5   :  { %v2044_v53 = vpop.xlane.xlu0 %2043 }
 0xcb6   :  { %8325 = vrcp.f32 %v2044_v53 }
 0xcb9   :  { %v2047_v54 = vpop.xlane.xlu0 %2046 }
 0xcba   :  { %8327 = vrcp.f32 %v2047_v54 }
 0xcbd   :  { %v2053_v55 = vpop.permute.xlu0 %2052 }
 0xcbe   :  { %7262 = vmatpush3.msra.mxu0 %v2053_v55 }
 0xcbf   :  { %7266 = vmatprep.subr.mxu0 %v9118_v57 }
 0xcc0   :  { %v8326_v58 = vpop.eup %8325 }
 0xcc1   :  { %v2049_v59 = vmul.f32 %v8326_v58, %v8322_v47  ;;  %v2368_v63 = vpop.permute.xlu0 %2367 }
 0xcc3   :  { %7264 = vmatmul.mubr.msk.f32.vlgmr.msra.gmra.mrb[24].mxu0 %vm1203_vm3, %v2049_v59 }
 0xcc4   :  { %v8328_v60 = vpop.eup %8327  ;;  %7267 = vmatpush3.msra.mxu0 %v2129_v56  ;;  %7268 = vmatprep.mubr.msk.f32.mxu0 %vm9119_vm0, %v9118_v57 }
 0xcc5   :  { %v2051_v61 = vmul.f32 %v8328_v60, %v8324_v49  ;;  %7282 = vmatprep.subr.mxu0 %v9118_v57 }
 0xcc7   :  { %7269 = vmatmul.mubr.msk.f32.vlgmr.msra.gmra.mrb[26].mxu0 %vm1203_vm3, %v2051_v61 }
 0xcc8   :  { %7284 = vmatprep.mubr.msk.f32.mxu0 %vm9119_vm0, %v9118_v57 }
 0xccb   :  { %7283 = vmatpush3.xpose.msk.msra.mxu0 %vm1046_vm1, %v2290_v42  ;;  %v6660_v42 = vld [vmem:[#allocation16] ss:$0 sm:$0xff] }
 0xccc   :  { %7287 = vmatprep.subr.mxu0 %v9118_v57 }
 0xcce   :  { %7285 = vmatmul.mubr.msk.f32.vlgmr.msra.gmra.mrb[28].mxu0 %vm1046_vm1, %v2288_v62 }
 0xccf   :  { %7288 = vmatpush3.xpose.msk.msra.mxu0 %vm1046_vm1, %v2368_v63  ;;  %7289 = vmatprep.mubr.msk.f32.mxu0 %vm9119_vm0, %v9118_v57 }
 0xcd0   :  { %7297 = vmatprep.subr.mxu0 %v9118_v57 }
 0xcd2   :  { %7290 = vmatmul.mubr.msk.f32.vlgmr.msra.gmra.mrb[30].mxu0 %vm1046_vm1, %v2366_v0 }
 0xcd3   :  { %7299 = vmatprep.mubr.msk.f32.mxu0 %vm9119_vm0, %v9118_v57 }
 0xd96   :  { %v2124_v4 = vpop.f32.mrb[24].mxu0 }
 0xd97   :  { %v7265_v5 = vpop.f32.mrb[25].mxu0  ;;  %7279 = vmatprep.mubr.msk.f32.mxu1 %vm1046_vm1, %v2124_v4  ;;  %v2762_v4 = vld [vmem:[#allocation20 + $0x38] sm:$0xff] }
 0xd98   :  { %v2755_v5 = vld [vmem:[#allocation20] sm:$0xff] }
 0xd9a   :  { %v2200_v6 = vpop.f32.mrb[26].mxu0 }
 0xd9b   :  { %v7270_v7 = vpop.f32.mrb[27].mxu0  ;;  %7280 = vmatmul.mubr.msk.f32.vlgmr.msra.gmra.mrb[16].mxu1 %vm1046_vm1, %v2200_v6  ;;  %v7696_v6 = vpack.c.bf16 %v2762_v4, %v2758_v3  ;;  %v2790_v3 = vld [vmem:[#allocation20 + $0x118] sm:$0xff] }
 0xd9c   :  { %7294 = vmatprep.mubr.msk.f32.mxu1 %vm9119_vm0, %v9118_v57  ;;  %v2794_v4 = vld [vmem:[#allocation20 + $0x138] sm:$0xff] }
 0xda1   :  { %v2361_v8 = vpop.f32.mrb[28].mxu0 }
 0xda2   :  { %v2443_v9 = vmul.f32 0.17677669, %v2361_v8  ;;  %v7286_v10 = vpop.f32.mrb[29].mxu0  ;;  %v2761_v8 = vld [vmem:[#allocation20 + $0x30] sm:$0xff] }
 0xda3   :  { %v2768_v10 = vld [vmem:[#allocation20 + $0x68] sm:$0xff] }
 0xda4   :  { %v2445_v11 = vadd.f32 %v2443_v9, %v9697_v46 }
 0xda5   :  { %v2439_v12 = vpop.f32.mrb[30].mxu0 }
 0xda6   :  { %v2444_v13 = vmul.f32 0.17677669, %v2439_v12  ;;  %v7291_v14 = vpop.f32.mrb[31].mxu0  ;;  %v2447_v16 = vsel %vm1203_vm3, %v2445_v11, -inf  ;;  %v2770_v12 = vld [vmem:[#allocation20 + $0x78] sm:$0xff] }
 0xda7   :  { %2448 = vmax.xlane.f32.xlu0 %v2447_v16  ;;  %v2763_v16 = vld [vmem:[#allocation20 + $0x40] sm:$0xff] }
 0xda8   :  { %v2446_v17 = vadd.f32 %v2444_v13, %v9697_v46 }
 0xdaa   :  { %v2450_v18 = vsel %vm1203_vm3, %v2446_v17, -inf }
 0xdab   :  { %2451 = vmax.xlane.f32.xlu1 %v2450_v18  ;;  %v2765_v18 = vld [vmem:[#allocation20 + $0x50] sm:$0xff] }
 0xdbc   :  { %2545 = vrot.lane.b32.xlu1 %v9674_v39, %s9090_s9 }
 0xe34   :  { %v2449_v22 = vpop.xlane.xlu0 %2448 }
 0xe35   :  { %v2453_v23 = vsub.f32 %v2445_v11, %v2449_v22  ;;  %v2766_v11 = vld [vmem:[#allocation20 + $0x58] sm:$0xff] }
 0xe36   :  { %v7700_v14 = vpack.c.bf16 %v2770_v12, %v2766_v11  ;;  %v2798_v11 = vld [vmem:[#allocation20 + $0x158] sm:$0xff] }
 0xe37   :  { %v2455_v24 = vmul.f32 1.442695, %v2453_v23  ;;  %v2769_v23 = vld [vmem:[#allocation20 + $0x70] sm:$0xff]  ;;  %v2802_v12 = vld [vmem:[#allocation20 + $0x178] sm:$0xff] }
 0xe38   :  { %v2452_v25 = vpop.xlane.xlu1 %2451 }
 0xe39   :  { %8329 = vpow2.f32 %v2455_v24  ;;  %v2454_v15 = vsub.f32 %v2446_v17, %v2452_v25  ;;  %v2767_v17 = vld [vmem:[#allocation20 + $0x60] sm:$0xff]  ;;  %v2772_v24 = vld [vmem:[#allocation20 + $0x88] sm:$0xff] }
 0xe3a   :  { %v7670_v22 = vpack.c.bf16 %v2767_v17, %v2763_v16  ;;  %v2776_v25 = vld [vmem:[#allocation20 + $0xa8] sm:$0xff]  ;;  %v2795_v16 = vld [vmem:[#allocation20 + $0x140] sm:$0xff] }
 0xe3b   :  { %v2457_v27 = vmul.f32 1.442695, %v2454_v15  ;;  %v7702_v15 = vpack.c.bf16 %v2769_v23, %v2765_v18  ;;  %v2799_v17 = vld [vmem:[#allocation20 + $0x160] sm:$0xff]  ;;  %v2797_v18 = vld [vmem:[#allocation20 + $0x150] sm:$0xff] }
 0xe3c   :  { %v2546_v30 = vpop.permute.xlu1 %2545  ;;  %v2801_v23 = vld [vmem:[#allocation20 + $0x170] sm:$0xff] }
 0xe3d   :  { %8331 = vpow2.f32 %v2457_v27  ;;  %7298 = vmatpush3.msra.mxu0 %v2546_v30  ;;  %v7672_v27 = vpack.c.bf16 %v2776_v25, %v2772_v24  ;;  %v2774_v30 = vld [vmem:[#allocation20 + $0x98] sm:$0xff]  ;;  %v2804_v24 = vld [vmem:[#allocation20 + $0x188] sm:$0xff] }
 0xe3e   :  { %v2808_v25 = vld [vmem:[#allocation20 + $0x1a8] sm:$0xff] }
 0xe43   :  { %v8330_v31 = vpop.eup %8329 }
 0xe44   :  { %v2459_v32 = vsel %vm1203_vm3, %v8330_v31, 0.0 }
 0xe45   :  { %2460 = vadd.xlane.f32.xlu0 %v2459_v32  ;;  %v2771_v32 = vld [vmem:[#allocation20 + $0x80] sm:$0xff] }
 0xe47   :  { %v8332_v33 = vpop.eup %8331 }
 0xe48   :  { %v2462_v34 = vsel %vm1203_vm3, %v8332_v33, 0.0 }
 0xe49   :  { %2463 = vadd.xlane.f32.xlu0 %v2462_v34  ;;  %v2775_v34 = vld [vmem:[#allocation20 + $0xa0] sm:$0xff] }
 0xe4a   :  { %v7674_v37 = vpack.c.bf16 %v2775_v34, %v2771_v32  ;;  %v2803_v32 = vld [vmem:[#allocation20 + $0x180] sm:$0xff] }
 0xe4b   :  { %v2807_v34 = vld [vmem:[#allocation20 + $0x1a0] sm:$0xff] }
 0xe5f   :  { %2469 = vrot.lane.b32.xlu0 %v9688_v44, %s9090_s9  ;;  %v1044_v44 = vld [vmem:[#allocation14 + $0x70] sm:$0xff] }
 0xe60   :  { %v7660_v43 = vpack.c.bf16 %v1045_v38, %v1044_v44 }
 0xed2   :  { %v2461_v39 = vpop.xlane.xlu0 %2460 }
 0xed3   :  { %8333 = vrcp.f32 %v2461_v39  ;;  %v2773_v39 = vld [vmem:[#allocation20 + $0x90] sm:$0xff] }
 0xed6   :  { %v2464_v40 = vpop.xlane.xlu0 %2463 }
 0xed7   :  { %8335 = vrcp.f32 %v2464_v40  ;;  %v7706_v40 = vpack.c.bf16 %v2777_v36, %v2773_v39  ;;  %v2805_v39 = vld [vmem:[#allocation20 + $0x190] sm:$0xff] }
 0xed8   :  { %v2809_v36 = vld [vmem:[#allocation20 + $0x1b0] sm:$0xff] }
 0xeda   :  { %v2470_v45 = vpop.permute.xlu0 %2469 }
 0xedb   :  { %7293 = vmatpush3.msra.mxu1 %v2470_v45 }
 0xedc   :  { %7657 = vmatprep.subr.bf16.mxu1 %v7656_v41 }
 0xedd   :  { %v8334_v47 = vpop.eup %8333 }
 0xede   :  { %v2466_v48 = vmul.f32 %v8334_v47, %v8330_v31  ;;  %v2778_v31 = vld [vmem:[#allocation20 + $0xb8] sm:$0xff] }
 0xee0   :  { %7295 = vmatmul.mubr.msk.f32.vlgmr.msra.gmra.mrb[18].mxu1 %vm1203_vm3, %v2466_v48 }
 0xee1   :  { %v8336_v49 = vpop.eup %8335  ;;  %7659 = vmatpush3.bf16.msra.mxu1 %v7656_v41 }
 0xee2   :  { %v2468_v35 = vmul.f32 %v8336_v49, %v8332_v33  ;;  %7661 = vmatprep.subr.bf16.mxu1 %v7660_v43  ;;  %v7704_v33 = vpack.c.bf16 %v2778_v31, %v2774_v30  ;;  %v2806_v30 = vld [vmem:[#allocation20 + $0x198] sm:$0xff] }
 0xee3   :  { %v2810_v31 = vld [vmem:[#allocation20 + $0x1b8] sm:$0xff] }
 0xee4   :  { %7300 = vmatmul.mubr.msk.f32.vlgmr.msra.gmra.mrb[32].mxu0 %vm1203_vm3, %v2468_v35 }
 0xee5   :  { %2905 = vmatprep.mubr.f32.mxu0 %v9118_v57  ;;  %7663 = vmatpush3.bf16.msra.mxu1 %v7660_v43  ;;  %v2780_v43 = vld [vmem:[#allocation20 + $0xc8] sm:$0xff] }
 0xee6   :  { %7697 = vmatprep.subr.bf16.mxu1 %v7696_v6  ;;  %v7712_v6 = vpack.c.bf16 %v2794_v4, %v2790_v3 }
 0xfb3   :  { %v2541_v51 = vpop.f32.mrb[18].mxu1 }
 0xfb4   :  { %v7296_v53 = vpop.f32.mrb[19].mxu1  ;;  %7310 = vmatprep.mubr.msk.f32.mxu1 %vm1046_vm1, %v2541_v51  ;;  %v2784_v51 = vld [vmem:[#allocation20 + $0xe8] sm:$0xff] }
 0xfb5   :  { %v2782_v53 = vld [vmem:[#allocation20 + $0xd8] sm:$0xff] }
 0xfb7   :  { %v2617_v54 = vpop.f32.mrb[32].mxu0 }
 0xfb8   :  { %v7301_v55 = vpop.f32.mrb[33].mxu0  ;;  %7311 = vmatmul.mubr.msk.f32.vlgmr.msra.gmra.mrb[16].mxu1 %vm1046_vm1, %v2617_v54  ;;  %v7676_v54 = vpack.c.bf16 %v2784_v51, %v2780_v43  ;;  %v2815_v43 = vld [vmem:[#allocation20 + $0x1e0] sm:$0xff] }
 0xfb9   :  { %2982 = vmatprep.mubr.f32.mxu1 %v9118_v57  ;;  %v2786_v55 = vld [vmem:[#allocation20 + $0xf8] sm:$0xff] }
0x108b   :  { %v7312_v56 = vpop.f32.mrb[16].mxu1 }
0x108c   :  { %v8240_v58 = vadd.f32 %v7312_v56, %v9771_v20  ;;  %v2693_v59 = vpop.f32.mrb[17].mxu1  ;;  %v7664_v20 = vpack.c.bf16 %v2760_v2, %v2756_v1  ;;  %v2779_v56 = vld [vmem:[#allocation20 + $0xc0] sm:$0xff]  ;;  %v2788_v1 = vld [vmem:[#allocation20 + $0x108] sm:$0xff] }
0x108d   :  { %v8241_v60 = vadd.f32 %v2693_v59, %v9773_v21  ;;  %v2759_v21 = vld [vmem:[#allocation20 + $0x20] sm:$0xff]  ;;  %v7708_v59 = vpack.c.bf16 %v2786_v55, %v2782_v53  ;;  %v2792_v2 = vld [vmem:[#allocation20 + $0x128] sm:$0xff]  ;;  %v2813_v53 = vld [vmem:[#allocation20 + $0x1d0] sm:$0xff] }
0x108e   :  { %v2705_v61 = vadd.f32 %v8240_v58, %v9631_v52  ;;  %v7666_v7 = vpack.c.bf16 %v2759_v21, %v2755_v5  ;;  %v2757_v52 = vld [vmem:[#allocation20 + $0x10] sm:$0xff]  ;;  %7665 = vmatprep.subr.bf16.mxu0 %v7664_v20  ;;  %v2783_v58 = vld [vmem:[#allocation20 + $0xe0] sm:$0xff]  ;;  %v7680_v20 = vpack.c.bf16 %v2792_v2, %v2788_v1 }
0x108f   :  { %v2704_v62 = vadd.f32 %v8241_v60, %v9628_v50  ;;  %v2764_v50 = vld [vmem:[#allocation20 + $0x48] sm:$0xff]  ;;  %v7698_v9 = vpack.c.bf16 %v2761_v8, %v2757_v52  ;;  %v7678_v60 = vpack.c.bf16 %v2783_v58, %v2779_v56  ;;  %v2787_v5 = vld [vmem:[#allocation20 + $0x100] sm:$0xff]  ;;  %v2789_v52 = vld [vmem:[#allocation20 + $0x110] sm:$0xff] }
0x1090   :  { %v9836_v63 = vadd.f32 %v6660_v42, %v2705_v61  ;;  %7667 = vmatpush1.bf16.msra.mxu0 %v7666_v7  ;;  %v7668_v13 = vpack.c.bf16 %v2768_v10, %v2764_v50  ;;  %v2785_v61 = vld [vmem:[#allocation20 + $0xf0] sm:$0xff]  ;;  %v2791_v21 = vld [vmem:[#allocation20 + $0x120] sm:$0xff]  ;;  %v2796_v50 = vld [vmem:[#allocation20 + $0x148] sm:$0xff] }
0x1091   :  { %v9838_v0 = vadd.f32 %v6660_v42, %v2704_v62  ;;  %7699 = vmatpush1.bf16.msra.mxu1 %v7698_v9  ;;  %v2781_v42 = vld [vmem:[#allocation20 + $0xd0] sm:$0xff]  ;;  %v7682_v7 = vpack.c.bf16 %v2791_v21, %v2787_v5  ;;  %v2800_v10 = vld [vmem:[#allocation20 + $0x168] sm:$0xff] }
0x1092   :  { %2719 = vadd.xlane.f32.xlu0 %v9836_v63  ;;  %7669 = vmatprep.subr.bf16.mxu0 %v7668_v13  ;;  %v7710_v62 = vpack.c.bf16 %v2785_v61, %v2781_v42  ;;  %v2793_v8 = vld [vmem:[#allocation20 + $0x130] sm:$0xff]  ;;  %v7684_v13 = vpack.c.bf16 %v2800_v10, %v2796_v50  ;;  %v3051_v58 = vld [vmem:[#allocation23 + $0x80] sm:$0xff] }
0x1093   :  { %2717 = vadd.xlane.f32.xlu1 %v9838_v0  ;;  %7701 = vmatprep.subr.bf16.mxu1 %v7700_v14  ;;  %v7714_v9 = vpack.c.bf16 %v2793_v8, %v2789_v52  ;;  %v7716_v14 = vpack.c.bf16 %v2802_v12, %v2798_v11  ;;  %v3084_v61 = vld [vmem:[#allocation23 + $0x188] sm:$0xff]  ;;  %v6662_v52 = vld [vmem:[#allocation19] ss:$0 sm:$0xff]  ;;  %v3067_v11 = vld [vmem:[#allocation23 + $0x100] sm:$0xff] }
0x1094   :  { %7671 = vmatpush1.bf16.msra.mxu0 %v7670_v22  ;;  %v7686_v22 = vpack.c.bf16 %v2799_v17, %v2795_v16  ;;  %v3036_v10 = vld [vmem:[#allocation23 + $0x8] sm:$0xff]  ;;  %v3054_v16 = vld [vmem:[#allocation23 + $0x98] sm:$0xff]  ;;  %v3085_v17 = vld [vmem:[#allocation23 + $0x190] sm:$0xff] }
0x1095   :  { %7703 = vmatpush1.bf16.msra.mxu1 %v7702_v15  ;;  %7673 = vmatprep.subr.bf16.mxu0 %v7672_v27  ;;  %v7718_v15 = vpack.c.bf16 %v2801_v23, %v2797_v18  ;;  %v7688_v27 = vpack.c.bf16 %v2808_v25, %v2804_v24  ;;  %v3068_v12 = vld [vmem:[#allocation23 + $0x108] sm:$0xff]  ;;  %v3086_v18 = vld [vmem:[#allocation23 + $0x198] sm:$0xff] }
0x1096   :  { %7705 = vmatprep.subr.bf16.mxu1 %v7704_v33  ;;  %v7720_v33 = vpack.c.bf16 %v2810_v31, %v2806_v30  ;;  %v7762_v25 = vpack.c.bf16 %v3068_v12, %v3067_v11  ;;  %v7764_v31 = vpack.c.bf16 %v3086_v18, %v3085_v17  ;;  %v3061_v11 = vld [vmem:[#allocation23 + $0xd0] sm:$0xff]  ;;  %v3062_v12 = vld [vmem:[#allocation23 + $0xd8] sm:$0xff] }
0x1097   :  { %v3045_v17 = vld [vmem:[#allocation23 + $0x50] sm:$0xff]  ;;  %v3046_v18 = vld [vmem:[#allocation23 + $0x58] sm:$0xff] }
0x1098   :  { %7675 = vmatpush1.bf16.msra.mxu0 %v7674_v37  ;;  %v7690_v37 = vpack.c.bf16 %v2807_v34, %v2803_v32  ;;  %v3070_v32 = vld [vmem:[#allocation23 + $0x118] sm:$0xff]  ;;  %v3087_v34 = vld [vmem:[#allocation23 + $0x1a0] sm:$0xff] }
0x1099   :  { %7707 = vmatpush1.bf16.msra.mxu1 %v7706_v40  ;;  %7677 = vmatprep.subr.bf16.mxu0 %v7676_v54  ;;  %v2812_v40 = vld [vmem:[#allocation20 + $0x1c8] sm:$0xff]  ;;  %v2817_v54 = vld [vmem:[#allocation20 + $0x1f0] sm:$0xff] }
0x109a   :  { %7709 = vmatprep.subr.bf16.mxu1 %v7708_v59  ;;  %v7726_v56 = vpack.c.bf16 %v2817_v54, %v2813_v53  ;;  %v3052_v59 = vld [vmem:[#allocation23 + $0x88] sm:$0xff]  ;;  %v3057_v53 = vld [vmem:[#allocation23 + $0xb0] sm:$0xff]  ;;  %v3058_v54 = vld [vmem:[#allocation23 + $0xb8] sm:$0xff] }
0x109b   :  { %v7728_v42 = vpack.c.bf16 %v3052_v59, %v3051_v58  ;;  %v3090_v58 = vld [vmem:[#allocation23 + $0x1b8] sm:$0xff]  ;;  %v3041_v59 = vld [vmem:[#allocation23 + $0x30] sm:$0xff] }
0x109c   :  { %7679 = vmatpush1.bf16.msra.mxu0 %v7678_v60  ;;  %v3083_v60 = vld [vmem:[#allocation23 + $0x180] sm:$0xff] }
0x109d   :  { %7711 = vmatpush1.bf16.msra.mxu1 %v7710_v62  ;;  %7681 = vmatprep.subr.bf16.mxu0 %v7680_v20  ;;  %v7760_v62 = vpack.c.bf16 %v3084_v61, %v3083_v60  ;;  %v3042_v60 = vld [vmem:[#allocation23 + $0x38] sm:$0xff] }
0x109e   :  { %7713 = vmatprep.subr.bf16.mxu1 %v7712_v6  ;;  %v7742_v61 = vpack.c.bf16 %v3042_v60, %v3041_v59  ;;  %v9857_v59 = vsub.s32 3, %v9654_v26 }
0x10a0   :  { %7683 = vmatpush1.bf16.msra.mxu0 %v7682_v7  ;;  %v6661_v7 = vld [vmem:[#allocation17] ss:$0 sm:$0xff] }
0x10a1   :  { %7715 = vmatpush1.bf16.msra.mxu1 %v7714_v9  ;;  %7685 = vmatprep.subr.bf16.mxu0 %v7684_v13  ;;  %v3035_v9 = vld [vmem:[#allocation23] sm:$0xff]  ;;  %v3053_v13 = vld [vmem:[#allocation23 + $0x90] sm:$0xff] }
0x10a2   :  { %7717 = vmatprep.subr.bf16.mxu1 %v7716_v14  ;;  %v7730_v24 = vpack.c.bf16 %v3036_v10, %v3035_v9  ;;  %v7732_v30 = vpack.c.bf16 %v3054_v16, %v3053_v13  ;;  %v3076_v9 = vld [vmem:[#allocation23 + $0x148] sm:$0xff]  ;;  %v3093_v13 = vld [vmem:[#allocation23 + $0x1d0] sm:$0xff]  ;;  %v3094_v16 = vld [vmem:[#allocation23 + $0x1d8] sm:$0xff] }
0x10a4   :  { %7687 = vmatpush1.bf16.msra.mxu0 %v7686_v22 }
0x10a5   :  { %7719 = vmatpush1.bf16.msra.mxu1 %v7718_v15  ;;  %7689 = vmatprep.subr.bf16.mxu0 %v7688_v27  ;;  %v3037_v15 = vld [vmem:[#allocation23 + $0x10] sm:$0xff]  ;;  %v3038_v27 = vld [vmem:[#allocation23 + $0x18] sm:$0xff] }
0x10a6   :  { %7721 = vmatprep.subr.bf16.mxu1 %v7720_v33  ;;  %v3056_v33 = vld [vmem:[#allocation23 + $0xa8] sm:$0xff] }
0x10a8   :  { %7691 = vmatpush1.bf16.msra.mxu0 %v7690_v37  ;;  %v7734_v37 = vpack.c.bf16 %v3038_v27, %v3037_v15  ;;  %v3063_v27 = vld [vmem:[#allocation23 + $0xe0] sm:$0xff] }
0x111f   :  { %v2720_v41 = vpop.xlane.xlu0 %2719 }
0x1120   :  { %v2722_v45 = vmul.f32 0.0078125, %v2720_v41  ;;  %v2718_v47 = vpop.xlane.xlu1 %2717  ;;  %v2816_v41 = vld [vmem:[#allocation20 + $0x1e8] sm:$0xff] }
0x1121   :  { %v2721_v48 = vmul.f32 0.0078125, %v2718_v47  ;;  %v7722_v47 = vpack.c.bf16 %v2809_v36, %v2805_v39  ;;  %v3088_v39 = vld [vmem:[#allocation23 + $0x1a8] sm:$0xff] }
0x1122   :  { %v9843_v49 = vsub.f32 %v9836_v63, %v2722_v45  ;;  %v2814_v45 = vld [vmem:[#allocation20 + $0x1d8] sm:$0xff] }
0x1123   :  { %v9846_v35 = vsub.f32 %v9838_v0, %v2721_v48  ;;  %v7692_v48 = vpack.c.bf16 %v2816_v41, %v2812_v40  ;;  %7723 = vmatpush1.bf16.msra.mxu1 %v7722_v47  ;;  %v3039_v41 = vld [vmem:[#allocation23 + $0x20] sm:$0xff]  ;;  %v7768_v47 = vpack.c.bf16 %v3088_v39, %v3087_v34 }
0x1124   :  { %v2726_v44 = vmul.f32 %v9843_v49, %v9843_v49 }
0x1125   :  { %v2725_v38 = vmul.f32 %v9846_v35, %v9846_v35  ;;  %7693 = vmatprep.subr.bf16.mxu0 %v7692_v48  ;;  %v3040_v48 = vld [vmem:[#allocation23 + $0x28] sm:$0xff] }
0x1126   :  { %2729 = vadd.xlane.f32.xlu1 %v2726_v44  ;;  %v2818_v44 = vld [vmem:[#allocation20 + $0x1f8] sm:$0xff] }
0x1127   :  { %2727 = vadd.xlane.f32.xlu0 %v2725_v38  ;;  %v2811_v38 = vld [vmem:[#allocation20 + $0x1c0] sm:$0xff]  ;;  %v7724_v51 = vpack.c.bf16 %v2818_v44, %v2814_v45  ;;  %v3071_v44 = vld [vmem:[#allocation23 + $0x120] sm:$0xff] }
0x1128   :  { %v7694_v55 = vpack.c.bf16 %v2815_v43, %v2811_v38  ;;  %v3072_v38 = vld [vmem:[#allocation23 + $0x128] sm:$0xff]  ;;  %v7738_v43 = vpack.c.bf16 %v3040_v48, %v3039_v41  ;;  %v3065_v41 = vld [vmem:[#allocation23 + $0xf0] sm:$0xff] }
0x1129   :  { %7725 = vmatprep.subr.bf16.mxu1 %v7724_v51  ;;  %v7770_v51 = vpack.c.bf16 %v3072_v38, %v3071_v44  ;;  %v3098_v44 = vld [vmem:[#allocation23 + $0x1f8] sm:$0xff]  ;;  %v3049_v38 = vld [vmem:[#allocation23 + $0x70] sm:$0xff] }
0x112a   :  { %7695 = vmatpush1.bf16.msra.mxu0 %v7694_v55  ;;  %7727 = vmatpush1.bf16.msra.mxu1 %v7726_v56  ;;  %v3089_v55 = vld [vmem:[#allocation23 + $0x1b0] sm:$0xff]  ;;  %v7740_v56 = vpack.c.bf16 %v3058_v54, %v3057_v53 }
0x112b   :  { %7729 = vmatprep.subr.bf16.mxu0 %v7728_v42  ;;  %7761 = vmatprep.subr.bf16.mxu1 %v7760_v62  ;;  %v7772_v42 = vpack.c.bf16 %v3090_v58, %v3089_v55  ;;  %v3073_v62 = vld [vmem:[#allocation23 + $0x130] sm:$0xff]  ;;  %v3082_v55 = vld [vmem:[#allocation23 + $0x178] sm:$0xff] }
0x112c   :  { %v3081_v54 = vld [vmem:[#allocation23 + $0x170] sm:$0xff]  ;;  %v2819_v58 = vld [vmem:[#allocation22] sm:$0xf] }
0x112d   :  { %v2824_v60 = vrot.slane %v2819_v58, %v9660_v28 }
0x11b3   :  { %v2730_v1 = vpop.xlane.xlu1 %2729 }
0x11b4   :  { %v2732_v2 = vmul.f32 0.0078125, %v2730_v1  ;;  %v2728_v3 = vpop.xlane.xlu0 %2727  ;;  %v3074_v1 = vld [vmem:[#allocation23 + $0x138] sm:$0xff] }
0x11b5   :  { %v2731_v20 = vmul.f32 0.0078125, %v2728_v3  ;;  %v3059_v3 = vld [vmem:[#allocation23 + $0xc0] sm:$0xff] }
0x11b6   :  { %v2734_v4 = vadd.f32 1e-06, %v2732_v2  ;;  %v7774_v2 = vpack.c.bf16 %v3074_v1, %v3073_v62  ;;  %v2836_v62 = vrot.slane %v2819_v58, %v9857_v59 }
0x11b7   :  { %v2733_v5 = vadd.f32 1e-06, %v2731_v20  ;;  %v3060_v20 = vld [vmem:[#allocation23 + $0xc8] sm:$0xff] }
0x11b8   :  { %8337 = vrsqrt.f32 %v2734_v4  ;;  %v3091_v4 = vld [vmem:[#allocation23 + $0x1c0] sm:$0xff] }
0x11b9   :  { %8339 = vrsqrt.f32 %v2733_v5  ;;  %v7744_v5 = vpack.c.bf16 %v3060_v20, %v3059_v3 }
0x11c2   :  { %v8338_v21 = vpop.eup %8337 }
0x11c3   :  { %v8340_v6 = vpop.eup %8339  ;;  %v2738_v50 = vmul.f32 %v8338_v21, %v9843_v49  ;;  %v3055_v49 = vld [vmem:[#allocation23 + $0xa0] sm:$0xff]  ;;  %v3092_v21 = vld [vmem:[#allocation23 + $0x1c8] sm:$0xff] }
0x11c4   :  { %v2737_v8 = vmul.f32 %v8340_v6, %v9846_v35  ;;  %v3069_v35 = vld [vmem:[#allocation23 + $0x110] sm:$0xff]  ;;  %v7736_v45 = vpack.c.bf16 %v3056_v33, %v3055_v49  ;;  %v3043_v6 = vld [vmem:[#allocation23 + $0x40] sm:$0xff]  ;;  %v3048_v33 = vld [vmem:[#allocation23 + $0x68] sm:$0xff] }
0x11c5   :  { %v2746_v23 = vmul.f32 %v6661_v7, %v2738_v50  ;;  %v7766_v40 = vpack.c.bf16 %v3070_v32, %v3069_v35  ;;  %v3075_v50 = vld [vmem:[#allocation23 + $0x140] sm:$0xff]  ;;  %v3096_v32 = vld [vmem:[#allocation23 + $0x1e8] sm:$0xff] }
0x11c6   :  { %v2745_v14 = vmul.f32 %v6661_v7, %v2737_v8  ;;  %v3044_v7 = vld [vmem:[#allocation23 + $0x48] sm:$0xff]  ;;  %v7778_v10 = vpack.c.bf16 %v3076_v9, %v3075_v50  ;;  %v3047_v49 = vld [vmem:[#allocation23 + $0x60] sm:$0xff] }
0x11c7   :  { %v2754_v36 = vadd.f32 %v6662_v52, %v2746_v23  ;;  %v7746_v8 = vpack.c.bf16 %v3044_v7, %v3043_v6  ;;  %v7750_v23 = vpack.c.bf16 %v3046_v18, %v3045_v17  ;;  %v7754_v39 = vpack.c.bf16 %v3048_v33, %v3047_v49 }
0x11c8   :  { %v2753_v22 = vadd.f32 %v6662_v52, %v2745_v14  ;;  %v7776_v52 = vpack.c.bf16 %v3092_v21, %v3091_v4  ;;  %v7748_v14 = vpack.c.bf16 %v3062_v12, %v3061_v11 }
0x11ca   :  { %2906 = vmatmul.mubr.f32.vlgmr.msra.gmra.mrb[34].mxu0 %v2753_v22  ;;  %2983 = vmatmul.mubr.f32.vlgmr.msra.gmra.mrb[20].mxu1 %v2753_v22  ;;  %v7780_v22 = vpack.c.bf16 %v3094_v16, %v3093_v13 }
0x11cb   :  { %2911 = vmatprep.mubr.f32.mxu0 %v9118_v57  ;;  %2988 = vmatprep.mubr.f32.mxu1 %v9118_v57 }
0x11cc   :  { %7731 = vmatpush3.bf16.msra.mxu0 %v7730_v24  ;;  %7763 = vmatpush3.bf16.msra.mxu1 %v7762_v25  ;;  %v3077_v24 = vld [vmem:[#allocation23 + $0x150] sm:$0xff]  ;;  %v3078_v25 = vld [vmem:[#allocation23 + $0x158] sm:$0xff] }
0x11cd   :  { %7733 = vmatprep.subr.bf16.mxu0 %v7732_v30  ;;  %7765 = vmatprep.subr.bf16.mxu1 %v7764_v31  ;;  %v7782_v15 = vpack.c.bf16 %v3078_v25, %v3077_v24  ;;  %v3064_v30 = vld [vmem:[#allocation23 + $0xe8] sm:$0xff]  ;;  %v3095_v31 = vld [vmem:[#allocation23 + $0x1e0] sm:$0xff] }
0x11ce   :  { %2912 = vmatmul.mubr.f32.gmra.mrb[36].mxu0 %v2754_v36  ;;  %2989 = vmatmul.mubr.f32.gmra.mrb[22].mxu1 %v2754_v36  ;;  %v7752_v35 = vpack.c.bf16 %v3064_v30, %v3063_v27  ;;  %v7784_v34 = vpack.c.bf16 %v3096_v32, %v3095_v31  ;;  %v3079_v36 = vld [vmem:[#allocation23 + $0x160] sm:$0xff] }
0x11d0   :  { %7735 = vmatpush3.bf16.msra.mxu0 %v7734_v37  ;;  %7767 = vmatpush3.bf16.msra.mxu1 %v7766_v40  ;;  %v3080_v37 = vld [vmem:[#allocation23 + $0x168] sm:$0xff] }
0x11d1   :  { %7737 = vmatprep.subr.bf16.mxu0 %v7736_v45  ;;  %7769 = vmatprep.subr.bf16.mxu1 %v7768_v47  ;;  %v7786_v40 = vpack.c.bf16 %v3080_v37, %v3079_v36  ;;  %v3066_v45 = vld [vmem:[#allocation23 + $0xf8] sm:$0xff]  ;;  %v3097_v47 = vld [vmem:[#allocation23 + $0x1f0] sm:$0xff] }
0x11d2   :  { %v7756_v48 = vpack.c.bf16 %v3066_v45, %v3065_v41 }
0x11d4   :  { %7739 = vmatpush3.bf16.msra.mxu0 %v7738_v43  ;;  %7771 = vmatpush3.bf16.msra.mxu1 %v7770_v51  ;;  %v3050_v43 = vld [vmem:[#allocation23 + $0x78] sm:$0xff]  ;;  %v7788_v51 = vpack.c.bf16 %v3098_v44, %v3097_v47 }
0x11d5   :  { %7741 = vmatprep.subr.bf16.mxu0 %v7740_v56  ;;  %7773 = vmatprep.subr.bf16.mxu1 %v7772_v42  ;;  %v7758_v53 = vpack.c.bf16 %v3050_v43, %v3049_v38  ;;  %v7790_v56 = vpack.c.bf16 %v3082_v55, %v3081_v54  ;;  %v2832_v42 = vrot.slane %v2819_v58, %v9663_v29 }
0x11d8   :  { %7743 = vmatpush3.bf16.msra.mxu0 %v7742_v61  ;;  %7775 = vmatpush3.bf16.msra.mxu1 %v7774_v2  ;;  %v2828_v61 = vrot.slane %v2819_v58, %v9657_v19 }
0x11d9   :  { %7745 = vmatprep.subr.bf16.mxu0 %v7744_v5  ;;  %7777 = vmatprep.subr.bf16.mxu1 %v7776_v52 }
0x11dc   :  { %7747 = vmatpush3.bf16.msra.mxu0 %v7746_v8  ;;  %7779 = vmatpush3.bf16.msra.mxu1 %v7778_v10 }
0x11dd   :  { %7749 = vmatprep.subr.bf16.mxu0 %v7748_v14  ;;  %7781 = vmatprep.subr.bf16.mxu1 %v7780_v22 }
0x11e0   :  { %7751 = vmatpush3.bf16.msra.mxu0 %v7750_v23  ;;  %7783 = vmatpush3.bf16.msra.mxu1 %v7782_v15 }
0x11e1   :  { %7753 = vmatprep.subr.bf16.mxu0 %v7752_v35  ;;  %7785 = vmatprep.subr.bf16.mxu1 %v7784_v34 }
0x11e4   :  { %7755 = vmatpush3.bf16.msra.mxu0 %v7754_v39  ;;  %7787 = vmatpush3.bf16.msra.mxu1 %v7786_v40 }
0x11e5   :  { %7757 = vmatprep.subr.bf16.mxu0 %v7756_v48  ;;  %7789 = vmatprep.subr.bf16.mxu1 %v7788_v51 }
0x11e8   :  { %7759 = vmatpush3.bf16.msra.mxu0 %v7758_v53  ;;  %7791 = vmatpush3.bf16.msra.mxu1 %v7790_v56 }
0x129d   :  { %v2907_v1 = vpop.f32.mrb[34].mxu0  ;;  %v2984_v2 = vpop.f32.mrb[20].mxu1 }
0x129e   :  { %v2908_v3 = vadd.f32 %v2907_v1, %v2824_v60  ;;  %v2985_v20 = vadd.f32 %v2984_v2, %v2832_v42  ;;  %v2909_v4 = vpop.f32.mrb[35].mxu0  ;;  %v2986_v5 = vpop.f32.mrb[21].mxu1 }
0x129f   :  { %v2910_v21 = vadd.f32 %v2909_v4, %v2828_v61  ;;  %v2987_v6 = vadd.f32 %v2986_v5, %v2836_v62 }
0x12a0   :  { %v3003_v7 = vmul.f32 0.70710677, %v2908_v3  ;;  %v3005_v52 = vmul.f32 0.70710677, %v2985_v20  ;;  %v2995_v49 = vmul.f32 0.5, %v2908_v3  ;;  %v2997_v36 = vmul.f32 0.5, %v2985_v20 }
0x12a1   :  { %v3004_v26 = vmul.f32 0.70710677, %v2910_v21  ;;  %v3006_v8 = vmul.f32 0.70710677, %v2987_v6  ;;  %v2913_v50 = vpop.f32.mrb[36].mxu0  ;;  %v2990_v9 = vpop.f32.mrb[22].mxu1 }
0x12a2   :  { %8341 = verf.f32 %v3003_v7  ;;  %v2914_v10 = vadd.f32 %v2913_v50, %v2824_v60  ;;  %v2991_v11 = vadd.f32 %v2990_v9, %v2832_v42  ;;  %v2915_v12 = vpop.f32.mrb[37].mxu0  ;;  %v2992_v13 = vpop.f32.mrb[23].mxu1  ;;  %v2996_v35 = vmul.f32 0.5, %v2910_v21  ;;  %v6663_v3 = vld [vmem:[#allocation25] ss:$0 sm:$0xff] }
0x12a3   :  { %8343 = verf.f32 %v3005_v52  ;;  %v2916_v14 = vadd.f32 %v2915_v12, %v2828_v61  ;;  %v2993_v16 = vadd.f32 %v2992_v13, %v2836_v62  ;;  %v2998_v33 = vmul.f32 0.5, %v2987_v6 }
0x12a4   :  { %8345 = verf.f32 %v3004_v26  ;;  %v3007_v17 = vmul.f32 0.70710677, %v2914_v10  ;;  %v3009_v18 = vmul.f32 0.70710677, %v2991_v11  ;;  %v2999_v54 = vmul.f32 0.5, %v2914_v10 }
0x12a5   :  { %8347 = verf.f32 %v3006_v8  ;;  %v3008_v22 = vmul.f32 0.70710677, %v2916_v14  ;;  %v3010_v23 = vmul.f32 0.70710677, %v2993_v16  ;;  %v3000_v51 = vmul.f32 0.5, %v2916_v14 }
0x12a6   :  { %8349 = verf.f32 %v3007_v17  ;;  %v3002_v55 = vmul.f32 0.5, %v2993_v16  ;;  %v3001_v58 = vmul.f32 0.5, %v2991_v11  ;;  %v3302_v16 = vld [vmem:[#allocation11 + $0x188] sm:$0xff]  ;;  %v3305_v17 = vld [vmem:[#allocation11 + $0x1a0] sm:$0xff] }
0x12a7   :  { %8351 = verf.f32 %v3009_v18  ;;  %v3301_v18 = vld [vmem:[#allocation11 + $0x180] sm:$0xff] }
0x12a8   :  { %8353 = verf.f32 %v3008_v22  ;;  %v7792_v22 = vpack.c.bf16 %v3305_v17, %v3302_v16  ;;  %v3334_v16 = vld [vmem:[#allocation11 + $0x288] sm:$0xff] }
0x12a9   :  { %8355 = verf.f32 %v3010_v23  ;;  %v3304_v23 = vld [vmem:[#allocation11 + $0x198] sm:$0xff] }
0x12aa   :  { %7793 = vmatprep.subr.bf16.mxu0 %v7792_v22  ;;  %v3338_v22 = vld [vmem:[#allocation11 + $0x2a8] sm:$0xff] }
0x12ac   :  { %v8342_v24 = vpop.eup %8341 }
0x12ad   :  { %v8344_v25 = vpop.eup %8343  ;;  %v3019_v27 = vadd.f32 1.0, %v8342_v24  ;;  %v3308_v24 = vld [vmem:[#allocation11 + $0x1b8] sm:$0xff] }
0x12ae   :  { %v8346_v15 = vpop.eup %8345  ;;  %v3021_v31 = vadd.f32 1.0, %v8344_v25  ;;  %v3311_v25 = vld [vmem:[#allocation11 + $0x1d0] sm:$0xff] }
0x12af   :  { %v8348_v30 = vpop.eup %8347  ;;  %v3020_v32 = vadd.f32 1.0, %v8346_v15  ;;  %v3027_v41 = vmul.f32 %v3019_v27, %v2995_v49  ;;  %v7794_v15 = vpack.c.bf16 %v3304_v23, %v3301_v18  ;;  %v7796_v27 = vpack.c.bf16 %v3311_v25, %v3308_v24  ;;  %v3314_v49 = vld [vmem:[#allocation11 + $0x1e8] sm:$0xff]  ;;  %v3341_v23 = vld [vmem:[#allocation11 + $0x2c0] sm:$0xff] }
0x12b0   :  { %v3022_v34 = vadd.f32 1.0, %v8348_v30  ;;  %v8350_v39 = vpop.eup %8349  ;;  %v3029_v48 = vmul.f32 %v3021_v31, %v2997_v36  ;;  %v3306_v30 = vld [vmem:[#allocation11 + $0x1a8] sm:$0xff]  ;;  %v3307_v31 = vld [vmem:[#allocation11 + $0x1b0] sm:$0xff]  ;;  %v3333_v24 = vld [vmem:[#allocation11 + $0x280] sm:$0xff]  ;;  %v7816_v25 = vpack.c.bf16 %v3341_v23, %v3338_v22 }
0x12b1   :  { %v3028_v37 = vmul.f32 %v3020_v32, %v2996_v35  ;;  %v8352_v40 = vpop.eup %8351  ;;  %v3023_v44 = vadd.f32 1.0, %v8350_v39  ;;  %v3310_v32 = vld [vmem:[#allocation11 + $0x1c8] sm:$0xff]  ;;  %v3312_v39 = vld [vmem:[#allocation11 + $0x1d8] sm:$0xff] }
0x12b2   :  { %v3030_v45 = vmul.f32 %v3022_v34, %v2998_v33  ;;  %v8354_v47 = vpop.eup %8353  ;;  %v3025_v43 = vadd.f32 1.0, %v8352_v40  ;;  %v7798_v33 = vpack.c.bf16 %v3310_v32, %v3307_v31  ;;  %v3309_v34 = vld [vmem:[#allocation11 + $0x1c0] sm:$0xff]  ;;  %v3347_v32 = vld [vmem:[#allocation11 + $0x2f0] sm:$0xff] }
0x12b3   :  { %3170 = vmatprep.mubr.f32.mxu0 %v3028_v37  ;;  %v8356_v38 = vpop.eup %8355  ;;  %v3024_v53 = vadd.f32 1.0, %v8354_v47  ;;  %v3031_v61 = vmul.f32 %v3023_v44, %v2999_v54  ;;  %v7828_v37 = vpack.c.bf16 %v3312_v39, %v3309_v34  ;;  %v3313_v40 = vld [vmem:[#allocation11 + $0x1e0] sm:$0xff]  ;;  %v3343_v34 = vld [vmem:[#allocation11 + $0x2d0] sm:$0xff]  ;;  %v3346_v39 = vld [vmem:[#allocation11 + $0x2e8] sm:$0xff] }
0x12b4   :  { %3245 = vmatprep.mubr.f32.mxu1 %v3030_v45  ;;  %3171 = vmatmul.mubr.f32.vlgmr.msra.gmra.mrb[38].mxu0 %v3027_v41  ;;  %v3026_v56 = vadd.f32 1.0, %v8356_v38  ;;  %v3033_v62 = vmul.f32 %v3025_v43, %v3001_v58  ;;  %v3316_v41 = vld [vmem:[#allocation11 + $0x1f8] sm:$0xff]  ;;  %v3315_v58 = vld [vmem:[#allocation11 + $0x1f0] sm:$0xff] }
0x12b5   :  { %3246 = vmatmul.mubr.f32.vlgmr.msra.gmra.mrb[24].mxu1 %v3029_v48  ;;  %v3032_v60 = vmul.f32 %v3024_v53, %v3000_v51  ;;  %7795 = vmatpush1.bf16.msra.mxu0 %v7794_v15  ;;  %v7802_v45 = vpack.c.bf16 %v3316_v41, %v3313_v40  ;;  %v3336_v15 = vld [vmem:[#allocation11 + $0x298] sm:$0xff]  ;;  %v3345_v40 = vld [vmem:[#allocation11 + $0x2e0] sm:$0xff] }
0x12b6   :  { %v3034_v42 = vmul.f32 %v3026_v56, %v3002_v55  ;;  %7797 = vmatprep.subr.bf16.mxu0 %v7796_v27  ;;  %v3320_v55 = vld [vmem:[#allocation11 + $0x218] sm:$0xff]  ;;  %v3323_v56 = vld [vmem:[#allocation11 + $0x230] sm:$0xff]  ;;  %v3337_v27 = vld [vmem:[#allocation11 + $0x2a0] sm:$0xff] }
0x12b7   :  { %3175 = vmatprep.mubr.f32.mxu0 %v3032_v60  ;;  %v7804_v60 = vpack.c.bf16 %v3323_v56, %v3320_v55  ;;  %v3348_v41 = vld [vmem:[#allocation11 + $0x2f8] sm:$0xff] }
0x12b8   :  { %3250 = vmatprep.mubr.f32.mxu1 %v3034_v42  ;;  %3176 = vmatmul.mubr.f32.gmra.mrb[40].mxu0 %v3031_v61  ;;  %v3318_v42 = vld [vmem:[#allocation11 + $0x208] sm:$0xff]  ;;  %v3319_v61 = vld [vmem:[#allocation11 + $0x210] sm:$0xff]  ;;  %v6664_v56 = vld [vmem:[#allocation8 + $0x1] ss:$0 sm:$0xff] }
0x12b9   :  { %3251 = vmatmul.mubr.f32.gmra.mrb[26].mxu1 %v3033_v62  ;;  %3431 = vmatprep.mubr.f32.mxu0 %v9118_v57  ;;  %v3322_v62 = vld [vmem:[#allocation11 + $0x228] sm:$0xff] }
0x12ba   :  { %7799 = vmatpush1.bf16.msra.mxu0 %v7798_v33  ;;  %v3342_v33 = vld [vmem:[#allocation11 + $0x2c8] sm:$0xff] }
0x1387   :  { %v6925_v1 = vpop.f32.mrb[38].mxu0 }
0x1388   :  { %v6963_v2 = vpop.f32.mrb[24].mxu1  ;;  %v6926_v20 = vpop.f32.mrb[39].mxu0 }
0x1389   :  { %v6927_v4 = vadd.f32 %v6926_v20, %v6925_v1  ;;  %v6964_v5 = vpop.f32.mrb[25].mxu1  ;;  %v7832_v1 = vpack.c.bf16 %v3318_v42, %v3315_v58  ;;  %v3329_v20 = vld [vmem:[#allocation11 + $0x260] sm:$0xff] }
0x138a   :  { %v6965_v21 = vadd.f32 %v6964_v5, %v6963_v2  ;;  %v7806_v2 = vpack.c.bf16 %v3322_v62, %v3319_v61 }
0x138b   :  { %v3173_v6 = vadd.f32 %v6927_v4, %v6663_v3  ;;  %v6928_v7 = vpop.f32.mrb[40].mxu0  ;;  %v3321_v4 = vld [vmem:[#allocation11 + $0x220] sm:$0xff] }
0x138c   :  { %v6966_v26 = vpop.f32.mrb[26].mxu1  ;;  %v6929_v8 = vpop.f32.mrb[41].mxu0 }
0x138d   :  { %v3248_v52 = vadd.f32 %v6965_v21, %v3173_v6  ;;  %v6930_v50 = vadd.f32 %v6929_v8, %v6928_v7  ;;  %v6967_v9 = vpop.f32.mrb[27].mxu1  ;;  %v3324_v21 = vld [vmem:[#allocation11 + $0x238] sm:$0xff]  ;;  %v3325_v6 = vld [vmem:[#allocation11 + $0x240] sm:$0xff] }
0x138e   :  { %v6968_v10 = vadd.f32 %v6967_v9, %v6966_v26  ;;  %v3328_v7 = vld [vmem:[#allocation11 + $0x258] sm:$0xff]  ;;  %v3327_v9 = vld [vmem:[#allocation11 + $0x250] sm:$0xff] }
0x138f   :  { %v9865_v11 = vadd.f32 %v3248_v52, %v9838_v0  ;;  %v3178_v12 = vadd.f32 %v6930_v50, %v6663_v3  ;;  %v3303_v0 = vld [vmem:[#allocation11 + $0x190] sm:$0xff]  ;;  %v3326_v3 = vld [vmem:[#allocation11 + $0x248] sm:$0xff]  ;;  %v7836_v52 = vpack.c.bf16 %v3324_v21, %v3321_v4  ;;  %v7810_v26 = vpack.c.bf16 %v3328_v7, %v3325_v6  ;;  %v3332_v8 = vld [vmem:[#allocation11 + $0x278] sm:$0xff] }
0x1390   :  { %v7824_v35 = vpack.c.bf16 %v3306_v30, %v3303_v0  ;;  %v7808_v5 = vpack.c.bf16 %v3329_v20, %v3326_v3  ;;  %v3335_v50 = vld [vmem:[#allocation11 + $0x290] sm:$0xff]  ;;  %v3340_v0 = vld [vmem:[#allocation11 + $0x2b8] sm:$0xff]  ;;  %v7844_v30 = vpack.c.bf16 %v3336_v15, %v3333_v24 }
0x1391   :  { %3262 = vadd.xlane.f32.xlu0 %v9865_v11  ;;  %v3253_v13 = vadd.f32 %v6968_v10, %v3178_v12  ;;  %v7812_v10 = vpack.c.bf16 %v3335_v50, %v3332_v8  ;;  %v3330_v12 = vld [vmem:[#allocation11 + $0x268] sm:$0xff]  ;;  %v7818_v31 = vpack.c.bf16 %v3340_v0, %v3337_v27 }
0x1392   :  { %7825 = vmatprep.subr.bf16.mxu1 %v7824_v35  ;;  %v7840_v17 = vpack.c.bf16 %v3330_v12, %v3327_v9 }
0x1393   :  { %v9869_v14 = vadd.f32 %v3253_v13, %v9836_v63  ;;  %v3317_v63 = vld [vmem:[#allocation11 + $0x200] sm:$0xff]  ;;  %7827 = vmatpush3.bf16.msra.mxu1 %v7824_v35  ;;  %v3331_v13 = vld [vmem:[#allocation11 + $0x270] sm:$0xff]  ;;  %v3344_v35 = vld [vmem:[#allocation11 + $0x2d8] sm:$0xff] }
0x1394   :  { %v7800_v36 = vpack.c.bf16 %v3317_v63, %v3314_v49  ;;  %7829 = vmatprep.subr.bf16.mxu1 %v7828_v37  ;;  %v7814_v18 = vpack.c.bf16 %v3334_v16, %v3331_v13  ;;  %v3339_v49 = vld [vmem:[#allocation11 + $0x2b0] sm:$0xff]  ;;  %v7820_v63 = vpack.c.bf16 %v3347_v32, %v3344_v35 }
0x1395   :  { %3264 = vadd.xlane.f32.xlu1 %v9869_v14 }
0x1396   :  { %7801 = vmatprep.subr.bf16.mxu0 %v7800_v36  ;;  %v7848_v36 = vpack.c.bf16 %v3342_v33, %v3339_v49 }
0x1397   :  { %7831 = vmatpush3.bf16.msra.mxu1 %v7828_v37  ;;  %7803 = vmatpush1.bf16.msra.mxu0 %v7802_v45  ;;  %v7822_v37 = vpack.c.bf16 %v3346_v39, %v3343_v34  ;;  %v7852_v45 = vpack.c.bf16 %v3348_v41, %v3345_v40 }
0x1398   :  { %7805 = vmatprep.subr.bf16.mxu0 %v7804_v60  ;;  %7833 = vmatprep.subr.bf16.mxu1 %v7832_v1  ;;  %v6665_v60 = vld [vmem:[#allocation10 + $0x1] ss:$0 sm:$0xff] }
0x139b   :  { %7807 = vmatpush1.bf16.msra.mxu0 %v7806_v2  ;;  %7835 = vmatpush3.bf16.msra.mxu1 %v7832_v1 }
0x139c   :  { %7809 = vmatprep.subr.bf16.mxu0 %v7808_v5  ;;  %7837 = vmatprep.subr.bf16.mxu1 %v7836_v52 }
0x139f   :  { %7811 = vmatpush1.bf16.msra.mxu0 %v7810_v26  ;;  %7839 = vmatpush3.bf16.msra.mxu1 %v7836_v52 }
0x13a0   :  { %7813 = vmatprep.subr.bf16.mxu0 %v7812_v10  ;;  %7841 = vmatprep.subr.bf16.mxu1 %v7840_v17 }
0x13a3   :  { %7815 = vmatpush1.bf16.msra.mxu0 %v7814_v18  ;;  %7843 = vmatpush3.bf16.msra.mxu1 %v7840_v17 }
0x13a4   :  { %7817 = vmatprep.subr.bf16.mxu0 %v7816_v25  ;;  %7845 = vmatprep.subr.bf16.mxu1 %v7844_v30 }
0x13a7   :  { %7819 = vmatpush1.bf16.msra.mxu0 %v7818_v31  ;;  %7847 = vmatpush3.bf16.msra.mxu1 %v7844_v30 }
0x13a8   :  { %7821 = vmatprep.subr.bf16.mxu0 %v7820_v63  ;;  %7849 = vmatprep.subr.bf16.mxu1 %v7848_v36 }
0x13ab   :  { %7823 = vmatpush1.bf16.msra.mxu0 %v7822_v37  ;;  %7851 = vmatpush3.bf16.msra.mxu1 %v7848_v36 }
0x13ac   :  { %7348 = vmatprep.subr.mxu0 %v9118_v57  ;;  %7853 = vmatprep.subr.bf16.mxu1 %v7852_v45 }
0x13af   :  { %7855 = vmatpush3.bf16.msra.mxu1 %v7852_v45 }
0x13b0   :  { %7353 = vmatprep.subr.mxu1 %v9118_v57 }
0x141e   :  { %v3263_v47 = vpop.xlane.xlu0 %3262 }
0x141f   :  { %v3266_v48 = vmul.f32 0.0078125, %v3263_v47 }
0x1421   :  { %v9873_v44 = vsub.f32 %v9865_v11, %v3266_v48 }
0x1422   :  { %v3265_v38 = vpop.xlane.xlu1 %3264 }
0x1423   :  { %v3270_v43 = vmul.f32 %v9873_v44, %v9873_v44  ;;  %v3267_v51 = vmul.f32 0.0078125, %v3265_v38 }
0x1425   :  { %3272 = vadd.xlane.f32.xlu0 %v3270_v43  ;;  %v9878_v53 = vsub.f32 %v9869_v14, %v3267_v51 }
0x1427   :  { %v3271_v54 = vmul.f32 %v9878_v53, %v9878_v53 }
0x1429   :  { %3274 = vadd.xlane.f32.xlu1 %v3271_v54 }
0x14b2   :  { %v3273_v47 = vpop.xlane.xlu0 %3272 }
0x14b3   :  { %v3276_v48 = vmul.f32 0.0078125, %v3273_v47 }
0x14b5   :  { %v3278_v38 = vadd.f32 1e-06, %v3276_v48 }
0x14b6   :  { %v3275_v43 = vpop.xlane.xlu1 %3274 }
0x14b7   :  { %8357 = vrsqrt.f32 %v3278_v38  ;;  %v3277_v51 = vmul.f32 0.0078125, %v3275_v43 }
0x14b9   :  { %v3279_v54 = vadd.f32 1e-06, %v3277_v51 }
0x14bb   :  { %8359 = vrsqrt.f32 %v3279_v54 }
0x14c1   :  { %v8358_v55 = vpop.eup %8357 }
0x14c2   :  { %v3282_v58 = vmul.f32 %v8358_v55, %v9873_v44  ;;  %v3350_v44 = vld [vmem:[#allocation13 + $0x3] sm:$0x7] }
0x14c3   :  { %v3359_v20 = vrot.slane %v3350_v44, %v9657_v19  ;;  %v3363_v6 = vrot.slane %v3350_v44, %v9663_v29 }
0x14c4   :  { %v3290_v42 = vmul.f32 %v6664_v56, %v3282_v58 }
0x14c5   :  { %v8360_v61 = vpop.eup %8359 }
0x14c6   :  { %v3298_v62 = vadd.f32 %v6665_v60, %v3290_v42  ;;  %v3283_v1 = vmul.f32 %v8360_v61, %v9878_v53  ;;  %v3355_v53 = vrot.slane %v3350_v44, %v9660_v28 }
0x14c8   :  { %3432 = vmatmul.mubr.f32.vlgmr.msra.gmra.mrb[42].mxu0 %v3298_v62  ;;  %7345 = vmatprep.mubr.f32.mxu1 %v3298_v62  ;;  %v3291_v2 = vmul.f32 %v6664_v56, %v3283_v1 }
0x14c9   :  { %3437 = vmatprep.mubr.f32.mxu0 %v9118_v57 }
0x14ca   :  { %v3299_v3 = vadd.f32 %v6665_v60, %v3291_v2 }
0x14cc   :  { %3438 = vmatmul.mubr.f32.gmra.mrb[44].mxu0 %v3299_v3  ;;  %7346 = vmatmul.mubr.f32.vlgmr.msra.gmra.mrb[28].mxu1 %v3299_v3 }
0x14cd   :  { %7350 = vmatprep.mubr.msk.f32.mxu0 %vm9119_vm0, %v9118_v57  ;;  %7355 = vmatprep.mubr.msk.f32.mxu1 %vm9119_vm0, %v9118_v57 }
0x159b   :  { %v3433_v4 = vpop.f32.mrb[42].mxu0 }
0x159c   :  { %v3435_v5 = vpop.f32.mrb[43].mxu0  ;;  %v9898_v7 = vadd.f32 %v3433_v4, %v3355_v53 }
0x159d   :  { %v9893_v21 = vadd.f32 %v3435_v5, %v3359_v20 }
0x159f   :  { %7349 = vmatpush3.xpose.msk.msra.mxu0 %vm1046_vm1, %v9893_v21  ;;  %v3439_v52 = vpop.f32.mrb[44].mxu0  ;;  %v7347_v26 = vpop.f32.mrb[28].mxu1 }
0x15a0   :  { %7358 = vmatprep.subr.mxu0 %v9118_v57  ;;  %v3441_v8 = vpop.f32.mrb[45].mxu0  ;;  %v3510_v50 = vpop.f32.mrb[29].mxu1  ;;  %v9912_v12 = vadd.f32 %v3439_v52, %v3355_v53  ;;  %v9916_v13 = vadd.f32 %v7347_v26, %v3363_v6 }
0x15a1   :  { %v9901_v9 = vadd.f32 %v3441_v8, %v3359_v20  ;;  %v9903_v10 = vadd.f32 %v3510_v50, %v3363_v6 }
0x15a2   :  { %7351 = vmatmul.mubr.msk.f32.vlgmr.msra.gmra.mrb[46].mxu0 %vm1046_vm1, %v9898_v7 }
0x15a3   :  { %7360 = vmatprep.mubr.msk.f32.mxu0 %vm9119_vm0, %v9118_v57  ;;  %7354 = vmatpush3.xpose.msk.msra.mxu1 %vm1046_vm1, %v9901_v9 }
0x15a4   :  { %7359 = vmatpush3.msra.mxu0 %v9903_v10  ;;  %7363 = vmatprep.subr.mxu1 %v9118_v57 }
0x15a5   :  { %7368 = vmatprep.subr.mxu0 %v9118_v57 }
0x15a6   :  { %7356 = vmatmul.mubr.msk.f32.vlgmr.msra.gmra.mrb[30].mxu1 %vm1046_vm1, %v9912_v12 }
0x15a7   :  { %7364 = vmatpush3.msra.mxu1 %v9916_v13  ;;  %7365 = vmatprep.mubr.msk.f32.mxu1 %vm9119_vm0, %v9118_v57 }
0x15a8   :  { %7373 = vmatprep.subr.mxu1 %v9118_v57 }
0x1675   :  { %v3608_v16 = vpop.f32.mrb[46].mxu0 }
0x1676   :  { %v7352_v17 = vpop.f32.mrb[47].mxu0  ;;  %v3688_v47 = vmul.f32 0.17677669, %v3608_v16 }
0x1678   :  { %v3690_v48 = vadd.f32 %v3688_v47, %v9697_v46 }
0x1679   :  { %v3684_v18 = vpop.f32.mrb[30].mxu1 }
0x167a   :  { %v3689_v22 = vmul.f32 0.17677669, %v3684_v18  ;;  %v7357_v23 = vpop.f32.mrb[31].mxu1  ;;  %v3692_v38 = vsel %vm1203_vm3, %v3690_v48, -inf }
0x167c   :  { %v3691_v24 = vadd.f32 %v3689_v22, %v9697_v46 }
0x167e   :  { %v3695_v25 = vsel %vm1203_vm3, %v3691_v24, -inf }
0x167f   :  { %3696 = vmax.xlane.f32.xlu0 %v3695_v25 }
0x1695   :  { %3940 = vrot.lane.b32.xlu0 %v9901_v9, %s9120_s19 }
0x170c   :  { %v3697_v15 = vpop.xlane.xlu0 %3696 }
0x170d   :  { %v3699_v27 = vsub.f32 %v3691_v24, %v3697_v15 }
0x170f   :  { %v3702_v0 = vmul.f32 1.442695, %v3699_v27 }
0x1710   :  { %v3941_v63 = vpop.permute.xlu0 %3940 }
0x1711   :  { %8361 = vpow2.f32 %v3702_v0 }
0x171b   :  { %v8362_v30 = vpop.eup %8361 }
0x171c   :  { %v3707_v31 = vsel %vm1203_vm3, %v8362_v30, 0.0 }
0x171d   :  { %3708 = vadd.xlane.f32.xlu1 %v3707_v31 }
0x172e   :  { %3938 = vrot.lane.b32.xlu1 %v9912_v12, %s9120_s19 }
0x17aa   :  { %v3709_v35 = vpop.xlane.xlu1 %3708 }
0x17ab   :  { %8363 = vrcp.f32 %v3709_v35 }
0x17ae   :  { %v3939_v33 = vpop.permute.xlu1 %3938 }
0x17b5   :  { %v8364_v32 = vpop.eup %8363 }
0x17b6   :  { %v3713_v49 = vmul.f32 %v8364_v32, %v8362_v30 }
0x17b8   :  { %7366 = vmatmul.mubr.msk.f32.vlgmr.msra.gmra.mrb[32].mxu1 %vm1203_vm3, %v3713_v49 }
0x17b9   :  { %7374 = vmatpush3.xpose.msk.msra.mxu1 %vm1046_vm1, %v3941_v63  ;;  %7375 = vmatprep.mubr.msk.f32.mxu1 %vm9119_vm0, %v9118_v57 }
0x17ba   :  { %7383 = vmatprep.subr.mxu1 %v9118_v57 }
0x17bc   :  { %7376 = vmatmul.mubr.msk.f32.vlgmr.msra.gmra.mrb[34].mxu1 %vm1046_vm1, %v3939_v33 }
0x17bd   :  { %7385 = vmatprep.mubr.msk.f32.mxu1 %vm9119_vm0, %v9118_v57 }
0x188b   :  { %v9939_v34 = vpop.f32.mrb[32].mxu1 }
0x188c   :  { %v7367_v39 = vpop.f32.mrb[33].mxu1 }
0x188f   :  { %v4012_v36 = vpop.f32.mrb[34].mxu1 }
0x1890   :  { %v4017_v37 = vmul.f32 0.17677669, %v4012_v36  ;;  %v7377_v40 = vpop.f32.mrb[35].mxu1 }
0x1892   :  { %v4019_v41 = vadd.f32 %v4017_v37, %v9697_v46 }
0x1894   :  { %v4023_v45 = vsel %vm1203_vm3, %v4019_v41, -inf }
0x1895   :  { %4024 = vmax.xlane.f32.xlu1 %v4023_v45 }
0x18a6   :  { %4360 = vrot.lane.b32.xlu1 %v9893_v21, %s9109_s20 }
0x18aa   :  { %4358 = vrot.lane.b32.xlu1 %v9898_v7, %s9109_s20 }
0x18ae   :  { %4438 = vrot.lane.b32.xlu1 %v9901_v9, %s9109_s20 }
0x18d2   :  { %3693 = vmax.xlane.f32.xlu1 %v3692_v38 }
0x18e3   :  { %3860 = vrot.lane.b32.xlu1 %v9898_v7, %s9120_s19 }
0x1922   :  { %v4025_v43 = vpop.xlane.xlu1 %4024 }
0x1923   :  { %v4027_v51 = vsub.f32 %v4019_v41, %v4025_v43 }
0x1925   :  { %v4030_v54 = vmul.f32 1.442695, %v4027_v51 }
0x1926   :  { %v4361_v58 = vpop.permute.xlu1 %4360 }
0x1927   :  { %8365 = vpow2.f32 %v4030_v54 }
0x192a   :  { %v4359_v60 = vpop.permute.xlu1 %4358 }
0x192e   :  { %v4439_v42 = vpop.permute.xlu1 %4438 }
0x1931   :  { %v8366_v55 = vpop.eup %8365 }
0x1932   :  { %v4035_v56 = vsel %vm1203_vm3, %v8366_v55, 0.0 }
0x1933   :  { %4036 = vadd.xlane.f32.xlu0 %v4035_v56 }
0x1949   :  { %4120 = vrot.lane.b32.xlu0 %v9916_v13, %s9120_s19 }
0x194d   :  { %4436 = vrot.lane.b32.xlu0 %v9912_v12, %s9109_s20 }
0x195f   :  { %v3694_v61 = vpop.xlane.xlu1 %3693 }
0x1960   :  { %v3698_v62 = vsub.f32 %v3690_v48, %v3694_v61 }
0x1962   :  { %v3700_v1 = vmul.f32 1.442695, %v3698_v62 }
0x1963   :  { %v3861_v50 = vpop.permute.xlu1 %3860 }
0x1964   :  { %8367 = vpow2.f32 %v3700_v1 }
0x196e   :  { %v8368_v2 = vpop.eup %8367 }
0x196f   :  { %v3704_v3 = vsel %vm1203_vm3, %v8368_v2, 0.0 }
0x1970   :  { %3705 = vadd.xlane.f32.xlu0 %v3704_v3 }
0x1986   :  { %3862 = vrot.lane.b32.xlu0 %v9893_v21, %s9120_s19 }
0x19c0   :  { %v4037_v44 = vpop.xlane.xlu0 %4036 }
0x19c1   :  { %8369 = vrcp.f32 %v4037_v44 }
0x19c4   :  { %v4121_v20 = vpop.permute.xlu0 %4120 }
0x19c5   :  { %7384 = vmatpush3.msra.mxu1 %v4121_v20 }
0x19c6   :  { %7410 = vmatprep.subr.mxu1 %v9118_v57 }
0x19c8   :  { %v4437_v5 = vpop.permute.xlu0 %4436 }
0x19cb   :  { %v8370_v4 = vpop.eup %8369 }
0x19cc   :  { %v4041_v53 = vmul.f32 %v8370_v4, %v8366_v55 }
0x19ce   :  { %7386 = vmatmul.mubr.msk.f32.vlgmr.msra.gmra.mrb[36].mxu1 %vm1203_vm3, %v4041_v53 }
0x19cf   :  { %7411 = vmatpush3.xpose.msk.msra.mxu1 %vm1046_vm1, %v4361_v58  ;;  %7412 = vmatprep.mubr.msk.f32.mxu1 %vm9119_vm0, %v9118_v57 }
0x19d0   :  { %7415 = vmatprep.subr.mxu1 %v9118_v57 }
0x19d2   :  { %7413 = vmatmul.mubr.msk.f32.vlgmr.msra.gmra.mrb[38].mxu1 %vm1046_vm1, %v4359_v60 }
0x19d3   :  { %7416 = vmatpush3.xpose.msk.msra.mxu1 %vm1046_vm1, %v4439_v42  ;;  %7417 = vmatprep.mubr.msk.f32.mxu1 %vm9119_vm0, %v9118_v57 }
0x19d4   :  { %7420 = vmatprep.subr.mxu1 %v9118_v57 }
0x19d6   :  { %7418 = vmatmul.mubr.msk.f32.vlgmr.msra.gmra.mrb[40].mxu1 %vm1046_vm1, %v4437_v5 }
0x19d7   :  { %7422 = vmatprep.mubr.msk.f32.mxu1 %vm9119_vm0, %v9118_v57 }
0x19fd   :  { %v3706_v6 = vpop.xlane.xlu0 %3705 }
0x19fe   :  { %8371 = vrcp.f32 %v3706_v6 }
0x1a01   :  { %v3863_v8 = vpop.permute.xlu0 %3862 }
0x1a08   :  { %v8372_v52 = vpop.eup %8371 }
0x1a09   :  { %v3711_v26 = vmul.f32 %v8372_v52, %v8368_v2 }
0x1a0b   :  { %7361 = vmatmul.mubr.msk.f32.vlgmr.msra.gmra.mrb[48].mxu0 %vm1203_vm3, %v3711_v26  ;;  %v3524_v26 = vld [vmem:[#allocation14 + $0xa0] sm:$0xff] }
0x1a0c   :  { %7369 = vmatpush3.xpose.msk.msra.mxu0 %vm1046_vm1, %v3863_v8  ;;  %7370 = vmatprep.mubr.msk.f32.mxu0 %vm9119_vm0, %v9118_v57  ;;  %v3525_v8 = vld [vmem:[#allocation14 + $0xa8] sm:$0xff] }
0x1a0d   :  { %7378 = vmatprep.subr.mxu0 %v9118_v57 }
0x1a0f   :  { %7371 = vmatmul.mubr.msk.f32.vlgmr.msra.gmra.mrb[50].mxu0 %vm1046_vm1, %v3861_v50  ;;  %v3526_v50 = vld [vmem:[#allocation14 + $0xb0] sm:$0xff] }
0x1a10   :  { %7380 = vmatprep.mubr.msk.f32.mxu0 %vm9119_vm0, %v9118_v57 }
0x1aa1   :  { %v9983_v16 = vpop.f32.mrb[36].mxu1 }
0x1aa2   :  { %v7387_v17 = vpop.f32.mrb[37].mxu1 }
0x1aa3   :  { %v7856_v17 = vpack.c.bf16 %v3525_v8, %v3524_v26 }
0x1aa5   :  { %v4432_v18 = vpop.f32.mrb[38].mxu1 }
0x1aa6   :  { %v4514_v22 = vmul.f32 0.17677669, %v4432_v18  ;;  %v7414_v23 = vpop.f32.mrb[39].mxu1  ;;  %v3527_v18 = vld [vmem:[#allocation14 + $0xb8] sm:$0xff] }
0x1aa7   :  { %v3520_v23 = vld [vmem:[#allocation14 + $0x80] sm:$0xff] }
0x1aa8   :  { %v4516_v24 = vadd.f32 %v4514_v22, %v9697_v46  ;;  %v7860_v22 = vpack.c.bf16 %v3527_v18, %v3526_v50 }
0x1aa9   :  { %v4510_v25 = vpop.f32.mrb[40].mxu1 }
0x1aaa   :  { %v4515_v15 = vmul.f32 0.17677669, %v4510_v25  ;;  %v7419_v27 = vpop.f32.mrb[41].mxu1  ;;  %v4518_v0 = vsel %vm1203_vm3, %v4516_v24, -inf }
0x1aab   :  { %4519 = vmax.xlane.f32.xlu1 %v4518_v0 }
0x1aac   :  { %v4517_v30 = vadd.f32 %v4515_v15, %v9697_v46 }
0x1aae   :  { %v4521_v31 = vsel %vm1203_vm3, %v4517_v30, -inf }
0x1aaf   :  { %4522 = vmax.xlane.f32.xlu0 %v4521_v31 }
0x1abc   :  { %4540 = vrot.lane.b32.xlu1 %v9903_v10, %s9109_s20 }
0x1ac0   :  { %4777 = vrot.lane.b32.xlu1 %v9893_v21, %s9090_s9 }
0x1ac4   :  { %4775 = vrot.lane.b32.xlu1 %v9898_v7, %s9090_s9 }
0x1ac8   :  { %4855 = vrot.lane.b32.xlu1 %v9901_v9, %s9090_s9 }
0x1ade   :  { %v9997_v35 = vpop.f32.mrb[48].mxu0 }
0x1adf   :  { %v7362_v32 = vpop.f32.mrb[49].mxu0 }
0x1ae2   :  { %v3934_v49 = vpop.f32.mrb[50].mxu0 }
0x1ae3   :  { %v4016_v63 = vmul.f32 0.17677669, %v3934_v49  ;;  %v7372_v33 = vpop.f32.mrb[51].mxu0 }
0x1ae5   :  { %v4018_v39 = vadd.f32 %v4016_v63, %v9697_v46 }
0x1ae7   :  { %v4020_v36 = vsel %vm1203_vm3, %v4018_v39, -inf }
0x1aec   :  { %4021 = vmax.xlane.f32.xlu1 %v4020_v36 }
0x1b38   :  { %v4520_v37 = vpop.xlane.xlu1 %4519 }
0x1b39   :  { %v4524_v40 = vsub.f32 %v4516_v24, %v4520_v37  ;;  %v3521_v24 = vld [vmem:[#allocation14 + $0x88] sm:$0xff] }
0x1b3a   :  { %v7864_v25 = vpack.c.bf16 %v3521_v24, %v3520_v23 }
0x1b3b   :  { %v4526_v21 = vmul.f32 1.442695, %v4524_v40 }
0x1b3c   :  { %v4541_v41 = vpop.permute.xlu1 %4540  ;;  %v4523_v45 = vpop.xlane.xlu0 %4522 }
0x1b3d   :  { %8373 = vpow2.f32 %v4526_v21  ;;  %v4525_v7 = vsub.f32 %v4517_v30, %v4523_v45  ;;  %7421 = vmatpush3.msra.mxu1 %v4541_v41  ;;  %v3522_v41 = vld [vmem:[#allocation14 + $0x90] sm:$0xff]  ;;  %v3523_v45 = vld [vmem:[#allocation14 + $0x98] sm:$0xff] }
0x1b3e   :  { %7425 = vmatprep.subr.mxu1 %v9118_v57 }
0x1b3f   :  { %v4528_v9 = vmul.f32 1.442695, %v4525_v7 }
0x1b40   :  { %v4778_v51 = vpop.permute.xlu1 %4777 }
0x1b41   :  { %8375 = vpow2.f32 %v4528_v9  ;;  %v7868_v9 = vpack.c.bf16 %v3523_v45, %v3522_v41  ;;  %v5258_v41 = vld [vmem:[#allocation20 + $0x258] sm:$0xff] }
0x1b42   :  { %v5262_v45 = vld [vmem:[#allocation20 + $0x278] sm:$0xff] }
0x1b44   :  { %v4776_v54 = vpop.permute.xlu1 %4775 }
0x1b47   :  { %v8374_v47 = vpop.eup %8373 }
0x1b48   :  { %v4530_v48 = vsel %vm1203_vm3, %v8374_v47, 0.0  ;;  %v4856_v55 = vpop.permute.xlu1 %4855 }
0x1b49   :  { %4531 = vadd.xlane.f32.xlu0 %v4530_v48  ;;  %v3528_v48 = vld [vmem:[#allocation14 + $0xc0] sm:$0xff] }
0x1b4b   :  { %v8376_v38 = vpop.eup %8375 }
0x1b4c   :  { %v4533_v43 = vsel %vm1203_vm3, %v8376_v38, 0.0 }
0x1b4d   :  { %4534 = vadd.xlane.f32.xlu0 %v4533_v43  ;;  %v3530_v43 = vld [vmem:[#allocation14 + $0xd0] sm:$0xff] }
0x1b63   :  { %4616 = vrot.lane.b32.xlu0 %v9916_v13, %s9109_s20 }
0x1b67   :  { %4853 = vrot.lane.b32.xlu0 %v9912_v12, %s9090_s9 }
0x1b79   :  { %v4022_v56 = vpop.xlane.xlu1 %4021 }
0x1b7a   :  { %v4026_v58 = vsub.f32 %v4018_v39, %v4022_v56 }
0x1b7c   :  { %v4028_v60 = vmul.f32 1.442695, %v4026_v58 }
0x1b7e   :  { %8377 = vpow2.f32 %v4028_v60 }
0x1b88   :  { %v8378_v42 = vpop.eup %8377 }
0x1b89   :  { %v4032_v61 = vsel %vm1203_vm3, %v8378_v42, 0.0 }
0x1b8a   :  { %4033 = vadd.xlane.f32.xlu0 %v4032_v61 }
0x1ba0   :  { %4043 = vrot.lane.b32.xlu0 %v9903_v10, %s9120_s19 }
0x1ba4   :  { %5033 = vrot.lane.b32.xlu0 %v9916_v13, %s9090_s9 }
0x1bd6   :  { %v4532_v62 = vpop.xlane.xlu0 %4531 }
0x1bd7   :  { %8379 = vrcp.f32 %v4532_v62 }
0x1bda   :  { %v4535_v12 = vpop.xlane.xlu0 %4534 }
0x1bdb   :  { %8381 = vrcp.f32 %v4535_v12 }
0x1bde   :  { %v4617_v3 = vpop.permute.xlu0 %4616 }
0x1be1   :  { %v8380_v1 = vpop.eup %8379 }
0x1be2   :  { %v4537_v2 = vmul.f32 %v8380_v1, %v8374_v47  ;;  %v4854_v13 = vpop.permute.xlu0 %4853  ;;  %v3532_v1 = vld [vmem:[#allocation14 + $0xe0] sm:$0xff] }
0x1be4   :  { %7423 = vmatmul.mubr.msk.f32.vlgmr.msra.gmra.mrb[42].mxu1 %vm1203_vm3, %v4537_v2  ;;  %v3533_v2 = vld [vmem:[#allocation14 + $0xe8] sm:$0xff] }
0x1be5   :  { %v8382_v44 = vpop.eup %8381  ;;  %7426 = vmatpush3.msra.mxu1 %v4617_v3  ;;  %7427 = vmatprep.mubr.msk.f32.mxu1 %vm9119_vm0, %v9118_v57 }
0x1be6   :  { %v4539_v20 = vmul.f32 %v8382_v44, %v8376_v38  ;;  %7441 = vmatprep.subr.mxu1 %v9118_v57  ;;  %v3529_v38 = vld [vmem:[#allocation14 + $0xc8] sm:$0xff]  ;;  %v7880_v44 = vpack.c.bf16 %v3533_v2, %v3532_v1 }
0x1be8   :  { %7428 = vmatmul.mubr.msk.f32.vlgmr.msra.gmra.mrb[44].mxu1 %vm1203_vm3, %v4539_v20 }
0x1be9   :  { %7443 = vmatprep.mubr.msk.f32.mxu1 %vm9119_vm0, %v9118_v57 }
0x1bec   :  { %7442 = vmatpush3.xpose.msk.msra.mxu1 %vm1046_vm1, %v4778_v51  ;;  %v3531_v51 = vld [vmem:[#allocation14 + $0xd8] sm:$0xff] }
0x1bed   :  { %7446 = vmatprep.subr.mxu1 %v9118_v57 }
0x1bef   :  { %7444 = vmatmul.mubr.msk.f32.vlgmr.msra.gmra.mrb[46].mxu1 %vm1046_vm1, %v4776_v54  ;;  %v7876_v54 = vpack.c.bf16 %v3531_v51, %v3530_v43  ;;  %v5261_v43 = vld [vmem:[#allocation20 + $0x270] sm:$0xff]  ;;  %v5264_v51 = vld [vmem:[#allocation20 + $0x288] sm:$0xff] }
0x1bf0   :  { %7447 = vmatpush3.xpose.msk.msra.mxu1 %vm1046_vm1, %v4856_v55  ;;  %7448 = vmatprep.mubr.msk.f32.mxu1 %vm9119_vm0, %v9118_v57 }
0x1bf1   :  { %7456 = vmatprep.subr.mxu1 %v9118_v57 }
0x1bf3   :  { %7449 = vmatmul.mubr.msk.f32.vlgmr.msra.gmra.mrb[48].mxu1 %vm1046_vm1, %v4854_v13 }
0x1bf4   :  { %7458 = vmatprep.mubr.msk.f32.mxu1 %vm9119_vm0, %v9118_v57 }
0x1c17   :  { %v4034_v4 = vpop.xlane.xlu0 %4033 }
0x1c18   :  { %8383 = vrcp.f32 %v4034_v4 }
0x1c1b   :  { %v4044_v53 = vpop.permute.xlu0 %4043 }
0x1c1c   :  { %7379 = vmatpush3.msra.mxu0 %v4044_v53 }
0x1c1d   :  { %7857 = vmatprep.subr.bf16.mxu0 %v7856_v17 }
0x1c1f   :  { %v5034_v5 = vpop.permute.xlu0 %5033 }
0x1c20   :  { %7457 = vmatpush3.msra.mxu1 %v5034_v5 }
0x1c22   :  { %v8384_v6 = vpop.eup %8383 }
0x1c23   :  { %v4039_v52 = vmul.f32 %v8384_v6, %v8378_v42  ;;  %v3535_v6 = vld [vmem:[#allocation14 + $0xf8] sm:$0xff] }
0x1c25   :  { %7381 = vmatmul.mubr.msk.f32.vlgmr.msra.gmra.mrb[52].mxu0 %vm1203_vm3, %v4039_v52 }
0x1c26   :  { %7859 = vmatpush3.bf16.msra.mxu0 %v7856_v17 }
0x1c27   :  { %7861 = vmatprep.subr.bf16.mxu0 %v7860_v22 }
0x1c2a   :  { %7863 = vmatpush3.bf16.msra.mxu0 %v7860_v22  ;;  %v6698_v22 = vld [vmem:[#allocation16 + $0x1] ss:$0 sm:$0xff] }
0x1c2b   :  { %7865 = vmatprep.subr.bf16.mxu0 %v7864_v25 }
0x1cb7   :  { %v4612_v15 = vpop.f32.mrb[42].mxu1 }
0x1cb8   :  { %v7424_v27 = vpop.f32.mrb[43].mxu1 }
0x1cbb   :  { %v4688_v0 = vpop.f32.mrb[44].mxu1 }
0x1cbc   :  { %v7429_v30 = vpop.f32.mrb[45].mxu1 }
0x1cbd   :  { %v5252_v30 = vld [vmem:[#allocation20 + $0x228] sm:$0xff] }
0x1cc2   :  { %v4849_v31 = vpop.f32.mrb[46].mxu1 }
0x1cc3   :  { %v4931_v32 = vmul.f32 0.17677669, %v4849_v31  ;;  %v7445_v49 = vpop.f32.mrb[47].mxu1  ;;  %v5250_v31 = vld [vmem:[#allocation20 + $0x218] sm:$0xff] }
0x1cc4   :  { %v5254_v49 = vld [vmem:[#allocation20 + $0x238] sm:$0xff] }
0x1cc5   :  { %v4933_v63 = vadd.f32 %v4931_v32, %v9697_v46 }
0x1cc6   :  { %v4927_v33 = vpop.f32.mrb[48].mxu1 }
0x1cc7   :  { %v4932_v39 = vmul.f32 0.17677669, %v4927_v33  ;;  %v7450_v36 = vpop.f32.mrb[49].mxu1  ;;  %v4935_v37 = vsel %vm1203_vm3, %v4933_v63, -inf  ;;  %v5251_v33 = vld [vmem:[#allocation20 + $0x220] sm:$0xff] }
0x1cc8   :  { %4936 = vmax.xlane.f32.xlu1 %v4935_v37  ;;  %v5249_v36 = vld [vmem:[#allocation20 + $0x210] sm:$0xff] }
0x1cc9   :  { %v4934_v40 = vadd.f32 %v4932_v39, %v9697_v46  ;;  %v7872_v46 = vpack.c.bf16 %v3529_v38, %v3528_v48  ;;  %v7920_v39 = vpack.c.bf16 %v5254_v49, %v5250_v31  ;;  %v5253_v37 = vld [vmem:[#allocation20 + $0x230] sm:$0xff]  ;;  %v5259_v48 = vld [vmem:[#allocation20 + $0x260] sm:$0xff] }
0x1cca   :  { %v5257_v38 = vld [vmem:[#allocation20 + $0x250] sm:$0xff]  ;;  %v5279_v49 = vld [vmem:[#allocation20 + $0x300] sm:$0xff] }
0x1ccb   :  { %v4938_v21 = vsel %vm1203_vm3, %v4934_v40, -inf }
0x1ccc   :  { %4939 = vmax.xlane.f32.xlu1 %v4938_v21  ;;  %v5260_v21 = vld [vmem:[#allocation20 + $0x268] sm:$0xff] }
0x1cf8   :  { %v4115_v7 = vpop.f32.mrb[52].mxu0 }
0x1cf9   :  { %v7382_v47 = vpop.f32.mrb[53].mxu0  ;;  %7396 = vmatprep.mubr.msk.f32.mxu0 %vm1046_vm1, %v4115_v7 }
0x1cfa   :  { %7397 = vmatmul.mubr.msk.f32.vlgmr.msra.gmra.mrb[54].mxu0 %vm1046_vm1, %v9983_v16  ;;  %v5255_v47 = vld [vmem:[#allocation20 + $0x240] sm:$0xff] }
0x1cfb   :  { %7867 = vmatpush3.bf16.msra.mxu0 %v7864_v25  ;;  %7407 = vmatprep.mubr.msk.f32.mxu0 %vm1046_vm1, %v9997_v35 }
0x1cfc   :  { %7869 = vmatprep.subr.bf16.mxu0 %v7868_v9 }
0x1cff   :  { %7871 = vmatpush3.bf16.msra.mxu0 %v7868_v9  ;;  %v7924_v9 = vpack.c.bf16 %v5262_v45, %v5258_v41  ;;  %v5294_v45 = vld [vmem:[#allocation20 + $0x378] sm:$0xff] }
0x1d00   :  { %7873 = vmatprep.subr.bf16.mxu0 %v7872_v46 }
0x1d02   :  { %7408 = vmatmul.mubr.msk.f32.vlgmr.msra.gmra.mrb[54].mxu0 %vm1046_vm1, %v9939_v34 }
0x1d03   :  { %7875 = vmatpush3.bf16.msra.mxu0 %v7872_v46  ;;  %7438 = vmatprep.mubr.msk.f32.mxu0 %vm1046_vm1, %v4612_v15  ;;  %v7894_v46 = vpack.c.bf16 %v5259_v48, %v5255_v47 }
0x1d04   :  { %7877 = vmatprep.subr.bf16.mxu0 %v7876_v54 }
0x1d07   :  { %7879 = vmatpush3.bf16.msra.mxu0 %v7876_v54  ;;  %v5268_v54 = vld [vmem:[#allocation20 + $0x2a8] sm:$0xff] }
0x1d08   :  { %7451 = vmatprep.subr.mxu0 %v9118_v57 }
0x1d0a   :  { %7439 = vmatmul.mubr.msk.f32.vlgmr.msra.gmra.mrb[54].mxu0 %vm1046_vm1, %v4688_v0  ;;  %v5248_v0 = vld [vmem:[#allocation20 + $0x208] sm:$0xff] }
0x1d0b   :  { %7453 = vmatprep.mubr.msk.f32.mxu0 %vm9119_vm0, %v9118_v57  ;;  %v7888_v32 = vpack.c.bf16 %v5252_v30, %v5248_v0  ;;  %v5284_v0 = vld [vmem:[#allocation20 + $0x328] sm:$0xff]  ;;  %v5282_v30 = vld [vmem:[#allocation20 + $0x318] sm:$0xff] }
0x1d0d   :  { %7889 = vmatprep.subr.bf16.mxu1 %v7888_v32  ;;  %v5286_v32 = vld [vmem:[#allocation20 + $0x338] sm:$0xff] }
0x1d55   :  { %v4937_v16 = vpop.xlane.xlu1 %4936 }
0x1d56   :  { %v4941_v35 = vsub.f32 %v4933_v63, %v4937_v16  ;;  %v5247_v63 = vld [vmem:[#allocation20 + $0x200] sm:$0xff]  ;;  %v7926_v16 = vpack.c.bf16 %v5261_v43, %v5257_v38  ;;  %v5289_v38 = vld [vmem:[#allocation20 + $0x350] sm:$0xff]  ;;  %v5296_v43 = vld [vmem:[#allocation20 + $0x388] sm:$0xff] }
0x1d58   :  { %v4943_v55 = vmul.f32 1.442695, %v4941_v35  ;;  %v7896_v35 = vpack.c.bf16 %v5268_v54, %v5264_v51  ;;  %v5300_v54 = vld [vmem:[#allocation20 + $0x3a8] sm:$0xff] }
0x1d59   :  { %v4940_v56 = vpop.xlane.xlu1 %4939 }
0x1d5a   :  { %8385 = vpow2.f32 %v4943_v55  ;;  %v4942_v58 = vsub.f32 %v4934_v40, %v4940_v56  ;;  %v7922_v40 = vpack.c.bf16 %v5253_v37, %v5249_v36  ;;  %v5266_v55 = vld [vmem:[#allocation20 + $0x298] sm:$0xff]  ;;  %v5285_v36 = vld [vmem:[#allocation20 + $0x330] sm:$0xff] }
0x1d5b   :  { %v5270_v56 = vld [vmem:[#allocation20 + $0x2b8] sm:$0xff] }
0x1d5c   :  { %v4945_v60 = vmul.f32 1.442695, %v4942_v58  ;;  %v5263_v58 = vld [vmem:[#allocation20 + $0x280] sm:$0xff] }
0x1d5e   :  { %8387 = vpow2.f32 %v4945_v60  ;;  %v7928_v60 = vpack.c.bf16 %v5270_v56, %v5266_v55  ;;  %v7912_v55 = vpack.c.bf16 %v5300_v54, %v5296_v43  ;;  %v5531_v43 = vld [vmem:[#allocation23 + $0x210] sm:$0xff] }
0x1d64   :  { %v8386_v34 = vpop.eup %8385 }
0x1d65   :  { %v4947_v42 = vsel %vm1203_vm3, %v8386_v34, 0.0 }
0x1d66   :  { %4948 = vadd.xlane.f32.xlu1 %v4947_v42  ;;  %v5265_v42 = vld [vmem:[#allocation20 + $0x290] sm:$0xff] }
0x1d68   :  { %v8388_v61 = vpop.eup %8387 }
0x1d69   :  { %v4950_v62 = vsel %vm1203_vm3, %v8388_v61, 0.0 }
0x1d6a   :  { %4951 = vadd.xlane.f32.xlu1 %v4950_v62 }
0x1d7b   :  { %4957 = vrot.lane.b32.xlu1 %v9903_v10, %s9090_s9  ;;  %v3534_v10 = vld [vmem:[#allocation14 + $0xf0] sm:$0xff]  ;;  %s9121_s9 = smov [#allocation44]  }
0x1d7c   :  { %v7884_v52 = vpack.c.bf16 %v3535_v6, %v3534_v10  ;;  %v5276_v10 = vld [vmem:[#allocation20 + $0x2e8] sm:$0xff]  ;;  %v5274_v6 = vld [vmem:[#allocation20 + $0x2d8] sm:$0xff]  ;;  %s6604_s20 = sshll.u32 %s9121_s9, 4  ;;  %s6605_s20 = int_to_ptr.vmem [resolvable:$true] %s6604_s20 }
0x1d7d   :  { %s9025_s7 = scalar_lea.vmem %s6605_s20, 32  ;;  %p9030_p7 = scmp.lt.s32.totalorder %s6605_s20, %s6605_s20 }
0x1d7e   :  { %p9026_p6 = scmp.ne.s32.totalorder %s6605_s20, %s9025_s7  ;;  %p9031_p8 = scmp.lt.s32.totalorder %s9025_s7, %s9025_s7 }
0x1d80   :  { %p9032_p9 = por %p9031_p8, %p9030_p7 }
0x1d82   :  { %p9033_p10 = pnand %p9032_p9, %p9026_p6 }
0x1df3   :  { %v4949_v12 = vpop.xlane.xlu1 %4948 }
0x1df4   :  { %8389 = vrcp.f32 %v4949_v12 }
0x1df7   :  { %v4952_v3 = vpop.xlane.xlu1 %4951 }
0x1df8   :  { %8391 = vrcp.f32 %v4952_v3 }
0x1dfb   :  { %v4958_v20 = vpop.permute.xlu1 %4957 }
0x1dfc   :  { %7452 = vmatpush3.msra.mxu0 %v4958_v20 }
0x1dfd   :  { %7881 = vmatprep.subr.bf16.mxu0 %v7880_v44 }
0x1dfe   :  { %v8390_v13 = vpop.eup %8389 }
0x1dff   :  { %v4954_v4 = vmul.f32 %v8390_v13, %v8386_v34  ;;  %v5267_v34 = vld [vmem:[#allocation20 + $0x2a0] sm:$0xff] }
0x1e00   :  { %v7898_v62 = vpack.c.bf16 %v5267_v34, %v5263_v58  ;;  %v5295_v58 = vld [vmem:[#allocation20 + $0x380] sm:$0xff]  ;;  %v5297_v34 = vld [vmem:[#allocation20 + $0x390] sm:$0xff] }
0x1e01   :  { %7454 = vmatmul.mubr.msk.f32.vlgmr.msra.gmra.mrb[56].mxu0 %vm1203_vm3, %v4954_v4 }
0x1e02   :  { %v8392_v53 = vpop.eup %8391  ;;  %7883 = vmatpush3.bf16.msra.mxu0 %v7880_v44 }
0x1e03   :  { %v4956_v5 = vmul.f32 %v8392_v53, %v8388_v61  ;;  %7885 = vmatprep.subr.bf16.mxu0 %v7884_v52  ;;  %v5269_v61 = vld [vmem:[#allocation20 + $0x2b0] sm:$0xff] }
0x1e04   :  { %v7930_v12 = vpack.c.bf16 %v5269_v61, %v5265_v42  ;;  %v5301_v61 = vld [vmem:[#allocation20 + $0x3b0] sm:$0xff] }
0x1e05   :  { %7459 = vmatmul.mubr.msk.f32.vlgmr.msra.gmra.mrb[50].mxu1 %vm1203_vm3, %v4956_v5  ;;  %v5272_v5 = vld [vmem:[#allocation20 + $0x2c8] sm:$0xff] }
0x1e06   :  { %5398 = vmatprep.mubr.f32.mxu1 %v9118_v57  ;;  %7887 = vmatpush3.bf16.msra.mxu0 %v7884_v52  ;;  %v7900_v52 = vpack.c.bf16 %v5276_v10, %v5272_v5  ;;  %v5307_v5 = vld [vmem:[#allocation20 + $0x3e0] sm:$0xff]  ;;  %v5305_v10 = vld [vmem:[#allocation20 + $0x3d0] sm:$0xff] }
0x1e07   :  { %7921 = vmatprep.subr.bf16.mxu0 %v7920_v39 }
0x1ed4   :  { %v5029_v26 = vpop.f32.mrb[56].mxu0 }
0x1ed5   :  { %v7455_v8 = vpop.f32.mrb[57].mxu0  ;;  %7469 = vmatprep.mubr.msk.f32.mxu0 %vm1046_vm1, %v5029_v26  ;;  %v5278_v26 = vld [vmem:[#allocation20 + $0x2f8] sm:$0xff] }
0x1ed6   :  { %v5271_v8 = vld [vmem:[#allocation20 + $0x2c0] sm:$0xff] }
0x1ed8   :  { %v5105_v50 = vpop.f32.mrb[50].mxu1 }
0x1ed9   :  { %v7460_v17 = vpop.f32.mrb[51].mxu1  ;;  %7470 = vmatmul.mubr.msk.f32.vlgmr.msra.gmra.mrb[54].mxu0 %vm1046_vm1, %v5105_v50  ;;  %v5275_v50 = vld [vmem:[#allocation20 + $0x2e0] sm:$0xff] }
0x1eda   :  { %5475 = vmatprep.mubr.f32.mxu0 %v9118_v57  ;;  %7923 = vmatpush1.bf16.msra.mxu0 %v7922_v40  ;;  %v7932_v17 = vpack.c.bf16 %v5278_v26, %v5274_v6  ;;  %v5292_v40 = vld [vmem:[#allocation20 + $0x368] sm:$0xff]  ;;  %v5309_v6 = vld [vmem:[#allocation20 + $0x3f0] sm:$0xff] }
0x1edb   :  { %7925 = vmatprep.subr.bf16.mxu0 %v7924_v9  ;;  %v5291_v9 = vld [vmem:[#allocation20 + $0x360] sm:$0xff]  ;;  %v7950_v26 = vpack.c.bf16 %v5309_v6, %v5305_v10  ;;  %v5583_v6 = vld [vmem:[#allocation23 + $0x3b0] sm:$0xff] }
0x1edc   :  { %v5552_v10 = vld [vmem:[#allocation23 + $0x2b8] sm:$0xff] }
0x1ede   :  { %7927 = vmatpush1.bf16.msra.mxu0 %v7926_v16  ;;  %v5298_v16 = vld [vmem:[#allocation20 + $0x398] sm:$0xff] }
0x1edf   :  { %7929 = vmatprep.subr.bf16.mxu0 %v7928_v60  ;;  %v5299_v60 = vld [vmem:[#allocation20 + $0x3a0] sm:$0xff] }
0x1ee0   :  { %v7914_v42 = vpack.c.bf16 %v5299_v60, %v5295_v58  ;;  %v5550_v58 = vld [vmem:[#allocation23 + $0x2a8] sm:$0xff]  ;;  %v5581_v60 = vld [vmem:[#allocation23 + $0x3a0] sm:$0xff] }
0x1ee2   :  { %7931 = vmatpush1.bf16.msra.mxu0 %v7930_v12  ;;  %v5308_v12 = vld [vmem:[#allocation20 + $0x3e8] sm:$0xff] }
0x1ee3   :  { %7933 = vmatprep.subr.bf16.mxu0 %v7932_v17  ;;  %v5577_v17 = vld [vmem:[#allocation23 + $0x380] sm:$0xff] }
0x1fac   :  { %v7471_v18 = vpop.f32.mrb[54].mxu0 }
0x1fad   :  { %v5193_v23 = vadd.f32 %v7471_v18, %v9869_v14  ;;  %v5181_v24 = vpop.f32.mrb[55].mxu0  ;;  %v7890_v14 = vpack.c.bf16 %v5251_v33, %v5247_v63  ;;  %v7902_v18 = vpack.c.bf16 %v5275_v50, %v5271_v8  ;;  %v5283_v63 = vld [vmem:[#allocation20 + $0x320] sm:$0xff]  ;;  %v7936_v33 = vpack.c.bf16 %v5286_v32, %v5282_v30  ;;  %v5545_v8 = vld [vmem:[#allocation23 + $0x280] sm:$0xff]  ;;  %v5546_v50 = vld [vmem:[#allocation23 + $0x288] sm:$0xff] }
0x1fae   :  { %v5192_v25 = vadd.f32 %v5181_v24, %v9865_v11  ;;  %v5256_v11 = vld [vmem:[#allocation20 + $0x248] sm:$0xff]  ;;  %v7906_v39 = vpack.c.bf16 %v5283_v63, %v5279_v49  ;;  %v6699_v63 = vld [vmem:[#allocation17 + $0x1] ss:$0 sm:$0xff] }
0x1faf   :  { %v10059_v15 = vadd.f32 %v6698_v22, %v5193_v23  ;;  %7891 = vmatpush1.bf16.msra.mxu1 %v7890_v14  ;;  %v7892_v7 = vpack.c.bf16 %v5260_v21, %v5256_v11  ;;  %v5277_v23 = vld [vmem:[#allocation20 + $0x2f0] sm:$0xff]  ;;  %v5288_v11 = vld [vmem:[#allocation20 + $0x348] sm:$0xff]  ;;  %v5290_v21 = vld [vmem:[#allocation20 + $0x358] sm:$0xff] }
0x1fb0   :  { %v10061_v27 = vadd.f32 %v6698_v22, %v5192_v25  ;;  %v5273_v22 = vld [vmem:[#allocation20 + $0x2d0] sm:$0xff]  ;;  %v5280_v25 = vld [vmem:[#allocation20 + $0x308] sm:$0xff]  ;;  %v7908_v41 = vpack.c.bf16 %v5292_v40, %v5288_v11  ;;  %v7940_v47 = vpack.c.bf16 %v5294_v45, %v5290_v21  ;;  %v5547_v40 = vld [vmem:[#allocation23 + $0x290] sm:$0xff] }
0x1fb1   :  { %5210 = vadd.xlane.f32.xlu1 %v10059_v15  ;;  %7893 = vmatprep.subr.bf16.mxu1 %v7892_v7  ;;  %v7934_v24 = vpack.c.bf16 %v5277_v23, %v5273_v22  ;;  %v7904_v31 = vpack.c.bf16 %v5284_v0, %v5280_v25  ;;  %v5281_v14 = vld [vmem:[#allocation20 + $0x310] sm:$0xff]  ;;  %v5287_v7 = vld [vmem:[#allocation20 + $0x340] sm:$0xff]  ;;  %v5579_v45 = vld [vmem:[#allocation23 + $0x390] sm:$0xff] }
0x1fb2   :  { %5208 = vadd.xlane.f32.xlu0 %v10061_v27  ;;  %v7938_v37 = vpack.c.bf16 %v5285_v36, %v5281_v14  ;;  %v7910_v48 = vpack.c.bf16 %v5291_v9, %v5287_v7  ;;  %v5578_v22 = vld [vmem:[#allocation23 + $0x388] sm:$0xff]  ;;  %v5529_v14 = vld [vmem:[#allocation23 + $0x200] sm:$0xff]  ;;  %v5580_v7 = vld [vmem:[#allocation23 + $0x398] sm:$0xff] }
0x1fb3   :  { %7895 = vmatpush1.bf16.msra.mxu1 %v7894_v46  ;;  %7935 = vmatpush1.bf16.msra.mxu0 %v7934_v24  ;;  %v5293_v46 = vld [vmem:[#allocation20 + $0x370] sm:$0xff]  ;;  %v7984_v23 = vpack.c.bf16 %v5578_v22, %v5577_v17  ;;  %v5567_v22 = vld [vmem:[#allocation23 + $0x330] sm:$0xff] }
0x1fb4   :  { %7897 = vmatprep.subr.bf16.mxu1 %v7896_v35  ;;  %7937 = vmatprep.subr.bf16.mxu0 %v7936_v33  ;;  %v7942_v51 = vpack.c.bf16 %v5293_v46, %v5289_v38  ;;  %v5302_v35 = vld [vmem:[#allocation20 + $0x3b8] sm:$0xff]  ;;  %v5530_v36 = vld [vmem:[#allocation23 + $0x208] sm:$0xff] }
0x1fb5   :  { %v7944_v56 = vpack.c.bf16 %v5302_v35, %v5298_v16  ;;  %v6700_v33 = vld [vmem:[#allocation19 + $0x1] ss:$0 sm:$0xff]  ;;  %v5562_v11 = vld [vmem:[#allocation23 + $0x308] sm:$0xff]  ;;  %v7954_v38 = vpack.c.bf16 %v5530_v36, %v5529_v14  ;;  %v7988_v16 = vpack.c.bf16 %v5580_v7, %v5579_v45  ;;  %v5564_v35 = vld [vmem:[#allocation23 + $0x318] sm:$0xff] }
0x1fb6   :  { %v5569_v14 = vld [vmem:[#allocation23 + $0x340] sm:$0xff]  ;;  %v5570_v36 = vld [vmem:[#allocation23 + $0x348] sm:$0xff]  ;;  %v5588_v45 = vld [vmem:[#allocation23 + $0x3d8] sm:$0xff] }
0x1fb7   :  { %7899 = vmatpush1.bf16.msra.mxu1 %v7898_v62  ;;  %7939 = vmatpush1.bf16.msra.mxu0 %v7938_v37  ;;  %v5304_v62 = vld [vmem:[#allocation20 + $0x3c8] sm:$0xff]  ;;  %v5539_v7 = vld [vmem:[#allocation23 + $0x250] sm:$0xff] }
0x1fb8   :  { %7901 = vmatprep.subr.bf16.mxu1 %v7900_v52  ;;  %7941 = vmatprep.subr.bf16.mxu0 %v7940_v47  ;;  %v5561_v37 = vld [vmem:[#allocation23 + $0x300] sm:$0xff] }
0x1fb9   :  { %v7986_v46 = vpack.c.bf16 %v5562_v11, %v5561_v37  ;;  %v8002_v37 = vpack.c.bf16 %v5570_v36, %v5569_v14  ;;  %v5555_v11 = vld [vmem:[#allocation23 + $0x2d0] sm:$0xff] }
0x1fbb   :  { %7903 = vmatpush1.bf16.msra.mxu1 %v7902_v18  ;;  %7943 = vmatpush1.bf16.msra.mxu0 %v7942_v51  ;;  %v7952_v18 = vpack.c.bf16 %v5546_v50, %v5545_v8  ;;  %v5532_v51 = vld [vmem:[#allocation23 + $0x218] sm:$0xff]  ;;  %v5535_v8 = vld [vmem:[#allocation23 + $0x230] sm:$0xff] }
0x1fbc   :  { %7905 = vmatprep.subr.bf16.mxu1 %v7904_v31  ;;  %7945 = vmatprep.subr.bf16.mxu0 %v7944_v56  ;;  %v5536_v50 = vld [vmem:[#allocation23 + $0x238] sm:$0xff] }
0x1fbf   :  { %7907 = vmatpush1.bf16.msra.mxu1 %v7906_v39 }
0x1fc0   :  { %7909 = vmatprep.subr.bf16.mxu1 %v7908_v41  ;;  %v5548_v41 = vld [vmem:[#allocation23 + $0x298] sm:$0xff] }
0x1fc1   :  { %v7956_v54 = vpack.c.bf16 %v5548_v41, %v5547_v40  ;;  %v5556_v40 = vld [vmem:[#allocation23 + $0x2d8] sm:$0xff] }
0x1fc2   :  { %v7972_v41 = vpack.c.bf16 %v5556_v40, %v5555_v11 }
0x1fc3   :  { %7911 = vmatpush1.bf16.msra.mxu1 %v7910_v48 }
0x1fc4   :  { %7913 = vmatprep.subr.bf16.mxu1 %v7912_v55  ;;  %v5549_v55 = vld [vmem:[#allocation23 + $0x2a0] sm:$0xff] }
0x1fc7   :  { %7915 = vmatpush1.bf16.msra.mxu1 %v7914_v42  ;;  %v7958_v42 = vpack.c.bf16 %v5532_v51, %v5531_v43  ;;  %v5557_v51 = vld [vmem:[#allocation23 + $0x2e0] sm:$0xff] }
0x203e   :  { %v5211_v1 = vpop.xlane.xlu1 %5210 }
0x203f   :  { %v5209_v2 = vpop.xlane.xlu0 %5208  ;;  %v5213_v3 = vmul.f32 0.0078125, %v5211_v1  ;;  %v7946_v1 = vpack.c.bf16 %v5301_v61, %v5297_v34  ;;  %v5582_v34 = vld [vmem:[#allocation23 + $0x3a8] sm:$0xff] }
0x2040   :  { %v5212_v44 = vmul.f32 0.0078125, %v5209_v2  ;;  %v7916_v2 = vpack.c.bf16 %v5308_v12, %v5304_v62  ;;  %v5533_v62 = vld [vmem:[#allocation23 + $0x220] sm:$0xff]  ;;  %v7960_v12 = vpack.c.bf16 %v5550_v58, %v5549_v55 }
0x2041   :  { %v10069_v13 = vsub.f32 %v10059_v15, %v5213_v3  ;;  %v5306_v3 = vld [vmem:[#allocation20 + $0x3d8] sm:$0xff]  ;;  %7947 = vmatpush1.bf16.msra.mxu0 %v7946_v1  ;;  %v7992_v1 = vpack.c.bf16 %v5582_v34, %v5581_v60  ;;  %v5541_v55 = vld [vmem:[#allocation23 + $0x260] sm:$0xff] }
0x2042   :  { %v10066_v20 = vsub.f32 %v10061_v27, %v5212_v44  ;;  %v5310_v44 = vld [vmem:[#allocation20 + $0x3f8] sm:$0xff]  ;;  %7917 = vmatprep.subr.bf16.mxu1 %v7916_v2  ;;  %v5534_v2 = vld [vmem:[#allocation23 + $0x228] sm:$0xff]  ;;  %v5573_v34 = vld [vmem:[#allocation23 + $0x360] sm:$0xff] }
0x2043   :  { %v5217_v53 = vmul.f32 %v10069_v13, %v10069_v13 }
0x2044   :  { %v5216_v4 = vmul.f32 %v10066_v20, %v10066_v20 }
0x2046   :  { %5218 = vadd.xlane.f32.xlu0 %v5216_v4  ;;  %v5303_v4 = vld [vmem:[#allocation20 + $0x3c0] sm:$0xff] }
0x2047   :  { %v7918_v52 = vpack.c.bf16 %v5307_v5, %v5303_v4  ;;  %v7962_v4 = vpack.c.bf16 %v5534_v2, %v5533_v62  ;;  %v5551_v5 = vld [vmem:[#allocation23 + $0x2b0] sm:$0xff]  ;;  %v5560_v62 = vld [vmem:[#allocation23 + $0x2f8] sm:$0xff] }
0x2048   :  { %v5592_v2 = vld [vmem:[#allocation23 + $0x3f8] sm:$0xff] }
0x2049   :  { %7919 = vmatpush1.bf16.msra.mxu1 %v7918_v52  ;;  %v7964_v52 = vpack.c.bf16 %v5552_v10, %v5551_v5  ;;  %v5575_v5 = vld [vmem:[#allocation23 + $0x370] sm:$0xff]  ;;  %v5576_v10 = vld [vmem:[#allocation23 + $0x378] sm:$0xff] }
0x204a   :  { %5220 = vadd.xlane.f32.xlu0 %v5217_v53  ;;  %v7948_v53 = vpack.c.bf16 %v5310_v44, %v5306_v3  ;;  %7953 = vmatprep.subr.bf16.mxu1 %v7952_v18  ;;  %v5565_v3 = vld [vmem:[#allocation23 + $0x320] sm:$0xff]  ;;  %v5566_v44 = vld [vmem:[#allocation23 + $0x328] sm:$0xff]  ;;  %v7966_v18 = vpack.c.bf16 %v5536_v50, %v5535_v8 }
0x204c   :  { %7949 = vmatprep.subr.bf16.mxu0 %v7948_v53  ;;  %v7994_v53 = vpack.c.bf16 %v5566_v44, %v5565_v3  ;;  %v5543_v3 = vld [vmem:[#allocation23 + $0x270] sm:$0xff]  ;;  %v5544_v44 = vld [vmem:[#allocation23 + $0x278] sm:$0xff] }
0x204d   :  { %7951 = vmatpush1.bf16.msra.mxu0 %v7950_v26  ;;  %v5584_v26 = vld [vmem:[#allocation23 + $0x3b8] sm:$0xff] }
0x204e   :  { %7985 = vmatprep.subr.bf16.mxu0 %v7984_v23  ;;  %v7996_v17 = vpack.c.bf16 %v5584_v26, %v5583_v6  ;;  %v5568_v23 = vld [vmem:[#allocation23 + $0x338] sm:$0xff]  ;;  %v8014_v6 = vpack.c.bf16 %v5576_v10, %v5575_v5 }
0x20d3   :  { %v5219_v24 = vpop.xlane.xlu0 %5218 }
0x20d4   :  { %v5222_v25 = vmul.f32 0.0078125, %v5219_v24  ;;  %v7998_v24 = vpack.c.bf16 %v5568_v23, %v5567_v22 }
0x20d6   :  { %v5224_v0 = vadd.f32 1e-06, %v5222_v25  ;;  %v5553_v25 = vld [vmem:[#allocation23 + $0x2c0] sm:$0xff] }
0x20d7   :  { %v5221_v30 = vpop.xlane.xlu0 %5220 }
0x20d8   :  { %8393 = vrsqrt.f32 %v5224_v0  ;;  %v5223_v31 = vmul.f32 0.0078125, %v5221_v30  ;;  %v5554_v0 = vld [vmem:[#allocation23 + $0x2c8] sm:$0xff]  ;;  %v5585_v30 = vld [vmem:[#allocation23 + $0x3c0] sm:$0xff] }
0x20da   :  { %v5225_v32 = vadd.f32 1e-06, %v5223_v31  ;;  %v7968_v31 = vpack.c.bf16 %v5554_v0, %v5553_v25 }
0x20dc   :  { %8395 = vrsqrt.f32 %v5225_v32  ;;  %v5586_v32 = vld [vmem:[#allocation23 + $0x3c8] sm:$0xff] }
0x20e2   :  { %v8394_v49 = vpop.eup %8393 }
0x20e3   :  { %v5228_v39 = vmul.f32 %v8394_v49, %v10066_v20  ;;  %v5563_v20 = vld [vmem:[#allocation23 + $0x310] sm:$0xff]  ;;  %v5537_v49 = vld [vmem:[#allocation23 + $0x240] sm:$0xff] }
0x20e4   :  { %v7990_v61 = vpack.c.bf16 %v5564_v35, %v5563_v20  ;;  %v5590_v35 = vld [vmem:[#allocation23 + $0x3e8] sm:$0xff] }
0x20e5   :  { %v5236_v21 = vmul.f32 %v6699_v63, %v5228_v39 }
0x20e6   :  { %v8396_v9 = vpop.eup %8395 }
0x20e7   :  { %v5244_v47 = vadd.f32 %v6700_v33, %v5236_v21  ;;  %v5229_v48 = vmul.f32 %v8396_v9, %v10069_v13  ;;  %v5587_v21 = vld [vmem:[#allocation23 + $0x3d0] sm:$0xff]  ;;  %v5540_v9 = vld [vmem:[#allocation23 + $0x258] sm:$0xff] }
0x20e9   :  { %5399 = vmatmul.mubr.f32.vlgmr.msra.gmra.mrb[52].mxu1 %v5244_v47  ;;  %5476 = vmatmul.mubr.f32.vlgmr.msra.gmra.mrb[58].mxu0 %v5244_v47  ;;  %v5237_v56 = vmul.f32 %v6699_v63, %v5229_v48  ;;  %v5538_v63 = vld [vmem:[#allocation23 + $0x248] sm:$0xff]  ;;  %v8004_v47 = vpack.c.bf16 %v5588_v45, %v5587_v21  ;;  %v7974_v48 = vpack.c.bf16 %v5540_v9, %v5539_v7 }
0x20ea   :  { %5404 = vmatprep.mubr.f32.mxu1 %v9118_v57  ;;  %5481 = vmatprep.mubr.f32.mxu0 %v9118_v57  ;;  %v7970_v39 = vpack.c.bf16 %v5538_v63, %v5537_v49 }
0x20eb   :  { %v5245_v13 = vadd.f32 %v6700_v33, %v5237_v56  ;;  %7955 = vmatpush3.bf16.msra.mxu1 %v7954_v38  ;;  %7987 = vmatpush3.bf16.msra.mxu0 %v7986_v46  ;;  %v8000_v33 = vpack.c.bf16 %v5586_v32, %v5585_v30  ;;  %v5571_v38 = vld [vmem:[#allocation23 + $0x350] sm:$0xff]  ;;  %v5572_v46 = vld [vmem:[#allocation23 + $0x358] sm:$0xff]  ;;  %v5542_v56 = vld [vmem:[#allocation23 + $0x268] sm:$0xff] }
0x20ec   :  { %7957 = vmatprep.subr.bf16.mxu1 %v7956_v54  ;;  %7989 = vmatprep.subr.bf16.mxu0 %v7988_v16  ;;  %v8006_v43 = vpack.c.bf16 %v5572_v46, %v5571_v38  ;;  %v5558_v54 = vld [vmem:[#allocation23 + $0x2e8] sm:$0xff]  ;;  %v5589_v16 = vld [vmem:[#allocation23 + $0x3e0] sm:$0xff]  ;;  %v7978_v60 = vpack.c.bf16 %v5542_v56, %v5541_v55 }
0x20ed   :  { %5405 = vmatmul.mubr.f32.gmra.mrb[54].mxu1 %v5245_v13  ;;  %5482 = vmatmul.mubr.f32.gmra.mrb[60].mxu0 %v5245_v13  ;;  %v7976_v20 = vpack.c.bf16 %v5558_v54, %v5557_v51  ;;  %v8008_v58 = vpack.c.bf16 %v5590_v35, %v5589_v16  ;;  %v5574_v13 = vld [vmem:[#allocation23 + $0x368] sm:$0xff] }
0x20ef   :  { %7959 = vmatpush3.bf16.msra.mxu1 %v7958_v42  ;;  %7991 = vmatpush3.bf16.msra.mxu0 %v7990_v61  ;;  %v8010_v42 = vpack.c.bf16 %v5574_v13, %v5573_v34  ;;  %v5559_v61 = vld [vmem:[#allocation23 + $0x2f0] sm:$0xff] }
0x20f0   :  { %7961 = vmatprep.subr.bf16.mxu1 %v7960_v12  ;;  %7993 = vmatprep.subr.bf16.mxu0 %v7992_v1  ;;  %v5591_v12 = vld [vmem:[#allocation23 + $0x3f0] sm:$0xff]  ;;  %v7980_v1 = vpack.c.bf16 %v5560_v62, %v5559_v61 }
0x20f3   :  { %7963 = vmatpush3.bf16.msra.mxu1 %v7962_v4  ;;  %7995 = vmatpush3.bf16.msra.mxu0 %v7994_v53  ;;  %v8012_v4 = vpack.c.bf16 %v5592_v2, %v5591_v12  ;;  %v7982_v53 = vpack.c.bf16 %v5544_v44, %v5543_v3 }
0x20f4   :  { %7965 = vmatprep.subr.bf16.mxu1 %v7964_v52  ;;  %7997 = vmatprep.subr.bf16.mxu0 %v7996_v17  ;;  %v5312_v52 = vld [vmem:[#allocation22 + $0x4] sm:$0xf] }
0x20f5   :  { %v5317_v26 = vrot.slane %v5312_v52, %v9660_v28  ;;  %v5325_v8 = vrot.slane %v5312_v52, %v9663_v29  ;;  %v5321_v50 = vrot.slane %v5312_v52, %v9657_v19  ;;  %v5329_v17 = vrot.slane %v5312_v52, %v9857_v59 }
0x20f7   :  { %7967 = vmatpush3.bf16.msra.mxu1 %v7966_v18  ;;  %7999 = vmatpush3.bf16.msra.mxu0 %v7998_v24 }
0x20f8   :  { %7969 = vmatprep.subr.bf16.mxu1 %v7968_v31  ;;  %8001 = vmatprep.subr.bf16.mxu0 %v8000_v33 }
0x20fb   :  { %7971 = vmatpush3.bf16.msra.mxu1 %v7970_v39  ;;  %8003 = vmatpush3.bf16.msra.mxu0 %v8002_v37 }
0x20fc   :  { %7973 = vmatprep.subr.bf16.mxu1 %v7972_v41  ;;  %8005 = vmatprep.subr.bf16.mxu0 %v8004_v47 }
0x20ff   :  { %7975 = vmatpush3.bf16.msra.mxu1 %v7974_v48  ;;  %8007 = vmatpush3.bf16.msra.mxu0 %v8006_v43 }
0x2100   :  { %7977 = vmatprep.subr.bf16.mxu1 %v7976_v20  ;;  %8009 = vmatprep.subr.bf16.mxu0 %v8008_v58 }
0x2103   :  { %7979 = vmatpush3.bf16.msra.mxu1 %v7978_v60  ;;  %8011 = vmatpush3.bf16.msra.mxu0 %v8010_v42 }
0x2104   :  { %7981 = vmatprep.subr.bf16.mxu1 %v7980_v1  ;;  %8013 = vmatprep.subr.bf16.mxu0 %v8012_v4 }
0x2107   :  { %7983 = vmatpush3.bf16.msra.mxu1 %v7982_v53  ;;  %8015 = vmatpush3.bf16.msra.mxu0 %v8014_v6 }
0x21bc   :  { %v5400_v18 = vpop.f32.mrb[52].mxu1  ;;  %v5477_v22 = vpop.f32.mrb[58].mxu0 }
0x21bd   :  { %v5401_v23 = vadd.f32 %v5400_v18, %v5317_v26  ;;  %v5478_v24 = vadd.f32 %v5477_v22, %v5325_v8  ;;  %v5402_v25 = vpop.f32.mrb[53].mxu1  ;;  %v5479_v0 = vpop.f32.mrb[59].mxu0  ;;  %v6701_v22 = vld [vmem:[#allocation25 + $0x1] ss:$0 sm:$0xff] }
0x21be   :  { %v5403_v30 = vadd.f32 %v5402_v25, %v5321_v50  ;;  %v5480_v31 = vadd.f32 %v5479_v0, %v5329_v17 }
0x21bf   :  { %v5496_v32 = vmul.f32 0.70710677, %v5401_v23  ;;  %v5498_v49 = vmul.f32 0.70710677, %v5478_v24  ;;  %v5488_v35 = vmul.f32 0.5, %v5401_v23  ;;  %v5490_v60 = vmul.f32 0.5, %v5478_v24 }
0x21c0   :  { %v5497_v63 = vmul.f32 0.70710677, %v5403_v30  ;;  %v5499_v33 = vmul.f32 0.70710677, %v5480_v31  ;;  %v5406_v39 = vpop.f32.mrb[54].mxu1  ;;  %v5483_v14 = vpop.f32.mrb[60].mxu0 }
0x21c1   :  { %8397 = verf.f32 %v5496_v32  ;;  %v5407_v36 = vadd.f32 %v5406_v39, %v5317_v26  ;;  %v5484_v37 = vadd.f32 %v5483_v14, %v5325_v8  ;;  %v5408_v11 = vpop.f32.mrb[55].mxu1  ;;  %v5485_v40 = vpop.f32.mrb[61].mxu0  ;;  %v5489_v16 = vmul.f32 0.5, %v5403_v30 }
0x21c2   :  { %8399 = verf.f32 %v5498_v49  ;;  %v5409_v21 = vadd.f32 %v5408_v11, %v5321_v50  ;;  %v5486_v41 = vadd.f32 %v5485_v40, %v5329_v17  ;;  %v5491_v55 = vmul.f32 0.5, %v5480_v31 }
0x21c3   :  { %8401 = verf.f32 %v5497_v63  ;;  %v5500_v45 = vmul.f32 0.70710677, %v5407_v36  ;;  %v5502_v7 = vmul.f32 0.70710677, %v5484_v37  ;;  %v5492_v53 = vmul.f32 0.5, %v5407_v36 }
0x21c4   :  { %8403 = verf.f32 %v5499_v33  ;;  %v5501_v9 = vmul.f32 0.70710677, %v5409_v21  ;;  %v5503_v47 = vmul.f32 0.70710677, %v5486_v41  ;;  %v5493_v44 = vmul.f32 0.5, %v5409_v21 }
0x21c5   :  { %8405 = verf.f32 %v5500_v45  ;;  %v5495_v5 = vmul.f32 0.5, %v5486_v41  ;;  %v5494_v6 = vmul.f32 0.5, %v5484_v37  ;;  %v5808_v45 = vld [vmem:[#allocation29 + $0x8] sm:$0xff] }
0x21c6   :  { %8407 = verf.f32 %v5502_v7  ;;  %v5812_v7 = vld [vmem:[#allocation29 + $0x28] sm:$0xff] }
0x21c7   :  { %8409 = verf.f32 %v5501_v9  ;;  %v5810_v9 = vld [vmem:[#allocation29 + $0x18] sm:$0xff] }
0x21c8   :  { %8411 = verf.f32 %v5503_v47  ;;  %v8016_v47 = vpack.c.bf16 %v5812_v7, %v5808_v45  ;;  %v5842_v45 = vld [vmem:[#allocation29 + $0x118] sm:$0xff] }
0x21ca   :  { %8017 = vmatprep.subr.bf16.mxu1 %v8016_v47  ;;  %v5839_v47 = vld [vmem:[#allocation29 + $0x100] sm:$0xff] }
0x21cb   :  { %v8398_v48 = vpop.eup %8397 }
0x21cc   :  { %v8400_v38 = vpop.eup %8399  ;;  %v5512_v43 = vadd.f32 1.0, %v8398_v48  ;;  %v5814_v48 = vld [vmem:[#allocation29 + $0x38] sm:$0xff] }
0x21cd   :  { %v8402_v46 = vpop.eup %8401  ;;  %v5514_v54 = vadd.f32 1.0, %v8400_v38  ;;  %v5807_v38 = vld [vmem:[#allocation29] sm:$0xff] }
0x21ce   :  { %v8404_v51 = vpop.eup %8403  ;;  %v5513_v20 = vadd.f32 1.0, %v8402_v46  ;;  %v5520_v42 = vmul.f32 %v5512_v43, %v5488_v35  ;;  %v5811_v46 = vld [vmem:[#allocation29 + $0x20] sm:$0xff]  ;;  %v8048_v43 = vpack.c.bf16 %v5814_v48, %v5810_v9  ;;  %v5818_v35 = vld [vmem:[#allocation29 + $0x58] sm:$0xff] }
0x21cf   :  { %v5515_v56 = vadd.f32 1.0, %v8404_v51  ;;  %v8406_v58 = vpop.eup %8405  ;;  %v5522_v12 = vmul.f32 %v5514_v54, %v5490_v60  ;;  %v8018_v51 = vpack.c.bf16 %v5811_v46, %v5807_v38  ;;  %v5813_v54 = vld [vmem:[#allocation29 + $0x30] sm:$0xff]  ;;  %v5815_v60 = vld [vmem:[#allocation29 + $0x40] sm:$0xff]  ;;  %v5846_v9 = vld [vmem:[#allocation29 + $0x138] sm:$0xff] }
0x21d0   :  { %v5521_v34 = vmul.f32 %v5513_v20, %v5489_v16  ;;  %v8408_v13 = vpop.eup %8407  ;;  %v5516_v1 = vadd.f32 1.0, %v8406_v58  ;;  %v5816_v16 = vld [vmem:[#allocation29 + $0x48] sm:$0xff]  ;;  %8049 = vmatprep.subr.bf16.mxu0 %v8048_v43  ;;  %v5843_v48 = vld [vmem:[#allocation29 + $0x120] sm:$0xff]  ;;  %v8064_v38 = vpack.c.bf16 %v5846_v9, %v5842_v45  ;;  %v5841_v43 = vld [vmem:[#allocation29 + $0x110] sm:$0xff] }
0x21d1   :  { %v5523_v61 = vmul.f32 %v5515_v56, %v5491_v55  ;;  %v8410_v62 = vpop.eup %8409  ;;  %v5518_v3 = vadd.f32 1.0, %v8408_v13  ;;  %v5820_v20 = vld [vmem:[#allocation29 + $0x68] sm:$0xff]  ;;  %v5822_v55 = vld [vmem:[#allocation29 + $0x78] sm:$0xff]  ;;  %v5817_v13 = vld [vmem:[#allocation29 + $0x50] sm:$0xff]  ;;  %v8034_v46 = vpack.c.bf16 %v5843_v48, %v5839_v47 }
0x21d2   :  { %5665 = vmatprep.mubr.f32.mxu1 %v5521_v34  ;;  %v8412_v2 = vpop.eup %8411  ;;  %v5517_v4 = vadd.f32 1.0, %v8410_v62  ;;  %v5524_v8 = vmul.f32 %v5516_v1, %v5492_v53  ;;  %v8020_v56 = vpack.c.bf16 %v5820_v20, %v5816_v16  ;;  %v8052_v58 = vpack.c.bf16 %v5822_v55, %v5818_v35  ;;  %v5819_v34 = vld [vmem:[#allocation29 + $0x60] sm:$0xff]  ;;  %v5852_v16 = vld [vmem:[#allocation29 + $0x168] sm:$0xff]  ;;  %v5854_v35 = vld [vmem:[#allocation29 + $0x178] sm:$0xff] }
0x21d3   :  { %5740 = vmatprep.mubr.f32.mxu0 %v5523_v61  ;;  %5666 = vmatmul.mubr.f32.vlgmr.msra.gmra.mrb[56].mxu1 %v5520_v42  ;;  %v5519_v10 = vadd.f32 1.0, %v8412_v2  ;;  %v5526_v50 = vmul.f32 %v5518_v3, %v5494_v6  ;;  %v8022_v42 = vpack.c.bf16 %v5819_v34, %v5815_v60  ;;  %v5821_v61 = vld [vmem:[#allocation29 + $0x70] sm:$0xff]  ;;  %v5847_v55 = vld [vmem:[#allocation29 + $0x140] sm:$0xff] }
0x21d4   :  { %5741 = vmatmul.mubr.f32.vlgmr.msra.gmra.mrb[62].mxu0 %v5522_v12  ;;  %v5525_v52 = vmul.f32 %v5517_v4, %v5493_v44  ;;  %8019 = vmatpush1.bf16.msra.mxu1 %v8018_v51  ;;  %v8054_v62 = vpack.c.bf16 %v5821_v61, %v5817_v13  ;;  %v5845_v51 = vld [vmem:[#allocation29 + $0x130] sm:$0xff]  ;;  %v5856_v61 = vld [vmem:[#allocation29 + $0x188] sm:$0xff]  ;;  %v5871_v47 = vld [vmem:[#allocation31] sm:$0xf] }
0x21d5   :  { %v5527_v26 = vmul.f32 %v5519_v10, %v5495_v5  ;;  %8021 = vmatprep.subr.bf16.mxu1 %v8020_v56  ;;  %v5851_v56 = vld [vmem:[#allocation29 + $0x160] sm:$0xff]  ;;  %v5849_v34 = vld [vmem:[#allocation29 + $0x150] sm:$0xff]  ;;  %v5876_v48 = vrot.slane %v5871_v47, %v9660_v28 }
0x21d6   :  { %5670 = vmatprep.mubr.f32.mxu1 %v5525_v52  ;;  %v5824_v52 = vld [vmem:[#allocation29 + $0x88] sm:$0xff]  ;;  %v8038_v60 = vpack.c.bf16 %v5851_v56, %v5847_v55  ;;  %v5853_v13 = vld [vmem:[#allocation29 + $0x170] sm:$0xff] }
0x21d7   :  { %5745 = vmatprep.mubr.f32.mxu0 %v5527_v26  ;;  %5671 = vmatmul.mubr.f32.gmra.mrb[58].mxu1 %v5524_v8  ;;  %v5828_v26 = vld [vmem:[#allocation29 + $0xa8] sm:$0xff]  ;;  %v5826_v8 = vld [vmem:[#allocation29 + $0x98] sm:$0xff] }
0x21d8   :  { %5746 = vmatmul.mubr.f32.gmra.mrb[64].mxu0 %v5526_v50  ;;  %5962 = vmatprep.mubr.f32.mxu1 %v9118_v57  ;;  %v8024_v50 = vpack.c.bf16 %v5828_v26, %v5824_v52  ;;  %v5861_v52 = vld [vmem:[#allocation29 + $0x1b0] sm:$0xff]  ;;  %v5864_v26 = vld [vmem:[#allocation29 + $0x1c8] sm:$0xff] }
0x21d9   :  { %6033 = vmatprep.mubr.f32.mxu0 %v9118_v57  ;;  %8023 = vmatpush1.bf16.msra.mxu1 %v8022_v42  ;;  %v8070_v42 = vpack.c.bf16 %v5853_v13, %v5849_v34 }
0x21da   :  { %8025 = vmatprep.subr.bf16.mxu1 %v8024_v50  ;;  %v5868_v50 = vld [vmem:[#allocation29 + $0x1e8] sm:$0xff] }
0x22a6   :  { %v7075_v17 = vpop.f32.mrb[56].mxu1 }
0x22a7   :  { %v7113_v18 = vpop.f32.mrb[62].mxu0  ;;  %v7076_v23 = vpop.f32.mrb[57].mxu1 }
0x22a8   :  { %v7077_v24 = vadd.f32 %v7076_v23, %v7075_v17  ;;  %v7114_v25 = vpop.f32.mrb[63].mxu0  ;;  %v5830_v17 = vld [vmem:[#allocation29 + $0xb8] sm:$0xff] }
0x22a9   :  { %v7115_v0 = vadd.f32 %v7114_v25, %v7113_v18  ;;  %v5823_v18 = vld [vmem:[#allocation29 + $0x80] sm:$0xff]  ;;  %v8056_v23 = vpack.c.bf16 %v5830_v17, %v5826_v8  ;;  %v5825_v25 = vld [vmem:[#allocation29 + $0x90] sm:$0xff]  ;;  %v5866_v17 = vld [vmem:[#allocation29 + $0x1d8] sm:$0xff] }
0x22aa   :  { %v5668_v30 = vadd.f32 %v7077_v24, %v6701_v22  ;;  %v7078_v31 = vpop.f32.mrb[58].mxu1 }
0x22ab   :  { %v7116_v49 = vpop.f32.mrb[64].mxu0  ;;  %v7079_v63 = vpop.f32.mrb[59].mxu1 }
0x22ac   :  { %v5743_v32 = vadd.f32 %v7115_v0, %v5668_v30  ;;  %v7080_v33 = vadd.f32 %v7079_v63, %v7078_v31  ;;  %v7117_v39 = vpop.f32.mrb[65].mxu0  ;;  %v5829_v0 = vld [vmem:[#allocation29 + $0xb0] sm:$0xff]  ;;  %v5832_v31 = vld [vmem:[#allocation29 + $0xc8] sm:$0xff] }
0x22ad   :  { %v7118_v14 = vadd.f32 %v7117_v39, %v7116_v49  ;;  %v8058_v30 = vpack.c.bf16 %v5829_v0, %v5825_v25  ;;  %v5834_v49 = vld [vmem:[#allocation29 + $0xd8] sm:$0xff]  ;;  %v5831_v39 = vld [vmem:[#allocation29 + $0xc0] sm:$0xff]  ;;  %v5865_v0 = vld [vmem:[#allocation29 + $0x1d0] sm:$0xff] }
0x22ae   :  { %v5673_v36 = vadd.f32 %v7080_v33, %v6701_v22  ;;  %v5751_v57 = vadd.f32 %v5743_v32, %v10061_v27  ;;  %v5827_v22 = vld [vmem:[#allocation29 + $0xa0] sm:$0xff]  ;;  %v5836_v32 = vld [vmem:[#allocation29 + $0xe8] sm:$0xff]  ;;  %v5838_v33 = vld [vmem:[#allocation29 + $0xf8] sm:$0xff] }
0x22af   :  { %v8026_v24 = vpack.c.bf16 %v5827_v22, %v5823_v18  ;;  %v8028_v63 = vpack.c.bf16 %v5836_v32, %v5832_v31  ;;  %v5870_v18 = vld [vmem:[#allocation29 + $0x1f8] sm:$0xff]  ;;  %v8044_v22 = vpack.c.bf16 %v5868_v50, %v5864_v26  ;;  %v5867_v25 = vld [vmem:[#allocation29 + $0x1e0] sm:$0xff]  ;;  %v5869_v31 = vld [vmem:[#allocation29 + $0x1f0] sm:$0xff] }
0x22b0   :  { %v5748_v37 = vadd.f32 %v7118_v14, %v5673_v36  ;;  %v5835_v14 = vld [vmem:[#allocation29 + $0xe0] sm:$0xff]  ;;  %v8060_v36 = vpack.c.bf16 %v5838_v33, %v5834_v49  ;;  %v8078_v32 = vpack.c.bf16 %v5869_v31, %v5865_v0  ;;  %v6159_v0 = vld [vmem:[#allocation35 + $0x60] sm:$0xff]  ;;  %v6164_v31 = vld [vmem:[#allocation35 + $0x88] sm:$0xff] }
0x22b1   :  { %8027 = vmatpush1.bf16.msra.mxu1 %v8026_v24  ;;  %v5863_v24 = vld [vmem:[#allocation29 + $0x1c0] sm:$0xff] }
0x22b2   :  { %v5752_v11 = vadd.f32 %v5748_v37, %v10059_v15  ;;  %v5809_v15 = vld [vmem:[#allocation29 + $0x10] sm:$0xff]  ;;  %v8030_v37 = vpack.c.bf16 %v5835_v14, %v5831_v39  ;;  %8029 = vmatprep.subr.bf16.mxu1 %v8028_v63  ;;  %v6158_v26 = vld [vmem:[#allocation35 + $0x58] sm:$0xff] }
0x22b3   :  { %v8050_v27 = vpack.c.bf16 %v5813_v54, %v5809_v15  ;;  %v8066_v15 = vpack.c.bf16 %v5845_v51, %v5841_v43  ;;  %v5848_v54 = vld [vmem:[#allocation29 + $0x148] sm:$0xff] }
0x22b4   :  { %v5757_v40 = vrot.slane %v5752_v11, 7  ;;  %v8036_v20 = vpack.c.bf16 %v5852_v16, %v5848_v54 }
0x22b5   :  { %8051 = vmatpush1.bf16.msra.mxu0 %v8050_v27  ;;  %8031 = vmatpush1.bf16.msra.mxu1 %v8030_v37  ;;  %v5850_v27 = vld [vmem:[#allocation29 + $0x158] sm:$0xff] }
0x22b6   :  { %v5759_v21 = vsel %vm5758_vm4, %v5757_v40, %v5751_v57  ;;  %8053 = vmatprep.subr.bf16.mxu0 %v8052_v58  ;;  %v8068_v58 = vpack.c.bf16 %v5854_v35, %v5850_v27  ;;  %v6702_v37 = vld [vmem:[#allocation26] ss:$0 sm:$0xff] }
0x22b7   :  { %v5762_v41 = vsel %vm5761_vm5, %v5759_v21, 0.0  ;;  %v5840_v21 = vld [vmem:[#allocation29 + $0x108] sm:$0xff] }
0x22b8   :  { %5763 = vadd.xlane.f32.xlu0 %v5762_v41  ;;  %v5844_v41 = vld [vmem:[#allocation29 + $0x128] sm:$0xff] }
0x22b9   :  { %8055 = vmatpush1.bf16.msra.mxu0 %v8054_v62  ;;  %v8032_v7 = vpack.c.bf16 %v5844_v41, %v5840_v21  ;;  %v5860_v62 = vld [vmem:[#allocation29 + $0x1a8] sm:$0xff]  ;;  %v6703_v21 = vld [vmem:[#allocation28] ss:$0 sm:$0xff] }
0x22ba   :  { %8057 = vmatprep.subr.bf16.mxu0 %v8056_v23  ;;  %v8076_v23 = vpack.c.bf16 %v5870_v18, %v5866_v17  ;;  %v6155_v17 = vld [vmem:[#allocation35 + $0x40] sm:$0xff]  ;;  %v6157_v18 = vld [vmem:[#allocation35 + $0x50] sm:$0xff] }
0x22bb   :  { %8033 = vmatprep.subr.bf16.mxu1 %v8032_v7 }
0x22bc   :  { %8035 = vmatpush1.bf16.msra.mxu1 %v8034_v46 }
0x22bd   :  { %8059 = vmatpush1.bf16.msra.mxu0 %v8058_v30  ;;  %8037 = vmatprep.subr.bf16.mxu1 %v8036_v20  ;;  %v8046_v30 = vpack.c.bf16 %v5867_v25, %v5863_v24  ;;  %v8090_v24 = vpack.c.bf16 %v6157_v18, %v6155_v17  ;;  %v6185_v17 = vld [vmem:[#allocation35 + $0x130] sm:$0xff]  ;;  %v6188_v18 = vld [vmem:[#allocation35 + $0x148] sm:$0xff] }
0x22be   :  { %8061 = vmatprep.subr.bf16.mxu0 %v8060_v36 }
0x22c0   :  { %8039 = vmatpush1.bf16.msra.mxu1 %v8038_v60 }
0x2345   :  { %v5764_v12 = vpop.xlane.xlu0 %5763 }
0x2346   :  { %v5765_v1 = vmul.f32 0.0078125, %v5764_v12  ;;  %v5858_v12 = vld [vmem:[#allocation29 + $0x198] sm:$0xff] }
0x2348   :  { %v5767_v2 = vrot.slane %v5765_v1, 1  ;;  %v10089_v3 = vsub.f32 %v5751_v57, %v5765_v1  ;;  %v5837_v57 = vld [vmem:[#allocation29 + $0xf0] sm:$0xff]  ;;  %v8040_v1 = vpack.c.bf16 %v5860_v62, %v5856_v61  ;;  %v6150_v61 = vld [vmem:[#allocation35 + $0x18] sm:$0xff] }
0x2349   :  { %v6147_v62 = vld [vmem:[#allocation35] sm:$0xff] }
0x234a   :  { %v10091_v44 = vsub.f32 %v5752_v11, %v5767_v2  ;;  %v5772_v53 = vmul.f32 %v10089_v3, %v10089_v3  ;;  %v5833_v11 = vld [vmem:[#allocation29 + $0xd0] sm:$0xff]  ;;  %v5862_v2 = vld [vmem:[#allocation29 + $0x1b8] sm:$0xff]  ;;  %8041 = vmatprep.subr.bf16.mxu1 %v8040_v1 }
0x234b   :  { %v8062_v40 = vpack.c.bf16 %v5837_v57, %v5833_v11  ;;  %v6149_v1 = vld [vmem:[#allocation35 + $0x10] sm:$0xff] }
0x234c   :  { %v5773_v4 = vmul.f32 %v10091_v44, %v10091_v44 }
0x234d   :  { %8063 = vmatpush1.bf16.msra.mxu0 %v8062_v40 }
0x234e   :  { %v5776_v5 = vrot.slane %v5773_v4, 7  ;;  %8065 = vmatprep.subr.bf16.mxu0 %v8064_v38  ;;  %v5855_v4 = vld [vmem:[#allocation29 + $0x180] sm:$0xff]  ;;  %v5884_v38 = vrot.slane %v5871_v47, %v9663_v29 }
0x2350   :  { %v5777_v10 = vsel %vm5758_vm4, %v5776_v5, %v5772_v53  ;;  %v5859_v53 = vld [vmem:[#allocation29 + $0x1a0] sm:$0xff]  ;;  %v8072_v5 = vpack.c.bf16 %v5862_v2, %v5858_v12  ;;  %v6152_v2 = vld [vmem:[#allocation35 + $0x28] sm:$0xff] }
0x2351   :  { %v5779_v6 = vsel %vm5761_vm5, %v5777_v10, 0.0  ;;  %8067 = vmatpush1.bf16.msra.mxu0 %v8066_v15  ;;  %v8042_v10 = vpack.c.bf16 %v5859_v53, %v5855_v4  ;;  %v6154_v4 = vld [vmem:[#allocation35 + $0x38] sm:$0xff]  ;;  %v8082_v53 = vpack.c.bf16 %v6149_v1, %v6147_v62  ;;  %v6175_v62 = vld [vmem:[#allocation35 + $0xe0] sm:$0xff] }
0x2352   :  { %5780 = vadd.xlane.f32.xlu0 %v5779_v6  ;;  %8069 = vmatprep.subr.bf16.mxu0 %v8068_v58  ;;  %v5857_v6 = vld [vmem:[#allocation29 + $0x190] sm:$0xff] }
0x2353   :  { %v8074_v8 = vpack.c.bf16 %v5861_v52, %v5857_v6  ;;  %8043 = vmatpush1.bf16.msra.mxu1 %v8042_v10  ;;  %v6151_v10 = vld [vmem:[#allocation35 + $0x20] sm:$0xff]  ;;  %v6153_v6 = vld [vmem:[#allocation35 + $0x30] sm:$0xff]  ;;  %v6156_v52 = vld [vmem:[#allocation35 + $0x48] sm:$0xff] }
0x2354   :  { %8045 = vmatprep.subr.bf16.mxu1 %v8044_v22  ;;  %v8088_v50 = vpack.c.bf16 %v6158_v26, %v6156_v52  ;;  %v6160_v22 = vld [vmem:[#allocation35 + $0x68] sm:$0xff]  ;;  %v6186_v52 = vld [vmem:[#allocation35 + $0x138] sm:$0xff] }
0x2355   :  { %8071 = vmatpush1.bf16.msra.mxu0 %v8070_v42  ;;  %v6148_v42 = vld [vmem:[#allocation35 + $0x8] sm:$0xff] }
0x2356   :  { %8073 = vmatprep.subr.bf16.mxu0 %v8072_v5  ;;  %v8080_v12 = vpack.c.bf16 %v6150_v61, %v6148_v42  ;;  %v8084_v5 = vpack.c.bf16 %v6154_v4, %v6152_v2  ;;  %v6178_v42 = vld [vmem:[#allocation35 + $0xf8] sm:$0xff]  ;;  %v6180_v2 = vld [vmem:[#allocation35 + $0x108] sm:$0xff] }
0x2357   :  { %8047 = vmatpush1.bf16.msra.mxu1 %v8046_v30  ;;  %v6161_v30 = vld [vmem:[#allocation35 + $0x70] sm:$0xff]  ;;  %v6182_v4 = vld [vmem:[#allocation35 + $0x118] sm:$0xff] }
0x2358   :  { %8081 = vmatprep.subr.bf16.mxu1 %v8080_v12  ;;  %v6177_v12 = vld [vmem:[#allocation35 + $0xf0] sm:$0xff] }
0x2359   :  { %8075 = vmatpush1.bf16.msra.mxu0 %v8074_v8  ;;  %v8086_v8 = vpack.c.bf16 %v6153_v6, %v6151_v10  ;;  %v8110_v1 = vpack.c.bf16 %v6177_v12, %v6175_v62  ;;  %v6181_v10 = vld [vmem:[#allocation35 + $0x110] sm:$0xff]  ;;  %v6184_v6 = vld [vmem:[#allocation35 + $0x128] sm:$0xff]  ;;  %v6040_v12 = vld [vmem:[#allocation32] sm:$0xf] }
0x235a   :  { %8077 = vmatprep.subr.bf16.mxu0 %v8076_v23  ;;  %v6162_v23 = vld [vmem:[#allocation35 + $0x78] sm:$0xff] }
0x235b   :  { %v8092_v25 = vpack.c.bf16 %v6162_v23, %v6160_v22  ;;  %v6190_v22 = vld [vmem:[#allocation35 + $0x158] sm:$0xff] }
0x235d   :  { %8079 = vmatpush1.bf16.msra.mxu0 %v8078_v32  ;;  %v6166_v32 = vld [vmem:[#allocation35 + $0x98] sm:$0xff] }
0x23df   :  { %v5781_v49 = vpop.xlane.xlu0 %5780 }
0x23e0   :  { %v5782_v63 = vmul.f32 0.0078125, %v5781_v49  ;;  %v8094_v49 = vpack.c.bf16 %v6161_v30, %v6159_v0  ;;  %v6189_v0 = vld [vmem:[#allocation35 + $0x150] sm:$0xff]  ;;  %v6192_v30 = vld [vmem:[#allocation35 + $0x168] sm:$0xff] }
0x23e2   :  { %v5783_v33 = vadd.f32 1e-06, %v5782_v63  ;;  %v8096_v63 = vpack.c.bf16 %v6166_v32, %v6164_v31  ;;  %v6194_v31 = vld [vmem:[#allocation35 + $0x178] sm:$0xff] }
0x23e4   :  { %8413 = vrsqrt.f32 %v5783_v33  ;;  %v6163_v33 = vld [vmem:[#allocation35 + $0x80] sm:$0xff] }
0x23ee   :  { %v8414_v39 = vpop.eup %8413 }
0x23ef   :  { %v5786_v14 = vrot.slane %v8414_v39, 1  ;;  %v5789_v36 = vmul.f32 %v8414_v39, %v10089_v3  ;;  %v5880_v3 = vrot.slane %v5871_v47, %v9657_v19  ;;  %v6165_v39 = vld [vmem:[#allocation35 + $0x90] sm:$0xff] }
0x23f1   :  { %v5790_v11 = vmul.f32 %v5786_v14, %v10091_v44  ;;  %v5797_v57 = vmul.f32 %v6702_v37, %v5789_v36  ;;  %v5888_v44 = vrot.slane %v5871_v47, %v9857_v59  ;;  %v6168_v14 = vld [vmem:[#allocation35 + $0xa8] sm:$0xff]  ;;  %v6170_v36 = vld [vmem:[#allocation35 + $0xb8] sm:$0xff]  ;;  %v6173_v47 = vld [vmem:[#allocation35 + $0xd0] sm:$0xff] }
0x23f3   :  { %v5798_v40 = vmul.f32 %v6702_v37, %v5790_v11  ;;  %v5805_v45 = vadd.f32 %v6703_v21, %v5797_v57  ;;  %v8098_v37 = vpack.c.bf16 %v6165_v39, %v6163_v33  ;;  %v8100_v11 = vpack.c.bf16 %v6170_v36, %v6168_v14  ;;  %v6167_v57 = vld [vmem:[#allocation35 + $0xa0] sm:$0xff]  ;;  %v6193_v33 = vld [vmem:[#allocation35 + $0x170] sm:$0xff]  ;;  %v6196_v39 = vld [vmem:[#allocation35 + $0x188] sm:$0xff] }
0x23f4   :  { %v6198_v14 = vld [vmem:[#allocation35 + $0x198] sm:$0xff] }
0x23f5   :  { %v5806_v41 = vadd.f32 %v6703_v21, %v5798_v40  ;;  %v6169_v40 = vld [vmem:[#allocation35 + $0xb0] sm:$0xff]  ;;  %v6172_v21 = vld [vmem:[#allocation35 + $0xc8] sm:$0xff] }
0x23f7   :  { %v5895_v7 = vrot.slane %v5806_v41, 7  ;;  %v6174_v41 = vld [vmem:[#allocation35 + $0xd8] sm:$0xff] }
0x23f9   :  { %v5896_v9 = vsel %vm5758_vm4, %v5895_v7, %v5805_v45  ;;  %v8102_v45 = vpack.c.bf16 %v6169_v40, %v6167_v57  ;;  %v8104_v7 = vpack.c.bf16 %v6174_v41, %v6172_v21  ;;  %v6197_v57 = vld [vmem:[#allocation35 + $0x190] sm:$0xff]  ;;  %v6200_v40 = vld [vmem:[#allocation35 + $0x1a8] sm:$0xff]  ;;  %v6202_v21 = vld [vmem:[#allocation35 + $0x1b8] sm:$0xff] }
0x23fa   :  { %5963 = vmatmul.mubr.f32.vlgmr.msra.gmra.mrb[60].mxu1 %v5896_v9  ;;  %6034 = vmatmul.mubr.f32.vlgmr.msra.gmra.mrb[66].mxu0 %v5896_v9  ;;  %v6171_v9 = vld [vmem:[#allocation35 + $0xc0] sm:$0xff] }
0x23fb   :  { %8083 = vmatpush1.bf16.msra.mxu1 %v8082_v53  ;;  %v6179_v53 = vld [vmem:[#allocation35 + $0x100] sm:$0xff] }
0x23fc   :  { %8085 = vmatprep.subr.bf16.mxu1 %v8084_v5  ;;  %v8112_v5 = vpack.c.bf16 %v6182_v4, %v6180_v2  ;;  %v8114_v26 = vpack.c.bf16 %v6181_v10, %v6179_v53  ;;  %v6085_v2 = vrot.slane %v6040_v12, %v9657_v19  ;;  %v6081_v4 = vrot.slane %v6040_v12, %v9660_v28 }
0x23fd   :  { %v6093_v53 = vrot.slane %v6040_v12, %v9857_v59 }
0x23ff   :  { %8087 = vmatpush1.bf16.msra.mxu1 %v8086_v8  ;;  %v8116_v8 = vpack.c.bf16 %v6186_v52, %v6184_v6 }
0x2400   :  { %8089 = vmatprep.subr.bf16.mxu1 %v8088_v50  ;;  %v6183_v50 = vld [vmem:[#allocation35 + $0x120] sm:$0xff] }
0x2401   :  { %v8118_v23 = vpack.c.bf16 %v6185_v17, %v6183_v50 }
0x2403   :  { %8091 = vmatpush1.bf16.msra.mxu1 %v8090_v24  ;;  %v8120_v24 = vpack.c.bf16 %v6190_v22, %v6188_v18 }
0x2404   :  { %8093 = vmatprep.subr.bf16.mxu1 %v8092_v25  ;;  %v6187_v25 = vld [vmem:[#allocation35 + $0x140] sm:$0xff] }
0x2405   :  { %v8122_v32 = vpack.c.bf16 %v6189_v0, %v6187_v25 }
0x2407   :  { %8095 = vmatpush1.bf16.msra.mxu1 %v8094_v49  ;;  %v8124_v49 = vpack.c.bf16 %v6194_v31, %v6192_v30 }
0x2408   :  { %8097 = vmatprep.subr.bf16.mxu1 %v8096_v63  ;;  %v6191_v63 = vld [vmem:[#allocation35 + $0x160] sm:$0xff] }
0x2409   :  { %v8126_v36 = vpack.c.bf16 %v6193_v33, %v6191_v63 }
0x240b   :  { %8099 = vmatpush1.bf16.msra.mxu1 %v8098_v37  ;;  %v8128_v37 = vpack.c.bf16 %v6198_v14, %v6196_v39  ;;  %v6216_v14 = vld [vmem:[#allocation35 + $0x228] sm:$0xff] }
0x240c   :  { %8101 = vmatprep.subr.bf16.mxu1 %v8100_v11  ;;  %v6195_v11 = vld [vmem:[#allocation35 + $0x180] sm:$0xff] }
0x240d   :  { %v8130_v41 = vpack.c.bf16 %v6197_v57, %v6195_v11 }
0x240f   :  { %8103 = vmatpush1.bf16.msra.mxu1 %v8102_v45  ;;  %v8132_v45 = vpack.c.bf16 %v6202_v21, %v6200_v40 }
0x2410   :  { %8105 = vmatprep.subr.bf16.mxu1 %v8104_v7  ;;  %v6199_v7 = vld [vmem:[#allocation35 + $0x1a0] sm:$0xff] }
0x24cd   :  { %v5964_v46 = vpop.f32.mrb[60].mxu1  ;;  %v6035_v43 = vpop.f32.mrb[66].mxu0 }
0x24ce   :  { %v10106_v51 = vadd.f32 %v5964_v46, %v5876_v48  ;;  %v5966_v15 = vpop.f32.mrb[61].mxu1  ;;  %v6037_v54 = vpop.f32.mrb[67].mxu0  ;;  %v10108_v16 = vadd.f32 %v6035_v43, %v5884_v38  ;;  %v8106_v48 = vpack.c.bf16 %v6173_v47, %v6171_v9  ;;  %v6201_v9 = vld [vmem:[#allocation35 + $0x1b0] sm:$0xff]  ;;  %v6204_v47 = vld [vmem:[#allocation35 + $0x1c8] sm:$0xff] }
0x24cf   :  { %v10110_v27 = vadd.f32 %v5966_v15, %v5880_v3  ;;  %v10116_v55 = vadd.f32 %v6037_v54, %v5888_v44 }
0x24d0   :  { %v6042_v20 = vsel %vm5761_vm5, %v10106_v51, 0.0  ;;  %v6045_v58 = vsel %vm5761_vm5, %v10108_v16, 0.0  ;;  %8107 = vmatpush1.bf16.msra.mxu1 %v8106_v48  ;;  %v6206_v48 = vld [vmem:[#allocation35 + $0x1d8] sm:$0xff] }
0x24d1   :  { %v6043_v35 = vsel %vm5761_vm5, %v10110_v27, 0.0  ;;  %v6047_v34 = vsel %vm5761_vm5, %v10116_v55, 0.0 }
0x24d2   :  { %v6044_v56 = vadd.f32 %v6043_v35, %v6042_v20 }
0x24d4   :  { %v6046_v60 = vadd.f32 %v6045_v58, %v6044_v56 }
0x24d6   :  { %v6048_v13 = vadd.f32 %v6047_v34, %v6046_v60 }
0x24d8   :  { %6049 = vadd.xlane.f32.xlu0 %v6048_v13  ;;  %v6176_v13 = vld [vmem:[#allocation35 + $0xe8] sm:$0xff] }
0x24d9   :  { %v8108_v61 = vpack.c.bf16 %v6178_v42, %v6176_v13 }
0x24db   :  { %8109 = vmatprep.subr.bf16.mxu1 %v8108_v61 }
0x24dc   :  { %8111 = vmatpush1.bf16.msra.mxu1 %v8110_v1  ;;  %v6041_v1 = vld [vmem:[#allocation34] sm:$0xf] }
0x24dd   :  { %8113 = vmatprep.subr.bf16.mxu1 %v8112_v5  ;;  %v6089_v5 = vrot.slane %v6040_v12, %v9663_v29  ;;  %v6110_v6 = vrot.slane %v6041_v1, %v9657_v19  ;;  %v6106_v52 = vrot.slane %v6041_v1, %v9660_v28  ;;  %v6227_v12 = vld [vmem:[#allocation35 + $0x280] sm:$0xff] }
0x24e0   :  { %8115 = vmatpush1.bf16.msra.mxu1 %v8114_v26  ;;  %v6118_v26 = vrot.slane %v6041_v1, %v9857_v59 }
0x24e1   :  { %8117 = vmatprep.subr.bf16.mxu1 %v8116_v8  ;;  %v6114_v8 = vrot.slane %v6041_v1, %v9663_v29  ;;  %v6229_v1 = vld [vmem:[#allocation35 + $0x290] sm:$0xff] }
0x24e4   :  { %8119 = vmatpush1.bf16.msra.mxu1 %v8118_v23 }
0x24e5   :  { %8121 = vmatprep.subr.bf16.mxu1 %v8120_v24 }
0x24e8   :  { %8123 = vmatpush1.bf16.msra.mxu1 %v8122_v32 }
0x24e9   :  { %8125 = vmatprep.subr.bf16.mxu1 %v8124_v49 }
0x24ec   :  { %8127 = vmatpush1.bf16.msra.mxu1 %v8126_v36  ;;  %v6218_v36 = vld [vmem:[#allocation35 + $0x238] sm:$0xff] }
0x24ed   :  { %8129 = vmatprep.subr.bf16.mxu1 %v8128_v37 }
0x24f0   :  { %8131 = vmatpush1.bf16.msra.mxu1 %v8130_v41 }
0x24f1   :  { %8133 = vmatprep.subr.bf16.mxu1 %v8132_v45 }
0x2565   :  { %v6050_v38 = vpop.xlane.xlu0 %6049 }
0x2566   :  { %v6052_v3 = vmul.f32 0.001953125, %v6050_v38  ;;  %v8134_v38 = vpack.c.bf16 %v6201_v9, %v6199_v7  ;;  %v8148_v9 = vpack.c.bf16 %v6218_v36, %v6216_v14  ;;  %v6249_v14 = vld [vmem:[#allocation35 + $0x330] sm:$0xff]  ;;  %v6252_v36 = vld [vmem:[#allocation35 + $0x348] sm:$0xff] }
0x2568   :  { %v10123_v46 = vsub.f32 %v10106_v51, %v6052_v3  ;;  %v10126_v43 = vsub.f32 %v10110_v27, %v6052_v3  ;;  %v10129_v44 = vsub.f32 %v10108_v16, %v6052_v3  ;;  %v10132_v15 = vsub.f32 %v10116_v55, %v6052_v3  ;;  %8135 = vmatpush1.bf16.msra.mxu1 %v8134_v38 }
0x2569   :  { %v8136_v3 = vpack.c.bf16 %v6206_v48, %v6204_v47  ;;  %v6215_v47 = vld [vmem:[#allocation35 + $0x220] sm:$0xff]  ;;  %v6217_v48 = vld [vmem:[#allocation35 + $0x230] sm:$0xff] }
0x256a   :  { %v6057_v54 = vmul.f32 %v10123_v46, %v10123_v46  ;;  %v6058_v20 = vmul.f32 %v10126_v43, %v10126_v43  ;;  %v6059_v35 = vmul.f32 %v10129_v44, %v10129_v44  ;;  %v6060_v51 = vmul.f32 %v10132_v15, %v10132_v15 }
0x256b   :  { %8137 = vmatprep.subr.bf16.mxu1 %v8136_v3  ;;  %v6220_v3 = vld [vmem:[#allocation35 + $0x248] sm:$0xff] }
0x256c   :  { %v6061_v27 = vsel %vm5761_vm5, %v6057_v54, 0.0  ;;  %v6062_v16 = vsel %vm5761_vm5, %v6058_v20, 0.0  ;;  %v6064_v55 = vsel %vm5761_vm5, %v6059_v35, 0.0  ;;  %v6066_v60 = vsel %vm5761_vm5, %v6060_v51, 0.0  ;;  %v6203_v54 = vld [vmem:[#allocation35 + $0x1c0] sm:$0xff]  ;;  %v6205_v20 = vld [vmem:[#allocation35 + $0x1d0] sm:$0xff] }
0x256d   :  { %v6063_v56 = vadd.f32 %v6062_v16, %v6061_v27  ;;  %v6208_v35 = vld [vmem:[#allocation35 + $0x1e8] sm:$0xff]  ;;  %v6210_v51 = vld [vmem:[#allocation35 + $0x1f8] sm:$0xff]  ;;  %v8138_v27 = vpack.c.bf16 %v6205_v20, %v6203_v54  ;;  %v8150_v20 = vpack.c.bf16 %v6217_v48, %v6215_v47  ;;  %v6255_v47 = vld [vmem:[#allocation35 + $0x360] sm:$0xff] }
0x256e   :  { %v8140_v16 = vpack.c.bf16 %v6210_v51, %v6208_v35  ;;  %v6222_v54 = vld [vmem:[#allocation35 + $0x258] sm:$0xff]  ;;  %v6219_v51 = vld [vmem:[#allocation35 + $0x240] sm:$0xff]  ;;  %v6257_v48 = vld [vmem:[#allocation35 + $0x370] sm:$0xff] }
0x256f   :  { %v6065_v58 = vadd.f32 %v6064_v55, %v6063_v56  ;;  %v6207_v56 = vld [vmem:[#allocation35 + $0x1e0] sm:$0xff]  ;;  %v6209_v55 = vld [vmem:[#allocation35 + $0x1f0] sm:$0xff]  ;;  %8139 = vmatpush1.bf16.msra.mxu1 %v8138_v27  ;;  %v8152_v35 = vpack.c.bf16 %v6222_v54, %v6220_v3  ;;  %v6262_v3 = vld [vmem:[#allocation35 + $0x398] sm:$0xff]  ;;  %v8190_v54 = vpack.c.bf16 %v6257_v48, %v6255_v47 }
0x2570   :  { %8141 = vmatprep.subr.bf16.mxu1 %v8140_v16  ;;  %v6221_v27 = vld [vmem:[#allocation35 + $0x250] sm:$0xff]  ;;  %v6224_v16 = vld [vmem:[#allocation35 + $0x268] sm:$0xff] }
0x2571   :  { %v6067_v34 = vadd.f32 %v6066_v60, %v6065_v58  ;;  %v8142_v58 = vpack.c.bf16 %v6209_v55, %v6207_v56  ;;  %v6212_v60 = vld [vmem:[#allocation35 + $0x208] sm:$0xff]  ;;  %v6226_v56 = vld [vmem:[#allocation35 + $0x278] sm:$0xff]  ;;  %v8154_v55 = vpack.c.bf16 %v6221_v27, %v6219_v51  ;;  %v6259_v51 = vld [vmem:[#allocation35 + $0x380] sm:$0xff] }
0x2572   :  { %v6261_v27 = vld [vmem:[#allocation35 + $0x390] sm:$0xff]  ;;  %v6508_v48 = vld [vmem:[#allocation41 + $0xa0] sm:$0xff] }
0x2573   :  { %6068 = vadd.xlane.f32.xlu1 %v6067_v34  ;;  %8143 = vmatpush1.bf16.msra.mxu1 %v8142_v58  ;;  %v6214_v34 = vld [vmem:[#allocation35 + $0x218] sm:$0xff]  ;;  %v8156_v58 = vpack.c.bf16 %v6226_v56, %v6224_v16  ;;  %v6264_v16 = vld [vmem:[#allocation35 + $0x3a8] sm:$0xff] }
0x2574   :  { %v8144_v13 = vpack.c.bf16 %v6214_v34, %v6212_v60  ;;  %v6223_v60 = vld [vmem:[#allocation35 + $0x260] sm:$0xff]  ;;  %v6225_v34 = vld [vmem:[#allocation35 + $0x270] sm:$0xff]  ;;  %v6266_v56 = vld [vmem:[#allocation35 + $0x3b8] sm:$0xff] }
0x2576   :  { %8145 = vmatprep.subr.bf16.mxu1 %v8144_v13  ;;  %v6228_v13 = vld [vmem:[#allocation35 + $0x288] sm:$0xff] }
0x2600   :  { %v6069_v42 = vpop.xlane.xlu1 %6068 }
0x2601   :  { %v6070_v61 = vmul.f32 0.001953125, %v6069_v42  ;;  %v6230_v42 = vld [vmem:[#allocation35 + $0x298] sm:$0xff] }
0x2603   :  { %v6071_v62 = vadd.f32 1e-05, %v6070_v61  ;;  %v8158_v61 = vpack.c.bf16 %v6225_v34, %v6223_v60  ;;  %v6263_v60 = vld [vmem:[#allocation35 + $0x3a0] sm:$0xff]  ;;  %v6265_v34 = vld [vmem:[#allocation35 + $0x3b0] sm:$0xff] }
0x2605   :  { %8415 = vrsqrt.f32 %v6071_v62  ;;  %v8160_v62 = vpack.c.bf16 %v6230_v42, %v6228_v13  ;;  %v6268_v13 = vld [vmem:[#allocation35 + $0x3c8] sm:$0xff]  ;;  %v6270_v42 = vld [vmem:[#allocation35 + $0x3d8] sm:$0xff] }
0x260f   :  { %v8416_v10 = vpop.eup %8415 }
0x2610   :  { %v6074_v50 = vmul.f32 %v8416_v10, %v10126_v43  ;;  %v6073_v17 = vmul.f32 %v8416_v10, %v10123_v46  ;;  %v6076_v18 = vmul.f32 %v8416_v10, %v10132_v15  ;;  %v6075_v22 = vmul.f32 %v8416_v10, %v10129_v44  ;;  %v6211_v43 = vld [vmem:[#allocation35 + $0x200] sm:$0xff]  ;;  %v6213_v15 = vld [vmem:[#allocation35 + $0x210] sm:$0xff] }
0x2611   :  { %v8146_v21 = vpack.c.bf16 %v6213_v15, %v6211_v43  ;;  %v6231_v10 = vld [vmem:[#allocation35 + $0x2a0] sm:$0xff]  ;;  %v6248_v43 = vld [vmem:[#allocation35 + $0x328] sm:$0xff]  ;;  %v6250_v15 = vld [vmem:[#allocation35 + $0x338] sm:$0xff] }
0x2612   :  { %v6099_v23 = vmul.f32 %v6085_v2, %v6074_v50  ;;  %v6098_v24 = vmul.f32 %v6081_v4, %v6073_v17  ;;  %v6101_v25 = vmul.f32 %v6093_v53, %v6076_v18  ;;  %v6100_v0 = vmul.f32 %v6089_v5, %v6075_v22  ;;  %v6232_v2 = vld [vmem:[#allocation35 + $0x2a8] sm:$0xff]  ;;  %v6234_v4 = vld [vmem:[#allocation35 + $0x2b8] sm:$0xff]  ;;  %v6235_v17 = vld [vmem:[#allocation35 + $0x2c0] sm:$0xff] }
0x2613   :  { %v8162_v53 = vpack.c.bf16 %v6229_v1, %v6227_v12  ;;  %v8164_v5 = vpack.c.bf16 %v6234_v4, %v6232_v2  ;;  %v6237_v18 = vld [vmem:[#allocation35 + $0x2d0] sm:$0xff]  ;;  %v6240_v22 = vld [vmem:[#allocation35 + $0x2e8] sm:$0xff]  ;;  %v6267_v12 = vld [vmem:[#allocation35 + $0x3c0] sm:$0xff] }
0x2614   :  { %v6124_v30 = vadd.f32 %v6110_v6, %v6099_v23  ;;  %v6123_v31 = vadd.f32 %v6106_v52, %v6098_v24  ;;  %v6126_v32 = vadd.f32 %v6118_v26, %v6101_v25  ;;  %v10158_v49 = vadd.f32 %v6114_v8, %v6100_v0  ;;  %v6233_v6 = vld [vmem:[#allocation35 + $0x2b0] sm:$0xff]  ;;  %v6236_v52 = vld [vmem:[#allocation35 + $0x2c8] sm:$0xff]  ;;  %v6238_v26 = vld [vmem:[#allocation35 + $0x2d8] sm:$0xff] }
0x2615   :  { %v8166_v8 = vpack.c.bf16 %v6233_v6, %v6231_v10  ;;  %v8168_v50 = vpack.c.bf16 %v6238_v26, %v6236_v52  ;;  %v6242_v23 = vld [vmem:[#allocation35 + $0x2f8] sm:$0xff]  ;;  %v8170_v24 = vpack.c.bf16 %v6237_v18, %v6235_v17  ;;  %v6239_v0 = vld [vmem:[#allocation35 + $0x2e0] sm:$0xff]  ;;  %v6269_v1 = vld [vmem:[#allocation35 + $0x3d0] sm:$0xff] }
0x2616   :  { %v6132_v59 = vmul.f32 0.70710677, %v6124_v30  ;;  %v6131_v63 = vmul.f32 0.70710677, %v6123_v31  ;;  %v6134_v29 = vmul.f32 0.70710677, %v6126_v32  ;;  %v8172_v25 = vpack.c.bf16 %v6242_v23, %v6240_v22 }
0x2617   :  { %v6128_v44 = vmul.f32 0.5, %v6124_v30  ;;  %v6127_v11 = vmul.f32 0.5, %v6123_v31  ;;  %v6130_v41 = vmul.f32 0.5, %v6126_v32  ;;  %v6241_v30 = vld [vmem:[#allocation35 + $0x2f0] sm:$0xff]  ;;  %v6244_v31 = vld [vmem:[#allocation35 + $0x308] sm:$0xff]  ;;  %v6246_v32 = vld [vmem:[#allocation35 + $0x318] sm:$0xff] }
0x2618   :  { %8417 = verf.f32 %v6132_v59  ;;  %v8174_v59 = vpack.c.bf16 %v6241_v30, %v6239_v0  ;;  %v6272_v2 = vld [vmem:[#allocation35 + $0x3e8] sm:$0xff]  ;;  %v6274_v4 = vld [vmem:[#allocation35 + $0x3f8] sm:$0xff]  ;;  %v6271_v10 = vld [vmem:[#allocation35 + $0x3e0] sm:$0xff] }
0x2619   :  { %8419 = verf.f32 %v6131_v63  ;;  %v8176_v63 = vpack.c.bf16 %v6246_v32, %v6244_v31  ;;  %v6273_v6 = vld [vmem:[#allocation35 + $0x3f0] sm:$0xff]  ;;  %v6275_v18 = vld [vmem:[#allocation37] sm:$0x3] }
0x261a   :  { %8421 = verf.f32 %v6134_v29  ;;  %v6243_v29 = vld [vmem:[#allocation35 + $0x300] sm:$0xff]  ;;  %v8206_v26 = vpack.c.bf16 %v6273_v6, %v6271_v10  ;;  %v6280_v22 = vrot.slane %v6275_v18, %v9660_v28  ;;  %v6284_v23 = vrot.slane %v6275_v18, %v9657_v19  ;;  %v6517_v10 = vld [vmem:[#allocation41 + $0xe8] sm:$0xff] }
0x2622   :  { %v8418_v46 = vpop.eup %8417 }
0x2623   :  { %v8420_v33 = vpop.eup %8419  ;;  %v6140_v39 = vadd.f32 1.0, %v8418_v46  ;;  %v6245_v46 = vld [vmem:[#allocation35 + $0x310] sm:$0xff] }
0x2624   :  { %v8422_v37 = vpop.eup %8421  ;;  %v6139_v57 = vadd.f32 1.0, %v8420_v33  ;;  %v8178_v33 = vpack.c.bf16 %v6245_v46, %v6243_v29 }
0x2625   :  { %v6144_v40 = vmul.f32 %v6140_v39, %v6128_v44  ;;  %v6142_v45 = vadd.f32 1.0, %v8422_v37  ;;  %v8180_v44 = vpack.c.bf16 %v6250_v15, %v6248_v43  ;;  %v6247_v39 = vld [vmem:[#allocation35 + $0x320] sm:$0xff]  ;;  %v6254_v37 = vld [vmem:[#allocation35 + $0x358] sm:$0xff] }
0x2626   :  { %v6143_v7 = vmul.f32 %v6139_v57, %v6127_v11  ;;  %v8182_v11 = vpack.c.bf16 %v6249_v14, %v6247_v39  ;;  %v8184_v57 = vpack.c.bf16 %v6254_v37, %v6252_v36  ;;  %v6504_v14 = vld [vmem:[#allocation41 + $0x80] sm:$0xff]  ;;  %v6505_v36 = vld [vmem:[#allocation41 + $0x88] sm:$0xff] }
0x2627   :  { %6351 = vmatprep.mubr.f32.mxu1 %v6144_v40  ;;  %v6146_v38 = vmul.f32 %v6142_v45, %v6130_v41  ;;  %v6251_v40 = vld [vmem:[#allocation35 + $0x340] sm:$0xff]  ;;  %v6256_v41 = vld [vmem:[#allocation35 + $0x368] sm:$0xff]  ;;  %v6258_v45 = vld [vmem:[#allocation35 + $0x378] sm:$0xff]  ;;  %v8208_v37 = vpack.c.bf16 %v6505_v36, %v6504_v14 }
0x2628   :  { %6352 = vmatmul.mubr.f32.vlgmr.msra.gmra.mrb[62].mxu1 %v6143_v7 }
0x2629   :  { %8147 = vmatpush1.bf16.msra.mxu1 %v8146_v21  ;;  %6422 = vmatprep.mubr.f32.mxu1 %v6146_v38  ;;  %v6253_v21 = vld [vmem:[#allocation35 + $0x350] sm:$0xff]  ;;  %v6260_v38 = vld [vmem:[#allocation35 + $0x388] sm:$0xff] }
0x262a   :  { %8149 = vmatprep.subr.bf16.mxu1 %v8148_v9  ;;  %v8186_v7 = vpack.c.bf16 %v6253_v21, %v6251_v40  ;;  %v8188_v9 = vpack.c.bf16 %v6258_v45, %v6256_v41  ;;  %8209 = vmatprep.subr.bf16.mxu0 %v8208_v37  ;;  %v6506_v21 = vld [vmem:[#allocation41 + $0x90] sm:$0xff]  ;;  %v6507_v41 = vld [vmem:[#allocation41 + $0x98] sm:$0xff] }
0x262b   :  { %v8212_v45 = vpack.c.bf16 %v6507_v41, %v6506_v21 }
0x262d   :  { %8151 = vmatpush1.bf16.msra.mxu1 %v8150_v20  ;;  %v6133_v20 = vmul.f32 0.70710677, %v10158_v49 }
0x262e   :  { %8153 = vmatprep.subr.bf16.mxu1 %v8152_v35  ;;  %v8192_v35 = vpack.c.bf16 %v6262_v3, %v6260_v38  ;;  %v6509_v38 = vld [vmem:[#allocation41 + $0xa8] sm:$0xff] }
0x262f   :  { %8423 = verf.f32 %v6133_v20  ;;  %v8216_v3 = vpack.c.bf16 %v6509_v38, %v6508_v48  ;;  %v6493_v20 = vld [vmem:[#allocation41 + $0x28] sm:$0xff] }
0x2631   :  { %8155 = vmatpush1.bf16.msra.mxu1 %v8154_v55  ;;  %v8194_v55 = vpack.c.bf16 %v6261_v27, %v6259_v51  ;;  %v6511_v27 = vld [vmem:[#allocation41 + $0xb8] sm:$0xff] }
0x2632   :  { %8157 = vmatprep.subr.bf16.mxu1 %v8156_v58  ;;  %v8196_v58 = vpack.c.bf16 %v6266_v56, %v6264_v16  ;;  %v6494_v16 = vld [vmem:[#allocation41 + $0x30] sm:$0xff]  ;;  %v6495_v56 = vld [vmem:[#allocation41 + $0x38] sm:$0xff] }
0x2635   :  { %8159 = vmatpush1.bf16.msra.mxu1 %v8158_v61  ;;  %v8198_v61 = vpack.c.bf16 %v6265_v34, %v6263_v60  ;;  %v6513_v60 = vld [vmem:[#allocation41 + $0xc8] sm:$0xff]  ;;  %v8222_v34 = vpack.c.bf16 %v6495_v56, %v6494_v16 }
0x2636   :  { %8161 = vmatprep.subr.bf16.mxu1 %v8160_v62  ;;  %v8200_v62 = vpack.c.bf16 %v6270_v42, %v6268_v13  ;;  %v6496_v42 = vld [vmem:[#allocation41 + $0x40] sm:$0xff] }
0x2639   :  { %8163 = vmatpush1.bf16.msra.mxu1 %v8162_v53  ;;  %v8202_v53 = vpack.c.bf16 %v6269_v1, %v6267_v12  ;;  %v8424_v52 = vpop.eup %8423  ;;  %v6515_v12 = vld [vmem:[#allocation41 + $0xd8] sm:$0xff] }
0x263a   :  { %8165 = vmatprep.subr.bf16.mxu1 %v8164_v5  ;;  %v8204_v5 = vpack.c.bf16 %v6274_v4, %v6272_v2  ;;  %v6498_v4 = vld [vmem:[#allocation41 + $0x50] sm:$0xff] }
0x263d   :  { %8167 = vmatpush1.bf16.msra.mxu1 %v8166_v8  ;;  %v6141_v8 = vadd.f32 1.0, %v8424_v52 }
0x263e   :  { %8169 = vmatprep.subr.bf16.mxu1 %v8168_v50  ;;  %v6129_v50 = vmul.f32 0.5, %v10158_v49 }
0x2640   :  { %v6145_v17 = vmul.f32 %v6141_v8, %v6129_v50  ;;  %v6501_v8 = vld [vmem:[#allocation41 + $0x68] sm:$0xff]  ;;  %v6518_v50 = vld [vmem:[#allocation41 + $0xf0] sm:$0xff] }
0x2641   :  { %8171 = vmatpush1.bf16.msra.mxu1 %v8170_v24 }
0x2642   :  { %8173 = vmatprep.subr.bf16.mxu1 %v8172_v25 }
0x2645   :  { %8175 = vmatpush1.bf16.msra.mxu1 %v8174_v59 }
0x2646   :  { %8177 = vmatprep.subr.bf16.mxu1 %v8176_v63 }
0x2649   :  { %8179 = vmatpush1.bf16.msra.mxu1 %v8178_v33 }
0x264a   :  { %8181 = vmatprep.subr.bf16.mxu1 %v8180_v44 }
0x264d   :  { %8183 = vmatpush1.bf16.msra.mxu1 %v8182_v11  ;;  %v6488_v11 = vld [vmem:[#allocation41] sm:$0xff] }
0x264e   :  { %8185 = vmatprep.subr.bf16.mxu1 %v8184_v57  ;;  %v6489_v57 = vld [vmem:[#allocation41 + $0x8] sm:$0xff] }
0x264f   :  { %v8210_v40 = vpack.c.bf16 %v6489_v57, %v6488_v11 }
0x2651   :  { %8187 = vmatpush1.bf16.msra.mxu1 %v8186_v7  ;;  %8211 = vmatpush3.bf16.msra.mxu0 %v8210_v40  ;;  %v6490_v7 = vld [vmem:[#allocation41 + $0x10] sm:$0xff] }
0x2652   :  { %8189 = vmatprep.subr.bf16.mxu1 %v8188_v9  ;;  %v6491_v9 = vld [vmem:[#allocation41 + $0x18] sm:$0xff]  ;;  %8213 = vmatprep.subr.bf16.mxu0 %v8212_v45 }
0x2653   :  { %v8214_v47 = vpack.c.bf16 %v6491_v9, %v6490_v7 }
0x2655   :  { %8191 = vmatpush1.bf16.msra.mxu1 %v8190_v54  ;;  %8215 = vmatpush3.bf16.msra.mxu0 %v8214_v47  ;;  %v6492_v54 = vld [vmem:[#allocation41 + $0x20] sm:$0xff] }
0x2656   :  { %8193 = vmatprep.subr.bf16.mxu1 %v8192_v35  ;;  %v6510_v35 = vld [vmem:[#allocation41 + $0xb0] sm:$0xff]  ;;  %v8218_v51 = vpack.c.bf16 %v6493_v20, %v6492_v54  ;;  %8217 = vmatprep.subr.bf16.mxu0 %v8216_v3 }
0x2659   :  { %8195 = vmatpush1.bf16.msra.mxu1 %v8194_v55  ;;  %v8220_v55 = vpack.c.bf16 %v6511_v27, %v6510_v35  ;;  %8219 = vmatpush3.bf16.msra.mxu0 %v8218_v51 }
0x265a   :  { %8197 = vmatprep.subr.bf16.mxu1 %v8196_v58  ;;  %v6512_v58 = vld [vmem:[#allocation41 + $0xc0] sm:$0xff] }
0x265b   :  { %8221 = vmatprep.subr.bf16.mxu0 %v8220_v55  ;;  %v8224_v13 = vpack.c.bf16 %v6513_v60, %v6512_v58 }
0x265d   :  { %8199 = vmatpush1.bf16.msra.mxu1 %v8198_v61  ;;  %v6497_v61 = vld [vmem:[#allocation41 + $0x48] sm:$0xff]  ;;  %8223 = vmatpush3.bf16.msra.mxu0 %v8222_v34 }
0x265e   :  { %8201 = vmatprep.subr.bf16.mxu1 %v8200_v62  ;;  %v6514_v62 = vld [vmem:[#allocation41 + $0xd0] sm:$0xff]  ;;  %v8226_v1 = vpack.c.bf16 %v6497_v61, %v6496_v42  ;;  %8225 = vmatprep.subr.bf16.mxu0 %v8224_v13 }
0x265f   :  { %v8228_v2 = vpack.c.bf16 %v6515_v12, %v6514_v62 }
0x2661   :  { %8203 = vmatpush1.bf16.msra.mxu1 %v8202_v53  ;;  %v6499_v53 = vld [vmem:[#allocation41 + $0x58] sm:$0xff]  ;;  %8227 = vmatpush3.bf16.msra.mxu0 %v8226_v1 }
0x2662   :  { %8205 = vmatprep.subr.bf16.mxu1 %v8204_v5  ;;  %v6516_v5 = vld [vmem:[#allocation41 + $0xe0] sm:$0xff]  ;;  %v8230_v6 = vpack.c.bf16 %v6499_v53, %v6498_v4  ;;  %8229 = vmatprep.subr.bf16.mxu0 %v8228_v2 }
0x2663   :  { %v8232_v52 = vpack.c.bf16 %v6517_v10, %v6516_v5 }
0x2665   :  { %8207 = vmatpush1.bf16.msra.mxu1 %v8206_v26  ;;  %v6500_v26 = vld [vmem:[#allocation41 + $0x60] sm:$0xff]  ;;  %8231 = vmatpush3.bf16.msra.mxu0 %v8230_v6 }
0x2666   :  { %v8234_v18 = vpack.c.bf16 %v6501_v8, %v6500_v26  ;;  %8233 = vmatprep.subr.bf16.mxu0 %v8232_v52 }
0x2668   :  { %6423 = vmatmul.mubr.f32.vlgmr.msra.gmra.mrb[62].mxu1 %v6145_v17  ;;  %v6519_v17 = vld [vmem:[#allocation41 + $0xf8] sm:$0xff] }
0x2669   :  { %8235 = vmatpush3.bf16.msra.mxu0 %v8234_v18 }
0x273b   :  { %v6424_v24 = vpop.f32.mrb[62].mxu1 }
0x273c   :  { %v8242_v25 = vadd.f32 %v6424_v24, %v6280_v22  ;;  %v6426_v0 = vpop.f32.mrb[63].mxu1  ;;  %v8236_v22 = vpack.c.bf16 %v6519_v17, %v6518_v50  ;;  %v6503_v24 = vld [vmem:[#allocation41 + $0x78] sm:$0xff] }
0x273d   :  { %v8243_v30 = vadd.f32 %v6426_v0, %v6284_v23  ;;  %v6502_v23 = vld [vmem:[#allocation41 + $0x70] sm:$0xff] }
0x273e   :  { %v6431_v31 = vsel %vm5761_vm5, %v8242_v25, 0.0  ;;  %8237 = vmatprep.subr.bf16.mxu0 %v8236_v22 }
0x273f   :  { %v6432_v32 = vsel %vm5761_vm5, %v8243_v30, 0.0 }
0x2740   :  { %v6433_v59 = vadd.f32 %v6432_v32, %v6431_v31  ;;  %v6429_v32 = vld [vmem:[#allocation38] sm:$0x3] }
0x2742   :  { %6434 = vadd.xlane.f32.xlu0 %v6433_v59  ;;  %v6430_v59 = vld [vmem:[#allocation40] sm:$0x3] }
0x27cf   :  { %v6435_v63 = vpop.xlane.xlu0 %6434 }
0x27d0   :  { %v6437_v49 = vmul.f32 0.00390625, %v6435_v63  ;;  %v6456_v63 = vrot.slane %v6429_v32, %v9660_v28 }
0x27d2   :  { %v10166_v29 = vsub.f32 %v8242_v25, %v6437_v49  ;;  %v10168_v46 = vsub.f32 %v8243_v30, %v6437_v49  ;;  %v8238_v25 = vpack.c.bf16 %v6503_v24, %v6502_v23  ;;  %v6460_v49 = vrot.slane %v6429_v32, %v9657_v19 }
0x27d4   :  { %v6440_v43 = vmul.f32 %v10166_v29, %v10166_v29  ;;  %v6441_v15 = vmul.f32 %v10168_v46, %v10168_v46  ;;  %8239 = vmatpush3.bf16.msra.mxu0 %v8238_v25 }
0x27d6   :  { %v6442_v33 = vsel %vm5761_vm5, %v6440_v43, 0.0  ;;  %v6443_v44 = vsel %vm5761_vm5, %v6441_v15, 0.0 }
0x27d7   :  { %v6444_v39 = vadd.f32 %v6443_v44, %v6442_v33  ;;  %v6469_v44 = vrot.slane %v6430_v59, %v9660_v28 }
0x27d9   :  { %6445 = vadd.xlane.f32.xlu1 %v6444_v39  ;;  %v6473_v39 = vrot.slane %v6430_v59, %v9657_v19  ;;  %v6704_v19 = vld [vmem:[#allocation43] ss:$0 sm:$0xff] }
0x2866   :  { %v6446_v0 = vpop.xlane.xlu1 %6445 }
0x2867   :  { %v6447_v30 = vmul.f32 0.00390625, %v6446_v0 }
0x2869   :  { %v6448_v31 = vadd.f32 1e-05, %v6447_v30 }
0x286b   :  { %8425 = vrsqrt.f32 %v6448_v31 }
0x2875   :  { %v8426_v43 = vpop.eup %8425 }
0x2876   :  { %v6450_v15 = vmul.f32 %v8426_v43, %v10166_v29  ;;  %v6451_v33 = vmul.f32 %v8426_v43, %v10168_v46 }
0x2878   :  { %v6464_v14 = vmul.f32 %v6460_v49, %v6451_v33  ;;  %v6463_v36 = vmul.f32 %v6456_v63, %v6450_v15 }
0x287a   :  { %v6477_v37 = vadd.f32 %v6473_v39, %v6464_v14  ;;  %v6476_v11 = vadd.f32 %v6469_v44, %v6463_v36 }
0x287c   :  { %v6481_v57 = vmul.f32 0.70710677, %v6477_v37  ;;  %v6480_v40 = vmul.f32 0.70710677, %v6476_v11  ;;  %v6479_v45 = vmul.f32 0.5, %v6477_v37  ;;  %v6478_v9 = vmul.f32 0.5, %v6476_v11 }
0x287e   :  { %8427 = verf.f32 %v6481_v57 }
0x287f   :  { %8429 = verf.f32 %v6480_v40 }
0x2888   :  { %v8428_v21 = vpop.eup %8427 }
0x2889   :  { %v8430_v41 = vpop.eup %8429  ;;  %v6485_v7 = vadd.f32 1.0, %v8428_v21 }
0x288a   :  { %v6484_v29 = vadd.f32 1.0, %v8430_v41 }
0x288b   :  { %v6487_v47 = vmul.f32 %v6485_v7, %v6479_v45 }
0x288c   :  { %v6486_v46 = vmul.f32 %v6484_v29, %v6478_v9 }
0x288d   :  { %6591 = vmatprep.mubr.f32.mxu0 %v6487_v47 }
0x288e   :  { %6592 = vmatmul.mubr.f32.vlgmr.msra.gmra.mrb[68].mxu0 %v6486_v46 }
0x2961   :  { %v7151_v28 = vpop.f32.mrb[68].mxu0 }
0x2962   :  { %v7152_v48 = vpop.f32.mrb[69].mxu0 }
0x2963   :  { %v7153_v38 = vadd.f32 %v7152_v48, %v7151_v28 }
0x2965   :  { %v6594_v3 = vadd.f32 %v7153_v38, %v6704_v19 }
0x2967   :  { %6597 = vst [vmem:[#allocation44] sm:$0x3] %v6594_v3 }
0x2968   :  { %9036 = shalt.err (!%p9033_p10)
}
0x2969   :  { %s10287_s16 = sld [smem:[#allocation77_spill]] }
0x296f   :  { %s9037_s28 = scalar_lea.hbm %s10287_s16, 32 }
0x2970   :  { %p9038_p11 = scmp.ne.s32.totalorder %s10287_s16, %s9037_s28  ;;  %p9041_p12 = scmp.lt.u32.totalorder %s9037_s28, %s10287_s16 }
0x2972   :  { %p9043_p13 = pnand %p9041_p12, %p9038_p11 }
0x2974   :  { %9046 = shalt.err (!%p9043_p13)
}
0x2975   :  { %6607 = dma.vmem_to_hbm [thread:$0]  %s6605_s20, 32, %s10287_s16, [#allocation4]  }
0x2976   :  { %9075 = dma.done.wait [#allocation4], 32  }
0x2977   :  { %9076 = vsyncadd [#allocation4], 4294967264 }
0x2978   :  { %6611 = vsyncpa [#allocation3], 1 }
0x2979   :  { %6612 = vsyncpa [#allocation6], 1 }
0x297a   :  { %6613 = vsyncpa [#allocation9], 1 }
0x297b   :  { %6614 = vsyncpa [#allocation12], 1 }
0x297c   :  { %6615 = vsyncpa [#allocation15], 1 }
0x297d   :  { %6616 = vsyncpa [#allocation18], 1 }
0x297e   :  { %6617 = vsyncpa [#allocation21], 1 }
0x297f   :  { %6618 = vsyncpa [#allocation24], 1 }
0x2980   :  { %6619 = vsyncpa [#allocation27], 1 }
0x2981   :  { %6620 = vsyncpa [#allocation30], 1 }
0x2982   :  { %6621 = vsyncpa [#allocation33], 1 }
0x2983   :  { %6622 = vsyncpa [#allocation36], 1 }
0x2984   :  { %6623 = vsyncpa [#allocation39], 1 }
0x2985   :  { %6624 = vsyncpa [#allocation42], 1 }
0x2986   :  { %6625 = vsyncpa [#allocation4], 1 }

</bundles_post_ra>
